<compile_context>
chip_gen: v6e
topology: v6e:2x2x1
jax: 0.10.0
libtpu: 0.0.40
codegen_flags: <defaults>
</compile_context>

<pallas_src>
import functools

import jax
import jax.numpy as jnp
import numpy as np
from jax.experimental import pallas as pl
from jax.experimental.pallas import tpu as pltpu

EPS = 1e-5
ROW_TILE_CAP = 1024                      # row tile for mem-bound epilogue
_VMEM_LIMIT = 32 * 1024 * 1024           # explicit scoped-VMEM request


def _row_tile(m, cap=ROW_TILE_CAP):
    """Largest divisor of m that is <= cap (always a true divisor)."""
    if m <= cap:
        return m
    for t in range(cap, 0, -1):
        if m % t == 0:
            return t
    return m


# --------------------------------------------------------------------------
# Pallas kernels
# --------------------------------------------------------------------------
def conv3x3_taps_kernel(*refs, taps, n_src, HW, pad_w, fuse_bn):
    """Generic fused 3x3 conv.

    * 9 taps = static sublane windows of one or more row-flattened source
      slabs; wrapped / pad reads are zeroed with precomputed masks.
    * taps are concatenated channel-wise in VMEM and contracted with the
      (9*Cin, Cout) weight in a single MXU dot.
    * per-channel sum / sum^2 for the following BatchNorm are per-grid-step
      outputs (reduced in JAX) -> grid axis stays "parallel".
    * fuse_bn: apply the previous layer's BN scale/shift + ReLU to the input
      slab in-kernel (row-validity mask keeps pad rows at zero).
    * pad_w > 0: write the output directly in the H-padded flattened layout
      the next stride-1 conv consumes.

    refs layout: src_0..src_{n_src-1}, w, masks, [valid, scale, shift,]
                 y, sums, sqs
    """
    srcs = refs[:n_src]
    w_ref = refs[n_src]
    m_ref = refs[n_src + 1]
    if fuse_bn:
        valid_ref, sc_ref, sh_ref = refs[n_src + 2:n_src + 5]
        y_ref, sum_ref, sq_ref = refs[n_src + 5:n_src + 8]
        slab = (jnp.maximum(srcs[0][0] * sc_ref[...] + sh_ref[...], 0.0)
                * valid_ref[...])

        def window(si, off):
            return slab[off:off + HW, :]
    else:
        y_ref, sum_ref, sq_ref = refs[n_src + 2:n_src + 5]

        def window(si, off):
            return srcs[si][0, off:off + HW, :]

    cols = []
    for (si, off, mi) in taps:
        t = window(si, off)
        if mi >= 0:
            t = t * m_ref[:, mi:mi + 1]
        cols.append(t)
    a = jnp.concatenate(cols, axis=-1)                         # (HW, 9*Cin)
    y = jnp.dot(a, w_ref[...], preferred_element_type=jnp.float32)

    if pad_w > 0:
        cout = y.shape[1]
        zeros = jnp.zeros((pad_w, cout), jnp.float32)
        y_ref[0, :pad_w, :] = zeros
        y_ref[0, pad_w:pad_w + HW, :] = y
        y_ref[0, pad_w + HW:, :] = zeros
    else:
        y_ref[0] = y

    sum_ref[0] = jnp.sum(y, axis=0, keepdims=True)
    sq_ref[0] = jnp.sum(y * y, axis=0, keepdims=True)


def scale_shift_add_act_kernel(y_ref, sc_ref, sh_ref, r_ref, o_ref):
    """o = relu(y * scale + shift + residual)."""
    o_ref[...] = jnp.maximum(
        y_ref[...] * sc_ref[...] + sh_ref[...] + r_ref[...], 0.0)


def scale_shift_proj_act_kernel(y_ref, sc_ref, sh_ref, xs_ref, w_ref, o_ref):
    """o = relu(y * scale + shift + xs @ w3)   (1x1 projection skip fused)."""
    res = jnp.dot(xs_ref[...], w_ref[...], preferred_element_type=jnp.float32)
    o_ref[...] = jnp.maximum(y_ref[...] * sc_ref[...] + sh_ref[...] + res, 0.0)


# --------------------------------------------------------------------------
# Static helpers (built once, passed as constants -- item: no per-step iota)
# --------------------------------------------------------------------------
def _lr_masks(hw, w):
    """(hw, 2): col 0 zeros the wrapped left-column reads (out col == 0),
    col 1 zeros the wrapped right-column reads (out col == w-1)."""
    col = np.arange(hw) % w
    return jnp.asarray(np.stack([col != 0, col != w - 1], axis=1)
                       .astype(np.float32))


def _valid_mask(hw, w):
    """(L, 1) row-validity mask for the padded flattened layout."""
    L = hw + 2 * (w + 1)
    v = np.zeros((L, 1), np.float32)
    v[w + 1:w + 1 + hw] = 1.0
    return jnp.asarray(v)


def _conv_weight(w_oihw):
    cout, cin = w_oihw.shape[0], w_oihw.shape[1]
    return jnp.transpose(w_oihw, (2, 3, 1, 0)).reshape(9 * cin, cout)


# --------------------------------------------------------------------------
# Pallas wrappers
# --------------------------------------------------------------------------
def _call_conv(kernel, srcs, src_lens, cin, wt, masks, extra, extra_specs,
               N, HW, Lout, Cout):
    in_specs = [pl.BlockSpec((1, l, cin), lambda n: (n, 0, 0))
                for l in src_lens]
    in_specs += [pl.BlockSpec(wt.shape, lambda n: (0, 0)),
                 pl.BlockSpec(masks.shape, lambda n: (0, 0))]
    in_specs += extra_specs
    out_shape = (jax.ShapeDtypeStruct((N, Lout, Cout), jnp.float32),
                 jax.ShapeDtypeStruct((N, 1, Cout), jnp.float32),
                 jax.ShapeDtypeStruct((N, 1, Cout), jnp.float32))
    out_specs = (pl.BlockSpec((1, Lout, Cout), lambda n: (n, 0, 0)),
                 pl.BlockSpec((1, 1, Cout), lambda n: (n, 0, 0)),
                 pl.BlockSpec((1, 1, Cout), lambda n: (n, 0, 0)))
    return pl.pallas_call(
        kernel,
        out_shape=out_shape,
        grid=(N,),
        in_specs=in_specs,
        out_specs=out_specs,
        compiler_params=pltpu.CompilerParams(
            dimension_semantics=("parallel",),
            vmem_limit_bytes=_VMEM_LIMIT),
    )(*srcs, wt, masks, *extra)


def conv1_stride1(x, w_oihw):
    """3x3 / stride-1 / pad-1 conv; output written in the padded flattened
    layout conv2 consumes; per-image BN stats emitted."""
    N, H, W, Cin = x.shape
    Cout = w_oihw.shape[0]
    HW = H * W
    P = W + 1
    L = HW + 2 * P
    xf = jnp.pad(x.reshape(N, HW, Cin), ((0, 0), (P, P), (0, 0)))  # single pad
    wt = _conv_weight(w_oihw)
    masks = _lr_masks(HW, W)
    taps = tuple((0, di * W + dj, {0: 0, 1: -1, 2: 1}[dj])
                 for di in range(3) for dj in range(3))
    kernel = functools.partial(conv3x3_taps_kernel, taps=taps, n_src=1,
                               HW=HW, pad_w=P, fuse_bn=False)
    return _call_conv(kernel, [xf], [L], Cin, wt, masks, [], [],
                      N, HW, L, Cout)


def conv1_stride2(x, w_oihw):
    """3x3 / stride-2 / pad-1 conv via 4-phase decomposition (no HBM im2col);
    output written in the padded flattened layout conv2 consumes."""
    N, H, W, Cin = x.shape
    assert H % 2 == 0 and W % 2 == 0, "stride-2 path requires even H, W"
    Ho, Wo = H // 2, W // 2
    HoWo = Ho * Wo
    Cout = w_oihw.shape[0]
    # even/odd (padded) row x col phases, row-flattened with row stride Wo;
    # even-col phases get a 1-element front pad so the dj=0 window is a
    # contiguous slice (left boundary handled by mask_l).
    ee = jnp.pad(x[:, 1::2, 1::2, :], ((0, 0), (1, 0), (0, 0), (0, 0)))
    eo = jnp.pad(x[:, 1::2, 0::2, :], ((0, 0), (1, 0), (0, 0), (0, 0)))
    oe = x[:, 0::2, 1::2, :]
    oo = x[:, 0::2, 0::2, :]
    ee_f = jnp.pad(ee.reshape(N, (Ho + 1) * Wo, Cin), ((0, 0), (1, 0), (0, 0)))
    eo_f = eo.reshape(N, (Ho + 1) * Wo, Cin)
    oe_f = jnp.pad(oe.reshape(N, HoWo, Cin), ((0, 0), (1, 0), (0, 0)))
    oo_f = oo.reshape(N, HoWo, Cin)
    srcs = [ee_f, eo_f, oe_f, oo_f]
    src_lens = [(Ho + 1) * Wo + 1, (Ho + 1) * Wo, HoWo + 1, HoWo]
    wt = _conv_weight(w_oihw)
    masks = _lr_masks(HoWo, Wo)
    # (src_index, window start, mask index) in (di, dj) order
    taps = ((0, 0, 0), (1, 0, -1), (0, 1, -1),
            (2, 0, 0), (3, 0, -1), (2, 1, -1),
            (0, Wo, 0), (1, Wo, -1), (0, Wo + 1, -1))
    P = Wo + 1
    Lout = HoWo + 2 * P
    kernel = functools.partial(conv3x3_taps_kernel, taps=taps, n_src=4,
                               HW=HoWo, pad_w=P, fuse_bn=False)
    out = _call_conv(kernel, srcs, src_lens, Cin, wt, masks, [], [],
                     N, HoWo, Lout, Cout)
    return out, Ho, Wo


def conv2_fused_bn(y1p, w_oihw, scale1, shift1, H, W):
    """3x3 / stride-1 conv whose input is the raw conv1 output in padded
    layout; BN1 scale/shift + ReLU are applied in-kernel (row-validity masked),
    so y1 never takes an extra HBM round trip."""
    N, L, Cin = y1p.shape
    HW = H * W
    assert L == HW + 2 * (W + 1)
    Cout = w_oihw.shape[0]
    wt = _conv_weight(w_oihw)
    masks = _lr_masks(HW, W)
    valid = _valid_mask(HW, W)
    taps = tuple((0, di * W + dj, {0: 0, 1: -1, 2: 1}[dj])
                 for di in range(3) for dj in range(3))
    kernel = functools.partial(conv3x3_taps_kernel, taps=taps, n_src=1,
                               HW=HW, pad_w=0, fuse_bn=True)
    extra = [valid, scale1.reshape(1, Cin), shift1.reshape(1, Cin)]
    extra_specs = [pl.BlockSpec((L, 1), lambda n: (0, 0)),
                   pl.BlockSpec((1, Cin), lambda n: (0, 0)),
                   pl.BlockSpec((1, Cin), lambda n: (0, 0))]
    return _call_conv(kernel, [y1p], [L], Cin, wt, masks, extra, extra_specs,
                      N, HW, HW, Cout)


def bn_scale_shift(sums, sqs, nrows, gamma, beta):
    """Fold batch statistics + affine params into per-channel scale/shift.
    TODO(synk): E[y^2]-E[y]^2 loses precision if |mean| >> std (fine here)."""
    mean = sums / nrows
    var = sqs / nrows - mean * mean
    scale = gamma * jax.lax.rsqrt(var + EPS)
    shift = beta - mean * scale
    return scale, shift


def epilogue_add(y, scale, shift, res):
    """relu(y*scale + shift + res), lane-dense view for narrow channels,
    output aliased onto the dead y buffer."""
    M, C = y.shape
    dense = (M * C) % 128 == 0 and 128 % C == 0
    if dense:
        reps = 128 // C
        yv = y.reshape(M * C // 128, 128)
        rv = res.reshape(M * C // 128, 128)
        scv = jnp.tile(scale, reps).reshape(1, 128)
        shv = jnp.tile(shift, reps).reshape(1, 128)
    else:
        yv, rv = y, res
        scv, shv = scale.reshape(1, C), shift.reshape(1, C)
    Mv, Cv = yv.shape
    tm = _row_tile(Mv)
    row = pl.BlockSpec((tm, Cv), lambda i: (i, 0))
    par = pl.BlockSpec((1, Cv), lambda i: (0, 0))
    out = pl.pallas_call(
        scale_shift_add_act_kernel,
        out_shape=jax.ShapeDtypeStruct((Mv, Cv), jnp.float32),
        grid=(Mv // tm,),
        in_specs=[row, par, par, row],
        out_specs=row,
        input_output_aliases={0: 0},
        compiler_params=pltpu.CompilerParams(
            dimension_semantics=("parallel",), vmem_limit_bytes=_VMEM_LIMIT),
    )(yv, scv, shv, rv)
    return out.reshape(M, C)


def epilogue_proj(y, scale, shift, xs, w3):
    """relu(y*scale + shift + xs @ w3): the 1x1 projection skip is fused into
    the epilogue (no separate skip matmul pass, no res materialization)."""
    M, C = y.shape
    Cin = xs.shape[1]
    tm = _row_tile(M)
    row_y = pl.BlockSpec((tm, C), lambda i: (i, 0))
    row_x = pl.BlockSpec((tm, Cin), lambda i: (i, 0))
    par = pl.BlockSpec((1, C), lambda i: (0, 0))
    wsp = pl.BlockSpec((Cin, C), lambda i: (0, 0))
    return pl.pallas_call(
        scale_shift_proj_act_kernel,
        out_shape=jax.ShapeDtypeStruct((M, C), jnp.float32),
        grid=(M // tm,),
        in_specs=[row_y, par, par, row_x, wsp],
        out_specs=row_y,
        input_output_aliases={0: 0},
        compiler_params=pltpu.CompilerParams(
            dimension_semantics=("parallel",), vmem_limit_bytes=_VMEM_LIMIT),
    )(y, scale.reshape(1, C), shift.reshape(1, C), xs, w3)


# --------------------------------------------------------------------------
# Residual forward (Pallas)
# --------------------------------------------------------------------------
@functools.partial(jax.jit, static_argnames=("use_1x1conv", "strides"))
def residual_forward(x_nchw, params, *, use_1x1conv, strides):
    x = jnp.transpose(x_nchw, (0, 2, 3, 1)).astype(jnp.float32)   # NCHW->NHWC
    N, H, W, Cin = x.shape
    Cout = params["w1"].shape[0]

    # conv1 + fused BN1 statistics.  b1 dropped: a per-channel bias right
    # before training-mode BatchNorm cancels exactly.
    if strides == 1:
        y1p, s1, q1 = conv1_stride1(x, params["w1"])
        Ho, Wo = H, W
    elif strides == 2:
        (y1p, s1, q1), Ho, Wo = conv1_stride2(x, params["w1"])
    else:
        raise NotImplementedError("strides must be 1 or 2")
    M1 = N * Ho * Wo
    scale1, shift1 = bn_scale_shift(jnp.sum(s1, axis=(0, 1)),
                                    jnp.sum(q1, axis=(0, 1)),
                                    float(M1), params["g1"], params["be1"])

    # conv2 with BN1+ReLU fused onto its input slab + fused BN2 statistics.
    y2, s2, q2 = conv2_fused_bn(y1p, params["w2"], scale1, shift1, Ho, Wo)
    scale2, shift2 = bn_scale_shift(jnp.sum(s2, axis=(0, 1)),
                                    jnp.sum(q2, axis=(0, 1)),
                                    float(M1), params["g2"], params["be2"])

    y2f = y2.reshape(M1, Cout)
    if use_1x1conv:
        shift2 = shift2 + params["b3"]        # fold skip bias into shift2
        xs = x[:, ::strides, ::strides, :].reshape(M1, Cin)
        w3 = jnp.transpose(params["w3"][:, :, 0, 0], (1, 0))     # (Cin, Cout)
        out = epilogue_proj(y2f, scale2, shift2, xs, w3)
    else:
        assert Cin == Cout and strides == 1
        out = epilogue_add(y2f, scale2, shift2, x.reshape(M1, Cin))
    return jnp.transpose(out.reshape(N, Ho, Wo, Cout), (0, 3, 1, 2))


# --------------------------------------------------------------------------
# Pure-JAX reference (independent of the Pallas path)
# --------------------------------------------------------------------------
def residual_reference(x, params, *, use_1x1conv, strides):
    def conv(x, w, b, s, pad):
        y = jax.lax.conv_general_dilated(
            x, w, (s, s), pad, dimension_numbers=("NCHW", "OIHW", "NCHW"))
        return y + b[None, :, None, None]

    def bn_train(y, gamma, beta):
        mean = jnp.mean(y, axis=(0, 2, 3), keepdims=True)
        var = jnp.mean((y - mean) ** 2, axis=(0, 2, 3), keepdims=True)
        return ((y - mean) * jax.lax.rsqrt(var + EPS)
                * gamma[None, :, None, None] + beta[None, :, None, None])

    y = conv(x, params["w1"], params["b1"], strides, ((1, 1), (1, 1)))
    y = jnp.maximum(bn_train(y, params["g1"], params["be1"]), 0.0)
    y = conv(y, params["w2"], params["b2"], 1, ((1, 1), (1, 1)))
    y = bn_train(y, params["g2"], params["be2"])
    if use_1x1conv:
        xr = conv(x, params["w3"], params["b3"], strides, ((0, 0), (0, 0)))
    else:
        xr = x
    return jnp.maximum(y + xr, 0.0)


# --------------------------------------------------------------------------
# Parameter init + test
# --------------------------------------------------------------------------
def make_params(key, cin, cout, use_1x1conv):
    ks = jax.random.split(key, 12)
    p = {
        "w1": jax.random.normal(ks[0], (cout, cin, 3, 3), jnp.float32) * 0.1,
        "b1": jax.random.normal(ks[1], (cout,), jnp.float32) * 0.1,
        "w2": jax.random.normal(ks[2], (cout, cout, 3, 3), jnp.float32) * 0.1,
        "b2": jax.random.normal(ks[3], (cout,), jnp.float32) * 0.1,
        "g1": 1.0 + jax.random.normal(ks[4], (cout,), jnp.float32) * 0.1,
        "be1": jax.random.normal(ks[5], (cout,), jnp.float32) * 0.1,
        "g2": 1.0 + jax.random.normal(ks[6], (cout,), jnp.float32) * 0.1,
        "be2": jax.random.normal(ks[7], (cout,), jnp.float32) * 0.1,
    }
    if use_1x1conv:
        p["w3"] = jax.random.normal(ks[8], (cout, cin, 1, 1), jnp.float32) * 0.1
        p["b3"] = jax.random.normal(ks[9], (cout,), jnp.float32) * 0.1
    return p


if __name__ == "__main__":
    key = jax.random.PRNGKey(0)
    kx, kp1, kp2 = jax.random.split(key, 3)
    x = jax.random.normal(kx, (2, 4, 16, 16), jnp.float32)   # NCHW, like PyTorch

    # Config A: identity skip (input_channels == num_channels, stride 1)
    params_a = make_params(kp1, 4, 4, use_1x1conv=False)
    out_a = residual_forward(x, params_a, use_1x1conv=False, strides=1)
    out_a = jax.block_until_ready(out_a)
    ref_a = residual_reference(x, params_a, use_1x1conv=False, strides=1)
    np.testing.assert_allclose(np.asarray(out_a), np.asarray(ref_a),
                               rtol=1e-4, atol=2e-4)

    # Config B: 1x1-conv projection skip, stride 2, channel change 4 -> 8
    params_b = make_params(kp2, 4, 8, use_1x1conv=True)
    out_b = residual_forward(x, params_b, use_1x1conv=True, strides=2)
    out_b = jax.block_until_ready(out_b)
    ref_b = residual_reference(x, params_b, use_1x1conv=True, strides=2)
    np.testing.assert_allclose(np.asarray(out_b), np.asarray(ref_b),
                               rtol=1e-4, atol=2e-4)

    print("KERNEL_OK")
</pallas_src>

<mosaic_0001>
module attributes {stable_mosaic.version = 11 : i64} {
  func.func @conv3x3_taps_kernel(%arg0: i32, %arg1: memref<1x290x4xf32, #tpu.memory_space<vmem>>, %arg2: memref<36x4xf32, #tpu.memory_space<vmem>>, %arg3: memref<256x2xf32, #tpu.memory_space<vmem>>, %arg4: memref<1x290x4xf32, #tpu.memory_space<vmem>>, %arg5: memref<1x1x4xf32, #tpu.memory_space<vmem>>, %arg6: memref<1x1x4xf32, #tpu.memory_space<vmem>>) attributes {dimension_semantics = [#tpu.dimension_semantics<parallel>], iteration_bounds = array<i64: 2>, scalar_prefetch = 0 : i64, scratch_operands = 0 : i64, tpu.core_type = #tpu.core_type<tc>, window_params = [{transform_indices = @transform_0, window_bounds = array<i64: 1, 290, 4>}, {pipeline_mode = #tpu.pipeline_mode<synchronous>, transform_indices = @transform_1, window_bounds = array<i64: 36, 4>}, {pipeline_mode = #tpu.pipeline_mode<synchronous>, transform_indices = @transform_2, window_bounds = array<i64: 256, 2>}, {transform_indices = @transform_3, window_bounds = array<i64: 1, 290, 4>}, {transform_indices = @transform_4, window_bounds = array<i64: 1, 1, 4>}, {transform_indices = @transform_5, window_bounds = array<i64: 1, 1, 4>}]} {
    %c0 = arith.constant 0 : index
    %c0_0 = arith.constant 0 : index
    %c0_1 = arith.constant 0 : index
    %0 = vector.load %arg1[%c0, %c0_0, %c0_1] : memref<1x290x4xf32, #tpu.memory_space<vmem>>, vector<1x256x4xf32>
    %1 = vector.shape_cast %0 : vector<1x256x4xf32> to vector<256x4xf32>
    %c0_2 = arith.constant 0 : index
    %c0_3 = arith.constant 0 : index
    %2 = vector.load %arg3[%c0_2, %c0_3] : memref<256x2xf32, #tpu.memory_space<vmem>>, vector<256x1xf32>
    %3 = vector.broadcast %2 : vector<256x1xf32> to vector<256x4xf32>
    %4 = arith.mulf %1, %3 : vector<256x4xf32>
    %c0_4 = arith.constant 0 : index
    %c1 = arith.constant 1 : index
    %c0_5 = arith.constant 0 : index
    %5 = vector.load %arg1[%c0_4, %c1, %c0_5] : memref<1x290x4xf32, #tpu.memory_space<vmem>>, vector<1x256x4xf32>
    %6 = vector.shape_cast %5 : vector<1x256x4xf32> to vector<256x4xf32>
    %c0_6 = arith.constant 0 : index
    %c2 = arith.constant 2 : index
    %c0_7 = arith.constant 0 : index
    %7 = vector.load %arg1[%c0_6, %c2, %c0_7] : memref<1x290x4xf32, #tpu.memory_space<vmem>>, vector<1x256x4xf32>
    %8 = vector.shape_cast %7 : vector<1x256x4xf32> to vector<256x4xf32>
    %c0_8 = arith.constant 0 : index
    %c1_9 = arith.constant 1 : index
    %9 = vector.load %arg3[%c0_8, %c1_9] : memref<256x2xf32, #tpu.memory_space<vmem>>, vector<256x1xf32>
    %10 = vector.broadcast %9 : vector<256x1xf32> to vector<256x4xf32>
    %11 = arith.mulf %8, %10 : vector<256x4xf32>
    %c0_10 = arith.constant 0 : index
    %c16 = arith.constant 16 : index
    %c0_11 = arith.constant 0 : index
    %12 = vector.load %arg1[%c0_10, %c16, %c0_11] : memref<1x290x4xf32, #tpu.memory_space<vmem>>, vector<1x256x4xf32>
    %13 = vector.shape_cast %12 : vector<1x256x4xf32> to vector<256x4xf32>
    %c0_12 = arith.constant 0 : index
    %c0_13 = arith.constant 0 : index
    %14 = vector.load %arg3[%c0_12, %c0_13] : memref<256x2xf32, #tpu.memory_space<vmem>>, vector<256x1xf32>
    %15 = vector.broadcast %14 : vector<256x1xf32> to vector<256x4xf32>
    %16 = arith.mulf %13, %15 : vector<256x4xf32>
    %c0_14 = arith.constant 0 : index
    %c17 = arith.constant 17 : index
    %c0_15 = arith.constant 0 : index
    %17 = vector.load %arg1[%c0_14, %c17, %c0_15] : memref<1x290x4xf32, #tpu.memory_space<vmem>>, vector<1x256x4xf32>
    %18 = vector.shape_cast %17 : vector<1x256x4xf32> to vector<256x4xf32>
    %c0_16 = arith.constant 0 : index
    %c18 = arith.constant 18 : index
    %c0_17 = arith.constant 0 : index
    %19 = vector.load %arg1[%c0_16, %c18, %c0_17] : memref<1x290x4xf32, #tpu.memory_space<vmem>>, vector<1x256x4xf32>
    %20 = vector.shape_cast %19 : vector<1x256x4xf32> to vector<256x4xf32>
    %c0_18 = arith.constant 0 : index
    %c1_19 = arith.constant 1 : index
    %21 = vector.load %arg3[%c0_18, %c1_19] : memref<256x2xf32, #tpu.memory_space<vmem>>, vector<256x1xf32>
    %22 = vector.broadcast %21 : vector<256x1xf32> to vector<256x4xf32>
    %23 = arith.mulf %20, %22 : vector<256x4xf32>
    %c0_20 = arith.constant 0 : index
    %c32 = arith.constant 32 : index
    %c0_21 = arith.constant 0 : index
    %24 = vector.load %arg1[%c0_20, %c32, %c0_21] : memref<1x290x4xf32, #tpu.memory_space<vmem>>, vector<1x256x4xf32>
    %25 = vector.shape_cast %24 : vector<1x256x4xf32> to vector<256x4xf32>
    %c0_22 = arith.constant 0 : index
    %c0_23 = arith.constant 0 : index
    %26 = vector.load %arg3[%c0_22, %c0_23] : memref<256x2xf32, #tpu.memory_space<vmem>>, vector<256x1xf32>
    %27 = vector.broadcast %26 : vector<256x1xf32> to vector<256x4xf32>
    %28 = arith.mulf %25, %27 : vector<256x4xf32>
    %c0_24 = arith.constant 0 : index
    %c33 = arith.constant 33 : index
    %c0_25 = arith.constant 0 : index
    %29 = vector.load %arg1[%c0_24, %c33, %c0_25] : memref<1x290x4xf32, #tpu.memory_space<vmem>>, vector<1x256x4xf32>
    %30 = vector.shape_cast %29 : vector<1x256x4xf32> to vector<256x4xf32>
    %c0_26 = arith.constant 0 : index
    %c34 = arith.constant 34 : index
    %c0_27 = arith.constant 0 : index
    %31 = vector.load %arg1[%c0_26, %c34, %c0_27] : memref<1x290x4xf32, #tpu.memory_space<vmem>>, vector<1x256x4xf32>
    %32 = vector.shape_cast %31 : vector<1x256x4xf32> to vector<256x4xf32>
    %c0_28 = arith.constant 0 : index
    %c1_29 = arith.constant 1 : index
    %33 = vector.load %arg3[%c0_28, %c1_29] : memref<256x2xf32, #tpu.memory_space<vmem>>, vector<256x1xf32>
    %34 = vector.broadcast %33 : vector<256x1xf32> to vector<256x4xf32>
    %35 = arith.mulf %32, %34 : vector<256x4xf32>
    %36 = tpu.concatenate %4, %6, %11, %16, %18, %23, %28, %30, %35 in 1 : vector<256x4xf32>, vector<256x4xf32>, vector<256x4xf32>, vector<256x4xf32>, vector<256x4xf32>, vector<256x4xf32>, vector<256x4xf32>, vector<256x4xf32>, vector<256x4xf32> -> vector<256x36xf32>
    %c0_30 = arith.constant 0 : index
    %c0_31 = arith.constant 0 : index
    %37 = vector.load %arg2[%c0_30, %c0_31] : memref<36x4xf32, #tpu.memory_space<vmem>>, vector<36x4xf32>
    %cst = arith.constant dense<0.000000e+00> : vector<256x4xf32>
    %38 = tpu.matmul %36, %37, %cst {dimension_numbers = #tpu.dot_dimension_numbers<[1], [0], [0], [1], [0, 0, 1, 1], [], []>} : vector<256x36xf32>, vector<36x4xf32>, vector<256x4xf32> -> vector<256x4xf32>
    %cst_32 = arith.constant 0.000000e+00 : f32
    %39 = vector.broadcast %cst_32 : f32 to vector<17x4xf32>
    %c0_33 = arith.constant 0 : index
    %c0_34 = arith.constant 0 : index
    %c0_35 = arith.constant 0 : index
    %40 = vector.load %arg4[%c0_33, %c0_34, %c0_35] : memref<1x290x4xf32, #tpu.memory_space<vmem>>, vector<1x17x4xf32>
    %41 = vector.shape_cast %40 : vector<1x17x4xf32> to vector<17x4xf32>
    %42 = vector.shape_cast %39 : vector<17x4xf32> to vector<1x17x4xf32>
    tpu.vector_store %arg4[%c0_33, %c0_34, %c0_35], %42 {strides = array<i32>} : memref<1x290x4xf32, #tpu.memory_space<vmem>>, vector<1x17x4xf32>,
    %c0_36 = arith.constant 0 : index
    %c17_37 = arith.constant 17 : index
    %c0_38 = arith.constant 0 : index
    %43 = vector.load %arg4[%c0_36, %c17_37, %c0_38] : memref<1x290x4xf32, #tpu.memory_space<vmem>>, vector<1x256x4xf32>
    %44 = vector.shape_cast %43 : vector<1x256x4xf32> to vector<256x4xf32>
    %45 = vector.shape_cast %38 : vector<256x4xf32> to vector<1x256x4xf32>
    tpu.vector_store %arg4[%c0_36, %c17_37, %c0_38], %45 {strides = array<i32>} : memref<1x290x4xf32, #tpu.memory_space<vmem>>, vector<1x256x4xf32>,
    %c0_39 = arith.constant 0 : index
    %c273 = arith.constant 273 : index
    %c0_40 = arith.constant 0 : index
    %46 = vector.load %arg4[%c0_39, %c273, %c0_40] : memref<1x290x4xf32, #tpu.memory_space<vmem>>, vector<1x17x4xf32>
    %47 = vector.shape_cast %46 : vector<1x17x4xf32> to vector<17x4xf32>
    %48 = vector.shape_cast %39 : vector<17x4xf32> to vector<1x17x4xf32>
    tpu.vector_store %arg4[%c0_39, %c273, %c0_40], %48 {strides = array<i32>} : memref<1x290x4xf32, #tpu.memory_space<vmem>>, vector<1x17x4xf32>,
    %cst_41 = arith.constant dense<0.000000e+00> : vector<4xf32>
    %49 = vector.multi_reduction <add>, %38, %cst_41 [0] : vector<256x4xf32> to vector<4xf32>
    %50 = vector.shape_cast %49 : vector<4xf32> to vector<1x4xf32>
    %c0_42 = arith.constant 0 : index
    %c0_43 = arith.constant 0 : index
    %c0_44 = arith.constant 0 : index
    %51 = vector.load %arg5[%c0_42, %c0_43, %c0_44] : memref<1x1x4xf32, #tpu.memory_space<vmem>>, vector<1x1x4xf32>
    %52 = vector.shape_cast %51 : vector<1x1x4xf32> to vector<1x4xf32>
    %53 = vector.shape_cast %50 : vector<1x4xf32> to vector<1x1x4xf32>
    tpu.vector_store %arg5[%c0_42, %c0_43, %c0_44], %53 {strides = array<i32>} : memref<1x1x4xf32, #tpu.memory_space<vmem>>, vector<1x1x4xf32>,
    %54 = arith.mulf %38, %38 : vector<256x4xf32>
    %cst_45 = arith.constant dense<0.000000e+00> : vector<4xf32>
    %55 = vector.multi_reduction <add>, %54, %cst_45 [0] : vector<256x4xf32> to vector<4xf32>
    %56 = vector.shape_cast %55 : vector<4xf32> to vector<1x4xf32>
    %c0_46 = arith.constant 0 : index
    %c0_47 = arith.constant 0 : index
    %c0_48 = arith.constant 0 : index
    %57 = vector.load %arg6[%c0_46, %c0_47, %c0_48] : memref<1x1x4xf32, #tpu.memory_space<vmem>>, vector<1x1x4xf32>
    %58 = vector.shape_cast %57 : vector<1x1x4xf32> to vector<1x4xf32>
    %59 = vector.shape_cast %56 : vector<1x4xf32> to vector<1x1x4xf32>
    tpu.vector_store %arg6[%c0_46, %c0_47, %c0_48], %59 {strides = array<i32>} : memref<1x1x4xf32, #tpu.memory_space<vmem>>, vector<1x1x4xf32>,
    return
  }
  func.func @transform_0(%arg0: i32) -> (i32, i32, i32) {
    %c0_i32 = arith.constant 0 : i32
    %c0_i32_0 = arith.constant 0 : i32
    %c0_i32_1 = arith.constant 0 : i32
    return %arg0, %c0_i32, %c0_i32_0 : i32, i32, i32
  }
  func.func @transform_1(%arg0: i32) -> (i32, i32) {
    %c0_i32 = arith.constant 0 : i32
    %c0_i32_0 = arith.constant 0 : i32
    %c0_i32_1 = arith.constant 0 : i32
    return %c0_i32, %c0_i32_0 : i32, i32
  }
  func.func @transform_2(%arg0: i32) -> (i32, i32) {
    %c0_i32 = arith.constant 0 : i32
    %c0_i32_0 = arith.constant 0 : i32
    %c0_i32_1 = arith.constant 0 : i32
    return %c0_i32, %c0_i32_0 : i32, i32
  }
  func.func @transform_3(%arg0: i32) -> (i32, i32, i32) {
    %c0_i32 = arith.constant 0 : i32
    %c0_i32_0 = arith.constant 0 : i32
    %c0_i32_1 = arith.constant 0 : i32
    return %arg0, %c0_i32, %c0_i32_0 : i32, i32, i32
  }
  func.func @transform_4(%arg0: i32) -> (i32, i32, i32) {
    %c0_i32 = arith.constant 0 : i32
    %c0_i32_0 = arith.constant 0 : i32
    %c0_i32_1 = arith.constant 0 : i32
    return %arg0, %c0_i32, %c0_i32_0 : i32, i32, i32
  }
  func.func @transform_5(%arg0: i32) -> (i32, i32, i32) {
    %c0_i32 = arith.constant 0 : i32
    %c0_i32_0 = arith.constant 0 : i32
    %c0_i32_1 = arith.constant 0 : i32
    return %arg0, %c0_i32, %c0_i32_0 : i32, i32, i32
  }
}

module attributes {stable_mosaic.version = 11 : i64} {
  func.func @conv3x3_taps_kernel(%arg0: i32, %arg1: memref<1x290x4xf32, #tpu.memory_space<vmem>>, %arg2: memref<36x4xf32, #tpu.memory_space<vmem>>, %arg3: memref<256x2xf32, #tpu.memory_space<vmem>>, %arg4: memref<290x1xf32, #tpu.memory_space<vmem>>, %arg5: memref<1x4xf32, #tpu.memory_space<vmem>>, %arg6: memref<1x4xf32, #tpu.memory_space<vmem>>, %arg7: memref<1x256x4xf32, #tpu.memory_space<vmem>>, %arg8: memref<1x1x4xf32, #tpu.memory_space<vmem>>, %arg9: memref<1x1x4xf32, #tpu.memory_space<vmem>>) attributes {dimension_semantics = [#tpu.dimension_semantics<parallel>], iteration_bounds = array<i64: 2>, scalar_prefetch = 0 : i64, scratch_operands = 0 : i64, tpu.core_type = #tpu.core_type<tc>, window_params = [{transform_indices = @transform_0, window_bounds = array<i64: 1, 290, 4>}, {pipeline_mode = #tpu.pipeline_mode<synchronous>, transform_indices = @transform_1, window_bounds = array<i64: 36, 4>}, {pipeline_mode = #tpu.pipeline_mode<synchronous>, transform_indices = @transform_2, window_bounds = array<i64: 256, 2>}, {pipeline_mode = #tpu.pipeline_mode<synchronous>, transform_indices = @transform_3, window_bounds = array<i64: 290, 1>}, {pipeline_mode = #tpu.pipeline_mode<synchronous>, transform_indices = @transform_4, window_bounds = array<i64: 1, 4>}, {pipeline_mode = #tpu.pipeline_mode<synchronous>, transform_indices = @transform_5, window_bounds = array<i64: 1, 4>}, {transform_indices = @transform_6, window_bounds = array<i64: 1, 256, 4>}, {transform_indices = @transform_7, window_bounds = array<i64: 1, 1, 4>}, {transform_indices = @transform_8, window_bounds = array<i64: 1, 1, 4>}]} {
    %c0 = arith.constant 0 : index
    %c0_0 = arith.constant 0 : index
    %c0_1 = arith.constant 0 : index
    %0 = vector.load %arg1[%c0, %c0_0, %c0_1] : memref<1x290x4xf32, #tpu.memory_space<vmem>>, vector<1x290x4xf32>
    %1 = vector.shape_cast %0 : vector<1x290x4xf32> to vector<290x4xf32>
    %c0_2 = arith.constant 0 : index
    %c0_3 = arith.constant 0 : index
    %2 = vector.load %arg5[%c0_2, %c0_3] : memref<1x4xf32, #tpu.memory_space<vmem>>, vector<1x4xf32>
    %3 = vector.broadcast %2 : vector<1x4xf32> to vector<290x4xf32>
    %4 = arith.mulf %1, %3 : vector<290x4xf32>
    %c0_4 = arith.constant 0 : index
    %c0_5 = arith.constant 0 : index
    %5 = vector.load %arg6[%c0_4, %c0_5] : memref<1x4xf32, #tpu.memory_space<vmem>>, vector<1x4xf32>
    %6 = vector.broadcast %5 : vector<1x4xf32> to vector<290x4xf32>
    %7 = arith.addf %4, %6 : vector<290x4xf32>
    %cst = arith.constant 0.000000e+00 : f32
    %8 = vector.broadcast %cst : f32 to vector<290x4xf32>
    %9 = arith.maximumf %7, %8 : vector<290x4xf32>
    %c0_6 = arith.constant 0 : index
    %c0_7 = arith.constant 0 : index
    %10 = vector.load %arg4[%c0_6, %c0_7] : memref<290x1xf32, #tpu.memory_space<vmem>>, vector<290x1xf32>
    %11 = vector.broadcast %10 : vector<290x1xf32> to vector<290x4xf32>
    %12 = arith.mulf %9, %11 : vector<290x4xf32>
    %13 = vector.extract_strided_slice %12 {offsets = [0, 0], sizes = [256, 4], strides = [1, 1]} : vector<290x4xf32> to vector<256x4xf32>
    %c0_8 = arith.constant 0 : index
    %c0_9 = arith.constant 0 : index
    %14 = vector.load %arg3[%c0_8, %c0_9] : memref<256x2xf32, #tpu.memory_space<vmem>>, vector<256x1xf32>
    %15 = vector.broadcast %14 : vector<256x1xf32> to vector<256x4xf32>
    %16 = arith.mulf %13, %15 : vector<256x4xf32>
    %17 = vector.extract_strided_slice %12 {offsets = [1, 0], sizes = [256, 4], strides = [1, 1]} : vector<290x4xf32> to vector<256x4xf32>
    %18 = vector.extract_strided_slice %12 {offsets = [2, 0], sizes = [256, 4], strides = [1, 1]} : vector<290x4xf32> to vector<256x4xf32>
    %c0_10 = arith.constant 0 : index
    %c1 = arith.constant 1 : index
    %19 = vector.load %arg3[%c0_10, %c1] : memref<256x2xf32, #tpu.memory_space<vmem>>, vector<256x1xf32>
    %20 = vector.broadcast %19 : vector<256x1xf32> to vector<256x4xf32>
    %21 = arith.mulf %18, %20 : vector<256x4xf32>
    %22 = vector.extract_strided_slice %12 {offsets = [16, 0], sizes = [256, 4], strides = [1, 1]} : vector<290x4xf32> to vector<256x4xf32>
    %c0_11 = arith.constant 0 : index
    %c0_12 = arith.constant 0 : index
    %23 = vector.load %arg3[%c0_11, %c0_12] : memref<256x2xf32, #tpu.memory_space<vmem>>, vector<256x1xf32>
    %24 = vector.broadcast %23 : vector<256x1xf32> to vector<256x4xf32>
    %25 = arith.mulf %22, %24 : vector<256x4xf32>
    %26 = vector.extract_strided_slice %12 {offsets = [17, 0], sizes = [256, 4], strides = [1, 1]} : vector<290x4xf32> to vector<256x4xf32>
    %27 = vector.extract_strided_slice %12 {offsets = [18, 0], sizes = [256, 4], strides = [1, 1]} : vector<290x4xf32> to vector<256x4xf32>
    %c0_13 = arith.constant 0 : index
    %c1_14 = arith.constant 1 : index
    %28 = vector.load %arg3[%c0_13, %c1_14] : memref<256x2xf32, #tpu.memory_space<vmem>>, vector<256x1xf32>
    %29 = vector.broadcast %28 : vector<256x1xf32> to vector<256x4xf32>
    %30 = arith.mulf %27, %29 : vector<256x4xf32>
    %31 = vector.extract_strided_slice %12 {offsets = [32, 0], sizes = [256, 4], strides = [1, 1]} : vector<290x4xf32> to vector<256x4xf32>
    %c0_15 = arith.constant 0 : index
    %c0_16 = arith.constant 0 : index
    %32 = vector.load %arg3[%c0_15, %c0_16] : memref<256x2xf32, #tpu.memory_space<vmem>>, vector<256x1xf32>
    %33 = vector.broadcast %32 : vector<256x1xf32> to vector<256x4xf32>
    %34 = arith.mulf %31, %33 : vector<256x4xf32>
    %35 = vector.extract_strided_slice %12 {offsets = [33, 0], sizes = [256, 4], strides = [1, 1]} : vector<290x4xf32> to vector<256x4xf32>
    %36 = vector.extract_strided_slice %12 {offsets = [34, 0], sizes = [256, 4], strides = [1, 1]} : vector<290x4xf32> to vector<256x4xf32>
    %c0_17 = arith.constant 0 : index
    %c1_18 = arith.constant 1 : index
    %37 = vector.load %arg3[%c0_17, %c1_18] : memref<256x2xf32, #tpu.memory_space<vmem>>, vector<256x1xf32>
    %38 = vector.broadcast %37 : vector<256x1xf32> to vector<256x4xf32>
    %39 = arith.mulf %36, %38 : vector<256x4xf32>
    %40 = tpu.concatenate %16, %17, %21, %25, %26, %30, %34, %35, %39 in 1 : vector<256x4xf32>, vector<256x4xf32>, vector<256x4xf32>, vector<256x4xf32>, vector<256x4xf32>, vector<256x4xf32>, vector<256x4xf32>, vector<256x4xf32>, vector<256x4xf32> -> vector<256x36xf32>
    %c0_19 = arith.constant 0 : index
    %c0_20 = arith.constant 0 : index
    %41 = vector.load %arg2[%c0_19, %c0_20] : memref<36x4xf32, #tpu.memory_space<vmem>>, vector<36x4xf32>
    %cst_21 = arith.constant dense<0.000000e+00> : vector<256x4xf32>
    %42 = tpu.matmul %40, %41, %cst_21 {dimension_numbers = #tpu.dot_dimension_numbers<[1], [0], [0], [1], [0, 0, 1, 1], [], []>} : vector<256x36xf32>, vector<36x4xf32>, vector<256x4xf32> -> vector<256x4xf32>
    %c0_22 = arith.constant 0 : index
    %c0_23 = arith.constant 0 : index
    %c0_24 = arith.constant 0 : index
    %43 = vector.load %arg7[%c0_22, %c0_23, %c0_24] : memref<1x256x4xf32, #tpu.memory_space<vmem>>, vector<1x256x4xf32>
    %44 = vector.shape_cast %43 : vector<1x256x4xf32> to vector<256x4xf32>
    %45 = vector.shape_cast %42 : vector<256x4xf32> to vector<1x256x4xf32>
    tpu.vector_store %arg7[%c0_22, %c0_23, %c0_24], %45 {strides = array<i32>} : memref<1x256x4xf32, #tpu.memory_space<vmem>>, vector<1x256x4xf32>,
    %cst_25 = arith.constant dense<0.000000e+00> : vector<4xf32>
    %46 = vector.multi_reduction <add>, %42, %cst_25 [0] : vector<256x4xf32> to vector<4xf32>
    %47 = vector.shape_cast %46 : vector<4xf32> to vector<1x4xf32>
    %c0_26 = arith.constant 0 : index
    %c0_27 = arith.constant 0 : index
    %c0_28 = arith.constant 0 : index
    %48 = vector.load %arg8[%c0_26, %c0_27, %c0_28] : memref<1x1x4xf32, #tpu.memory_space<vmem>>, vector<1x1x4xf32>
    %49 = vector.shape_cast %48 : vector<1x1x4xf32> to vector<1x4xf32>
    %50 = vector.shape_cast %47 : vector<1x4xf32> to vector<1x1x4xf32>
    tpu.vector_store %arg8[%c0_26, %c0_27, %c0_28], %50 {strides = array<i32>} : memref<1x1x4xf32, #tpu.memory_space<vmem>>, vector<1x1x4xf32>,
    %51 = arith.mulf %42, %42 : vector<256x4xf32>
    %cst_29 = arith.constant dense<0.000000e+00> : vector<4xf32>
    %52 = vector.multi_reduction <add>, %51, %cst_29 [0] : vector<256x4xf32> to vector<4xf32>
    %53 = vector.shape_cast %52 : vector<4xf32> to vector<1x4xf32>
    %c0_30 = arith.constant 0 : index
    %c0_31 = arith.constant 0 : index
    %c0_32 = arith.constant 0 : index
    %54 = vector.load %arg9[%c0_30, %c0_31, %c0_32] : memref<1x1x4xf32, #tpu.memory_space<vmem>>, vector<1x1x4xf32>
    %55 = vector.shape_cast %54 : vector<1x1x4xf32> to vector<1x4xf32>
    %56 = vector.shape_cast %53 : vector<1x4xf32> to vector<1x1x4xf32>
    tpu.vector_store %arg9[%c0_30, %c0_31, %c0_32], %56 {strides = array<i32>} : memref<1x1x4xf32, #tpu.memory_space<vmem>>, vector<1x1x4xf32>,
    return
  }
  func.func @transform_0(%arg0: i32) -> (i32, i32, i32) {
    %c0_i32 = arith.constant 0 : i32
    %c0_i32_0 = arith.constant 0 : i32
    %c0_i32_1 = arith.constant 0 : i32
    return %arg0, %c0_i32, %c0_i32_0 : i32, i32, i32
  }
  func.func @transform_1(%arg0: i32) -> (i32, i32) {
    %c0_i32 = arith.constant 0 : i32
    %c0_i32_0 = arith.constant 0 : i32
    %c0_i32_1 = arith.constant 0 : i32
    return %c0_i32, %c0_i32_0 : i32, i32
  }
  func.func @transform_2(%arg0: i32) -> (i32, i32) {
    %c0_i32 = arith.constant 0 : i32
    %c0_i32_0 = arith.constant 0 : i32
    %c0_i32_1 = arith.constant 0 : i32
    return %c0_i32, %c0_i32_0 : i32, i32
  }
  func.func @transform_3(%arg0: i32) -> (i32, i32) {
    %c0_i32 = arith.constant 0 : i32
    %c0_i32_0 = arith.constant 0 : i32
    %c0_i32_1 = arith.constant 0 : i32
    return %c0_i32, %c0_i32_0 : i32, i32
  }
  func.func @transform_4(%arg0: i32) -> (i32, i32) {
    %c0_i32 = arith.constant 0 : i32
    %c0_i32_0 = arith.constant 0 : i32
    %c0_i32_1 = arith.constant 0 : i32
    return %c0_i32, %c0_i32_0 : i32, i32
  }
  func.func @transform_5(%arg0: i32) -> (i32, i32) {
    %c0_i32 = arith.constant 0 : i32
    %c0_i32_0 = arith.constant 0 : i32
    %c0_i32_1 = arith.constant 0 : i32
    return %c0_i32, %c0_i32_0 : i32, i32
  }
  func.func @transform_6(%arg0: i32) -> (i32, i32, i32) {
    %c0_i32 = arith.constant 0 : i32
    %c0_i32_0 = arith.constant 0 : i32
    %c0_i32_1 = arith.constant 0 : i32
    return %arg0, %c0_i32, %c0_i32_0 : i32, i32, i32
  }
  func.func @transform_7(%arg0: i32) -> (i32, i32, i32) {
    %c0_i32 = arith.constant 0 : i32
    %c0_i32_0 = arith.constant 0 : i32
    %c0_i32_1 = arith.constant 0 : i32
    return %arg0, %c0_i32, %c0_i32_0 : i32, i32, i32
  }
  func.func @transform_8(%arg0: i32) -> (i32, i32, i32) {
    %c0_i32 = arith.constant 0 : i32
    %c0_i32_0 = arith.constant 0 : i32
    %c0_i32_1 = arith.constant 0 : i32
    return %arg0, %c0_i32, %c0_i32_0 : i32, i32, i32
  }
}

module attributes {stable_mosaic.version = 11 : i64} {
  func.func @scale_shift_add_act_kernel(%arg0: i32, %arg1: memref<16x128xf32, #tpu.memory_space<vmem>>, %arg2: memref<1x128xf32, #tpu.memory_space<vmem>>, %arg3: memref<1x128xf32, #tpu.memory_space<vmem>>, %arg4: memref<16x128xf32, #tpu.memory_space<vmem>>, %arg5: memref<16x128xf32, #tpu.memory_space<vmem>>) attributes {dimension_semantics = [#tpu.dimension_semantics<parallel>], iteration_bounds = array<i64: 1>, scalar_prefetch = 0 : i64, scratch_operands = 0 : i64, tpu.core_type = #tpu.core_type<tc>, window_params = [{transform_indices = @transform_0, window_bounds = array<i64: 16, 128>}, {pipeline_mode = #tpu.pipeline_mode<synchronous>, transform_indices = @transform_1, window_bounds = array<i64: 1, 128>}, {pipeline_mode = #tpu.pipeline_mode<synchronous>, transform_indices = @transform_2, window_bounds = array<i64: 1, 128>}, {transform_indices = @transform_3, window_bounds = array<i64: 16, 128>}, {transform_indices = @transform_4, window_bounds = array<i64: 16, 128>}]} {
    %c0 = arith.constant 0 : index
    %c0_0 = arith.constant 0 : index
    %0 = vector.load %arg1[%c0, %c0_0] : memref<16x128xf32, #tpu.memory_space<vmem>>, vector<16x128xf32>
    %c0_1 = arith.constant 0 : index
    %c0_2 = arith.constant 0 : index
    %1 = vector.load %arg2[%c0_1, %c0_2] : memref<1x128xf32, #tpu.memory_space<vmem>>, vector<1x128xf32>
    %2 = vector.broadcast %1 : vector<1x128xf32> to vector<16x128xf32>
    %3 = arith.mulf %0, %2 : vector<16x128xf32>
    %c0_3 = arith.constant 0 : index
    %c0_4 = arith.constant 0 : index
    %4 = vector.load %arg3[%c0_3, %c0_4] : memref<1x128xf32, #tpu.memory_space<vmem>>, vector<1x128xf32>
    %5 = vector.broadcast %4 : vector<1x128xf32> to vector<16x128xf32>
    %6 = arith.addf %3, %5 : vector<16x128xf32>
    %c0_5 = arith.constant 0 : index
    %c0_6 = arith.constant 0 : index
    %7 = vector.load %arg4[%c0_5, %c0_6] : memref<16x128xf32, #tpu.memory_space<vmem>>, vector<16x128xf32>
    %8 = arith.addf %6, %7 : vector<16x128xf32>
    %cst = arith.constant 0.000000e+00 : f32
    %9 = vector.broadcast %cst : f32 to vector<16x128xf32>
    %10 = arith.maximumf %8, %9 : vector<16x128xf32>
    %c0_7 = arith.constant 0 : index
    %c0_8 = arith.constant 0 : index
    %11 = vector.load %arg5[%c0_7, %c0_8] : memref<16x128xf32, #tpu.memory_space<vmem>>, vector<16x128xf32>
    tpu.vector_store %arg5[%c0_7, %c0_8], %10 {strides = array<i32>} : memref<16x128xf32, #tpu.memory_space<vmem>>, vector<16x128xf32>,
    return
  }
  func.func @transform_0(%arg0: i32) -> (i32, i32) {
    %c0_i32 = arith.constant 0 : i32
    %c0_i32_0 = arith.constant 0 : i32
    return %arg0, %c0_i32 : i32, i32
  }
  func.func @transform_1(%arg0: i32) -> (i32, i32) {
    %c0_i32 = arith.constant 0 : i32
    %c0_i32_0 = arith.constant 0 : i32
    %c0_i32_1 = arith.constant 0 : i32
    return %c0_i32, %c0_i32_0 : i32, i32
  }
  func.func @transform_2(%arg0: i32) -> (i32, i32) {
    %c0_i32 = arith.constant 0 : i32
    %c0_i32_0 = arith.constant 0 : i32
    %c0_i32_1 = arith.constant 0 : i32
    return %c0_i32, %c0_i32_0 : i32, i32
  }
  func.func @transform_3(%arg0: i32) -> (i32, i32) {
    %c0_i32 = arith.constant 0 : i32
    %c0_i32_0 = arith.constant 0 : i32
    return %arg0, %c0_i32 : i32, i32
  }
  func.func @transform_4(%arg0: i32) -> (i32, i32) {
    %c0_i32 = arith.constant 0 : i32
    %c0_i32_0 = arith.constant 0 : i32
    return %arg0, %c0_i32 : i32, i32
  }
}

</mosaic_0001>

<bundles_post_ra>
// kernel: tile.18
= control target key start
LH: loop header
LB: loop body
LE: loop exit
PB: predicated region body
PF: predicated region fallthrough
CT: control target
= control target key end

     0   :  { %s40_s0 = inlined_call_operand.vmem [shape: f32[4], index: 0, kind: input, shape index: {}]   ;;  %s41_s1 = inlined_call_operand.vmem [shape: f32[32,4], index: 1, kind: output, shape index: {}]  }
   0x1   :  { %v4_v0 = vld [vmem:[%s40_s0] ss:$0 sm:$0xff] }
   0x2   :  { %5 = vst [vmem:[%s41_s1] sm:$0xff] %v4_v0  ;;  %12 = vst [vmem:[%s41_s1 + $0x8] sm:$0xff] %v4_v0 }
   0x3   :  { %13 = vst [vmem:[%s41_s1 + $0x10] sm:$0xff] %v4_v0  ;;  %14 = vst [vmem:[%s41_s1 + $0x18] sm:$0xff] %v4_v0 }

// kernel: tile.19
= control target key start
LH: loop header
LB: loop body
LE: loop exit
PB: predicated region body
PF: predicated region fallthrough
CT: control target
= control target key end

     0   :  { %s261_s10 = smov 124   ;;  %s262_s11 = smov 116   ;;  %vm3_vm0 = vcmask 31744   ;;  %vm9_vm1 = vcmask 1048544   ;;  %vm15_vm2 = vcmask 1015744   ;;  %vm21_vm3 = vcmask 982944   ;;  %s401_s0 = inlined_call_operand.vmem [shape: f32[32,4], index: 0, kind: input, shape index: {}]   ;;  %s402_s1 = inlined_call_operand.vmem [shape: f32[1,128], index: 1, kind: output, shape index: {}]  }
   0x1   :  { %v199_v0 = vld [vmem:[%s401_s0 + $0x1f] sm:$0x1]   ;;  %v201_v1 = vld [vmem:[%s401_s0 + $0x1d] sm:$0x1]   ;;  %v200_v2 = vld [vmem:[%s401_s0 + $0x1e] sm:$0x1]  }
   0x2   :  { %7 = vrot.lane.b32.xlu0 %v199_v0, %s261_s10  ;;  %19 = vrot.lane.b32.xlu1 %v201_v1, %s262_s11  ;;  %v202_v3 = vld [vmem:[%s401_s0 + $0x1c] sm:$0x1]   ;;  %s263_s16 = smov 120   ;;  %s264_s17 = smov 112   ;;  %v203_v4 = vld [vmem:[%s401_s0 + $0x1b] sm:$0x1]  }
   0x3   :  { %v204_v5 = vld [vmem:[%s401_s0 + $0x1a] sm:$0x1]   ;;  %s265_s22 = smov 108   ;;  %s266_s23 = smov 104   ;;  %v205_v6 = vld [vmem:[%s401_s0 + $0x19] sm:$0x1]  }
   0x4   :  { %v206_v7 = vld [vmem:[%s401_s0 + $0x18] sm:$0x1]   ;;  %s267_s28 = smov 100   ;;  %s268_s29 = smov 96   ;;  %v207_v8 = vld [vmem:[%s401_s0 + $0x17] sm:$0x1]  }
   0x5   :  { %v208_v9 = vld [vmem:[%s401_s0 + $0x16] sm:$0x1]   ;;  %v2_v10 = vld [vmem:[%s401_s0] sm:$0x1]   ;;  %s269_s7 = smov 92   ;;  %s270_s8 = smov 88  }
   0x6   :  { %13 = vrot.lane.b32.xlu0 %v200_v2, %s263_s16  ;;  %25 = vrot.lane.b32.xlu1 %v202_v3, %s264_s17  ;;  %4 = vst.msk [vmem:[#allocation0] sm:$0x1] %vm3_vm0, %v2_v10   ;;  %v209_v11 = vld [vmem:[%s401_s0 + $0x15] sm:$0x1]   ;;  %v210_v12 = vld [vmem:[%s401_s0 + $0x14] sm:$0x1]  }
   0x7   :  { %s271_s13 = smov 84   ;;  %s272_s14 = smov 80   ;;  %v211_v13 = vld [vmem:[%s401_s0 + $0x13] sm:$0x1]   ;;  %v212_v14 = vld [vmem:[%s401_s0 + $0x12] sm:$0x1]  }
   0x8   :  { %s273_s19 = smov 76   ;;  %s274_s20 = smov 72   ;;  %v213_v15 = vld [vmem:[%s401_s0 + $0x11] sm:$0x1]   ;;  %v214_v16 = vld [vmem:[%s401_s0 + $0x10] sm:$0x1]  }
   0x9   :  { %s275_s25 = smov 68   ;;  %s276_s26 = smov 64   ;;  %v215_v17 = vld [vmem:[%s401_s0 + $0xf] sm:$0x1]   ;;  %v216_v18 = vld [vmem:[%s401_s0 + $0xe] sm:$0x1]  }
   0xa   :  { %31 = vrot.lane.b32.xlu0 %v203_v4, %s265_s22  ;;  %37 = vrot.lane.b32.xlu1 %v204_v5, %s266_s23  ;;  %s277_s2 = smov 60   ;;  %s278_s3 = smov 56   ;;  %v217_v19 = vld [vmem:[%s401_s0 + $0xd] sm:$0x1]   ;;  %v218_v20 = vld [vmem:[%s401_s0 + $0xc] sm:$0x1]  }
   0xb   :  { %s280_s9 = smov 48   ;;  %v219_v21 = vld [vmem:[%s401_s0 + $0xb] sm:$0x1]   ;;  %v220_v22 = vld [vmem:[%s401_s0 + $0xa] sm:$0x1]   ;;  %s282_s15 = smov 40  }
   0xc   :  { %v221_v23 = vld [vmem:[%s401_s0 + $0x9] sm:$0x1]   ;;  %v222_v24 = vld [vmem:[%s401_s0 + $0x8] sm:$0x1]   ;;  %s284_s21 = smov 32   ;;  %s286_s27 = smov 24  }
   0xd   :  { %v223_v25 = vld [vmem:[%s401_s0 + $0x7] sm:$0x1]   ;;  %v224_v26 = vld [vmem:[%s401_s0 + $0x6] sm:$0x1]   ;;  %v225_v27 = vld [vmem:[%s401_s0 + $0x5] sm:$0x1]  }
   0xe   :  { %43 = vrot.lane.b32.xlu0 %v205_v6, %s267_s28  ;;  %49 = vrot.lane.b32.xlu1 %v206_v7, %s268_s29  ;;  %v226_v28 = vld [vmem:[%s401_s0 + $0x4] sm:$0x1]   ;;  %s288_s4 = smov 16   ;;  %v227_v29 = vld [vmem:[%s401_s0 + $0x3] sm:$0x1]   ;;  %s290_s10 = smov 8  }
   0xf   :  { %v228_v30 = vld [vmem:[%s401_s0 + $0x2] sm:$0x1]   ;;  %v229_v31 = vld [vmem:[%s401_s0 + $0x1] sm:$0x1]   ;;  %s291_s0 = smov 4   ;;  %vm27_vm4 = vcmask 950144  }
  0x10   :  { %vm33_vm5 = vcmask 917344   ;;  %vm39_vm6 = vcmask 884544   ;;  %vm45_vm7 = vcmask 851744   ;;  %vm51_vm8 = vcmask 818944  }
  0x11   :  { %vm57_vm9 = vcmask 786144   ;;  %vm63_vm10 = vcmask 753344   ;;  %vm69_vm11 = vcmask 720544   ;;  %vm75_vm12 = vcmask 687744  }
  0x12   :  { %55 = vrot.lane.b32.xlu0 %v207_v8, %s269_s7  ;;  %61 = vrot.lane.b32.xlu1 %v208_v9, %s270_s8  ;;  %s279_s8 = smov 52   ;;  %vm81_vm13 = vcmask 654944   ;;  %vm87_vm14 = vcmask 622144   ;;  %vm93_vm15 = vcmask 589344   ;;  %vm99_vm0 = vcmask 556544  }
  0x16   :  { %67 = vrot.lane.b32.xlu0 %v209_v11, %s271_s13  ;;  %73 = vrot.lane.b32.xlu1 %v210_v12, %s272_s14  ;;  %s281_s14 = smov 44  }
  0x1a   :  { %79 = vrot.lane.b32.xlu0 %v211_v13, %s273_s19  ;;  %85 = vrot.lane.b32.xlu1 %v212_v14, %s274_s20  ;;  %s283_s20 = smov 36  }
  0x1e   :  { %91 = vrot.lane.b32.xlu0 %v213_v15, %s275_s25  ;;  %97 = vrot.lane.b32.xlu1 %v214_v16, %s276_s26  ;;  %s285_s26 = smov 28  }
  0x22   :  { %103 = vrot.lane.b32.xlu0 %v215_v17, %s277_s2  ;;  %109 = vrot.lane.b32.xlu1 %v216_v18, %s278_s3  ;;  %s287_s3 = smov 20  }
  0x26   :  { %115 = vrot.lane.b32.xlu0 %v217_v19, %s279_s8  ;;  %121 = vrot.lane.b32.xlu1 %v218_v20, %s280_s9  ;;  %s289_s9 = smov 12  }
  0x2a   :  { %127 = vrot.lane.b32.xlu0 %v219_v21, %s281_s14  ;;  %133 = vrot.lane.b32.xlu1 %v220_v22, %s282_s15 }
  0x2e   :  { %139 = vrot.lane.b32.xlu0 %v221_v23, %s283_s20  ;;  %145 = vrot.lane.b32.xlu1 %v222_v24, %s284_s21 }
  0x32   :  { %151 = vrot.lane.b32.xlu0 %v223_v25, %s285_s26  ;;  %157 = vrot.lane.b32.xlu1 %v224_v26, %s286_s27 }
  0x36   :  { %163 = vrot.lane.b32.xlu0 %v225_v27, %s287_s3  ;;  %169 = vrot.lane.b32.xlu1 %v226_v28, %s288_s4 }
  0x3a   :  { %175 = vrot.lane.b32.xlu0 %v227_v29, %s289_s9  ;;  %181 = vrot.lane.b32.xlu1 %v228_v30, %s290_s10 }
  0x3e   :  { %187 = vrot.lane.b32.xlu0 %v229_v31, %s291_s0 }
  0x74   :  { %v8_v32 = vpop.permute.xlu0 %7   ;;  %v20_v33 = vpop.permute.xlu1 %19  }
  0x75   :  { %10 = vst.msk [vmem:[#allocation0] sm:$0x1] %vm9_vm1, %v8_v32   ;;  %vm105_vm1 = vcmask 523744  }
  0x78   :  { %v14_v34 = vpop.permute.xlu0 %13   ;;  %v26_v35 = vpop.permute.xlu1 %25  }
  0x79   :  { %16 = vst.msk [vmem:[#allocation0] sm:$0x1] %vm15_vm2, %v14_v34   ;;  %vm111_vm2 = vcmask 490944  }
  0x7a   :  { %22 = vst.msk [vmem:[#allocation0] sm:$0x1] %vm21_vm3, %v20_v33   ;;  %vm117_vm3 = vcmask 458144  }
  0x7b   :  { %28 = vst.msk [vmem:[#allocation0] sm:$0x1] %vm27_vm4, %v26_v35   ;;  %vm123_vm4 = vcmask 425344  }
  0x7c   :  { %v32_v36 = vpop.permute.xlu0 %31   ;;  %v38_v37 = vpop.permute.xlu1 %37  }
  0x7d   :  { %34 = vst.msk [vmem:[#allocation0] sm:$0x1] %vm33_vm5, %v32_v36   ;;  %vm129_vm5 = vcmask 392544  }
  0x7e   :  { %40 = vst.msk [vmem:[#allocation0] sm:$0x1] %vm39_vm6, %v38_v37   ;;  %vm135_vm6 = vcmask 359744  }
  0x80   :  { %v44_v38 = vpop.permute.xlu0 %43   ;;  %v50_v39 = vpop.permute.xlu1 %49  }
  0x81   :  { %46 = vst.msk [vmem:[#allocation0] sm:$0x1] %vm45_vm7, %v44_v38   ;;  %vm141_vm7 = vcmask 326944  }
  0x82   :  { %52 = vst.msk [vmem:[#allocation0] sm:$0x1] %vm51_vm8, %v50_v39   ;;  %vm147_vm8 = vcmask 294144  }
  0x84   :  { %v56_v40 = vpop.permute.xlu0 %55   ;;  %v62_v41 = vpop.permute.xlu1 %61  }
  0x85   :  { %58 = vst.msk [vmem:[#allocation0] sm:$0x1] %vm57_vm9, %v56_v40   ;;  %vm153_vm9 = vcmask 261344  }
  0x86   :  { %64 = vst.msk [vmem:[#allocation0] sm:$0x1] %vm63_vm10, %v62_v41   ;;  %vm159_vm10 = vcmask 228544  }
  0x88   :  { %v68_v42 = vpop.permute.xlu0 %67   ;;  %v74_v43 = vpop.permute.xlu1 %73  }
  0x89   :  { %70 = vst.msk [vmem:[#allocation0] sm:$0x1] %vm69_vm11, %v68_v42   ;;  %vm165_vm11 = vcmask 195744  }
  0x8a   :  { %76 = vst.msk [vmem:[#allocation0] sm:$0x1] %vm75_vm12, %v74_v43   ;;  %vm171_vm12 = vcmask 162944  }
  0x8c   :  { %v80_v44 = vpop.permute.xlu0 %79   ;;  %v86_v45 = vpop.permute.xlu1 %85  }
  0x8d   :  { %82 = vst.msk [vmem:[#allocation0] sm:$0x1] %vm81_vm13, %v80_v44   ;;  %vm177_vm13 = vcmask 130144  }
  0x8e   :  { %88 = vst.msk [vmem:[#allocation0] sm:$0x1] %vm87_vm14, %v86_v45   ;;  %vm183_vm14 = vcmask 97344  }
  0x90   :  { %v92_v46 = vpop.permute.xlu0 %91   ;;  %v98_v47 = vpop.permute.xlu1 %97  }
  0x91   :  { %94 = vst.msk [vmem:[#allocation0] sm:$0x1] %vm93_vm15, %v92_v46   ;;  %vm189_vm15 = vcmask 64544  }
  0x92   :  { %100 = vst.msk [vmem:[#allocation0] sm:$0x1] %vm99_vm0, %v98_v47  }
  0x94   :  { %v104_v48 = vpop.permute.xlu0 %103   ;;  %v110_v49 = vpop.permute.xlu1 %109  }
  0x95   :  { %106 = vst.msk [vmem:[#allocation0] sm:$0x1] %vm105_vm1, %v104_v48  }
  0x96   :  { %112 = vst.msk [vmem:[#allocation0] sm:$0x1] %vm111_vm2, %v110_v49  }
  0x98   :  { %v116_v50 = vpop.permute.xlu0 %115   ;;  %v122_v51 = vpop.permute.xlu1 %121  }
  0x99   :  { %118 = vst.msk [vmem:[#allocation0] sm:$0x1] %vm117_vm3, %v116_v50  }
  0x9a   :  { %124 = vst.msk [vmem:[#allocation0] sm:$0x1] %vm123_vm4, %v122_v51  }
  0x9c   :  { %v128_v52 = vpop.permute.xlu0 %127   ;;  %v134_v53 = vpop.permute.xlu1 %133  }
  0x9d   :  { %130 = vst.msk [vmem:[#allocation0] sm:$0x1] %vm129_vm5, %v128_v52  }
  0x9e   :  { %136 = vst.msk [vmem:[#allocation0] sm:$0x1] %vm135_vm6, %v134_v53  }
  0xa0   :  { %v140_v54 = vpop.permute.xlu0 %139   ;;  %v146_v55 = vpop.permute.xlu1 %145  }
  0xa1   :  { %142 = vst.msk [vmem:[#allocation0] sm:$0x1] %vm141_vm7, %v140_v54  }
  0xa2   :  { %148 = vst.msk [vmem:[#allocation0] sm:$0x1] %vm147_vm8, %v146_v55  }
  0xa4   :  { %v152_v56 = vpop.permute.xlu0 %151   ;;  %v158_v57 = vpop.permute.xlu1 %157  }
  0xa5   :  { %154 = vst.msk [vmem:[#allocation0] sm:$0x1] %vm153_vm9, %v152_v56  }
  0xa6   :  { %160 = vst.msk [vmem:[#allocation0] sm:$0x1] %vm159_vm10, %v158_v57  }
  0xa8   :  { %v164_v58 = vpop.permute.xlu0 %163   ;;  %v170_v59 = vpop.permute.xlu1 %169  }
  0xa9   :  { %166 = vst.msk [vmem:[#allocation0] sm:$0x1] %vm165_vm11, %v164_v58  }
  0xaa   :  { %172 = vst.msk [vmem:[#allocation0] sm:$0x1] %vm171_vm12, %v170_v59  }
  0xac   :  { %v176_v60 = vpop.permute.xlu0 %175   ;;  %v182_v61 = vpop.permute.xlu1 %181  }
  0xad   :  { %178 = vst.msk [vmem:[#allocation0] sm:$0x1] %vm177_vm13, %v176_v60  }
  0xae   :  { %184 = vst.msk [vmem:[#allocation0] sm:$0x1] %vm183_vm14, %v182_v61  }
  0xb0   :  { %v188_v62 = vpop.permute.xlu0 %187  }
  0xb1   :  { %190 = vst.msk [vmem:[#allocation0] sm:$0x1] %vm189_vm15, %v188_v62  }
  0xb8   :  { %v195_v63 = vld [vmem:[#allocation0] sm:$0x1] }
  0xb9   :  { %198 = vst [vmem:[%s402_s1] sm:$0x1] %v195_v63 }

// kernel: residual_forward.5
= control target key start
LH: loop header
LB: loop body
LE: loop exit
PB: predicated region body
PF: predicated region fallthrough
CT: control target
= control target key end

     0   :  { %s100_s0 = inlined_call_operand.vmem [shape: f32[16,128], index: 0, kind: input, shape index: {}, may-alias: {0,4}]   ;;  %s101_s1 = inlined_call_operand.vmem [shape: f32[1,128], index: 1, kind: input, shape index: {}]   ;;  %s102_s2 = inlined_call_operand.vmem [shape: f32[1,128], index: 2, kind: input, shape index: {}]   ;;  %s103_s3 = inlined_call_operand.vmem [shape: f32[16,128], index: 3, kind: input, shape index: {}]   ;;  %s104_s4 = inlined_call_operand.vmem [shape: f32[16,128], index: 4, kind: output, shape index: {}, may-alias: {0,4}]  }
   0x1   :  { %v17_v0 = vld [vmem:[%s100_s0] sm:$0xff]  ;;  %v18_v4 = vld [vmem:[%s100_s0 + $0x8] sm:$0xff] }
   0x2   :  { %v49_v1 = vld [vmem:[%s101_s1] ss:$0 sm:$0xff]  ;;  %v38_v8 = vld [vmem:[%s103_s3 + $0x8] sm:$0xff] }
   0x3   :  { %v50_v2 = vld [vmem:[%s102_s2] ss:$0 sm:$0xff]  ;;  %v26_v3 = vmul.f32 %v49_v1, %v17_v0  ;;  %v27_v6 = vmul.f32 %v49_v1, %v18_v4 }
   0x4   :  { %v37_v5 = vld [vmem:[%s103_s3] sm:$0xff] }
   0x5   :  { %v35_v7 = vadd.f32 %v50_v2, %v26_v3  ;;  %v36_v9 = vadd.f32 %v50_v2, %v27_v6 }
   0x7   :  { %v39_v10 = vadd.f32 %v37_v5, %v35_v7  ;;  %v40_v11 = vadd.f32 %v38_v8, %v36_v9 }
   0x9   :  { %v41_v12 = vmax.f32 %v39_v10, 0.0  ;;  %v42_v13 = vmax.f32 %v40_v11, 0.0 }
   0xb   :  { %43 = vst [vmem:[%s104_s4] sm:$0xff] %v41_v12  ;;  %44 = vst [vmem:[%s104_s4 + $0x8] sm:$0xff] %v42_v13 }

// kernel: residual_forward.3
= control target key start
LH: loop header
LB: loop body
LE: loop exit
PB: predicated region body
PF: predicated region fallthrough
CT: control target
= control target key end

     0   :  { %s3092_s18 = smov 0   ;;  %s4907_s0 = inlined_call_operand.vmem [shape: f32[2,290,4], index: 0, kind: input, shape index: {}]   ;;  %s4908_s1 = inlined_call_operand.vmem [shape: f32[36,4], index: 1, kind: input, shape index: {}]   ;;  %s4909_s2 = inlined_call_operand.vmem [shape: f32[256,2], index: 2, kind: input, shape index: {}]   ;;  %s4910_s3 = inlined_call_operand.vmem [shape: f32[2,290,4], index: 3, kind: output, shape index: {0}]   ;;  %s4911_s4 = inlined_call_operand.vmem [shape: f32[2,1,4], index: 4, kind: output, shape index: {1}]   ;;  %s4912_s5 = inlined_call_operand.vmem [shape: f32[2,1,4], index: 5, kind: output, shape index: {2}]  }
   0x1 LB: > { %s2857_s19 = sadd.s32 4294967295, %s3049_s18   ;;  %p2861_p0 = scmp.ge.s32.totalorder %s3049_s18, 1  ;;  %s3049_s18 = sphi %s3092_s18, %s16_s18  }
   0x2   : > { %p192_p1 = scmp.lt.s32.totalorder %s3049_s18, 3 }
   0x4   : > { %p193_p2 = pnand %p2861_p0, %p192_p1 }
   0x6   : > { %196 = sbr.rel (%p193_p2) target bundleno = 991 (0x3df), region = 32 }
   0xb   : > { %v3103_v0 = vld [vmem:[%s4909_s2 + $0x10] sm:$0xff]  ;;  %v3108_v1 = vld [vmem:[%s4909_s2] sm:$0xff]  ;;  %v3051_v2 = vmov 0   ;;  %v3115_v3 = vld [vmem:[%s4909_s2 + $0x18] sm:$0xff]  ;;  %v3052_v33 = vmov 1   ;;  %p226_p3 = scmp.lt.s32.totalorder %s2857_s19, 1 }
   0xc   : > { %3025 = vset.pattern.permute.xlu1 %v3051_v2  ;;  %3024 = vset.pattern.permute.xlu0 %v3051_v2  ;;  %v275_v4 = vld [vmem:[%s4909_s2 + $0x8] sm:$0xff]  ;;  %v278_v6 = vld [vmem:[%s4909_s2 + $0x20] sm:$0xff]  ;;  %v281_v7 = vld [vmem:[%s4909_s2 + $0x38] sm:$0xff]  ;;  %s3053_s17 = smov 4   ;;  %s3054_s20 = smov 8   ;;  %vm2312_vm0 = vcmask 1043456  }
   0xd   : > { %318 = vperm.xlu1 %3025, %v3103_v0   ;;  %308 = vperm.xlu0 %3024, %v3108_v1   ;;  %v3124_v5 = vld [vmem:[%s4909_s2 + $0x28] sm:$0xff]  ;;  %v280_v8 = vld [vmem:[%s4909_s2 + $0x30] sm:$0xff]  ;;  %v282_v10 = vld [vmem:[%s4909_s2 + $0x40] sm:$0xff]  ;;  %s5280_s19 = smov (!%p226_p3, %s2857_s19), 1  ;;  %s3055_s21 = smov 12   ;;  %vm1946_vm1 = vcmask 31744  }
   0xe   : > { %v283_v9 = vld [vmem:[%s4909_s2 + $0x48] sm:$0xff]  ;;  %v285_v11 = vld [vmem:[%s4909_s2 + $0x58] sm:$0xff]  ;;  %v284_v12 = vld [vmem:[%s4909_s2 + $0x50] sm:$0xff]  ;;  %s3004_s13 = smul.u32 296, %s5280_s19  ;;  %s3056_s22 = smov 16   ;;  %vm1979_vm2 = vcmask 64512  }
   0xf   : > { %v287_v13 = vld [vmem:[%s4909_s2 + $0x68] sm:$0xff]  ;;  %v286_v14 = vld [vmem:[%s4909_s2 + $0x60] sm:$0xff]  ;;  %v289_v15 = vld [vmem:[%s4909_s2 + $0x78] sm:$0xff]  ;;  %s3057_s23 = smov 20   ;;  %s3058_s24 = smov 24   ;;  %vm2012_vm3 = vcmask 97280  }
  0x10   : > { %v288_v16 = vld [vmem:[%s4909_s2 + $0x70] sm:$0xff]  ;;  %v291_v17 = vld [vmem:[%s4909_s2 + $0x88] sm:$0xff]  ;;  %v290_v18 = vld [vmem:[%s4909_s2 + $0x80] sm:$0xff]  ;;  %s3228_s16 = scalar_lea.vmem %s4907_s0, %s3004_s13  ;;  %s3059_s27 = smov 28   ;;  %vm2045_vm4 = vcmask 130048   ;;  %vm2078_vm5 = vcmask 162816  }
  0x11   : > { %323 = vperm.xlu1 %3025, %v3115_v3   ;;  %313 = vperm.xlu0 %3024, %v275_v4   ;;  %v293_v19 = vld [vmem:[%s4909_s2 + $0x98] sm:$0xff]  ;;  %v292_v20 = vld [vmem:[%s4909_s2 + $0x90] sm:$0xff]  ;;  %v295_v21 = vld [vmem:[%s4909_s2 + $0xa8] sm:$0xff]  ;;  %s3060_s11 = smov 32   ;;  %vm2111_vm6 = vcmask 195584   ;;  %vm2144_vm7 = vcmask 228352   ;;  %s4655_s15 = scalar_lea.vmem %s4910_s3, %s3004_s13 }
  0x12   : > { %v294_v22 = vld [vmem:[%s4909_s2 + $0xa0] sm:$0xff]  ;;  %v297_v23 = vld [vmem:[%s4909_s2 + $0xb8] sm:$0xff]  ;;  %v296_v24 = vld [vmem:[%s4909_s2 + $0xb0] sm:$0xff]  ;;  %vm2177_vm8 = vcmask 261120   ;;  %vm2215_vm9 = vcmask 293888   ;;  %vm2543_vm10 = vcmask 24576  }
  0x13   : > { %v299_v25 = vld [vmem:[%s4909_s2 + $0xc8] sm:$0xff]  ;;  %v298_v26 = vld [vmem:[%s4909_s2 + $0xc0] sm:$0xff]  ;;  %v301_v27 = vld [vmem:[%s4909_s2 + $0xd8] sm:$0xff] }
  0x14   : > { %v300_v28 = vld [vmem:[%s4909_s2 + $0xd0] sm:$0xff]  ;;  %v303_v29 = vld [vmem:[%s4909_s2 + $0xe8] sm:$0xff]  ;;  %v302_v30 = vld [vmem:[%s4909_s2 + $0xe0] sm:$0xff] }
  0x15   : > { %333 = vperm.xlu1 %3025, %v3124_v5   ;;  %328 = vperm.xlu0 %3024, %v278_v6   ;;  %v305_v31 = vld [vmem:[%s4909_s2 + $0xf8] sm:$0xff]  ;;  %v304_v32 = vld [vmem:[%s4909_s2 + $0xf0] sm:$0xff]  ;;  %v498_v37 = vld [vmem:[%s3228_s16 + $0x1] sm:$0xff] }
  0x16   : > { %v499_v36 = vld [vmem:[%s3228_s16 + $0x9] sm:$0xff]  ;;  %v501_v40 = vld [vmem:[%s3228_s16 + $0x19] sm:$0xff]  ;;  %v500_v41 = vld [vmem:[%s3228_s16 + $0x11] sm:$0xff] }
  0x17   : > { %v503_v44 = vld [vmem:[%s3228_s16 + $0x29] sm:$0xff]  ;;  %v502_v45 = vld [vmem:[%s3228_s16 + $0x21] sm:$0xff]  ;;  %v505_v48 = vld [vmem:[%s3228_s16 + $0x39] sm:$0xff] }
  0x18   : > { %v504_v49 = vld [vmem:[%s3228_s16 + $0x31] sm:$0xff]  ;;  %v507_v52 = vld [vmem:[%s3228_s16 + $0x49] sm:$0xff]  ;;  %v506_v53 = vld [vmem:[%s3228_s16 + $0x41] sm:$0xff] }
  0x19   : > { %343 = vperm.xlu1 %3025, %v281_v7   ;;  %338 = vperm.xlu0 %3024, %v280_v8   ;;  %v509_v56 = vld [vmem:[%s3228_s16 + $0x59] sm:$0xff]  ;;  %v508_v57 = vld [vmem:[%s3228_s16 + $0x51] sm:$0xff]  ;;  %v511_v60 = vld [vmem:[%s3228_s16 + $0x69] sm:$0xff] }
  0x1a   : > { %v510_v61 = vld [vmem:[%s3228_s16 + $0x61] sm:$0xff] }
  0x1d   : > { %353 = vperm.xlu1 %3025, %v283_v9   ;;  %348 = vperm.xlu0 %3024, %v282_v10  }
  0x21   : > { %363 = vperm.xlu1 %3025, %v285_v11   ;;  %358 = vperm.xlu0 %3024, %v284_v12  }
  0x25   : > { %373 = vperm.xlu1 %3025, %v287_v13   ;;  %368 = vperm.xlu0 %3024, %v286_v14  }
  0x29   : > { %383 = vperm.xlu1 %3025, %v289_v15   ;;  %378 = vperm.xlu0 %3024, %v288_v16  }
  0x2d   : > { %393 = vperm.xlu1 %3025, %v291_v17   ;;  %388 = vperm.xlu0 %3024, %v290_v18  }
  0x31   : > { %403 = vperm.xlu1 %3025, %v293_v19   ;;  %398 = vperm.xlu0 %3024, %v292_v20  }
  0x35   : > { %413 = vperm.xlu1 %3025, %v295_v21   ;;  %408 = vperm.xlu0 %3024, %v294_v22  }
  0x39   : > { %423 = vperm.xlu1 %3025, %v297_v23   ;;  %418 = vperm.xlu0 %3024, %v296_v24  }
  0x3d   : > { %433 = vperm.xlu1 %3025, %v299_v25   ;;  %428 = vperm.xlu0 %3024, %v298_v26  }
  0x41   : > { %443 = vperm.xlu1 %3025, %v301_v27   ;;  %438 = vperm.xlu0 %3024, %v300_v28  }
  0x45   : > { %453 = vperm.xlu1 %3025, %v303_v29   ;;  %448 = vperm.xlu0 %3024, %v302_v30  }
  0x49   : > { %463 = vperm.xlu1 %3025, %v305_v31   ;;  %458 = vperm.xlu0 %3024, %v304_v32  }
  0x4d   : > { %3027 = vset.pattern.permute.xlu1 %v3052_v33  ;;  %3026 = vset.pattern.permute.xlu0 %v3052_v33  ;;  %v528_v33 = vld [vmem:[%s3228_s16 + $0xf1] sm:$0xff] }
  0x4e   : > { %567 = vperm.xlu1 %3027, %v275_v4   ;;  %563 = vperm.xlu0 %3026, %v3108_v1   ;;  %v512_v1 = vld [vmem:[%s3228_s16 + $0x71] sm:$0xff]  ;;  %v515_v4 = vld [vmem:[%s3228_s16 + $0x89] sm:$0xff] }
  0x52   : > { %571 = vperm.xlu1 %3027, %v3103_v0   ;;  %575 = vperm.xlu0 %3026, %v3115_v3   ;;  %v513_v0 = vld [vmem:[%s3228_s16 + $0x79] sm:$0xff] }
  0x56   : > { %579 = vperm.xlu1 %3027, %v278_v6   ;;  %583 = vperm.xlu0 %3026, %v3124_v5   ;;  %v514_v5 = vld [vmem:[%s3228_s16 + $0x81] sm:$0xff] }
  0x5a   : > { %587 = vperm.xlu1 %3027, %v280_v8   ;;  %591 = vperm.xlu0 %3026, %v281_v7   ;;  %v517_v8 = vld [vmem:[%s3228_s16 + $0x99] sm:$0xff] }
  0x5e   : > { %595 = vperm.xlu1 %3027, %v282_v10   ;;  %599 = vperm.xlu0 %3026, %v283_v9   ;;  %v516_v9 = vld [vmem:[%s3228_s16 + $0x91] sm:$0xff] }
  0x62   : > { %603 = vperm.xlu1 %3027, %v284_v12   ;;  %607 = vperm.xlu0 %3026, %v285_v11   ;;  %v519_v12 = vld [vmem:[%s3228_s16 + $0xa9] sm:$0xff] }
  0x66   : > { %611 = vperm.xlu1 %3027, %v286_v14   ;;  %615 = vperm.xlu0 %3026, %v287_v13   ;;  %v518_v13 = vld [vmem:[%s3228_s16 + $0xa1] sm:$0xff] }
  0x6a   : > { %619 = vperm.xlu1 %3027, %v288_v16   ;;  %623 = vperm.xlu0 %3026, %v289_v15   ;;  %v521_v16 = vld [vmem:[%s3228_s16 + $0xb9] sm:$0xff] }
  0x6e   : > { %627 = vperm.xlu1 %3027, %v290_v18   ;;  %631 = vperm.xlu0 %3026, %v291_v17   ;;  %v520_v17 = vld [vmem:[%s3228_s16 + $0xb1] sm:$0xff] }
  0x72   : > { %635 = vperm.xlu1 %3027, %v292_v20   ;;  %639 = vperm.xlu0 %3026, %v293_v19   ;;  %v523_v20 = vld [vmem:[%s3228_s16 + $0xc9] sm:$0xff] }
  0x76   : > { %643 = vperm.xlu1 %3027, %v294_v22   ;;  %647 = vperm.xlu0 %3026, %v295_v21   ;;  %v522_v21 = vld [vmem:[%s3228_s16 + $0xc1] sm:$0xff] }
  0x7a   : > { %651 = vperm.xlu1 %3027, %v296_v24   ;;  %655 = vperm.xlu0 %3026, %v297_v23   ;;  %v525_v24 = vld [vmem:[%s3228_s16 + $0xd9] sm:$0xff] }
  0x7e   : > { %659 = vperm.xlu1 %3027, %v298_v26   ;;  %663 = vperm.xlu0 %3026, %v299_v25   ;;  %v524_v25 = vld [vmem:[%s3228_s16 + $0xd1] sm:$0xff] }
  0x82   : > { %667 = vperm.xlu1 %3027, %v300_v28   ;;  %671 = vperm.xlu0 %3026, %v301_v27   ;;  %v527_v28 = vld [vmem:[%s3228_s16 + $0xe9] sm:$0xff] }
  0x86   : > { %675 = vperm.xlu1 %3027, %v302_v30   ;;  %679 = vperm.xlu0 %3026, %v303_v29   ;;  %v526_v29 = vld [vmem:[%s3228_s16 + $0xe1] sm:$0xff] }
  0x88   : > { %v3219_v34 = vpop.permute.xlu1 %318  ;;  %v3221_v35 = vpop.permute.xlu0 %308 }
  0x89   : > { %5027 = vst [vmem:[#allocation2_spill] sm:$0xff] %v3221_v35 }
  0x8a   : > { %683 = vperm.xlu1 %3027, %v304_v32   ;;  %687 = vperm.xlu0 %3026, %v305_v31   ;;  %v529_v32 = vld [vmem:[%s3228_s16 + $0xf9] sm:$0xff] }
  0x8c   : > { %v3232_v38 = vpop.permute.xlu1 %323  ;;  %v3234_v39 = vpop.permute.xlu0 %313 }
  0x8d   : > { %5028 = vst [vmem:[#allocation3_spill] sm:$0xff] %v3234_v39 }
  0x8e   : > { %986 = vrot.lane.b32.xlu0 %v499_v36, %s3053_s17  ;;  %984 = vrot.lane.b32.xlu1 %v498_v37, %s3053_s17  ;;  %v530_v36 = vld [vmem:[%s3228_s16 + $0x2] sm:$0xff] }
  0x90   : > { %v3240_v42 = vpop.permute.xlu1 %333  ;;  %v3242_v43 = vpop.permute.xlu0 %328 }
  0x91   : > { %5029 = vst [vmem:[#allocation4_spill] sm:$0xff] %v3240_v42 }
  0x92   : > { %990 = vrot.lane.b32.xlu0 %v501_v40, %s3053_s17  ;;  %988 = vrot.lane.b32.xlu1 %v500_v41, %s3053_s17  ;;  %v531_v41 = vld [vmem:[%s3228_s16 + $0xa] sm:$0xff] }
  0x94   : > { %v3248_v46 = vpop.permute.xlu1 %343  ;;  %v3250_v47 = vpop.permute.xlu0 %338 }
  0x95   : > { %5030 = vst [vmem:[#allocation5_spill] sm:$0xff] %v3250_v47 }
  0x96   : > { %994 = vrot.lane.b32.xlu0 %v503_v44, %s3053_s17  ;;  %992 = vrot.lane.b32.xlu1 %v502_v45, %s3053_s17 }
  0x98   : > { %v3256_v50 = vpop.permute.xlu1 %353  ;;  %v3258_v51 = vpop.permute.xlu0 %348 }
  0x9a   : > { %998 = vrot.lane.b32.xlu0 %v505_v48, %s3053_s17  ;;  %996 = vrot.lane.b32.xlu1 %v504_v49, %s3053_s17 }
  0x9c   : > { %v3264_v54 = vpop.permute.xlu1 %363  ;;  %v3266_v55 = vpop.permute.xlu0 %358 }
  0x9e   : > { %1002 = vrot.lane.b32.xlu0 %v507_v52, %s3053_s17  ;;  %1000 = vrot.lane.b32.xlu1 %v506_v53, %s3053_s17  ;;  %v3368_v52 = vld [vmem:[%s3228_s16 + $0x1a] sm:$0xff]  ;;  %v3372_v53 = vld [vmem:[%s3228_s16 + $0x12] sm:$0xff] }
  0xa0   : > { %v3272_v58 = vpop.permute.xlu1 %373  ;;  %v3274_v59 = vpop.permute.xlu0 %368 }
  0xa2   : > { %1006 = vrot.lane.b32.xlu0 %v509_v56, %s3053_s17  ;;  %1004 = vrot.lane.b32.xlu1 %v508_v57, %s3053_s17 }
  0xa4   : > { %v3280_v62 = vpop.permute.xlu1 %383  ;;  %v3282_v63 = vpop.permute.xlu0 %378 }
  0xa6   : > { %1010 = vrot.lane.b32.xlu0 %v511_v60, %s3053_s17  ;;  %1008 = vrot.lane.b32.xlu1 %v510_v61, %s3053_s17 }
  0xa8   : > { %v3288_v2 = vpop.permute.xlu1 %393  ;;  %v3290_v3 = vpop.permute.xlu0 %388 }
  0xaa   : > { %1014 = vrot.lane.b32.xlu0 %v513_v0, %s3053_s17  ;;  %1012 = vrot.lane.b32.xlu1 %v512_v1, %s3053_s17  ;;  %v3384_v0 = vld [vmem:[%s3228_s16 + $0x2a] sm:$0xff]  ;;  %v3388_v1 = vld [vmem:[%s3228_s16 + $0x22] sm:$0xff] }
  0xac   : > { %v3296_v6 = vpop.permute.xlu1 %403  ;;  %v3298_v7 = vpop.permute.xlu0 %398 }
  0xad   : > { %5031 = vst [vmem:[#allocation6_spill] sm:$0xff] %v3298_v7 }
  0xae   : > { %1018 = vrot.lane.b32.xlu0 %v515_v4, %s3053_s17  ;;  %1016 = vrot.lane.b32.xlu1 %v514_v5, %s3053_s17 }
  0xb0   : > { %v3304_v10 = vpop.permute.xlu1 %413  ;;  %v3306_v11 = vpop.permute.xlu0 %408 }
  0xb2   : > { %1022 = vrot.lane.b32.xlu0 %v517_v8, %s3053_s17  ;;  %1020 = vrot.lane.b32.xlu1 %v516_v9, %s3053_s17 }
  0xb4   : > { %v3312_v14 = vpop.permute.xlu1 %423  ;;  %v3314_v15 = vpop.permute.xlu0 %418 }
  0xb5   : > { %5032 = vst [vmem:[#allocation7_spill] sm:$0xff] %v3312_v14  ;;  %5033 = vst [vmem:[#allocation8_spill] sm:$0xff] %v3314_v15 }
  0xb6   : > { %1026 = vrot.lane.b32.xlu0 %v519_v12, %s3053_s17  ;;  %1024 = vrot.lane.b32.xlu1 %v518_v13, %s3053_s17  ;;  %v3400_v12 = vld [vmem:[%s3228_s16 + $0x3a] sm:$0xff]  ;;  %v3404_v13 = vld [vmem:[%s3228_s16 + $0x32] sm:$0xff] }
  0xb8   : > { %v3320_v18 = vpop.permute.xlu1 %433  ;;  %v3322_v19 = vpop.permute.xlu0 %428 }
  0xb9   : > { %5034 = vst [vmem:[#allocation9_spill] sm:$0xff] %v3320_v18  ;;  %5035 = vst [vmem:[#allocation10_spill] sm:$0xff] %v3322_v19 }
  0xba   : > { %1030 = vrot.lane.b32.xlu0 %v521_v16, %s3053_s17  ;;  %1028 = vrot.lane.b32.xlu1 %v520_v17, %s3053_s17 }
  0xbc   : > { %v3328_v22 = vpop.permute.xlu1 %443  ;;  %v3330_v23 = vpop.permute.xlu0 %438 }
  0xbd   : > { %5036 = vst [vmem:[#allocation11_spill] sm:$0xff] %v3328_v22  ;;  %5037 = vst [vmem:[#allocation12_spill] sm:$0xff] %v3330_v23 }
  0xbe   : > { %1034 = vrot.lane.b32.xlu0 %v523_v20, %s3053_s17  ;;  %1032 = vrot.lane.b32.xlu1 %v522_v21, %s3053_s17 }
  0xc0   : > { %v3336_v26 = vpop.permute.xlu1 %453  ;;  %v3338_v27 = vpop.permute.xlu0 %448 }
  0xc1   : > { %5038 = vst [vmem:[#allocation13_spill] sm:$0xff] %v3336_v26  ;;  %5039 = vst [vmem:[#allocation14_spill] sm:$0xff] %v3338_v27 }
  0xc2   : > { %1038 = vrot.lane.b32.xlu0 %v525_v24, %s3053_s17  ;;  %1036 = vrot.lane.b32.xlu1 %v524_v25, %s3053_s17  ;;  %v3416_v24 = vld [vmem:[%s3228_s16 + $0x4a] sm:$0xff]  ;;  %v3420_v25 = vld [vmem:[%s3228_s16 + $0x42] sm:$0xff] }
  0xc3   : > { %5047 = vst [vmem:[#allocation22_spill] sm:$0xff] %v3416_v24  ;;  %5048 = vst [vmem:[#allocation23_spill] sm:$0xff] %v3420_v25 }
  0xc4   : > { %v3344_v30 = vpop.permute.xlu1 %463  ;;  %v3346_v31 = vpop.permute.xlu0 %458 }
  0xc5   : > { %5040 = vst [vmem:[#allocation15_spill] sm:$0xff] %v3344_v30  ;;  %5041 = vst [vmem:[#allocation16_spill] sm:$0xff] %v3346_v31 }
  0xc6   : > { %1042 = vrot.lane.b32.xlu0 %v527_v28, %s3053_s17  ;;  %1040 = vrot.lane.b32.xlu1 %v526_v29, %s3053_s17 }
  0xc9   : > { %v3353_v37 = vpop.permute.xlu1 %567  ;;  %v3355_v40 = vpop.permute.xlu0 %563 }
  0xca   : > { %1046 = vrot.lane.b32.xlu0 %v529_v32, %s3053_s17  ;;  %1044 = vrot.lane.b32.xlu1 %v528_v33, %s3053_s17  ;;  %v690_v44 = vmul.f32 %v3355_v40, %v530_v36  ;;  %v691_v45 = vmul.f32 %v3353_v37, %v531_v41  ;;  %v3432_v36 = vld [vmem:[%s3228_s16 + $0x5a] sm:$0xff]  ;;  %v3436_v41 = vld [vmem:[%s3228_s16 + $0x52] sm:$0xff]  ;;  %s238_s17 = scalar_lea.vmem %s4911_s4, %s5280_s19 }
  0xcb   : > { %5051 = vst [vmem:[#allocation26_spill] sm:$0xff] %v3432_v36  ;;  %5052 = vst [vmem:[#allocation27_spill] sm:$0xff] %v3436_v41 }
  0xcd   : > { %v3362_v48 = vpop.permute.xlu1 %571  ;;  %v3364_v49 = vpop.permute.xlu0 %575 }
  0xce   : > { %1114 = vrot.lane.b32.xlu0 %v691_v45, %s3054_s20  ;;  %1112 = vrot.lane.b32.xlu1 %v690_v44, %s3054_s20  ;;  %v693_v56 = vmul.f32 %v3368_v52, %v3364_v49  ;;  %v692_v57 = vmul.f32 %v3372_v53, %v3362_v48 }
  0xd1   : > { %v3378_v60 = vpop.permute.xlu1 %579  ;;  %v3380_v61 = vpop.permute.xlu0 %583 }
  0xd2   : > { %5042 = vst [vmem:[#allocation17_spill] sm:$0xff] %v3380_v61  ;;  %1118 = vrot.lane.b32.xlu0 %v693_v56, %s3054_s20  ;;  %1116 = vrot.lane.b32.xlu1 %v692_v57, %s3054_s20  ;;  %v695_v4 = vmul.f32 %v3384_v0, %v3380_v61  ;;  %v694_v5 = vmul.f32 %v3388_v1, %v3378_v60 }
  0xd5   : > { %v3394_v8 = vpop.permute.xlu1 %587  ;;  %v3396_v9 = vpop.permute.xlu0 %591 }
  0xd6   : > { %5043 = vst [vmem:[#allocation18_spill] sm:$0xff] %v3394_v8  ;;  %5044 = vst [vmem:[#allocation19_spill] sm:$0xff] %v3396_v9  ;;  %1122 = vrot.lane.b32.xlu0 %v695_v4, %s3054_s20  ;;  %1120 = vrot.lane.b32.xlu1 %v694_v5, %s3054_s20  ;;  %v697_v16 = vmul.f32 %v3400_v12, %v3396_v9  ;;  %v696_v17 = vmul.f32 %v3404_v13, %v3394_v8  ;;  %v3448_v4 = vld [vmem:[%s3228_s16 + $0x6a] sm:$0xff]  ;;  %v3452_v5 = vld [vmem:[%s3228_s16 + $0x62] sm:$0xff] }
  0xd7   : > { %5055 = vst [vmem:[#allocation30_spill] sm:$0xff] %v3448_v4  ;;  %5056 = vst [vmem:[#allocation31_spill] sm:$0xff] %v3452_v5 }
  0xd9   : > { %v3410_v20 = vpop.permute.xlu1 %595  ;;  %v3412_v21 = vpop.permute.xlu0 %599 }
  0xda   : > { %5045 = vst [vmem:[#allocation20_spill] sm:$0xff] %v3410_v20  ;;  %5046 = vst [vmem:[#allocation21_spill] sm:$0xff] %v3412_v21  ;;  %1126 = vrot.lane.b32.xlu0 %v697_v16, %s3054_s20  ;;  %1124 = vrot.lane.b32.xlu1 %v696_v17, %s3054_s20  ;;  %v699_v28 = vmul.f32 %v3416_v24, %v3412_v21  ;;  %v698_v29 = vmul.f32 %v3420_v25, %v3410_v20 }
  0xdd   : > { %v3426_v32 = vpop.permute.xlu1 %603  ;;  %v3428_v33 = vpop.permute.xlu0 %607 }
  0xde   : > { %5049 = vst [vmem:[#allocation24_spill] sm:$0xff] %v3426_v32  ;;  %5050 = vst [vmem:[#allocation25_spill] sm:$0xff] %v3428_v33  ;;  %1130 = vrot.lane.b32.xlu0 %v699_v28, %s3054_s20  ;;  %1128 = vrot.lane.b32.xlu1 %v698_v29, %s3054_s20  ;;  %v701_v44 = vmul.f32 %v3432_v36, %v3428_v33  ;;  %v700_v45 = vmul.f32 %v3436_v41, %v3426_v32 }
  0xe1   : > { %v3442_v56 = vpop.permute.xlu1 %611  ;;  %v3444_v57 = vpop.permute.xlu0 %615 }
  0xe2   : > { %5053 = vst [vmem:[#allocation28_spill] sm:$0xff] %v3442_v56  ;;  %5054 = vst [vmem:[#allocation29_spill] sm:$0xff] %v3444_v57  ;;  %1134 = vrot.lane.b32.xlu0 %v701_v44, %s3054_s20  ;;  %1132 = vrot.lane.b32.xlu1 %v700_v45, %s3054_s20  ;;  %v703_v16 = vmul.f32 %v3448_v4, %v3444_v57  ;;  %v702_v17 = vmul.f32 %v3452_v5, %v3442_v56  ;;  %v3464_v44 = vld [vmem:[%s3228_s16 + $0x7a] sm:$0xff]  ;;  %v3468_v45 = vld [vmem:[%s3228_s16 + $0x72] sm:$0xff] }
  0xe3   : > { %5059 = vst [vmem:[#allocation34_spill] sm:$0xff] %v3464_v44  ;;  %5060 = vst [vmem:[#allocation35_spill] sm:$0xff] %v3468_v45 }
  0xe5   : > { %v3458_v28 = vpop.permute.xlu1 %619  ;;  %v3460_v29 = vpop.permute.xlu0 %623 }
  0xe6   : > { %5057 = vst [vmem:[#allocation32_spill] sm:$0xff] %v3458_v28  ;;  %5058 = vst [vmem:[#allocation33_spill] sm:$0xff] %v3460_v29  ;;  %1138 = vrot.lane.b32.xlu0 %v703_v16, %s3054_s20  ;;  %1136 = vrot.lane.b32.xlu1 %v702_v17, %s3054_s20  ;;  %v705_v57 = vmul.f32 %v3464_v44, %v3460_v29  ;;  %v704_v56 = vmul.f32 %v3468_v45, %v3458_v28  ;;  %v3480_v16 = vld [vmem:[%s3228_s16 + $0x8a] sm:$0xff]  ;;  %v3484_v17 = vld [vmem:[%s3228_s16 + $0x82] sm:$0xff] }
  0xe7   : > { %5063 = vst [vmem:[#allocation38_spill] sm:$0xff] %v3480_v16  ;;  %5064 = vst [vmem:[#allocation39_spill] sm:$0xff] %v3484_v17 }
  0xe9   : > { %v3474_v33 = vpop.permute.xlu1 %627  ;;  %v3476_v32 = vpop.permute.xlu0 %631 }
  0xea   : > { %5061 = vst [vmem:[#allocation36_spill] sm:$0xff] %v3474_v33  ;;  %5062 = vst [vmem:[#allocation37_spill] sm:$0xff] %v3476_v32  ;;  %1142 = vrot.lane.b32.xlu0 %v705_v57, %s3054_s20  ;;  %1140 = vrot.lane.b32.xlu1 %v704_v56, %s3054_s20  ;;  %v707_v29 = vmul.f32 %v3480_v16, %v3476_v32  ;;  %v706_v28 = vmul.f32 %v3484_v17, %v3474_v33  ;;  %v835_v57 = vld [vmem:[%s3228_s16 + $0x9a] sm:$0xff]  ;;  %v834_v56 = vld [vmem:[%s3228_s16 + $0x92] sm:$0xff] }
  0xeb   : > { %v837_v33 = vld [vmem:[%s3228_s16 + $0xaa] sm:$0xff] }
  0xed   : > { %v3490_v44 = vpop.permute.xlu1 %635  ;;  %v3492_v45 = vpop.permute.xlu0 %639 }
  0xee   : > { %5065 = vst [vmem:[#allocation40_spill] sm:$0xff] %v3490_v44  ;;  %5066 = vst [vmem:[#allocation41_spill] sm:$0xff] %v3492_v45  ;;  %1146 = vrot.lane.b32.xlu0 %v707_v29, %s3054_s20  ;;  %1144 = vrot.lane.b32.xlu1 %v706_v28, %s3054_s20  ;;  %v709_v4 = vmul.f32 %v835_v57, %v3492_v45  ;;  %v708_v5 = vmul.f32 %v834_v56, %v3490_v44  ;;  %v836_v29 = vld [vmem:[%s3228_s16 + $0xa2] sm:$0xff]  ;;  %v839_v56 = vld [vmem:[%s3228_s16 + $0xba] sm:$0xff] }
  0xf1   : > { %v3500_v32 = vpop.permute.xlu1 %643  ;;  %v3502_v16 = vpop.permute.xlu0 %647 }
  0xf2   : > { %5067 = vst [vmem:[#allocation42_spill] sm:$0xff] %v3500_v32  ;;  %5068 = vst [vmem:[#allocation43_spill] sm:$0xff] %v3502_v16  ;;  %1150 = vrot.lane.b32.xlu0 %v709_v4, %s3054_s20  ;;  %1148 = vrot.lane.b32.xlu1 %v708_v5, %s3054_s20  ;;  %v711_v28 = vmul.f32 %v837_v33, %v3502_v16  ;;  %v710_v17 = vmul.f32 %v836_v29, %v3500_v32  ;;  %v838_v4 = vld [vmem:[%s3228_s16 + $0xb2] sm:$0xff]  ;;  %v841_v29 = vld [vmem:[%s3228_s16 + $0xca] sm:$0xff] }
  0xf5   : > { %v3510_v21 = vpop.permute.xlu1 %651  ;;  %v3512_v57 = vpop.permute.xlu0 %655 }
  0xf6   : > { %5069 = vst [vmem:[#allocation44_spill] sm:$0xff] %v3510_v21  ;;  %5070 = vst [vmem:[#allocation45_spill] sm:$0xff] %v3512_v57  ;;  %1154 = vrot.lane.b32.xlu0 %v711_v28, %s3054_s20  ;;  %1152 = vrot.lane.b32.xlu1 %v710_v17, %s3054_s20  ;;  %v713_v5 = vmul.f32 %v839_v56, %v3512_v57  ;;  %v712_v45 = vmul.f32 %v838_v4, %v3510_v21  ;;  %v840_v28 = vld [vmem:[%s3228_s16 + $0xc2] sm:$0xff]  ;;  %v843_v4 = vld [vmem:[%s3228_s16 + $0xda] sm:$0xff] }
  0xf9   : > { %v3520_v44 = vpop.permute.xlu1 %659  ;;  %v3522_v33 = vpop.permute.xlu0 %663 }
  0xfa   : > { %5071 = vst [vmem:[#allocation46_spill] sm:$0xff] %v3520_v44  ;;  %5072 = vst [vmem:[#allocation47_spill] sm:$0xff] %v3522_v33  ;;  %1158 = vrot.lane.b32.xlu0 %v713_v5, %s3054_s20  ;;  %1156 = vrot.lane.b32.xlu1 %v712_v45, %s3054_s20  ;;  %v715_v17 = vmul.f32 %v841_v29, %v3522_v33  ;;  %v714_v16 = vmul.f32 %v840_v28, %v3520_v44  ;;  %v842_v5 = vld [vmem:[%s3228_s16 + $0xd2] sm:$0xff]  ;;  %v845_v33 = vld [vmem:[%s3228_s16 + $0xea] sm:$0xff] }
  0xfd   : > { %v3530_v32 = vpop.permute.xlu1 %667  ;;  %v3532_v56 = vpop.permute.xlu0 %671 }
  0xfe   : > { %5073 = vst [vmem:[#allocation48_spill] sm:$0xff] %v3530_v32  ;;  %5074 = vst [vmem:[#allocation49_spill] sm:$0xff] %v3532_v56  ;;  %1162 = vrot.lane.b32.xlu0 %v715_v17, %s3054_s20  ;;  %1160 = vrot.lane.b32.xlu1 %v714_v16, %s3054_s20  ;;  %v717_v45 = vmul.f32 %v843_v4, %v3532_v56  ;;  %v716_v57 = vmul.f32 %v842_v5, %v3530_v32  ;;  %v844_v17 = vld [vmem:[%s3228_s16 + $0xe2] sm:$0xff]  ;;  %v847_v5 = vld [vmem:[%s3228_s16 + $0xfa] sm:$0xff] }
 0x101   : > { %v3540_v29 = vpop.permute.xlu1 %675  ;;  %v3542_v28 = vpop.permute.xlu0 %679 }
 0x102   : > { %5075 = vst [vmem:[#allocation50_spill] sm:$0xff] %v3540_v29  ;;  %5076 = vst [vmem:[#allocation51_spill] sm:$0xff] %v3542_v28  ;;  %1166 = vrot.lane.b32.xlu0 %v717_v45, %s3054_s20  ;;  %1164 = vrot.lane.b32.xlu1 %v716_v57, %s3054_s20  ;;  %v719_v16 = vmul.f32 %v845_v33, %v3542_v28  ;;  %v718_v44 = vmul.f32 %v844_v17, %v3540_v29  ;;  %v846_v45 = vld [vmem:[%s3228_s16 + $0xf2] sm:$0xff] }
 0x103   : > { %v3560_v57 = vld [vmem:[%s3228_s16 + $0x18] sm:$0xff]  ;;  %v3568_v29 = vld [vmem:[%s3228_s16 + $0x10] sm:$0xff] }
 0x104   : > { %5079 = vst [vmem:[#allocation54_spill] sm:$0xff] %v3560_v57  ;;  %5082 = vst [vmem:[#allocation57_spill] sm:$0xff] %v3568_v29 }
 0x105   : > { %v3550_v21 = vpop.permute.xlu1 %683  ;;  %v3552_v4 = vpop.permute.xlu0 %687 }
 0x106   : > { %5077 = vst [vmem:[#allocation52_spill] sm:$0xff] %v3550_v21  ;;  %5078 = vst [vmem:[#allocation53_spill] sm:$0xff] %v3552_v4  ;;  %1170 = vrot.lane.b32.xlu0 %v719_v16, %s3054_s20  ;;  %1168 = vrot.lane.b32.xlu1 %v718_v44, %s3054_s20  ;;  %v721_v56 = vmul.f32 %v847_v5, %v3552_v4  ;;  %v720_v33 = vmul.f32 %v846_v45, %v3550_v21  ;;  %v3577_v5 = vld [vmem:[%s3228_s16 + $0x28] sm:$0xff]  ;;  %v3584_v21 = vld [vmem:[%s3228_s16 + $0x20] sm:$0xff] }
 0x107   : > { %v755_v44 = vmul.f32 %v3234_v39, %v3560_v57  ;;  %v754_v16 = vmul.f32 %v3221_v35, %v3568_v29  ;;  %5083 = vst [vmem:[#allocation58_spill] sm:$0xff] %v3577_v5  ;;  %5086 = vst [vmem:[#allocation61_spill] sm:$0xff] %v3584_v21  ;;  %v3598_v57 = vld [vmem:[%s3228_s16 + $0x38] sm:$0xff] }
 0x109   : > { %v3563_v28 = vpop.permute.xlu0 %986  ;;  %v3565_v17 = vpop.permute.xlu1 %984 }
 0x10a   : > { %5080 = vst [vmem:[#allocation55_spill] sm:$0xff] %v3563_v28  ;;  %5081 = vst [vmem:[#allocation56_spill] sm:$0xff] %v3565_v17  ;;  %1174 = vrot.lane.b32.xlu0 %v721_v56, %s3054_s20  ;;  %1172 = vrot.lane.b32.xlu1 %v720_v33, %s3054_s20  ;;  %v757_v56 = vmul.f32 %v3577_v5, %v3232_v38  ;;  %v756_v33 = vmul.f32 %v3584_v21, %v3219_v34 }
 0x10d   : > { %v3579_v45 = vpop.permute.xlu0 %990  ;;  %v3581_v4 = vpop.permute.xlu1 %988 }
 0x10e   : > { %5084 = vst [vmem:[#allocation59_spill] sm:$0xff] %v3579_v45  ;;  %5085 = vst [vmem:[#allocation60_spill] sm:$0xff] %v3581_v4  ;;  %1242 = vrot.lane.b32.xlu0 %v755_v44, %s3055_s21  ;;  %1240 = vrot.lane.b32.xlu1 %v754_v16, %s3055_s21  ;;  %v3602_v44 = vld [vmem:[%s3228_s16 + $0x30] sm:$0xff]  ;;  %v759_v16 = vmul.f32 %v3598_v57, %v3240_v42 }
 0x10f   : > { %v758_v4 = vmul.f32 %v3602_v44, %v3242_v43 }
 0x111   : > { %v3592_v32 = vpop.permute.xlu0 %994  ;;  %v3594_v45 = vpop.permute.xlu1 %992 }
 0x112   : > { %5087 = vst [vmem:[#allocation62_spill] sm:$0xff] %v3592_v32  ;;  %5088 = vst [vmem:[#allocation63_spill] sm:$0xff] %v3594_v45  ;;  %1246 = vrot.lane.b32.xlu0 %v757_v56, %s3055_s21  ;;  %1244 = vrot.lane.b32.xlu1 %v756_v33, %s3055_s21  ;;  %v3614_v56 = vld [vmem:[%s3228_s16 + $0x48] sm:$0xff]  ;;  %v3618_v33 = vld [vmem:[%s3228_s16 + $0x40] sm:$0xff] }
 0x113   : > { %v761_v45 = vmul.f32 %v3614_v56, %v3248_v46  ;;  %v760_v28 = vmul.f32 %v3618_v33, %v3250_v47 }
 0x115   : > { %v3608_v29 = vpop.permute.xlu0 %998  ;;  %v3610_v32 = vpop.permute.xlu1 %996 }
 0x116   : > { %5089 = vst [vmem:[#allocation64_spill] sm:$0xff] %v3610_v32  ;;  %1250 = vrot.lane.b32.xlu0 %v759_v16, %s3055_s21  ;;  %1248 = vrot.lane.b32.xlu1 %v758_v4, %s3055_s21  ;;  %v3630_v16 = vld [vmem:[%s3228_s16 + $0x58] sm:$0xff]  ;;  %v3634_v4 = vld [vmem:[%s3228_s16 + $0x50] sm:$0xff] }
 0x117   : > { %v763_v32 = vmul.f32 %v3630_v16, %v3256_v50  ;;  %v762_v36 = vmul.f32 %v3634_v4, %v3258_v51 }
 0x119   : > { %v3624_v17 = vpop.permute.xlu0 %1002  ;;  %v3626_v20 = vpop.permute.xlu1 %1000 }
 0x11a   : > { %1254 = vrot.lane.b32.xlu0 %v761_v45, %s3055_s21  ;;  %1252 = vrot.lane.b32.xlu1 %v760_v28, %s3055_s21  ;;  %v3646_v45 = vld [vmem:[%s3228_s16 + $0x68] sm:$0xff]  ;;  %v3650_v28 = vld [vmem:[%s3228_s16 + $0x60] sm:$0xff] }
 0x11b   : > { %v765_v30 = vmul.f32 %v3646_v45, %v3264_v54  ;;  %v764_v27 = vmul.f32 %v3650_v28, %v3266_v55 }
 0x11d   : > { %v3640_v41 = vpop.permute.xlu0 %1006  ;;  %v3642_v31 = vpop.permute.xlu1 %1004 }
 0x11e   : > { %1258 = vrot.lane.b32.xlu0 %v763_v32, %s3055_s21  ;;  %1256 = vrot.lane.b32.xlu1 %v762_v36, %s3055_s21  ;;  %v3662_v32 = vld [vmem:[%s3228_s16 + $0x78] sm:$0xff]  ;;  %v3666_v36 = vld [vmem:[%s3228_s16 + $0x70] sm:$0xff] }
 0x11f   : > { %v767_v47 = vmul.f32 %v3662_v32, %v3272_v58  ;;  %v766_v23 = vmul.f32 %v3666_v36, %v3274_v59 }
 0x121   : > { %v3656_v26 = vpop.permute.xlu0 %1010  ;;  %v3658_v9 = vpop.permute.xlu1 %1008 }
 0x122   : > { %1262 = vrot.lane.b32.xlu0 %v765_v30, %s3055_s21  ;;  %1260 = vrot.lane.b32.xlu1 %v764_v27, %s3055_s21  ;;  %v3678_v30 = vld [vmem:[%s3228_s16 + $0x88] sm:$0xff]  ;;  %v3682_v27 = vld [vmem:[%s3228_s16 + $0x80] sm:$0xff] }
 0x123   : > { %v769_v24 = vmul.f32 %v3678_v30, %v3280_v62  ;;  %v768_v19 = vmul.f32 %v3682_v27, %v3282_v63 }
 0x125   : > { %v3672_v22 = vpop.permute.xlu0 %1014  ;;  %v3674_v8 = vpop.permute.xlu1 %1012 }
 0x126   : > { %1266 = vrot.lane.b32.xlu0 %v767_v47, %s3055_s21  ;;  %1264 = vrot.lane.b32.xlu1 %v766_v23, %s3055_s21  ;;  %v3694_v47 = vld [vmem:[%s3228_s16 + $0x98] sm:$0xff]  ;;  %v3698_v23 = vld [vmem:[%s3228_s16 + $0x90] sm:$0xff] }
 0x127   : > { %5092 = vst [vmem:[#allocation67_spill] sm:$0xff] %v3694_v47  ;;  %5093 = vst [vmem:[#allocation68_spill] sm:$0xff] %v3698_v23  ;;  %v771_v14 = vmul.f32 %v3694_v47, %v3288_v2  ;;  %v770_v42 = vmul.f32 %v3698_v23, %v3290_v3 }
 0x129   : > { %v3688_v18 = vpop.permute.xlu0 %1018  ;;  %v3690_v25 = vpop.permute.xlu1 %1016 }
 0x12a   : > { %5090 = vst [vmem:[#allocation65_spill] sm:$0xff] %v3688_v18  ;;  %5091 = vst [vmem:[#allocation66_spill] sm:$0xff] %v3690_v25  ;;  %1270 = vrot.lane.b32.xlu0 %v769_v24, %s3055_s21  ;;  %1268 = vrot.lane.b32.xlu1 %v768_v19, %s3055_s21  ;;  %v3710_v24 = vld [vmem:[%s3228_s16 + $0xa8] sm:$0xff]  ;;  %v3714_v19 = vld [vmem:[%s3228_s16 + $0xa0] sm:$0xff] }
 0x12b   : > { %5096 = vst [vmem:[#allocation71_spill] sm:$0xff] %v3710_v24  ;;  %5097 = vst [vmem:[#allocation72_spill] sm:$0xff] %v3714_v19  ;;  %v773_v47 = vmul.f32 %v3710_v24, %v3296_v6  ;;  %v772_v23 = vmul.f32 %v3714_v19, %v3298_v7 }
 0x12d   : > { %v3704_v61 = vpop.permute.xlu0 %1022  ;;  %v3706_v18 = vpop.permute.xlu1 %1020 }
 0x12e   : > { %5094 = vst [vmem:[#allocation69_spill] sm:$0xff] %v3704_v61  ;;  %5095 = vst [vmem:[#allocation70_spill] sm:$0xff] %v3706_v18  ;;  %1274 = vrot.lane.b32.xlu0 %v771_v14, %s3055_s21  ;;  %1272 = vrot.lane.b32.xlu1 %v770_v42, %s3055_s21  ;;  %v3726_v14 = vld [vmem:[%s3228_s16 + $0xb8] sm:$0xff]  ;;  %v3730_v42 = vld [vmem:[%s3228_s16 + $0xb0] sm:$0xff] }
 0x12f   : > { %5100 = vst [vmem:[#allocation75_spill] sm:$0xff] %v3726_v14  ;;  %v775_v18 = vmul.f32 %v3726_v14, %v3304_v10  ;;  %v774_v24 = vmul.f32 %v3730_v42, %v3306_v11 }
 0x131   : > { %v3720_v25 = vpop.permute.xlu0 %1026  ;;  %v3722_v61 = vpop.permute.xlu1 %1024 }
 0x132   : > { %5098 = vst [vmem:[#allocation73_spill] sm:$0xff] %v3720_v25  ;;  %5099 = vst [vmem:[#allocation74_spill] sm:$0xff] %v3722_v61  ;;  %1278 = vrot.lane.b32.xlu0 %v773_v47, %s3055_s21  ;;  %1276 = vrot.lane.b32.xlu1 %v772_v23, %s3055_s21  ;;  %v786_v47 = vld [vmem:[%s3228_s16 + $0x11] sm:$0xff]  ;;  %v3744_v61 = vld [vmem:[%s3228_s16 + $0xc0] sm:$0xff] }
 0x133   : > { %v776_v23 = vmul.f32 %v3744_v61, %v3314_v15 }
 0x135   : > { %v3736_v19 = vpop.permute.xlu0 %1030  ;;  %v3738_v25 = vpop.permute.xlu1 %1028 }
 0x136   : > { %5101 = vst [vmem:[#allocation76_spill] sm:$0xff] %v3736_v19  ;;  %5102 = vst [vmem:[#allocation77_spill] sm:$0xff] %v3738_v25  ;;  %1282 = vrot.lane.b32.xlu0 %v775_v18, %s3055_s21  ;;  %1280 = vrot.lane.b32.xlu1 %v774_v24, %s3055_s21  ;;  %v850_v18 = vmul.f32 %v3372_v53, %v3355_v40  ;;  %v787_v24 = vld [vmem:[%s3228_s16 + $0x19] sm:$0xff]  ;;  %v788_v53 = vld [vmem:[%s3228_s16 + $0x21] sm:$0xff] }
 0x139   : > { %v3748_v7 = vpop.permute.xlu0 %1034  ;;  %v3750_v14 = vpop.permute.xlu1 %1032 }
 0x13a   : > { %5103 = vst [vmem:[#allocation78_spill] sm:$0xff] %v3748_v7  ;;  %5104 = vst [vmem:[#allocation79_spill] sm:$0xff] %v3750_v14  ;;  %1368 = vrot.lane.b32.xlu0 %v786_v47, %s3056_s22  ;;  %1284 = vrot.lane.b32.xlu1 %v776_v23, %s3055_s21  ;;  %v884_v14 = vmul.f32 %v3584_v21, %v3221_v35  ;;  %v851_v47 = vmul.f32 %v3368_v52, %v3353_v37 }
 0x13b   : > { %v885_v52 = vmul.f32 %v3577_v5, %v3234_v39  ;;  %v2212_v5 = vld [vmem:[%s4908_s1 + $0x10] sm:$0xff] }
 0x13d   : > { %v3757_v25 = vpop.permute.xlu0 %1038  ;;  %v3759_v19 = vpop.permute.xlu1 %1036 }
 0x13e   : > { %1496 = vrot.lane.b32.xlu0 %v850_v18, %s3057_s23  ;;  %1370 = vrot.lane.b32.xlu1 %v787_v24, %s3056_s22  ;;  %v2214_v18 = vld [vmem:[%s4908_s1 + $0x20] sm:$0xf] }
 0x13f   : > { %2936 = vmatprep.subr.msk.mxu0 %vm2312_vm0, %v2214_v18  ;;  %2994 = vmatprep.subr.msk.mxu1 %vm2312_vm0, %v2214_v18 }
 0x140   : > { %2937 = vmatpush3.msk.msra.mxu0 %vm2312_vm0, %v2214_v18  ;;  %2999 = vmatpush3.msk.msra.mxu1 %vm2312_vm0, %v2214_v18  ;;  %v2211_v18 = vld [vmem:[%s4908_s1 + $0x8] sm:$0xff] }
 0x141   : > { %v3767_v23 = vpop.permute.xlu0 %1042  ;;  %v3769_v7 = vpop.permute.xlu1 %1040 }
 0x142   : > { %1624 = vrot.lane.b32.xlu0 %v884_v14, %s3058_s24  ;;  %1498 = vrot.lane.b32.xlu1 %v851_v47, %s3057_s23  ;;  %v789_v14 = vld [vmem:[%s3228_s16 + $0x29] sm:$0xff]  ;;  %v2213_v47 = vld [vmem:[%s4908_s1 + $0x18] sm:$0xff] }
 0x143   : > { %2938 = vmatprep.subr.mxu0 %v2213_v47  ;;  %2995 = vmatprep.subr.mxu1 %v2213_v47 }
 0x144   : > { %2939 = vmatpush3.msra.mxu0 %v2213_v47  ;;  %3000 = vmatpush3.msra.mxu1 %v2213_v47 }
 0x145   : > { %v3779_v24 = vpop.permute.xlu0 %1046  ;;  %v3781_v21 = vpop.permute.xlu1 %1044  ;;  %2940 = vmatprep.subr.mxu0 %v2212_v5  ;;  %2996 = vmatprep.subr.mxu1 %v2212_v5 }
 0x146   : > { %5105 = vst [vmem:[#allocation80_spill] sm:$0xff] %v3781_v21  ;;  %1722 = vrot.lane.b32.xlu0 %v788_v53, %s3059_s27  ;;  %1626 = vrot.lane.b32.xlu1 %v885_v52, %s3058_s24  ;;  %v2210_v52 = vld [vmem:[%s4908_s1] sm:$0xff] }
 0x147   : > { %2941 = vmatpush3.msra.mxu0 %v2212_v5  ;;  %3001 = vmatpush3.msra.mxu1 %v2212_v5 }
 0x148   : > { %2942 = vmatprep.subr.mxu0 %v2211_v18  ;;  %2997 = vmatprep.subr.mxu1 %v2211_v18 }
 0x149   : > { %v3792_v39 = vpop.permute.xlu0 %1114  ;;  %v3794_v35 = vpop.permute.xlu1 %1112  ;;  %2943 = vmatpush3.msra.mxu0 %v2211_v18  ;;  %3002 = vmatpush3.msra.mxu1 %v2211_v18 }
 0x14a   : > { %5106 = vst [vmem:[#allocation81_spill] sm:$0xff] %v3792_v39  ;;  %5107 = vst [vmem:[#allocation82_spill] sm:$0xff] %v3794_v35  ;;  %1724 = vrot.lane.b32.xlu0 %v789_v14, %s3059_s27  ;;  %1372 = vrot.lane.b32.xlu1 %v788_v53, %s3056_s22  ;;  %v920_v39 = vmul.f32 %v3388_v1, %v3355_v40  ;;  %v921_v53 = vmul.f32 %v3384_v0, %v3353_v37 }
 0x14b   : > { %2944 = vmatprep.subr.mxu0 %v2210_v52  ;;  %v852_v40 = vmul.f32 %v3388_v1, %v3362_v48  ;;  %2998 = vmatprep.subr.mxu1 %v2210_v52  ;;  %v886_v37 = vmul.f32 %v3602_v44, %v3219_v34  ;;  %v853_v1 = vmul.f32 %v3384_v0, %v3364_v49  ;;  %v790_v0 = vld [vmem:[%s3228_s16 + $0x31] sm:$0xff] }
 0x14c   : > { %2945 = vmatpush3.msra.mxu0 %v2210_v52  ;;  %3003 = vmatpush3.msra.mxu1 %v2210_v52  ;;  %v475_v44 = vmul.f32 %v3614_v56, %v3256_v50  ;;  %v474_v52 = vmul.f32 %v3618_v33, %v3258_v51 }
 0x14d   : > { %v3806_v47 = vpop.permute.xlu0 %1118  ;;  %v3808_v35 = vpop.permute.xlu1 %1116 }
 0x14e   : > { %5108 = vst [vmem:[#allocation83_spill] sm:$0xff] %v3806_v47  ;;  %1374 = vrot.lane.b32.xlu0 %v789_v14, %s3056_s22  ;;  %1850 = vrot.lane.b32.xlu1 %v920_v39, %s3060_s11  ;;  %v473_v39 = vmul.f32 %v3598_v57, %v3248_v46 }
 0x150   : > { %v1954_v5 = vsel %vm1946_vm1, %v473_v39, %v3608_v29  ;;  %v887_v29 = vmul.f32 %v3598_v57, %v3232_v38  ;;  %v1955_v39 = vsel %vm1946_vm1, %v474_v52, %v3626_v20  ;;  %v476_v57 = vmul.f32 %v3634_v4, %v3266_v55 }
 0x151   : > { %v3816_v21 = vpop.permute.xlu0 %1122  ;;  %v3818_v47 = vpop.permute.xlu1 %1120 }
 0x152   : > { %1852 = vrot.lane.b32.xlu0 %v921_v53, %s3060_s11  ;;  %1500 = vrot.lane.b32.xlu1 %v852_v40, %s3057_s23  ;;  %v1956_v40 = vsel %vm1946_vm1, %v475_v44, %v3624_v17  ;;  %v791_v17 = vld [vmem:[%s3228_s16 + $0x39] sm:$0xff]  ;;  %v1957_v44 = vsel %vm1946_vm1, %v476_v57, %v3642_v31  ;;  %v922_v31 = vmul.f32 %v3404_v13, %v3362_v48 }
 0x153   : > { %v480_v48 = vmul.f32 %v3666_v36, %v3282_v63 }
 0x155   : > { %v1127_v14 = vpop.permute.xlu0 %1126  ;;  %v3830_v18 = vpop.permute.xlu1 %1124 }
 0x156   : > { %v3833_v53 = vsel %vm1979_vm2, %v1954_v5, %v1127_v14  ;;  %1628 = vrot.lane.b32.xlu0 %v886_v37, %s3058_s24  ;;  %1502 = vrot.lane.b32.xlu1 %v853_v1, %s3057_s23  ;;  %v477_v1 = vmul.f32 %v3630_v16, %v3264_v54 }
 0x157   : > { %5109 = vst [vmem:[#allocation84_spill] sm:$0xff] %v3833_v53 }
 0x158   : > { %v1958_v20 = vsel %vm1946_vm1, %v477_v1, %v3640_v41 }
 0x159   : > { %v1131_v37 = vpop.permute.xlu0 %1130  ;;  %v1129_v5 = vpop.permute.xlu1 %1128 }
 0x15a   : > { %v3849_v14 = vsel %vm1979_vm2, %v1956_v40, %v1131_v37  ;;  %v3852_v53 = vsel %vm1979_vm2, %v1955_v39, %v1129_v5  ;;  %1726 = vrot.lane.b32.xlu0 %v790_v0, %s3059_s27  ;;  %1630 = vrot.lane.b32.xlu1 %v887_v29, %s3058_s24  ;;  %v479_v29 = vmul.f32 %v3646_v45, %v3272_v58 }
 0x15b   : > { %5110 = vst [vmem:[#allocation85_spill] sm:$0xff] %v3849_v14  ;;  %5111 = vst [vmem:[#allocation86_spill] sm:$0xff] %v3852_v53  ;;  %v478_v5 = vmul.f32 %v3650_v28, %v3274_v59  ;;  %v5155_v53 = vld [vmem:[#allocation19_spill] sm:$0xff] }
 0x15c   : > { %v1960_v41 = vsel %vm1946_vm1, %v479_v29, %v3656_v26  ;;  %v923_v26 = vmul.f32 %v3400_v12, %v3364_v49  ;;  %v483_v49 = vmul.f32 %v3678_v30, %v3288_v2 }
 0x15d   : > { %v1135_v52 = vpop.permute.xlu0 %1134  ;;  %v1133_v40 = vpop.permute.xlu1 %1132  ;;  %v1959_v1 = vsel %vm1946_vm1, %v478_v5, %v3658_v9  ;;  %v854_v9 = vmul.f32 %v3404_v13, %v3378_v60  ;;  %v5118_v13 = vld [vmem:[#allocation17_spill] sm:$0xff] }
 0x15e   : > { %v3866_v39 = vsel %vm1979_vm2, %v1958_v20, %v1135_v52  ;;  %v3869_v37 = vsel %vm1979_vm2, %v1957_v44, %v1133_v40  ;;  %1728 = vrot.lane.b32.xlu0 %v791_v17, %s3059_s27  ;;  %1376 = vrot.lane.b32.xlu1 %v790_v0, %s3056_s22  ;;  %v481_v0 = vmul.f32 %v3662_v32, %v3280_v62 }
 0x15f   : > { %5112 = vst [vmem:[#allocation87_spill] sm:$0xff] %v3866_v39  ;;  %5113 = vst [vmem:[#allocation88_spill] sm:$0xff] %v3869_v37  ;;  %v488_v39 = vmul.f32 %v3730_v42, %v3314_v15  ;;  %v5147_v15 = vld [vmem:[#allocation18_spill] sm:$0xff] }
 0x160   : > { %v1962_v40 = vsel %vm1946_vm1, %v481_v0, %v3672_v22  ;;  %v482_v22 = vmul.f32 %v3682_v27, %v3290_v3  ;;  %v5120_v0 = vld [vmem:[#allocation66_spill] sm:$0xff] }
 0x161   : > { %v1139_v57 = vpop.permute.xlu0 %1138  ;;  %v1137_v20 = vpop.permute.xlu1 %1136 }
 0x162   : > { %v3884_v44 = vsel %vm1979_vm2, %v1960_v41, %v1139_v57  ;;  %v3887_v52 = vsel %vm1979_vm2, %v1959_v1, %v1137_v20  ;;  %1378 = vrot.lane.b32.xlu0 %v791_v17, %s3056_s22  ;;  %1854 = vrot.lane.b32.xlu1 %v922_v31, %s3060_s11  ;;  %v1961_v17 = vsel %vm1946_vm1, %v480_v48, %v3674_v8  ;;  %v5119_v57 = vld [vmem:[#allocation65_spill] sm:$0xff] }
 0x163   : > { %5114 = vst [vmem:[#allocation89_spill] sm:$0xff] %v3884_v44  ;;  %5115 = vst [vmem:[#allocation90_spill] sm:$0xff] %v3887_v52  ;;  %v888_v8 = vmul.f32 %v3618_v33, %v3242_v43  ;;  %v855_v31 = vmul.f32 %v3400_v12, %v5118_v13  ;;  %v1964_v20 = vsel %vm1946_vm1, %v483_v49, %v5119_v57  ;;  %v5123_v33 = vld [vmem:[#allocation67_spill] sm:$0xff]  ;;  %v5126_v57 = vld [vmem:[#allocation4_spill] sm:$0xff] }
 0x164   : > { %v1963_v48 = vsel %vm1946_vm1, %v482_v22, %v5120_v0  ;;  %v485_v12 = vmul.f32 %v5123_v33, %v3296_v6  ;;  %v792_v22 = vld [vmem:[%s3228_s16 + $0x41] sm:$0xff]  ;;  %v889_v0 = vmul.f32 %v3614_v56, %v5126_v57  ;;  %v5132_v56 = vld [vmem:[#allocation72_spill] sm:$0xff] }
 0x165   : > { %v1143_v29 = vpop.permute.xlu0 %1142  ;;  %v1141_v5 = vpop.permute.xlu1 %1140  ;;  %v486_v44 = vmul.f32 %v5132_v56, %v3306_v11 }
 0x166   : > { %v3904_v41 = vsel %vm1979_vm2, %v1962_v40, %v1143_v29  ;;  %v3907_v1 = vsel %vm1979_vm2, %v1961_v17, %v1141_v5  ;;  %1856 = vrot.lane.b32.xlu0 %v923_v26, %s3060_s11  ;;  %1504 = vrot.lane.b32.xlu1 %v854_v9, %s3057_s23  ;;  %v5124_v9 = vld [vmem:[#allocation6_spill] sm:$0xff]  ;;  %v5125_v5 = vld [vmem:[#allocation68_spill] sm:$0xff] }
 0x167   : > { %5116 = vst [vmem:[#allocation91_spill] sm:$0xff] %v3904_v41  ;;  %5117 = vst [vmem:[#allocation92_spill] sm:$0xff] %v3907_v1  ;;  %v484_v49 = vmul.f32 %v5125_v5, %v5124_v9 }
 0x169   : > { %v1147_v26 = vpop.permute.xlu0 %1146  ;;  %v1145_v40 = vpop.permute.xlu1 %1144 }
 0x16a   : > { %v3924_v17 = vsel %vm1979_vm2, %v1964_v20, %v1147_v26  ;;  %v3927_v29 = vsel %vm1979_vm2, %v1963_v48, %v1145_v40  ;;  %1632 = vrot.lane.b32.xlu0 %v888_v8, %s3058_s24  ;;  %1506 = vrot.lane.b32.xlu1 %v855_v31, %s3057_s23  ;;  %v5127_v20 = vld [vmem:[#allocation69_spill] sm:$0xff]  ;;  %v5128_v48 = vld [vmem:[#allocation70_spill] sm:$0xff]  ;;  %v5131_v31 = vld [vmem:[#allocation71_spill] sm:$0xff] }
 0x16b   : > { %5121 = vst [vmem:[#allocation17_spill] sm:$0xff] %v3924_v17  ;;  %5122 = vst [vmem:[#allocation65_spill] sm:$0xff] %v3927_v29  ;;  %v1966_v26 = vsel %vm1946_vm1, %v485_v12, %v5127_v20  ;;  %v1965_v40 = vsel %vm1946_vm1, %v484_v49, %v5128_v48  ;;  %v487_v1 = vmul.f32 %v5131_v31, %v3304_v10  ;;  %v793_v12 = vld [vmem:[%s3228_s16 + $0x49] sm:$0xff]  ;;  %v5133_v49 = vld [vmem:[#allocation73_spill] sm:$0xff] }
 0x16d   : > { %v1151_v8 = vpop.permute.xlu0 %1150  ;;  %v1149_v17 = vpop.permute.xlu1 %1148  ;;  %v1968_v20 = vsel %vm1946_vm1, %v487_v1, %v5133_v49  ;;  %v5140_v49 = vld [vmem:[#allocation76_spill] sm:$0xff] }
 0x16e   : > { %v3943_v29 = vsel %vm1979_vm2, %v1966_v26, %v1151_v8  ;;  %v3946_v41 = vsel %vm1979_vm2, %v1965_v40, %v1149_v17  ;;  %1730 = vrot.lane.b32.xlu0 %v792_v22, %s3059_s27  ;;  %1634 = vrot.lane.b32.xlu1 %v889_v0, %s3058_s24  ;;  %v5134_v26 = vld [vmem:[#allocation74_spill] sm:$0xff]  ;;  %v5138_v0 = vld [vmem:[#allocation75_spill] sm:$0xff] }
 0x16f   : > { %5129 = vst [vmem:[#allocation66_spill] sm:$0xff] %v3943_v29  ;;  %5130 = vst [vmem:[#allocation67_spill] sm:$0xff] %v3946_v41  ;;  %v1967_v48 = vsel %vm1946_vm1, %v486_v44, %v5134_v26  ;;  %v5137_v41 = vld [vmem:[#allocation7_spill] sm:$0xff]  ;;  %v5141_v26 = vld [vmem:[#allocation77_spill] sm:$0xff] }
 0x170   : > { %v489_v52 = vmul.f32 %v5138_v0, %v5137_v41  ;;  %v5139_v44 = vld [vmem:[#allocation23_spill] sm:$0xff] }
 0x171   : > { %v1155_v17 = vpop.permute.xlu0 %1154  ;;  %v1153_v40 = vpop.permute.xlu1 %1152  ;;  %v924_v1 = vmul.f32 %v5139_v44, %v3378_v60  ;;  %v5144_v60 = vld [vmem:[#allocation9_spill] sm:$0xff] }
 0x172   : > { %v3960_v8 = vsel %vm1979_vm2, %v1968_v20, %v1155_v17  ;;  %v3963_v29 = vsel %vm1979_vm2, %v1967_v48, %v1153_v40  ;;  %1732 = vrot.lane.b32.xlu0 %v793_v12, %s3059_s27  ;;  %1380 = vrot.lane.b32.xlu1 %v792_v22, %s3056_s22  ;;  %v1970_v20 = vsel %vm1946_vm1, %v489_v52, %v5140_v49  ;;  %v5145_v49 = vld [vmem:[#allocation10_spill] sm:$0xff] }
 0x173   : > { %5135 = vst [vmem:[#allocation6_spill] sm:$0xff] %v3960_v8  ;;  %5136 = vst [vmem:[#allocation68_spill] sm:$0xff] %v3963_v29  ;;  %v1969_v48 = vsel %vm1946_vm1, %v488_v39, %v5141_v26  ;;  %v3978_v8 = vld [vmem:[%s3228_s16 + $0xc8] sm:$0xff]  ;;  %v490_v39 = vmul.f32 %v3744_v61, %v5145_v49  ;;  %v5146_v26 = vld [vmem:[#allocation22_spill] sm:$0xff] }
 0x174   : > { %v491_v52 = vmul.f32 %v3978_v8, %v5144_v60  ;;  %v925_v37 = vmul.f32 %v5146_v26, %v5118_v13  ;;  %v4001_v60 = vld [vmem:[%s3228_s16 + $0xd8] sm:$0xff]  ;;  %v4004_v49 = vld [vmem:[%s3228_s16 + $0xd0] sm:$0xff] }
 0x175   : > { %v1159_v17 = vpop.permute.xlu0 %1158  ;;  %v1157_v40 = vpop.permute.xlu1 %1156 }
 0x176   : > { %v3981_v29 = vsel %vm1979_vm2, %v1970_v20, %v1159_v17  ;;  %v3984_v22 = vsel %vm1979_vm2, %v1969_v48, %v1157_v40  ;;  %1382 = vrot.lane.b32.xlu0 %v793_v12, %s3056_s22  ;;  %1858 = vrot.lane.b32.xlu1 %v924_v1, %s3060_s11  ;;  %v856_v20 = vmul.f32 %v5139_v44, %v5147_v15  ;;  %v5148_v17 = vld [vmem:[#allocation78_spill] sm:$0xff]  ;;  %v5149_v40 = vld [vmem:[#allocation79_spill] sm:$0xff] }
 0x177   : > { %5142 = vst [vmem:[#allocation4_spill] sm:$0xff] %v3981_v29  ;;  %5143 = vst [vmem:[#allocation69_spill] sm:$0xff] %v3984_v22  ;;  %v1972_v48 = vsel %vm1946_vm1, %v491_v52, %v5148_v17  ;;  %v1971_v12 = vsel %vm1946_vm1, %v490_v39, %v5149_v40  ;;  %v5152_v44 = vld [vmem:[#allocation11_spill] sm:$0xff]  ;;  %v5153_v39 = vld [vmem:[#allocation12_spill] sm:$0xff] }
 0x178   : > { %v493_v52 = vmul.f32 %v4001_v60, %v5152_v44  ;;  %v492_v17 = vmul.f32 %v4004_v49, %v5153_v39  ;;  %v5154_v40 = vld [vmem:[#allocation5_spill] sm:$0xff]  ;;  %v891_v44 = vmul.f32 %v3630_v16, %v3248_v46  ;;  %v5166_v46 = vld [vmem:[#allocation15_spill] sm:$0xff] }
 0x179   : > { %v1163_v29 = vpop.permute.xlu0 %1162  ;;  %v1161_v22 = vpop.permute.xlu1 %1160  ;;  %v890_v14 = vmul.f32 %v3634_v4, %v5154_v40 }
 0x17a   : > { %v4007_v1 = vsel %vm1979_vm2, %v1972_v48, %v1163_v29  ;;  %v4010_v13 = vsel %vm1979_vm2, %v1971_v12, %v1161_v22  ;;  %1860 = vrot.lane.b32.xlu0 %v925_v37, %s3060_s11  ;;  %1508 = vrot.lane.b32.xlu1 %v856_v20, %s3057_s23  ;;  %v857_v29 = vmul.f32 %v5146_v26, %v5155_v53 }
 0x17b   : > { %5150 = vst [vmem:[#allocation70_spill] sm:$0xff] %v4007_v1  ;;  %5151 = vst [vmem:[#allocation71_spill] sm:$0xff] %v4010_v13  ;;  %v1974_v22 = vsel %vm1946_vm1, %v493_v52, %v3757_v25  ;;  %v1973_v37 = vsel %vm1946_vm1, %v492_v17, %v3759_v19  ;;  %v4027_v1 = vld [vmem:[%s3228_s16 + $0xe8] sm:$0xff]  ;;  %v4030_v13 = vld [vmem:[%s3228_s16 + $0xe0] sm:$0xff] }
 0x17c   : > { %5156 = vst [vmem:[#allocation72_spill] sm:$0xff] %v4027_v1  ;;  %5157 = vst [vmem:[#allocation73_spill] sm:$0xff] %v4030_v13  ;;  %v5160_v25 = vld [vmem:[#allocation13_spill] sm:$0xff]  ;;  %v5161_v19 = vld [vmem:[#allocation14_spill] sm:$0xff] }
 0x17d   : > { %v1167_v48 = vpop.permute.xlu0 %1166  ;;  %v1165_v12 = vpop.permute.xlu1 %1164  ;;  %v495_v26 = vmul.f32 %v4027_v1, %v5160_v25  ;;  %v494_v52 = vmul.f32 %v4030_v13, %v5161_v19  ;;  %v794_v17 = vld [vmem:[%s3228_s16 + $0x51] sm:$0xff] }
 0x17e   : > { %v4033_v20 = vsel %vm1979_vm2, %v1974_v22, %v1167_v48  ;;  %v4036_v4 = vsel %vm1979_vm2, %v1973_v37, %v1165_v12  ;;  %1636 = vrot.lane.b32.xlu0 %v890_v14, %s3058_s24  ;;  %1510 = vrot.lane.b32.xlu1 %v857_v29, %s3057_s23  ;;  %v4052_v12 = vld [vmem:[%s3228_s16 + $0xf8] sm:$0xff]  ;;  %v5168_v25 = vld [vmem:[#allocation80_spill] sm:$0xff] }
 0x17f   : > { %5158 = vst [vmem:[#allocation74_spill] sm:$0xff] %v4033_v20  ;;  %5159 = vst [vmem:[#allocation7_spill] sm:$0xff] %v4036_v4  ;;  %v1976_v22 = vsel %vm1946_vm1, %v495_v26, %v3767_v23  ;;  %v1975_v37 = vsel %vm1946_vm1, %v494_v52, %v3769_v7  ;;  %v4055_v20 = vld [vmem:[%s3228_s16 + $0xf0] sm:$0xff]  ;;  %v497_v16 = vmul.f32 %v4052_v12, %v5166_v46  ;;  %v795_v26 = vld [vmem:[%s3228_s16 + $0x59] sm:$0xff] }
 0x180   : > { %5162 = vst [vmem:[#allocation75_spill] sm:$0xff] %v4052_v12  ;;  %5163 = vst [vmem:[#allocation23_spill] sm:$0xff] %v4055_v20  ;;  %v5167_v23 = vld [vmem:[#allocation16_spill] sm:$0xff] }
 0x181   : > { %v1171_v14 = vpop.permute.xlu0 %1170  ;;  %v1169_v48 = vpop.permute.xlu1 %1168  ;;  %v496_v7 = vmul.f32 %v4055_v20, %v5167_v23  ;;  %v1978_v52 = vsel %vm1946_vm1, %v497_v16, %v3779_v24 }
 0x182   : > { %v4058_v4 = vsel %vm1979_vm2, %v1976_v22, %v1171_v14  ;;  %v4061_v29 = vsel %vm1979_vm2, %v1975_v37, %v1169_v48  ;;  %1734 = vrot.lane.b32.xlu0 %v794_v17, %s3059_s27  ;;  %1638 = vrot.lane.b32.xlu1 %v891_v44, %s3058_s24  ;;  %v5171_v44 = vld [vmem:[#allocation27_spill] sm:$0xff] }
 0x183   : > { %5164 = vst [vmem:[#allocation76_spill] sm:$0xff] %v4058_v4  ;;  %5165 = vst [vmem:[#allocation77_spill] sm:$0xff] %v4061_v29  ;;  %v1977_v22 = vsel %vm1946_vm1, %v496_v7, %v5168_v25  ;;  %v926_v29 = vmul.f32 %v5171_v44, %v5147_v15  ;;  %v5172_v25 = vld [vmem:[#allocation26_spill] sm:$0xff]  ;;  %v5173_v7 = vld [vmem:[#allocation20_spill] sm:$0xff]  ;;  %v892_v15 = vmul.f32 %v3650_v28, %v3258_v51 }
 0x184   : > { %v927_v16 = vmul.f32 %v5172_v25, %v5155_v53  ;;  %v797_v51 = vld [vmem:[%s3228_s16 + $0x69] sm:$0xff] }
 0x185   : > { %v1175_v14 = vpop.permute.xlu0 %1174  ;;  %v1173_v37 = vpop.permute.xlu1 %1172 }
 0x186   : > { %v4075_v48 = vsel %vm1979_vm2, %v1978_v52, %v1175_v14  ;;  %v4078_v4 = vsel %vm1979_vm2, %v1977_v22, %v1173_v37  ;;  %1736 = vrot.lane.b32.xlu0 %v795_v26, %s3059_s27  ;;  %1384 = vrot.lane.b32.xlu1 %v794_v17, %s3056_s22  ;;  %v858_v52 = vmul.f32 %v5171_v44, %v5173_v7  ;;  %v796_v37 = vld [vmem:[%s3228_s16 + $0x61] sm:$0xff] }
 0x187   : > { %5169 = vst [vmem:[#allocation22_spill] sm:$0xff] %v4075_v48  ;;  %5170 = vst [vmem:[#allocation18_spill] sm:$0xff] %v4078_v4  ;;  %v893_v44 = vmul.f32 %v3646_v45, %v3256_v50  ;;  %v5177_v4 = vld [vmem:[#allocation24_spill] sm:$0xff] }
 0x189   : > { %v4084_v46 = vpop.permute.xlu0 %1242  ;;  %v4086_v24 = vpop.permute.xlu1 %1240 }
 0x18a   : > { %1386 = vrot.lane.b32.xlu0 %v795_v26, %s3056_s22  ;;  %1862 = vrot.lane.b32.xlu1 %v926_v29, %s3060_s11  ;;  %v5174_v26 = vld [vmem:[#allocation21_spill] sm:$0xff] }
 0x18b   : > { %v859_v29 = vmul.f32 %v5172_v25, %v5174_v26 }
 0x18d   : > { %v4094_v22 = vpop.permute.xlu0 %1246  ;;  %v4096_v17 = vpop.permute.xlu1 %1244 }
 0x18e   : > { %1864 = vrot.lane.b32.xlu0 %v927_v16, %s3060_s11  ;;  %1512 = vrot.lane.b32.xlu1 %v858_v52, %s3057_s23 }
 0x191   : > { %v4104_v14 = vpop.permute.xlu0 %1250  ;;  %v4106_v53 = vpop.permute.xlu1 %1248 }
 0x192   : > { %1640 = vrot.lane.b32.xlu0 %v892_v15, %s3058_s24  ;;  %1514 = vrot.lane.b32.xlu1 %v859_v29, %s3057_s23  ;;  %v5175_v15 = vld [vmem:[#allocation31_spill] sm:$0xff] }
 0x193   : > { %v928_v50 = vmul.f32 %v5175_v15, %v5173_v7  ;;  %v860_v23 = vmul.f32 %v5175_v15, %v5177_v4  ;;  %v894_v7 = vmul.f32 %v3666_v36, %v3266_v55  ;;  %v798_v15 = vld [vmem:[%s3228_s16 + $0x71] sm:$0xff]  ;;  %v799_v55 = vld [vmem:[%s3228_s16 + $0x79] sm:$0xff] }
 0x195   : > { %v4113_v16 = vpop.permute.xlu0 %1254  ;;  %v4115_v52 = vpop.permute.xlu1 %1252 }
 0x196   : > { %1738 = vrot.lane.b32.xlu0 %v796_v37, %s3059_s27  ;;  %1642 = vrot.lane.b32.xlu1 %v893_v44, %s3058_s24  ;;  %v5176_v44 = vld [vmem:[#allocation30_spill] sm:$0xff] }
 0x197   : > { %v929_v48 = vmul.f32 %v5176_v44, %v5174_v26 }
 0x199   : > { %v4120_v28 = vpop.permute.xlu0 %1258  ;;  %v4122_v25 = vpop.permute.xlu1 %1256 }
 0x19a   : > { %1740 = vrot.lane.b32.xlu0 %v797_v51, %s3059_s27  ;;  %1388 = vrot.lane.b32.xlu1 %v796_v37, %s3056_s22 }
 0x19d   : > { %v4128_v45 = vpop.permute.xlu0 %1262  ;;  %v4130_v29 = vpop.permute.xlu1 %1260 }
 0x19e   : > { %1390 = vrot.lane.b32.xlu0 %v797_v51, %s3056_s22  ;;  %1866 = vrot.lane.b32.xlu1 %v928_v50, %s3060_s11  ;;  %v5180_v51 = vld [vmem:[#allocation25_spill] sm:$0xff] }
 0x19f   : > { %v861_v50 = vmul.f32 %v5176_v44, %v5180_v51 }
 0x1a1   : > { %v4138_v12 = vpop.permute.xlu0 %1266  ;;  %v4140_v37 = vpop.permute.xlu1 %1264 }
 0x1a2   : > { %5178 = vst [vmem:[#allocation78_spill] sm:$0xff] %v4138_v12  ;;  %5179 = vst [vmem:[#allocation79_spill] sm:$0xff] %v4140_v37  ;;  %1868 = vrot.lane.b32.xlu0 %v929_v48, %s3060_s11  ;;  %1516 = vrot.lane.b32.xlu1 %v860_v23, %s3057_s23  ;;  %v895_v48 = vmul.f32 %v3662_v32, %v3264_v54  ;;  %v243_v12 = vld [vmem:[%s3228_s16 + $0x8] sm:$0xff] }
 0x1a5   : > { %v4148_v20 = vpop.permute.xlu0 %1270  ;;  %v4150_v26 = vpop.permute.xlu1 %1268 }
 0x1a6   : > { %5181 = vst [vmem:[#allocation5_spill] sm:$0xff] %v4148_v20  ;;  %5182 = vst [vmem:[#allocation19_spill] sm:$0xff] %v4150_v26  ;;  %1644 = vrot.lane.b32.xlu0 %v894_v7, %s3058_s24  ;;  %1518 = vrot.lane.b32.xlu1 %v861_v50, %s3057_s23  ;;  %v5187_v7 = vld [vmem:[#allocation35_spill] sm:$0xff] }
 0x1a7   : > { %v930_v54 = vmul.f32 %v5187_v7, %v5177_v4  ;;  %v896_v4 = vmul.f32 %v3682_v27, %v3274_v59  ;;  %v801_v59 = vld [vmem:[%s3228_s16 + $0x89] sm:$0xff]  ;;  %v5194_v27 = vld [vmem:[#allocation2_spill] sm:$0xff] }
 0x1a9   : > { %v4157_v19 = vpop.permute.xlu0 %1274  ;;  %v4159_v23 = vpop.permute.xlu1 %1272 }
 0x1aa   : > { %5183 = vst [vmem:[#allocation80_spill] sm:$0xff] %v4157_v19  ;;  %5184 = vst [vmem:[#allocation27_spill] sm:$0xff] %v4159_v23  ;;  %1742 = vrot.lane.b32.xlu0 %v798_v15, %s3059_s27  ;;  %1646 = vrot.lane.b32.xlu1 %v895_v48, %s3058_s24  ;;  %v5190_v48 = vld [vmem:[#allocation34_spill] sm:$0xff] }
 0x1ad   : > { %v4164_v36 = vpop.permute.xlu0 %1278  ;;  %v4166_v44 = vpop.permute.xlu1 %1276 }
 0x1ae   : > { %5185 = vst [vmem:[#allocation26_spill] sm:$0xff] %v4164_v36  ;;  %5186 = vst [vmem:[#allocation20_spill] sm:$0xff] %v4166_v44  ;;  %1744 = vrot.lane.b32.xlu0 %v799_v55, %s3059_s27  ;;  %1392 = vrot.lane.b32.xlu1 %v798_v15, %s3056_s22  ;;  %v931_v36 = vmul.f32 %v5190_v48, %v5180_v51  ;;  %v5191_v44 = vld [vmem:[#allocation28_spill] sm:$0xff] }
 0x1af   : > { %v862_v19 = vmul.f32 %v5187_v7, %v5191_v44  ;;  %v800_v7 = vld [vmem:[%s3228_s16 + $0x81] sm:$0xff] }
 0x1b1   : > { %v4172_v32 = vpop.permute.xlu0 %1282  ;;  %v4174_v50 = vpop.permute.xlu1 %1280 }
 0x1b2   : > { %5188 = vst [vmem:[#allocation21_spill] sm:$0xff] %v4172_v32  ;;  %5189 = vst [vmem:[#allocation31_spill] sm:$0xff] %v4174_v50  ;;  %1394 = vrot.lane.b32.xlu0 %v799_v55, %s3056_s22  ;;  %1870 = vrot.lane.b32.xlu1 %v930_v54, %s3060_s11  ;;  %v5193_v55 = vld [vmem:[#allocation29_spill] sm:$0xff] }
 0x1b3   : > { %v863_v54 = vmul.f32 %v5190_v48, %v5193_v55 }
 0x1b5   : > { %v1369_v15 = vpop.permute.xlu0 %1368  ;;  %v4182_v23 = vpop.permute.xlu1 %1284 }
 0x1b6   : > { %5192 = vst [vmem:[#allocation30_spill] sm:$0xff] %v4182_v23  ;;  %1872 = vrot.lane.b32.xlu0 %v931_v36, %s3060_s11  ;;  %1520 = vrot.lane.b32.xlu1 %v862_v19, %s3057_s23  ;;  %v897_v23 = vmul.f32 %v3678_v30, %v3272_v58  ;;  %v242_v19 = vld [vmem:[%s3228_s16] sm:$0xff] }
 0x1b7   : > { %v466_v48 = vmul.f32 %v5194_v27, %v242_v19  ;;  %v5196_v58 = vld [vmem:[#allocation82_spill] sm:$0xff]  ;;  %v5198_v19 = vld [vmem:[#allocation39_spill] sm:$0xff] }
 0x1b8   : > { %v932_v27 = vmul.f32 %v5198_v19, %v5191_v44 }
 0x1b9   : > { %v1497_v51 = vpop.permute.xlu0 %1496  ;;  %v1371_v32 = vpop.permute.xlu1 %1370 }
 0x1ba   : > { %1648 = vrot.lane.b32.xlu0 %v896_v4, %s3058_s24  ;;  %1522 = vrot.lane.b32.xlu1 %v863_v54, %s3057_s23  ;;  %v5195_v4 = vld [vmem:[#allocation56_spill] sm:$0xff] }
 0x1bb   : > { %v1947_v54 = vsel %vm1946_vm1, %v466_v48, %v5195_v4 }
 0x1bc   : > { %v1980_v30 = vsel %vm1979_vm2, %v1947_v54, %v5196_v58 }
 0x1bd   : > { %v1625_v36 = vpop.permute.xlu0 %1624  ;;  %v1499_v50 = vpop.permute.xlu1 %1498  ;;  %v2013_v1 = vsel %vm2012_vm3, %v1980_v30, %v4086_v24  ;;  %v5201_v24 = vld [vmem:[#allocation81_spill] sm:$0xff] }
 0x1be   : > { %1746 = vrot.lane.b32.xlu0 %v800_v7, %s3059_s27  ;;  %1650 = vrot.lane.b32.xlu1 %v897_v23, %s3058_s24  ;;  %v5197_v23 = vld [vmem:[#allocation3_spill] sm:$0xff]  ;;  %v2046_v48 = vsel %vm2045_vm4, %v2013_v1, %v1369_v15  ;;  %v5202_v1 = vld [vmem:[#allocation32_spill] sm:$0xff] }
 0x1bf   : > { %v467_v37 = vmul.f32 %v5197_v23, %v243_v12  ;;  %v2079_v54 = vsel %vm2078_vm5, %v2046_v48, %v1497_v51  ;;  %v5200_v12 = vld [vmem:[#allocation38_spill] sm:$0xff]  ;;  %v864_v15 = vmul.f32 %v5198_v19, %v5202_v1  ;;  %v5203_v19 = vld [vmem:[#allocation33_spill] sm:$0xff] }
 0x1c0   : > { %v933_v44 = vmul.f32 %v5200_v12, %v5193_v55  ;;  %v2112_v30 = vsel %vm2111_vm6, %v2079_v54, %v1625_v36 }
 0x1c1   : > { %v1723_v20 = vpop.permute.xlu0 %1722  ;;  %v1627_v26 = vpop.permute.xlu1 %1626 }
 0x1c2   : > { %1748 = vrot.lane.b32.xlu0 %v801_v59, %s3059_s27  ;;  %1396 = vrot.lane.b32.xlu1 %v800_v7, %s3056_s22  ;;  %v5199_v7 = vld [vmem:[#allocation55_spill] sm:$0xff]  ;;  %v2145_v51 = vsel %vm2144_vm7, %v2112_v30, %v1723_v20  ;;  %v5205_v30 = vld [vmem:[#allocation60_spill] sm:$0xff] }
 0x1c3   : > { %v1948_v4 = vsel %vm1946_vm1, %v467_v37, %v5199_v7 }
 0x1c4   : > { %v1981_v58 = vsel %vm1979_vm2, %v1948_v4, %v5201_v24 }
 0x1c5   : > { %v1725_v13 = vpop.permute.xlu0 %1724  ;;  %v1373_v39 = vpop.permute.xlu1 %1372  ;;  %v2014_v37 = vsel %vm2012_vm3, %v1981_v58, %v4084_v46  ;;  %v898_v46 = vmul.f32 %v5125_v5, %v3282_v63  ;;  %v802_v63 = vld [vmem:[%s3228_s16 + $0x91] sm:$0xff]  ;;  %v899_v5 = vmul.f32 %v5123_v33, %v3280_v62  ;;  %v5206_v33 = vld [vmem:[#allocation54_spill] sm:$0xff] }
 0x1c6   : > { %1398 = vrot.lane.b32.xlu0 %v801_v59, %s3056_s22  ;;  %1874 = vrot.lane.b32.xlu1 %v932_v27, %s3060_s11  ;;  %v2047_v27 = vsel %vm2045_vm4, %v2014_v37, %v1371_v32  ;;  %v865_v32 = vmul.f32 %v5200_v12, %v5203_v19  ;;  %v5204_v12 = vld [vmem:[#allocation57_spill] sm:$0xff]  ;;  %v469_v37 = vmul.f32 %v3232_v38, %v5206_v33  ;;  %v805_v33 = vld [vmem:[%s3228_s16 + $0xa9] sm:$0xff] }
 0x1c7   : > { %v2080_v36 = vsel %vm2078_vm5, %v2047_v27, %v1499_v50  ;;  %v3029_v38 = vld [vmem:[%s3228_s16 + $0x9a] sm:$0xff] }
 0x1c8   : > { %v2113_v20 = vsel %vm2111_vm6, %v2080_v36, %v1627_v26 }
 0x1c9   : > { %v1375_v59 = vpop.permute.xlu0 %1374  ;;  %v1851_v23 = vpop.permute.xlu1 %1850  ;;  %v2146_v48 = vsel %vm2144_vm7, %v2113_v20, %v1725_v13  ;;  %v803_v13 = vld [vmem:[%s3228_s16 + $0x99] sm:$0xff] }
 0x1ca   : > { %1876 = vrot.lane.b32.xlu0 %v933_v44, %s3060_s11  ;;  %v2178_v55 = vsel %vm2177_vm8, %v2145_v51, %v1851_v23  ;;  %1524 = vrot.lane.b32.xlu1 %v864_v15, %s3057_s23  ;;  %v468_v44 = vmul.f32 %v3219_v34, %v5204_v12  ;;  %v3028_v51 = vld [vmem:[%s3228_s16 + $0x92] sm:$0xff] }
 0x1cb   : > { %2946 = vmatprep.mubr.msk.f32.mxu0 %vm2215_vm9, %v2178_v55  ;;  %v934_v23 = vmul.f32 %v3028_v51, %v5202_v1  ;;  %v5208_v1 = vld [vmem:[#allocation83_spill] sm:$0xff] }
 0x1cc   : > { %v1949_v15 = vsel %vm1946_vm1, %v468_v44, %v5205_v30  ;;  %v5210_v44 = vld [vmem:[#allocation37_spill] sm:$0xff] }
 0x1cd   : > { %v1853_v7 = vpop.permute.xlu0 %1852  ;;  %v1501_v4 = vpop.permute.xlu1 %1500  ;;  %v1982_v62 = vsel %vm1979_vm2, %v1949_v15, %v3808_v35 }
 0x1ce   : > { %v2179_v54 = vsel %vm2177_vm8, %v2146_v48, %v1853_v7  ;;  %1652 = vrot.lane.b32.xlu0 %v898_v46, %s3058_s24  ;;  %1526 = vrot.lane.b32.xlu1 %v865_v32, %s3057_s23  ;;  %v2015_v34 = vsel %vm2012_vm3, %v1982_v62, %v4096_v17  ;;  %v5207_v46 = vld [vmem:[#allocation59_spill] sm:$0xff]  ;;  %v935_v32 = vmul.f32 %v3029_v38, %v5203_v19  ;;  %v5209_v7 = vld [vmem:[#allocation36_spill] sm:$0xff] }
 0x1cf   : > { %2947 = vmatmul.mubr.msk.f32.vlgmr.msra.gmra.mxu0 %vm2215_vm9, %v2179_v54  ;;  %v2048_v36 = vsel %vm2045_vm4, %v2015_v34, %v1373_v39  ;;  %v1950_v20 = vsel %vm1946_vm1, %v469_v37, %v5207_v46  ;;  %v866_v54 = vmul.f32 %v3028_v51, %v5209_v7  ;;  %v5211_v37 = vld [vmem:[#allocation61_spill] sm:$0xff] }
 0x1d0   : > { %v2081_v35 = vsel %vm2078_vm5, %v2048_v36, %v1501_v4  ;;  %v1983_v48 = vsel %vm1979_vm2, %v1950_v20, %v5208_v1  ;;  %v470_v51 = vmul.f32 %v5211_v37, %v3242_v43  ;;  %v3030_v20 = vld [vmem:[%s3228_s16 + $0xa2] sm:$0xff] }
 0x1d1   : > { %v1629_v26 = vpop.permute.xlu0 %1628  ;;  %v1503_v50 = vpop.permute.xlu1 %1502  ;;  %v2016_v39 = vsel %vm2012_vm3, %v1983_v48, %v4094_v22  ;;  %v900_v22 = vmul.f32 %v5132_v56, %v3290_v3  ;;  %v901_v3 = vmul.f32 %v5131_v31, %v3288_v2  ;;  %v5213_v31 = vld [vmem:[#allocation58_spill] sm:$0xff] }
 0x1d2   : > { %1750 = vrot.lane.b32.xlu0 %v802_v63, %s3059_s27  ;;  %1654 = vrot.lane.b32.xlu1 %v899_v5, %s3058_s24  ;;  %v2114_v17 = vsel %vm2111_vm6, %v2081_v35, %v1629_v26  ;;  %v2049_v4 = vsel %vm2045_vm4, %v2016_v39, %v1375_v59  ;;  %v471_v46 = vmul.f32 %v5213_v31, %v5126_v57  ;;  %v5214_v48 = vld [vmem:[#allocation62_spill] sm:$0xff]  ;;  %v3031_v57 = vld [vmem:[%s3228_s16 + $0xaa] sm:$0xff] }
 0x1d3   : > { %v2082_v19 = vsel %vm2078_vm5, %v2049_v4, %v1503_v50  ;;  %v804_v50 = vld [vmem:[%s3228_s16 + $0xa1] sm:$0xff]  ;;  %v936_v35 = vmul.f32 %v3030_v20, %v5209_v7  ;;  %v5215_v39 = vld [vmem:[#allocation40_spill] sm:$0xff] }
 0x1d5   : > { %v1727_v24 = vpop.permute.xlu0 %1726  ;;  %v1631_v58 = vpop.permute.xlu1 %1630 }
 0x1d6   : > { %1752 = vrot.lane.b32.xlu0 %v803_v13, %s3059_s27  ;;  %1400 = vrot.lane.b32.xlu1 %v802_v63, %s3056_s22  ;;  %v2147_v63 = vsel %vm2144_vm7, %v2114_v17, %v1727_v24  ;;  %v2115_v26 = vsel %vm2111_vm6, %v2082_v19, %v1631_v58  ;;  %v867_v24 = vmul.f32 %v3029_v38, %v5210_v44 }
 0x1d7   : > { %v1952_v17 = vsel %vm1946_vm1, %v471_v46, %v5214_v48  ;;  %v3034_v46 = vld [vmem:[%s3228_s16 + $0xba] sm:$0xff] }
 0x1d8   : > { %v1985_v7 = vsel %vm1979_vm2, %v1952_v17, %v3816_v21 }
 0x1d9   : > { %v1729_v27 = vpop.permute.xlu0 %1728  ;;  %v1377_v55 = vpop.permute.xlu1 %1376 }
 0x1da   : > { %1402 = vrot.lane.b32.xlu0 %v803_v13, %s3056_s22  ;;  %1878 = vrot.lane.b32.xlu1 %v934_v23, %s3060_s11  ;;  %v2148_v59 = vsel %vm2144_vm7, %v2115_v26, %v1729_v27  ;;  %v5212_v27 = vld [vmem:[#allocation63_spill] sm:$0xff] }
 0x1db   : > { %v1951_v36 = vsel %vm1946_vm1, %v470_v51, %v5212_v27  ;;  %v5217_v51 = vld [vmem:[#allocation64_spill] sm:$0xff] }
 0x1dc   : > { %v1984_v2 = vsel %vm1979_vm2, %v1951_v36, %v3818_v47 }
 0x1dd   : > { %v1379_v5 = vpop.permute.xlu0 %1378  ;;  %v1855_v13 = vpop.permute.xlu1 %1854  ;;  %v2017_v43 = vsel %vm2012_vm3, %v1984_v2, %v4106_v53 }
 0x1de   : > { %v2180_v12 = vsel %vm2177_vm8, %v2147_v63, %v1855_v13  ;;  %1880 = vrot.lane.b32.xlu0 %v935_v32, %s3060_s11  ;;  %1528 = vrot.lane.b32.xlu1 %v866_v54, %s3057_s23  ;;  %v2050_v1 = vsel %vm2045_vm4, %v2017_v43, %v1377_v55  ;;  %v937_v54 = vmul.f32 %v3031_v57, %v5210_v44  ;;  %v5216_v44 = vld [vmem:[#allocation41_spill] sm:$0xff] }
 0x1df   : > { %2949 = vmatprep.mubr.msk.f32.mxu0 %vm2215_vm9, %v2180_v12  ;;  %v868_v63 = vmul.f32 %v3030_v20, %v5215_v39  ;;  %v2018_v55 = vsel %vm2012_vm3, %v1985_v7, %v4104_v14  ;;  %v902_v14 = vmul.f32 %v3730_v42, %v5124_v9  ;;  %v806_v42 = vld [vmem:[%s3228_s16 + $0xb1] sm:$0xff]  ;;  %v903_v9 = vmul.f32 %v5138_v0, %v3296_v6  ;;  %v5220_v7 = vld [vmem:[#allocation43_spill] sm:$0xff] }
 0x1e0   : > { %v2051_v19 = vsel %vm2045_vm4, %v2018_v55, %v1379_v5  ;;  %v869_v5 = vmul.f32 %v3031_v57, %v5216_v44  ;;  %v3033_v0 = vld [vmem:[%s3228_s16 + $0xb2] sm:$0xff]  ;;  %v939_v20 = vmul.f32 %v3034_v46, %v5216_v44  ;;  %v809_v44 = vld [vmem:[%s3228_s16 + $0xc9] sm:$0xff] }
 0x1e1   : > { %v1857_v30 = vpop.permute.xlu0 %1856  ;;  %v1505_v15 = vpop.permute.xlu1 %1504 }
 0x1e2   : > { %v2181_v62 = vsel %vm2177_vm8, %v2148_v59, %v1857_v30  ;;  %1656 = vrot.lane.b32.xlu0 %v900_v22, %s3058_s24  ;;  %1530 = vrot.lane.b32.xlu1 %v867_v24, %s3057_s23  ;;  %v2083_v47 = vsel %vm2078_vm5, %v2050_v1, %v1505_v15 }
 0x1e3   : > { %2950 = vmatmul.mubr.msk.f32.gmra.mxu0 %vm2215_vm9, %v2181_v62 }
 0x1e5   : > { %v1633_v56 = vpop.permute.xlu0 %1632  ;;  %v1507_v58 = vpop.permute.xlu1 %1506 }
 0x1e6   : > { %1754 = vrot.lane.b32.xlu0 %v804_v50, %s3059_s27  ;;  %1658 = vrot.lane.b32.xlu1 %v901_v3, %s3058_s24  ;;  %v2116_v53 = vsel %vm2111_vm6, %v2083_v47, %v1633_v56  ;;  %v2084_v21 = vsel %vm2078_vm5, %v2051_v19, %v1507_v58  ;;  %v807_v3 = vld [vmem:[%s3228_s16 + $0xb9] sm:$0xff]  ;;  %v3032_v56 = vld [vmem:[%s3228_s16 + $0x30] sm:$0xff]  ;;  %v777_v19 = vmul.f32 %v3978_v8, %v5137_v41 }
 0x1e7   : > { %v472_v58 = vmul.f32 %v3032_v56, %v5154_v40 }
 0x1e9   : > { %v1731_v23 = vpop.permute.xlu0 %1730  ;;  %v1635_v34 = vpop.permute.xlu1 %1634 }
 0x1ea   : > { %1756 = vrot.lane.b32.xlu0 %v805_v33, %s3059_s27  ;;  %1404 = vrot.lane.b32.xlu1 %v804_v50, %s3056_s22  ;;  %v2149_v13 = vsel %vm2144_vm7, %v2116_v53, %v1731_v23  ;;  %v2117_v26 = vsel %vm2111_vm6, %v2084_v21, %v1635_v34  ;;  %v1953_v23 = vsel %vm1946_vm1, %v472_v58, %v5217_v51  ;;  %v3036_v51 = vld [vmem:[%s3228_s16 + $0xca] sm:$0xff] }
 0x1eb   : > { %v1986_v6 = vsel %vm1979_vm2, %v1953_v23, %v3830_v18  ;;  %v938_v34 = vmul.f32 %v3033_v0, %v5215_v39  ;;  %v871_v53 = vmul.f32 %v3034_v46, %v5220_v7  ;;  %v5224_v23 = vld [vmem:[#allocation45_spill] sm:$0xff]  ;;  %v5226_v46 = vld [vmem:[#allocation8_spill] sm:$0xff] }
 0x1ec   : > { %v2019_v27 = vsel %vm2012_vm3, %v1986_v6, %v4115_v52  ;;  %v873_v6 = vmul.f32 %v3036_v51, %v5224_v23 }
 0x1ed   : > { %v1733_v38 = vpop.permute.xlu0 %1732  ;;  %v1381_v32 = vpop.permute.xlu1 %1380 }
 0x1ee   : > { %1406 = vrot.lane.b32.xlu0 %v805_v33, %s3056_s22  ;;  %1882 = vrot.lane.b32.xlu1 %v936_v35, %s3060_s11  ;;  %v2150_v24 = vsel %vm2144_vm7, %v2117_v26, %v1733_v38  ;;  %v2052_v2 = vsel %vm2045_vm4, %v2019_v27, %v1381_v32  ;;  %v5218_v35 = vld [vmem:[#allocation42_spill] sm:$0xff]  ;;  %v5219_v38 = vld [vmem:[#allocation84_spill] sm:$0xff] }
 0x1ef   : > { %v870_v43 = vmul.f32 %v3033_v0, %v5218_v35  ;;  %v2020_v52 = vsel %vm2012_vm3, %v5219_v38, %v4113_v16  ;;  %v904_v16 = vmul.f32 %v3744_v61, %v3306_v11  ;;  %v905_v11 = vmul.f32 %v3978_v8, %v3304_v10  ;;  %v5221_v10 = vld [vmem:[#allocation86_spill] sm:$0xff] }
 0x1f0   : > { %v941_v0 = vmul.f32 %v3036_v51, %v5220_v7  ;;  %v907_v38 = vmul.f32 %v4001_v60, %v5137_v41 }
 0x1f1   : > { %v1383_v4 = vpop.permute.xlu0 %1382  ;;  %v1859_v12 = vpop.permute.xlu1 %1858 }
 0x1f2   : > { %v2182_v22 = vsel %vm2177_vm8, %v2149_v13, %v1859_v12  ;;  %1884 = vrot.lane.b32.xlu0 %v937_v54, %s3060_s11  ;;  %1532 = vrot.lane.b32.xlu1 %v868_v63, %s3057_s23  ;;  %v2053_v17 = vsel %vm2045_vm4, %v2020_v52, %v1383_v4  ;;  %v808_v4 = vld [vmem:[%s3228_s16 + $0xc1] sm:$0xff] }
 0x1f3   : > { %2952 = vmatprep.mubr.msk.f32.mxu0 %vm2215_vm9, %v2182_v22 }
 0x1f5   : > { %v1861_v59 = vpop.permute.xlu0 %1860  ;;  %v1509_v30 = vpop.permute.xlu1 %1508 }
 0x1f6   : > { %v2183_v15 = vsel %vm2177_vm8, %v2150_v24, %v1861_v59  ;;  %1660 = vrot.lane.b32.xlu0 %v902_v14, %s3058_s24  ;;  %1534 = vrot.lane.b32.xlu1 %v869_v5, %s3057_s23  ;;  %v2085_v31 = vsel %vm2078_vm5, %v2052_v2, %v1509_v30  ;;  %v3035_v14 = vld [vmem:[%s3228_s16 + $0xc2] sm:$0xff]  ;;  %v2021_v5 = vsel %vm2012_vm3, %v5221_v10, %v4122_v25 }
 0x1f7   : > { %2953 = vmatmul.mubr.msk.f32.gmra.mxu0 %vm2215_vm9, %v2183_v15  ;;  %v940_v26 = vmul.f32 %v3035_v14, %v5218_v35  ;;  %v5222_v15 = vld [vmem:[#allocation44_spill] sm:$0xff]  ;;  %v5225_v2 = vld [vmem:[#allocation10_spill] sm:$0xff]  ;;  %v5231_v10 = vld [vmem:[#allocation47_spill] sm:$0xff] }
 0x1f9   : > { %v1637_v62 = vpop.permute.xlu0 %1636  ;;  %v1511_v50 = vpop.permute.xlu1 %1510 }
 0x1fa   : > { %1758 = vrot.lane.b32.xlu0 %v806_v42, %s3059_s27  ;;  %1662 = vrot.lane.b32.xlu1 %v903_v9, %s3058_s24  ;;  %v2118_v18 = vsel %vm2111_vm6, %v2085_v31, %v1637_v62  ;;  %v2086_v57 = vsel %vm2078_vm5, %v2053_v17, %v1511_v50  ;;  %v5223_v62 = vld [vmem:[#allocation85_spill] sm:$0xff]  ;;  %v778_v31 = vmul.f32 %v4004_v49, %v5225_v2 }
 0x1fb   : > { %v2022_v50 = vsel %vm2012_vm3, %v5223_v62, %v4120_v28 }
 0x1fd   : > { %v1735_v33 = vpop.permute.xlu0 %1734  ;;  %v1639_v37 = vpop.permute.xlu1 %1638 }
 0x1fe   : > { %1760 = vrot.lane.b32.xlu0 %v807_v3, %s3059_s27  ;;  %1408 = vrot.lane.b32.xlu1 %v806_v42, %s3056_s22  ;;  %v2151_v1 = vsel %vm2144_vm7, %v2118_v18, %v1735_v33  ;;  %v2119_v54 = vsel %vm2111_vm6, %v2086_v57, %v1639_v37  ;;  %v872_v42 = vmul.f32 %v3035_v14, %v5222_v15 }
 0x201   : > { %v1737_v40 = vpop.permute.xlu0 %1736  ;;  %v1385_v36 = vpop.permute.xlu1 %1384 }
 0x202   : > { %1410 = vrot.lane.b32.xlu0 %v807_v3, %s3056_s22  ;;  %1886 = vrot.lane.b32.xlu1 %v938_v34, %s3060_s11  ;;  %v2152_v39 = vsel %vm2144_vm7, %v2119_v54, %v1737_v40  ;;  %v2054_v30 = vsel %vm2045_vm4, %v2021_v5, %v1385_v36  ;;  %v3037_v54 = vld [vmem:[%s3228_s16 + $0xd2] sm:$0xff] }
 0x203   : > { %v942_v7 = vmul.f32 %v3037_v54, %v5222_v15  ;;  %v5233_v15 = vld [vmem:[#allocation73_spill] sm:$0xff] }
 0x205   : > { %v1387_v32 = vpop.permute.xlu0 %1386  ;;  %v1863_v48 = vpop.permute.xlu1 %1862 }
 0x206   : > { %v2184_v47 = vsel %vm2177_vm8, %v2151_v1, %v1863_v48  ;;  %1888 = vrot.lane.b32.xlu0 %v939_v20, %s3060_s11  ;;  %1536 = vrot.lane.b32.xlu1 %v870_v43, %s3057_s23  ;;  %v2055_v58 = vsel %vm2045_vm4, %v2022_v50, %v1387_v32  ;;  %v906_v20 = vmul.f32 %v4004_v49, %v5226_v46  ;;  %v810_v43 = vld [vmem:[%s3228_s16 + $0xd1] sm:$0xff] }
 0x207   : > { %2955 = vmatprep.mubr.msk.f32.mxu0 %vm2215_vm9, %v2184_v47  ;;  %v5227_v32 = vld [vmem:[#allocation9_spill] sm:$0xff]  ;;  %v5228_v48 = vld [vmem:[#allocation88_spill] sm:$0xff] }
 0x208   : > { %v779_v49 = vmul.f32 %v4001_v60, %v5227_v32  ;;  %v2023_v17 = vsel %vm2012_vm3, %v5228_v48, %v4130_v29  ;;  %v811_v60 = vld [vmem:[%s3228_s16 + $0xd9] sm:$0xff] }
 0x209   : > { %v1865_v63 = vpop.permute.xlu0 %1864  ;;  %v1513_v55 = vpop.permute.xlu1 %1512 }
 0x20a   : > { %v2185_v13 = vsel %vm2177_vm8, %v2152_v39, %v1865_v63  ;;  %1664 = vrot.lane.b32.xlu0 %v904_v16, %s3058_s24  ;;  %1538 = vrot.lane.b32.xlu1 %v871_v53, %s3057_s23  ;;  %v2087_v8 = vsel %vm2078_vm5, %v2054_v30, %v1513_v55  ;;  %v5229_v39 = vld [vmem:[#allocation87_spill] sm:$0xff] }
 0x20b   : > { %2956 = vmatmul.mubr.msk.f32.gmra.mxu0 %vm2215_vm9, %v2185_v13  ;;  %v2024_v29 = vsel %vm2012_vm3, %v5229_v39, %v4128_v45 }
 0x20d   : > { %v1641_v61 = vpop.permute.xlu0 %1640  ;;  %v1515_v12 = vpop.permute.xlu1 %1514 }
 0x20e   : > { %1762 = vrot.lane.b32.xlu0 %v808_v4, %s3059_s27  ;;  %1666 = vrot.lane.b32.xlu1 %v905_v11, %s3058_s24  ;;  %v2120_v9 = vsel %vm2111_vm6, %v2087_v8, %v1641_v61  ;;  %v2088_v37 = vsel %vm2078_vm5, %v2055_v58, %v1515_v12  ;;  %v5230_v12 = vld [vmem:[#allocation46_spill] sm:$0xff]  ;;  %v5232_v8 = vld [vmem:[#allocation12_spill] sm:$0xff]  ;;  %v5235_v58 = vld [vmem:[#allocation79_spill] sm:$0xff] }
 0x211   : > { %v1739_v22 = vpop.permute.xlu0 %1738  ;;  %v1643_v21 = vpop.permute.xlu1 %1642 }
 0x212   : > { %1412 = vrot.lane.b32.xlu0 %v808_v4, %s3056_s22  ;;  %1286 = vrot.lane.b32.xlu1 %v777_v19, %s3055_s21  ;;  %v2153_v25 = vsel %vm2144_vm7, %v2120_v9, %v1739_v22  ;;  %v2121_v28 = vsel %vm2111_vm6, %v2088_v37, %v1643_v21  ;;  %v874_v19 = vmul.f32 %v3037_v54, %v5230_v12 }
 0x213   : > { %v908_v9 = vmul.f32 %v5233_v15, %v5225_v2 }
 0x215   : > { %v1741_v24 = vpop.permute.xlu0 %1740  ;;  %v1389_v59 = vpop.permute.xlu1 %1388 }
 0x216   : > { %1890 = vrot.lane.b32.xlu0 %v940_v26, %s3060_s11  ;;  %1764 = vrot.lane.b32.xlu1 %v809_v44, %s3059_s27  ;;  %v2154_v34 = vsel %vm2144_vm7, %v2121_v28, %v1741_v24  ;;  %v2056_v16 = vsel %vm2045_vm4, %v2023_v17, %v1389_v59 }
 0x219   : > { %v1391_v3 = vpop.permute.xlu0 %1390  ;;  %v1867_v56 = vpop.permute.xlu1 %1866 }
 0x21a   : > { %v2186_v33 = vsel %vm2177_vm8, %v2153_v25, %v1867_v56  ;;  %1540 = vrot.lane.b32.xlu0 %v872_v42, %s3057_s23  ;;  %1414 = vrot.lane.b32.xlu1 %v809_v44, %s3056_s22  ;;  %v2057_v4 = vsel %vm2045_vm4, %v2024_v29, %v1391_v3  ;;  %v3038_v44 = vld [vmem:[%s3228_s16 + $0xda] sm:$0xff]  ;;  %v780_v42 = vmul.f32 %v5233_v15, %v5232_v8  ;;  %v5234_v3 = vld [vmem:[#allocation72_spill] sm:$0xff] }
 0x21b   : > { %2958 = vmatprep.mubr.msk.f32.mxu0 %vm2215_vm9, %v2186_v33  ;;  %v875_v5 = vmul.f32 %v3038_v44, %v5231_v10  ;;  %v943_v24 = vmul.f32 %v3038_v44, %v5224_v23  ;;  %v812_v25 = vld [vmem:[%s3228_s16 + $0xe1] sm:$0xff]  ;;  %v909_v56 = vmul.f32 %v5234_v3, %v5227_v32  ;;  %v813_v32 = vld [vmem:[%s3228_s16 + $0xe9] sm:$0xff] }
 0x21c   : > { %v5236_v33 = vld [vmem:[#allocation90_spill] sm:$0xff] }
 0x21d   : > { %v1869_v27 = vpop.permute.xlu0 %1868  ;;  %v1517_v40 = vpop.permute.xlu1 %1516  ;;  %v2025_v37 = vsel %vm2012_vm3, %v5236_v33, %v5235_v58 }
 0x21e   : > { %v2187_v36 = vsel %vm2177_vm8, %v2154_v34, %v1869_v27  ;;  %1542 = vrot.lane.b32.xlu0 %v873_v6, %s3057_s23  ;;  %1892 = vrot.lane.b32.xlu1 %v941_v0, %s3060_s11  ;;  %v2089_v41 = vsel %vm2078_vm5, %v2056_v16, %v1517_v40  ;;  %v5237_v34 = vld [vmem:[#allocation11_spill] sm:$0xff]  ;;  %v5238_v40 = vld [vmem:[#allocation78_spill] sm:$0xff] }
 0x21f   : > { %2959 = vmatmul.mubr.msk.f32.gmra.mxu0 %vm2215_vm9, %v2187_v36  ;;  %v781_v27 = vmul.f32 %v5234_v3, %v5237_v34  ;;  %v5239_v36 = vld [vmem:[#allocation89_spill] sm:$0xff] }
 0x220   : > { %v2026_v2 = vsel %vm2012_vm3, %v5239_v36, %v5238_v40  ;;  %v5249_v3 = vld [vmem:[#allocation13_spill] sm:$0xff] }
 0x221   : > { %v1645_v18 = vpop.permute.xlu0 %1644  ;;  %v1519_v35 = vpop.permute.xlu1 %1518 }
 0x222   : > { %1288 = vrot.lane.b32.xlu0 %v778_v31, %s3055_s21  ;;  %1668 = vrot.lane.b32.xlu1 %v906_v20, %s3058_s24  ;;  %v2122_v53 = vsel %vm2111_vm6, %v2089_v41, %v1645_v18  ;;  %v2090_v61 = vsel %vm2078_vm5, %v2057_v4, %v1519_v35 }
 0x225   : > { %v1743_v52 = vpop.permute.xlu0 %1742  ;;  %v1647_v1 = vpop.permute.xlu1 %1646 }
 0x226   : > { %1766 = vrot.lane.b32.xlu0 %v810_v43, %s3059_s27  ;;  %1670 = vrot.lane.b32.xlu1 %v907_v38, %s3058_s24  ;;  %v2155_v63 = vsel %vm2144_vm7, %v2122_v53, %v1743_v52  ;;  %v2123_v45 = vsel %vm2111_vm6, %v2090_v61, %v1647_v1  ;;  %v3039_v38 = vld [vmem:[%s3228_s16 + $0xe2] sm:$0xff]  ;;  %v5241_v53 = vld [vmem:[#allocation49_spill] sm:$0xff] }
 0x227   : > { %v944_v52 = vmul.f32 %v3039_v38, %v5230_v12  ;;  %v5244_v61 = vld [vmem:[#allocation19_spill] sm:$0xff]  ;;  %v5245_v12 = vld [vmem:[#allocation92_spill] sm:$0xff] }
 0x229   : > { %v1745_v47 = vpop.permute.xlu0 %1744  ;;  %v1393_v57 = vpop.permute.xlu1 %1392 }
 0x22a   : > { %1416 = vrot.lane.b32.xlu0 %v810_v43, %s3056_s22  ;;  %1290 = vrot.lane.b32.xlu1 %v779_v49, %s3055_s21  ;;  %v2156_v22 = vsel %vm2144_vm7, %v2123_v45, %v1745_v47  ;;  %v2058_v6 = vsel %vm2045_vm4, %v2025_v37, %v1393_v57  ;;  %v5240_v57 = vld [vmem:[#allocation48_spill] sm:$0xff] }
 0x22b   : > { %v876_v16 = vmul.f32 %v3039_v38, %v5240_v57 }
 0x22d   : > { %v1395_v55 = vpop.permute.xlu0 %1394  ;;  %v1871_v13 = vpop.permute.xlu1 %1870 }
 0x22e   : > { %v2188_v11 = vsel %vm2177_vm8, %v2155_v63, %v1871_v13  ;;  %1894 = vrot.lane.b32.xlu0 %v942_v7, %s3060_s11  ;;  %1768 = vrot.lane.b32.xlu1 %v811_v60, %s3059_s27  ;;  %v2059_v18 = vsel %vm2045_vm4, %v2026_v2, %v1395_v55  ;;  %v3040_v7 = vld [vmem:[%s3228_s16 + $0xea] sm:$0xff]  ;;  %v5242_v55 = vld [vmem:[#allocation14_spill] sm:$0xff] }
 0x22f   : > { %2961 = vmatprep.mubr.msk.f32.mxu0 %vm2215_vm9, %v2188_v11  ;;  %v945_v39 = vmul.f32 %v3040_v7, %v5231_v10  ;;  %v5243_v13 = vld [vmem:[#allocation23_spill] sm:$0xff] }
 0x230   : > { %v782_v4 = vmul.f32 %v5243_v13, %v5242_v55  ;;  %v910_v11 = vmul.f32 %v5243_v13, %v5232_v8  ;;  %v5246_v10 = vld [vmem:[#allocation75_spill] sm:$0xff] }
 0x231   : > { %v1873_v21 = vpop.permute.xlu0 %1872  ;;  %v1521_v14 = vpop.permute.xlu1 %1520 }
 0x232   : > { %v2189_v26 = vsel %vm2177_vm8, %v2156_v22, %v1873_v21  ;;  %1544 = vrot.lane.b32.xlu0 %v874_v19, %s3057_s23  ;;  %1418 = vrot.lane.b32.xlu1 %v811_v60, %s3056_s22  ;;  %v2091_v28 = vsel %vm2078_vm5, %v2058_v6, %v1521_v14  ;;  %v877_v60 = vmul.f32 %v3040_v7, %v5241_v53 }
 0x233   : > { %2962 = vmatmul.mubr.msk.f32.gmra.mxu0 %vm2215_vm9, %v2189_v26  ;;  %v2027_v19 = vsel %vm2012_vm3, %v5245_v12, %v5244_v61  ;;  %v814_v26 = vld [vmem:[%s3228_s16 + $0xf1] sm:$0xff] }
 0x235   : > { %v1649_v59 = vpop.permute.xlu0 %1648  ;;  %v1523_v30 = vpop.permute.xlu1 %1522 }
 0x236   : > { %1546 = vrot.lane.b32.xlu0 %v875_v5, %s3057_s23  ;;  %1896 = vrot.lane.b32.xlu1 %v943_v24, %s3060_s11  ;;  %v2124_v0 = vsel %vm2111_vm6, %v2091_v28, %v1649_v59  ;;  %v2092_v43 = vsel %vm2078_vm5, %v2059_v18, %v1523_v30  ;;  %v911_v5 = vmul.f32 %v5246_v10, %v5237_v34  ;;  %v5247_v24 = vld [vmem:[#allocation5_spill] sm:$0xff]  ;;  %v5248_v59 = vld [vmem:[#allocation91_spill] sm:$0xff] }
 0x237   : > { %v2028_v30 = vsel %vm2012_vm3, %v5248_v59, %v5247_v24  ;;  %v815_v28 = vld [vmem:[%s3228_s16 + $0xf9] sm:$0xff]  ;;  %v817_v24 = vld [vmem:[%s3228_s16 + $0x109] sm:$0xff] }
 0x239   : > { %v1747_v62 = vpop.permute.xlu0 %1746  ;;  %v1651_v50 = vpop.permute.xlu1 %1650 }
 0x23a   : > { %1292 = vrot.lane.b32.xlu0 %v780_v42, %s3055_s21  ;;  %1672 = vrot.lane.b32.xlu1 %v908_v9, %s3058_s24  ;;  %v2157_v31 = vsel %vm2144_vm7, %v2124_v0, %v1747_v62  ;;  %v2125_v1 = vsel %vm2111_vm6, %v2092_v43, %v1651_v50  ;;  %v5253_v43 = vld [vmem:[#allocation65_spill] sm:$0xff] }
 0x23d   : > { %v1749_v51 = vpop.permute.xlu0 %1748  ;;  %v1397_v23 = vpop.permute.xlu1 %1396 }
 0x23e   : > { %1770 = vrot.lane.b32.xlu0 %v812_v25, %s3059_s27  ;;  %1674 = vrot.lane.b32.xlu1 %v909_v56, %s3058_s24  ;;  %v2158_v49 = vsel %vm2144_vm7, %v2125_v1, %v1749_v51  ;;  %v2060_v21 = vsel %vm2045_vm4, %v2027_v19, %v1397_v23  ;;  %v783_v56 = vmul.f32 %v5246_v10, %v5249_v3  ;;  %v3041_v23 = vld [vmem:[%s3228_s16 + $0xf2] sm:$0xff] }
 0x23f   : > { %v946_v6 = vmul.f32 %v3041_v23, %v5240_v57 }
 0x241   : > { %v1399_v46 = vpop.permute.xlu0 %1398  ;;  %v1875_v20 = vpop.permute.xlu1 %1874 }
 0x242   : > { %v2190_v35 = vsel %vm2177_vm8, %v2157_v31, %v1875_v20  ;;  %1420 = vrot.lane.b32.xlu0 %v812_v25, %s3056_s22  ;;  %1294 = vrot.lane.b32.xlu1 %v781_v27, %s3055_s21  ;;  %v2061_v9 = vsel %vm2045_vm4, %v2028_v30, %v1399_v46  ;;  %v5250_v27 = vld [vmem:[#allocation50_spill] sm:$0xff]  ;;  %v5251_v46 = vld [vmem:[#allocation51_spill] sm:$0xff] }
 0x243   : > { %2964 = vmatprep.mubr.msk.f32.mxu0 %vm2215_vm9, %v2190_v35  ;;  %v878_v40 = vmul.f32 %v3041_v23, %v5250_v27  ;;  %v3042_v31 = vld [vmem:[%s3228_s16 + $0xfa] sm:$0xff]  ;;  %v5252_v35 = vld [vmem:[#allocation27_spill] sm:$0xff] }
 0x244   : > { %v879_v20 = vmul.f32 %v3042_v31, %v5251_v46  ;;  %v947_v18 = vmul.f32 %v3042_v31, %v5241_v53  ;;  %v2029_v38 = vsel %vm2012_vm3, %v5253_v43, %v5252_v35  ;;  %v883_v23 = vld [vmem:[%s3228_s16 + $0x118] sm:$0xff] }
 0x245   : > { %v1877_v48 = vpop.permute.xlu0 %1876  ;;  %v1525_v17 = vpop.permute.xlu1 %1524 }
 0x246   : > { %v2191_v47 = vsel %vm2177_vm8, %v2158_v49, %v1877_v48  ;;  %1898 = vrot.lane.b32.xlu0 %v944_v52, %s3060_s11  ;;  %1772 = vrot.lane.b32.xlu1 %v813_v32, %s3059_s27  ;;  %v2093_v14 = vsel %vm2078_vm5, %v2060_v21, %v1525_v17  ;;  %v5254_v17 = vld [vmem:[#allocation16_spill] sm:$0xff]  ;;  %v5257_v21 = vld [vmem:[#allocation15_spill] sm:$0xff] }
 0x247   : > { %2965 = vmatmul.mubr.msk.f32.gmra.mxu0 %vm2215_vm9, %v2191_v47 }
 0x249   : > { %v1653_v41 = vpop.permute.xlu0 %1652  ;;  %v1527_v54 = vpop.permute.xlu1 %1526 }
 0x24a   : > { %1548 = vrot.lane.b32.xlu0 %v876_v16, %s3057_s23  ;;  %1422 = vrot.lane.b32.xlu1 %v813_v32, %s3056_s22  ;;  %v2126_v44 = vsel %vm2111_vm6, %v2093_v14, %v1653_v41  ;;  %v2094_v50 = vsel %vm2078_vm5, %v2061_v9, %v1527_v54  ;;  %v752_v32 = vld [vmem:[%s3228_s16 + $0x100] sm:$0xff]  ;;  %v5255_v41 = vld [vmem:[#allocation80_spill] sm:$0xff]  ;;  %v5256_v54 = vld [vmem:[#allocation17_spill] sm:$0xff] }
 0x24b   : > { %v784_v47 = vmul.f32 %v752_v32, %v5254_v17  ;;  %v912_v16 = vmul.f32 %v752_v32, %v5242_v55  ;;  %v2030_v7 = vsel %vm2012_vm3, %v5256_v54, %v5255_v41  ;;  %v816_v55 = vld [vmem:[%s3228_s16 + $0x101] sm:$0xff]  ;;  %v918_v41 = vld [vmem:[%s3228_s16 + $0x112] sm:$0xff] }
 0x24c   : > { %v5260_v9 = vld [vmem:[#allocation67_spill] sm:$0xff] }
 0x24d   : > { %v1751_v29 = vpop.permute.xlu0 %1750  ;;  %v1655_v63 = vpop.permute.xlu1 %1654 }
 0x24e   : > { %1550 = vrot.lane.b32.xlu0 %v877_v60, %s3057_s23  ;;  %1900 = vrot.lane.b32.xlu1 %v945_v39, %s3060_s11  ;;  %v2159_v8 = vsel %vm2144_vm7, %v2126_v44, %v1751_v29  ;;  %v2127_v25 = vsel %vm2111_vm6, %v2094_v50, %v1655_v63  ;;  %v753_v29 = vld [vmem:[%s3228_s16 + $0x108] sm:$0xff] }
 0x24f   : > { %v913_v61 = vmul.f32 %v753_v29, %v5249_v3  ;;  %v785_v14 = vmul.f32 %v753_v29, %v5257_v21  ;;  %v849_v3 = vld [vmem:[%s3228_s16 + $0x10a] sm:$0xff] }
 0x251   : > { %v1753_v45 = vpop.permute.xlu0 %1752  ;;  %v1401_v22 = vpop.permute.xlu1 %1400 }
 0x252   : > { %1296 = vrot.lane.b32.xlu0 %v782_v4, %s3055_s21  ;;  %1676 = vrot.lane.b32.xlu1 %v910_v11, %s3058_s24  ;;  %v2160_v58 = vsel %vm2144_vm7, %v2127_v25, %v1753_v45  ;;  %v2062_v49 = vsel %vm2045_vm4, %v2029_v38, %v1401_v22 }
 0x255   : > { %v1403_v15 = vpop.permute.xlu0 %1402  ;;  %v1879_v42 = vpop.permute.xlu1 %1878 }
 0x256   : > { %v2192_v62 = vsel %vm2177_vm8, %v2159_v8, %v1879_v42  ;;  %1774 = vrot.lane.b32.xlu0 %v814_v26, %s3059_s27  ;;  %1678 = vrot.lane.b32.xlu1 %v911_v5, %s3058_s24  ;;  %v2063_v63 = vsel %vm2045_vm4, %v2030_v7, %v1403_v15  ;;  %v5258_v8 = vld [vmem:[#allocation52_spill] sm:$0xff] }
 0x257   : > { %2967 = vmatprep.mubr.msk.f32.mxu0 %vm2215_vm9, %v2192_v62  ;;  %v5259_v42 = vld [vmem:[#allocation20_spill] sm:$0xff]  ;;  %v950_v54 = vmul.f32 %v918_v41, %v5258_v8 }
 0x258   : > { %v2031_v62 = vsel %vm2012_vm3, %v5260_v9, %v5259_v42 }
 0x259   : > { %v1881_v33 = vpop.permute.xlu0 %1880  ;;  %v1529_v37 = vpop.permute.xlu1 %1528 }
 0x25a   : > { %v2193_v51 = vsel %vm2177_vm8, %v2160_v58, %v1881_v33  ;;  %1424 = vrot.lane.b32.xlu0 %v814_v26, %s3056_s22  ;;  %1298 = vrot.lane.b32.xlu1 %v783_v56, %s3055_s21  ;;  %v2095_v48 = vsel %vm2078_vm5, %v2062_v49, %v1529_v37  ;;  %v848_v26 = vld [vmem:[%s3228_s16 + $0x102] sm:$0xff]  ;;  %v5261_v33 = vld [vmem:[#allocation53_spill] sm:$0xff] }
 0x25b   : > { %2968 = vmatmul.mubr.msk.f32.gmra.mxu0 %vm2215_vm9, %v2193_v51  ;;  %v948_v5 = vmul.f32 %v848_v26, %v5250_v27  ;;  %v880_v15 = vmul.f32 %v848_v26, %v5258_v8  ;;  %v881_v37 = vmul.f32 %v849_v3, %v5261_v33  ;;  %v917_v49 = vld [vmem:[%s3228_s16 + $0x119] sm:$0xff] }
 0x25d   : > { %v1657_v0 = vpop.permute.xlu0 %1656  ;;  %v1531_v34 = vpop.permute.xlu1 %1530 }
 0x25e   : > { %1902 = vrot.lane.b32.xlu0 %v946_v6, %s3060_s11  ;;  %1776 = vrot.lane.b32.xlu1 %v815_v28, %s3059_s27  ;;  %v2128_v57 = vsel %vm2111_vm6, %v2095_v48, %v1657_v0  ;;  %v2096_v4 = vsel %vm2078_vm5, %v2063_v63, %v1531_v34  ;;  %v949_v6 = vmul.f32 %v849_v3, %v5251_v46  ;;  %v5263_v0 = vld [vmem:[#allocation66_spill] sm:$0xff]  ;;  %v916_v48 = vld [vmem:[%s3228_s16 + $0x111] sm:$0xff] }
 0x261   : > { %v1755_v36 = vpop.permute.xlu0 %1754  ;;  %v1659_v2 = vpop.permute.xlu1 %1658 }
 0x262   : > { %1552 = vrot.lane.b32.xlu0 %v878_v40, %s3057_s23  ;;  %1426 = vrot.lane.b32.xlu1 %v815_v28, %s3056_s22  ;;  %v2161_v53 = vsel %vm2144_vm7, %v2128_v57, %v1755_v36  ;;  %v2129_v11 = vsel %vm2111_vm6, %v2096_v4, %v1659_v2  ;;  %v5262_v28 = vld [vmem:[#allocation26_spill] sm:$0xff]  ;;  %v882_v2 = vld [vmem:[%s3228_s16 + $0x110] sm:$0xff] }
 0x263   : > { %v2032_v34 = vsel %vm2012_vm3, %v5263_v0, %v5262_v28  ;;  %v914_v43 = vmul.f32 %v882_v2, %v5254_v17 }
 0x265   : > { %v1757_v52 = vpop.permute.xlu0 %1756  ;;  %v1405_v1 = vpop.permute.xlu1 %1404 }
 0x266   : > { %1554 = vrot.lane.b32.xlu0 %v879_v20, %s3057_s23  ;;  %1904 = vrot.lane.b32.xlu1 %v947_v18, %s3060_s11  ;;  %v2162_v12 = vsel %vm2144_vm7, %v2129_v11, %v1757_v52  ;;  %v2064_v56 = vsel %vm2045_vm4, %v2031_v62, %v1405_v1  ;;  %v915_v18 = vmul.f32 %v883_v23, %v5257_v21 }
 0x269   : > { %v1407_v60 = vpop.permute.xlu0 %1406  ;;  %v1883_v39 = vpop.permute.xlu1 %1882 }
 0x26a   : > { %1300 = vrot.lane.b32.xlu0 %v784_v47, %s3055_s21  ;;  %v2194_v13 = vsel %vm2177_vm8, %v2161_v53, %v1883_v39  ;;  %1680 = vrot.lane.b32.xlu1 %v912_v16, %s3058_s24  ;;  %v2065_v31 = vsel %vm2045_vm4, %v2032_v34, %v1407_v60  ;;  %v919_v47 = vld [vmem:[%s3228_s16 + $0x11a] sm:$0xff]  ;;  %v5264_v60 = vld [vmem:[#allocation31_spill] sm:$0xff]  ;;  %v5265_v39 = vld [vmem:[#allocation68_spill] sm:$0xff] }
 0x26b   : > { %2970 = vmatprep.mubr.msk.f32.mxu1 %vm2215_vm9, %v2194_v13  ;;  %v951_v17 = vmul.f32 %v919_v47, %v5261_v33  ;;  %v2033_v29 = vsel %vm2012_vm3, %v5265_v39, %v5264_v60  ;;  %v5268_v34 = vld [vmem:[#allocation30_spill] sm:$0xff] }
 0x26d   : > { %v1885_v19 = vpop.permute.xlu0 %1884  ;;  %v1533_v45 = vpop.permute.xlu1 %1532 }
 0x26e   : > { %v2195_v22 = vsel %vm2177_vm8, %v2162_v12, %v1885_v19  ;;  %1778 = vrot.lane.b32.xlu0 %v816_v55, %s3059_s27  ;;  %1682 = vrot.lane.b32.xlu1 %v913_v61, %s3058_s24  ;;  %v2097_v58 = vsel %vm2078_vm5, %v2064_v56, %v1533_v45 }
 0x26f   : > { %2971 = vmatmul.mubr.msk.f32.vlgmr.msra.gmra.mxu1 %vm2215_vm9, %v2195_v22 }
 0x271   : > { %v1661_v44 = vpop.permute.xlu0 %1660  ;;  %v1535_v10 = vpop.permute.xlu1 %1534 }
 0x272   : > { %1428 = vrot.lane.b32.xlu0 %v816_v55, %s3056_s22  ;;  %1302 = vrot.lane.b32.xlu1 %v785_v14, %s3055_s21  ;;  %v2130_v51 = vsel %vm2111_vm6, %v2097_v58, %v1661_v44  ;;  %v2098_v46 = vsel %vm2078_vm5, %v2065_v31, %v1535_v10 }
 0x275   : > { %v1759_v59 = vpop.permute.xlu0 %1758  ;;  %v1663_v30 = vpop.permute.xlu1 %1662 }
 0x276   : > { %1906 = vrot.lane.b32.xlu0 %v948_v5, %s3060_s11  ;;  %1780 = vrot.lane.b32.xlu1 %v817_v24, %s3059_s27  ;;  %v2163_v27 = vsel %vm2144_vm7, %v2130_v51, %v1759_v59  ;;  %v2131_v35 = vsel %vm2111_vm6, %v2098_v46, %v1663_v30  ;;  %v5267_v59 = vld [vmem:[#allocation6_spill] sm:$0xff] }
 0x279   : > { %v1761_v50 = vpop.permute.xlu0 %1760  ;;  %v1409_v25 = vpop.permute.xlu1 %1408 }
 0x27a   : > { %1556 = vrot.lane.b32.xlu0 %v880_v15, %s3057_s23  ;;  %1430 = vrot.lane.b32.xlu1 %v817_v24, %s3056_s22  ;;  %v2164_v38 = vsel %vm2144_vm7, %v2131_v35, %v1761_v50  ;;  %v2066_v4 = vsel %vm2045_vm4, %v2033_v29, %v1409_v25  ;;  %v5266_v24 = vld [vmem:[#allocation21_spill] sm:$0xff]  ;;  %s241_s22 = scalar_lea.vmem %s4912_s5, %s5280_s19 }
 0x27b   : > { %v2034_v30 = vsel %vm2012_vm3, %v5267_v59, %v5266_v24  ;;  %v5271_v24 = vld [vmem:[#allocation71_spill] sm:$0xff] }
 0x27d   : > { %v1411_v40 = vpop.permute.xlu0 %1410  ;;  %v1887_v36 = vpop.permute.xlu1 %1886 }
 0x27e   : > { %v2196_v20 = vsel %vm2177_vm8, %v2163_v27, %v1887_v36  ;;  %1558 = vrot.lane.b32.xlu0 %v881_v37, %s3057_s23  ;;  %1908 = vrot.lane.b32.xlu1 %v949_v6, %s3060_s11  ;;  %v2067_v62 = vsel %vm2045_vm4, %v2034_v30, %v1411_v40  ;;  %v5269_v27 = vld [vmem:[#allocation69_spill] sm:$0xff] }
 0x27f   : > { %2973 = vmatprep.mubr.msk.f32.mxu1 %vm2215_vm9, %v2196_v20  ;;  %v2035_v40 = vsel %vm2012_vm3, %v5269_v27, %v5268_v34 }
 0x281   : > { %v1889_v52 = vpop.permute.xlu0 %1888  ;;  %v1537_v1 = vpop.permute.xlu1 %1536 }
 0x282   : > { %v2197_v32 = vsel %vm2177_vm8, %v2164_v38, %v1889_v52  ;;  %1686 = vrot.lane.b32.xlu0 %v915_v18, %s3058_s24  ;;  %1684 = vrot.lane.b32.xlu1 %v914_v43, %s3058_s24  ;;  %v2099_v55 = vsel %vm2078_vm5, %v2066_v4, %v1537_v1 }
 0x283   : > { %2974 = vmatmul.mubr.msk.f32.gmra.mxu1 %vm2215_vm9, %v2197_v32 }
 0x285   : > { %v1665_v57 = vpop.permute.xlu0 %1664  ;;  %v1539_v16 = vpop.permute.xlu1 %1538 }
 0x286   : > { %1784 = vrot.lane.b32.xlu0 %v917_v49, %s3059_s27  ;;  %1782 = vrot.lane.b32.xlu1 %v916_v48, %s3059_s27  ;;  %v2132_v61 = vsel %vm2111_vm6, %v2099_v55, %v1665_v57  ;;  %v2100_v25 = vsel %vm2078_vm5, %v2067_v62, %v1539_v16 }
 0x289   : > { %v1763_v7 = vpop.permute.xlu0 %1762  ;;  %v1667_v53 = vpop.permute.xlu1 %1666 }
 0x28a   : > { %1912 = vrot.lane.b32.xlu0 %v951_v17, %s3060_s11  ;;  %1910 = vrot.lane.b32.xlu1 %v950_v54, %s3060_s11  ;;  %v2165_v12 = vsel %vm2144_vm7, %v2132_v61, %v1763_v7  ;;  %v2133_v3 = vsel %vm2111_vm6, %v2100_v25, %v1667_v53  ;;  %v5270_v7 = vld [vmem:[#allocation4_spill] sm:$0xff] }
 0x28d   : > { %v1413_v63 = vpop.permute.xlu0 %1412  ;;  %v4648_v13 = vpop.permute.xlu1 %1286 }
 0x28e   : > { %v2068_v31 = vsel %vm2045_vm4, %v2035_v40, %v1413_v63  ;;  %v2036_v53 = vsel %vm2012_vm3, %v5270_v7, %v4648_v13 }
 0x28f   : > { %v2948_v11 = vpop.f32.mrf.mxu0 }
 0x290   : > { %2546 = vst.msk [vmem:[%s4655_s15 + $0x19] sm:$0xff] %vm1946_vm1, %v2948_v11  ;;  %v2651_v19 = vmul.f32 %v2948_v11, %v2948_v11  ;;  %v2581_v26 = vsel %vm1946_vm1, %v2948_v11, 0.0 }
 0x291   : > { %v1891_v45 = vpop.permute.xlu0 %1890  ;;  %v1765_v22 = vpop.permute.xlu1 %1764 }
 0x292   : > { %v2198_v21 = vsel %vm2177_vm8, %v2165_v12, %v1891_v45  ;;  %v2382_v14 = vpop.f32.mrf.mxu0  ;;  %v2683_v8 = vsel %vm1946_vm1, %v2651_v19, 0.0  ;;  %v2166_v56 = vsel %vm2144_vm7, %v2133_v3, %v1765_v22 }
 0x293   : > { %2545 = vst.msk [vmem:[%s4655_s15 + $0x11] sm:$0xff] %vm1946_vm1, %v2382_v14  ;;  %v2580_v44 = vsel %vm1946_vm1, %v2382_v14, 0.0  ;;  %v2650_v10 = vmul.f32 %v2382_v14, %v2382_v14  ;;  %2976 = vmatprep.mubr.msk.f32.mxu1 %vm2215_vm9, %v2198_v21 }
 0x294   : > { %v2582_v5 = vadd.f32 %v2581_v26, %v2580_v44 }
 0x295   : > { %v2682_v15 = vsel %vm1946_vm1, %v2650_v10, 0.0  ;;  %v1541_v42 = vpop.permute.xlu0 %1540  ;;  %v1415_v9 = vpop.permute.xlu1 %1414 }
 0x296   : > { %v2684_v50 = vadd.f32 %v2683_v8, %v2682_v15  ;;  %v2101_v46 = vsel %vm2078_vm5, %v2068_v31, %v1541_v42  ;;  %v2069_v29 = vsel %vm2045_vm4, %v2036_v53, %v1415_v9  ;;  %v5273_v53 = vld [vmem:[#allocation7_spill] sm:$0xff] }
 0x299   : > { %v1543_v58 = vpop.permute.xlu0 %1542  ;;  %v1893_v33 = vpop.permute.xlu1 %1892 }
 0x29a   : > { %v2199_v37 = vsel %vm2177_vm8, %v2166_v56, %v1893_v33  ;;  %v2102_v63 = vsel %vm2078_vm5, %v2069_v29, %v1543_v58 }
 0x29b   : > { %2977 = vmatmul.mubr.msk.f32.gmra.mxu1 %vm2215_vm9, %v2199_v37 }
 0x29d   : > { %v1289_v51 = vpop.permute.xlu0 %1288  ;;  %v1669_v23 = vpop.permute.xlu1 %1668 }
 0x29e   : > { %v2134_v38 = vsel %vm2111_vm6, %v2101_v46, %v1669_v23  ;;  %v2037_v59 = vsel %vm2012_vm3, %v5271_v24, %v1289_v51 }
 0x2a1   : > { %v1767_v6 = vpop.permute.xlu0 %1766  ;;  %v1671_v28 = vpop.permute.xlu1 %1670 }
 0x2a2   : > { %v2167_v1 = vsel %vm2144_vm7, %v2134_v38, %v1767_v6  ;;  %v2135_v4 = vsel %vm2111_vm6, %v2102_v63, %v1671_v28  ;;  %v5272_v6 = vld [vmem:[#allocation70_spill] sm:$0xff] }
 0x2a3   : > { %v2951_v0 = vpop.f32.mrf.mxu0 }
 0x2a4   : > { %2548 = vst.msk [vmem:[%s4655_s15 + $0x29] sm:$0xff] %vm1946_vm1, %v2951_v0  ;;  %v2653_v18 = vmul.f32 %v2951_v0, %v2951_v0  ;;  %v2585_v32 = vsel %vm1946_vm1, %v2951_v0, 0.0 }
 0x2a5   : > { %v1417_v36 = vpop.permute.xlu0 %1416  ;;  %v1291_v2 = vpop.permute.xlu1 %1290 }
 0x2a6   : > { %v2392_v20 = vpop.f32.mrf.mxu0  ;;  %v2687_v17 = vsel %vm1946_vm1, %v2653_v18, 0.0  ;;  %v2070_v9 = vsel %vm2045_vm4, %v2037_v59, %v1417_v36  ;;  %v2038_v28 = vsel %vm2012_vm3, %v5272_v6, %v1291_v2 }
 0x2a7   : > { %2547 = vst.msk [vmem:[%s4655_s15 + $0x21] sm:$0xff] %vm1946_vm1, %v2392_v20  ;;  %v2583_v35 = vsel %vm1946_vm1, %v2392_v20, 0.0  ;;  %v2652_v43 = vmul.f32 %v2392_v20, %v2392_v20 }
 0x2a8   : > { %v2584_v52 = vadd.f32 %v2583_v35, %v2582_v5 }
 0x2a9   : > { %v2685_v49 = vsel %vm1946_vm1, %v2652_v43, 0.0  ;;  %v1895_v48 = vpop.permute.xlu0 %1894  ;;  %v1769_v47 = vpop.permute.xlu1 %1768 }
 0x2aa   : > { %v2686_v57 = vadd.f32 %v2685_v49, %v2684_v50  ;;  %v2200_v16 = vsel %vm2177_vm8, %v2167_v1, %v1895_v48  ;;  %v2586_v41 = vadd.f32 %v2585_v32, %v2584_v52  ;;  %v2168_v55 = vsel %vm2144_vm7, %v2135_v4, %v1769_v47 }
 0x2ab   : > { %2979 = vmatprep.mubr.msk.f32.mxu1 %vm2215_vm9, %v2200_v16 }
 0x2ac   : > { %v2688_v54 = vadd.f32 %v2687_v17, %v2686_v57 }
 0x2ad   : > { %v1545_v60 = vpop.permute.xlu0 %1544  ;;  %v1419_v39 = vpop.permute.xlu1 %1418 }
 0x2ae   : > { %v2103_v25 = vsel %vm2078_vm5, %v2070_v9, %v1545_v60  ;;  %v2071_v27 = vsel %vm2045_vm4, %v2038_v28, %v1419_v39  ;;  %v5275_v28 = vld [vmem:[#allocation77_spill] sm:$0xff] }
 0x2b1   : > { %v1547_v11 = vpop.permute.xlu0 %1546  ;;  %v1897_v61 = vpop.permute.xlu1 %1896 }
 0x2b2   : > { %v2201_v12 = vsel %vm2177_vm8, %v2168_v55, %v1897_v61  ;;  %v2104_v40 = vsel %vm2078_vm5, %v2071_v27, %v1547_v11 }
 0x2b3   : > { %2980 = vmatmul.mubr.msk.f32.gmra.mxu1 %vm2215_vm9, %v2201_v12 }
 0x2b5   : > { %v1293_v19 = vpop.permute.xlu0 %1292  ;;  %v1673_v45 = vpop.permute.xlu1 %1672 }
 0x2b6   : > { %v2136_v56 = vsel %vm2111_vm6, %v2103_v25, %v1673_v45  ;;  %v2039_v60 = vsel %vm2012_vm3, %v5273_v53, %v1293_v19 }
 0x2b7   : > { %v2954_v13 = vpop.f32.mrf.mxu0 }
 0x2b8   : > { %2550 = vst.msk [vmem:[%s4655_s15 + $0x39] sm:$0xff] %vm1946_vm1, %v2954_v13  ;;  %v2655_v26 = vmul.f32 %v2954_v13, %v2954_v13  ;;  %v2589_v30 = vsel %vm1946_vm1, %v2954_v13, 0.0  ;;  %v5274_v13 = vld [vmem:[#allocation74_spill] sm:$0xff] }
 0x2b9   : > { %v1771_v22 = vpop.permute.xlu0 %1770  ;;  %v1675_v21 = vpop.permute.xlu1 %1674 }
 0x2ba   : > { %v2402_v14 = vpop.f32.mrf.mxu0  ;;  %v2691_v3 = vsel %vm1946_vm1, %v2655_v26, 0.0  ;;  %v2169_v33 = vsel %vm2144_vm7, %v2136_v56, %v1771_v22  ;;  %v2137_v36 = vsel %vm2111_vm6, %v2104_v40, %v1675_v21 }
 0x2bb   : > { %2549 = vst.msk [vmem:[%s4655_s15 + $0x31] sm:$0xff] %vm1946_vm1, %v2402_v14  ;;  %v2587_v44 = vsel %vm1946_vm1, %v2402_v14, 0.0  ;;  %v2654_v10 = vmul.f32 %v2402_v14, %v2402_v14 }
 0x2bc   : > { %v2588_v5 = vadd.f32 %v2587_v44, %v2586_v41 }
 0x2bd   : > { %v2689_v8 = vsel %vm1946_vm1, %v2654_v10, 0.0  ;;  %v1421_v15 = vpop.permute.xlu0 %1420  ;;  %v1295_v42 = vpop.permute.xlu1 %1294 }
 0x2be   : > { %v2690_v62 = vadd.f32 %v2689_v8, %v2688_v54  ;;  %v2590_v50 = vadd.f32 %v2589_v30, %v2588_v5  ;;  %v2072_v63 = vsel %vm2045_vm4, %v2039_v60, %v1421_v15  ;;  %v2040_v19 = vsel %vm2012_vm3, %v5274_v13, %v1295_v42 }
 0x2c0   : > { %v2692_v58 = vadd.f32 %v2691_v3, %v2690_v62 }
 0x2c1   : > { %v1899_v37 = vpop.permute.xlu0 %1898  ;;  %v1773_v51 = vpop.permute.xlu1 %1772 }
 0x2c2   : > { %v2202_v23 = vsel %vm2177_vm8, %v2169_v33, %v1899_v37  ;;  %v2170_v31 = vsel %vm2144_vm7, %v2137_v36, %v1773_v51 }
 0x2c3   : > { %2982 = vmatprep.mubr.msk.f32.mxu1 %vm2215_vm9, %v2202_v23 }
 0x2c5   : > { %v1549_v0 = vpop.permute.xlu0 %1548  ;;  %v1423_v34 = vpop.permute.xlu1 %1422 }
 0x2c6   : > { %v2105_v4 = vsel %vm2078_vm5, %v2072_v63, %v1549_v0  ;;  %v2073_v14 = vsel %vm2045_vm4, %v2040_v19, %v1423_v34  ;;  %v5278_v19 = vld [vmem:[#allocation22_spill] sm:$0xff] }
 0x2c9   : > { %v1551_v20 = vpop.permute.xlu0 %1550  ;;  %v1901_v46 = vpop.permute.xlu1 %1900 }
 0x2ca   : > { %v2203_v18 = vsel %vm2177_vm8, %v2170_v31, %v1901_v46  ;;  %v2106_v26 = vsel %vm2078_vm5, %v2073_v14, %v1551_v20 }
 0x2cb   : > { %v2957_v35 = vpop.f32.mrf.mxu0  ;;  %2983 = vmatmul.mubr.msk.f32.gmra.mxu1 %vm2215_vm9, %v2203_v18 }
 0x2cc   : > { %2552 = vst.msk [vmem:[%s4655_s15 + $0x49] sm:$0xff] %vm1946_vm1, %v2957_v35  ;;  %v2657_v52 = vmul.f32 %v2957_v35, %v2957_v35  ;;  %v2593_v48 = vsel %vm1946_vm1, %v2957_v35, 0.0 }
 0x2cd   : > { %v1297_v2 = vpop.permute.xlu0 %1296  ;;  %v1677_v43 = vpop.permute.xlu1 %1676 }
 0x2ce   : > { %v2412_v38 = vpop.f32.mrf.mxu0  ;;  %v2695_v54 = vsel %vm1946_vm1, %v2657_v52, 0.0  ;;  %v2138_v55 = vsel %vm2111_vm6, %v2105_v4, %v1677_v43  ;;  %v2041_v0 = vsel %vm2012_vm3, %v5275_v28, %v1297_v2  ;;  %v5276_v2 = vld [vmem:[#allocation76_spill] sm:$0xff] }
 0x2cf   : > { %2551 = vst.msk [vmem:[%s4655_s15 + $0x41] sm:$0xff] %vm1946_vm1, %v2412_v38  ;;  %v2591_v1 = vsel %vm1946_vm1, %v2412_v38, 0.0  ;;  %v2656_v32 = vmul.f32 %v2412_v38, %v2412_v38 }
 0x2d0   : > { %v2592_v49 = vadd.f32 %v2591_v1, %v2590_v50 }
 0x2d1   : > { %v2693_v47 = vsel %vm1946_vm1, %v2656_v32, 0.0  ;;  %v1775_v57 = vpop.permute.xlu0 %1774  ;;  %v1679_v16 = vpop.permute.xlu1 %1678 }
 0x2d2   : > { %v2694_v41 = vadd.f32 %v2693_v47, %v2692_v58  ;;  %v2594_v17 = vadd.f32 %v2593_v48, %v2592_v49  ;;  %v2171_v11 = vsel %vm2144_vm7, %v2138_v55, %v1775_v57  ;;  %v2139_v10 = vsel %vm2111_vm6, %v2106_v26, %v1679_v16 }
 0x2d4   : > { %v2696_v7 = vadd.f32 %v2695_v54, %v2694_v41 }
 0x2d5   : > { %v1425_v39 = vpop.permute.xlu0 %1424  ;;  %v1299_v29 = vpop.permute.xlu1 %1298 }
 0x2d6   : > { %v2074_v40 = vsel %vm2045_vm4, %v2041_v0, %v1425_v39  ;;  %v2042_v38 = vsel %vm2012_vm3, %v5276_v2, %v1299_v29 }
 0x2d9   : > { %v1903_v61 = vpop.permute.xlu0 %1902  ;;  %v1777_v12 = vpop.permute.xlu1 %1776 }
 0x2da   : > { %v2204_v45 = vsel %vm2177_vm8, %v2171_v11, %v1903_v61  ;;  %v2172_v5 = vsel %vm2144_vm7, %v2139_v10, %v1777_v12 }
 0x2db   : > { %2985 = vmatprep.mubr.msk.f32.mxu1 %vm2215_vm9, %v2204_v45  ;;  %v5277_v45 = vld [vmem:[#allocation18_spill] sm:$0xff] }
 0x2dd   : > { %v1553_v22 = vpop.permute.xlu0 %1552  ;;  %v1427_v21 = vpop.permute.xlu1 %1426 }
 0x2de   : > { %v2107_v36 = vsel %vm2078_vm5, %v2074_v40, %v1553_v22  ;;  %v2075_v32 = vsel %vm2045_vm4, %v2042_v38, %v1427_v21 }
 0x2df   : > { %v2960_v44 = vpop.f32.mrf.mxu0 }
 0x2e0   : > { %2554 = vst.msk [vmem:[%s4655_s15 + $0x59] sm:$0xff] %vm1946_vm1, %v2960_v44  ;;  %v2659_v15 = vmul.f32 %v2960_v44, %v2960_v44  ;;  %v2597_v50 = vsel %vm1946_vm1, %v2960_v44, 0.0 }
 0x2e1   : > { %v1555_v24 = vpop.permute.xlu0 %1554  ;;  %v1905_v59 = vpop.permute.xlu1 %1904 }
 0x2e2   : > { %v2205_v30 = vsel %vm2177_vm8, %v2172_v5, %v1905_v59  ;;  %v2422_v8 = vpop.f32.mrf.mxu0  ;;  %v2699_v37 = vsel %vm1946_vm1, %v2659_v15, 0.0  ;;  %v2108_v48 = vsel %vm2078_vm5, %v2075_v32, %v1555_v24 }
 0x2e3   : > { %2553 = vst.msk [vmem:[%s4655_s15 + $0x51] sm:$0xff] %vm1946_vm1, %v2422_v8  ;;  %v2595_v42 = vsel %vm1946_vm1, %v2422_v8, 0.0  ;;  %v2658_v9 = vmul.f32 %v2422_v8, %v2422_v8  ;;  %2986 = vmatmul.mubr.msk.f32.gmra.mxu1 %vm2215_vm9, %v2205_v30 }
 0x2e4   : > { %v2596_v62 = vadd.f32 %v2595_v42, %v2594_v17 }
 0x2e5   : > { %v2697_v25 = vsel %vm1946_vm1, %v2658_v9, 0.0  ;;  %v1301_v3 = vpop.permute.xlu0 %1300  ;;  %v1681_v56 = vpop.permute.xlu1 %1680 }
 0x2e6   : > { %v2698_v58 = vadd.f32 %v2697_v25, %v2696_v7  ;;  %v2598_v33 = vadd.f32 %v2597_v50, %v2596_v62  ;;  %v2140_v31 = vsel %vm2111_vm6, %v2107_v36, %v1681_v56  ;;  %v2043_v13 = vsel %vm2012_vm3, %v5277_v45, %v1301_v3 }
 0x2e8   : > { %v2700_v51 = vadd.f32 %v2699_v37, %v2698_v58 }
 0x2e9   : > { %v1779_v23 = vpop.permute.xlu0 %1778  ;;  %v1683_v6 = vpop.permute.xlu1 %1682 }
 0x2ea   : > { %v2173_v20 = vsel %vm2144_vm7, %v2140_v31, %v1779_v23  ;;  %v2141_v41 = vsel %vm2111_vm6, %v2108_v48, %v1683_v6 }
 0x2ed   : > { %v1429_v34 = vpop.permute.xlu0 %1428  ;;  %v1303_v27 = vpop.permute.xlu1 %1302 }
 0x2ee   : > { %v2044_v22 = vsel %vm2012_vm3, %v5278_v19, %v1303_v27  ;;  %v2076_v26 = vsel %vm2045_vm4, %v2043_v13, %v1429_v34  ;;  %v3061_v19 = vmov 0.0  }
 0x2ef   : > { %2541 = vst.msk [vmem:[%s4655_s15] sm:$0xff] %vm1946_vm1, %v3061_v19  ;;  %2542 = vst.msk [vmem:[%s4655_s15 + $0x8] sm:$0xff] %vm1946_vm1, %v3061_v19 }
 0x2f0   : > { %2544 = vst.msk [vmem:[%s4655_s15 + $0x10] sm:$0x1] %vm2543_vm10, %v3061_v19  ;;  %2579 = vst.msk [vmem:[%s4655_s15 + $0x121] sm:$0x1] %vm2543_vm10, %v3061_v19 }
 0x2f1   : > { %v1907_v46 = vpop.permute.xlu0 %1906  ;;  %v1781_v18 = vpop.permute.xlu1 %1780  ;;  %2577 = vst.msk [vmem:[%s4655_s15 + $0x111] sm:$0xff] %vm1946_vm1, %v3061_v19  ;;  %2578 = vst.msk [vmem:[%s4655_s15 + $0x119] sm:$0xff] %vm1946_vm1, %v3061_v19 }
 0x2f2   : > { %v2206_v35 = vsel %vm2177_vm8, %v2173_v20, %v1907_v46  ;;  %v2174_v54 = vsel %vm2144_vm7, %v2141_v41, %v1781_v18 }
 0x2f3   : > { %v2963_v43 = vpop.f32.mrf.mxu0  ;;  %2988 = vmatprep.mubr.msk.f32.mxu1 %vm2215_vm9, %v2206_v35 }
 0x2f4   : > { %2556 = vst.msk [vmem:[%s4655_s15 + $0x69] sm:$0xff] %vm1946_vm1, %v2963_v43  ;;  %v2661_v47 = vmul.f32 %v2963_v43, %v2963_v43  ;;  %v2601_v7 = vsel %vm1946_vm1, %v2963_v43, 0.0 }
 0x2f5   : > { %v1557_v52 = vpop.permute.xlu0 %1556  ;;  %v1431_v1 = vpop.permute.xlu1 %1430 }
 0x2f6   : > { %v2432_v49 = vpop.f32.mrf.mxu0  ;;  %v2703_v55 = vsel %vm1946_vm1, %v2661_v47, 0.0  ;;  %v2077_v44 = vsel %vm2045_vm4, %v2044_v22, %v1431_v1  ;;  %v2109_v10 = vsel %vm2078_vm5, %v2076_v26, %v1557_v52 }
 0x2f7   : > { %2555 = vst.msk [vmem:[%s4655_s15 + $0x61] sm:$0xff] %vm1946_vm1, %v2432_v49  ;;  %v2599_v57 = vsel %vm1946_vm1, %v2432_v49, 0.0  ;;  %v2660_v16 = vmul.f32 %v2432_v49, %v2432_v49 }
 0x2f8   : > { %v2600_v17 = vadd.f32 %v2599_v57, %v2598_v33 }
 0x2f9   : > { %v2701_v53 = vsel %vm1946_vm1, %v2660_v16, 0.0  ;;  %v1559_v60 = vpop.permute.xlu0 %1558  ;;  %v1909_v39 = vpop.permute.xlu1 %1908 }
 0x2fa   : > { %v2702_v29 = vadd.f32 %v2701_v53, %v2700_v51  ;;  %v2207_v63 = vsel %vm2177_vm8, %v2174_v54, %v1909_v39  ;;  %v2602_v4 = vadd.f32 %v2601_v7, %v2600_v17  ;;  %v2110_v5 = vsel %vm2078_vm5, %v2077_v44, %v1559_v60 }
 0x2fb   : > { %2989 = vmatmul.mubr.msk.f32.gmra.mxu1 %vm2215_vm9, %v2207_v63 }
 0x2fc   : > { %v2704_v11 = vadd.f32 %v2703_v55, %v2702_v29 }
 0x2fd   : > { %v1687_v61 = vpop.permute.xlu0 %1686  ;;  %v1685_v12 = vpop.permute.xlu1 %1684 }
 0x2fe   : > { %v2143_v24 = vsel %vm2111_vm6, %v2110_v5, %v1687_v61  ;;  %v2142_v59 = vsel %vm2111_vm6, %v2109_v10, %v1685_v12 }
 0x301   : > { %v1785_v21 = vpop.permute.xlu0 %1784  ;;  %v1783_v14 = vpop.permute.xlu1 %1782 }
 0x302   : > { %v2176_v30 = vsel %vm2144_vm7, %v2143_v24, %v1785_v21  ;;  %v2175_v8 = vsel %vm2144_vm7, %v2142_v59, %v1783_v14 }
 0x305   : > { %v1913_v15 = vpop.permute.xlu0 %1912  ;;  %v1911_v42 = vpop.permute.xlu1 %1910 }
 0x306   : > { %v2209_v9 = vsel %vm2177_vm8, %v2176_v30, %v1913_v15  ;;  %v2208_v62 = vsel %vm2177_vm8, %v2175_v8, %v1911_v42 }
 0x307   : > { %v2966_v50 = vpop.f32.mrf.mxu0  ;;  %2991 = vmatprep.mubr.msk.f32.mxu1 %vm2215_vm9, %v2208_v62 }
 0x308   : > { %2558 = vst.msk [vmem:[%s4655_s15 + $0x79] sm:$0xff] %vm1946_vm1, %v2966_v50  ;;  %2992 = vmatmul.mubr.msk.f32.gmra.mxu1 %vm2215_vm9, %v2209_v9  ;;  %v2663_v3 = vmul.f32 %v2966_v50, %v2966_v50  ;;  %v2605_v37 = vsel %vm1946_vm1, %v2966_v50, 0.0 }
 0x309   : > { %v2442_v25 = vpop.f32.mrf.mxu0 }
 0x30a   : > { %2557 = vst.msk [vmem:[%s4655_s15 + $0x71] sm:$0xff] %vm1946_vm1, %v2442_v25  ;;  %v2603_v56 = vsel %vm1946_vm1, %v2442_v25, 0.0  ;;  %v2662_v58 = vmul.f32 %v2442_v25, %v2442_v25  ;;  %v2707_v28 = vsel %vm1946_vm1, %v2663_v3, 0.0 }
 0x30b   : > { %v2604_v33 = vadd.f32 %v2603_v56, %v2602_v4 }
 0x30c   : > { %v2705_v51 = vsel %vm1946_vm1, %v2662_v58, 0.0 }
 0x30d   : > { %v2706_v23 = vadd.f32 %v2705_v51, %v2704_v11  ;;  %v2606_v6 = vadd.f32 %v2605_v37, %v2604_v33 }
 0x30f   : > { %v2708_v0 = vadd.f32 %v2707_v28, %v2706_v23 }
 0x31b   : > { %v2969_v34 = vpop.f32.mrf.mxu0 }
 0x31c   : > { %2560 = vst.msk [vmem:[%s4655_s15 + $0x89] sm:$0xff] %vm1946_vm1, %v2969_v34  ;;  %v2665_v40 = vmul.f32 %v2969_v34, %v2969_v34  ;;  %v2609_v46 = vsel %vm1946_vm1, %v2969_v34, 0.0 }
 0x31d   : > { %v2452_v27 = vpop.f32.mrf.mxu0 }
 0x31e   : > { %2559 = vst.msk [vmem:[%s4655_s15 + $0x81] sm:$0xff] %vm1946_vm1, %v2452_v27  ;;  %v2607_v36 = vsel %vm1946_vm1, %v2452_v27, 0.0  ;;  %v2664_v31 = vmul.f32 %v2452_v27, %v2452_v27  ;;  %v2711_v2 = vsel %vm1946_vm1, %v2665_v40, 0.0 }
 0x31f   : > { %v2608_v20 = vadd.f32 %v2607_v36, %v2606_v6 }
 0x320   : > { %v2709_v18 = vsel %vm1946_vm1, %v2664_v31, 0.0 }
 0x321   : > { %v2610_v35 = vadd.f32 %v2609_v46, %v2608_v20  ;;  %v2710_v43 = vadd.f32 %v2709_v18, %v2708_v0 }
 0x323   : > { %v2712_v38 = vadd.f32 %v2711_v2, %v2710_v43 }
 0x32f   : > { %v2972_v52 = vpop.f32.mrf.mxu1 }
 0x330   : > { %2562 = vst.msk [vmem:[%s4655_s15 + $0x99] sm:$0xff] %vm1946_vm1, %v2972_v52  ;;  %v2667_v32 = vmul.f32 %v2972_v52, %v2972_v52  ;;  %v2613_v57 = vsel %vm1946_vm1, %v2972_v52, 0.0 }
 0x331   : > { %v2462_v1 = vpop.f32.mrf.mxu1 }
 0x332   : > { %2561 = vst.msk [vmem:[%s4655_s15 + $0x91] sm:$0xff] %vm1946_vm1, %v2462_v1  ;;  %v2611_v49 = vsel %vm1946_vm1, %v2462_v1, 0.0  ;;  %v2666_v48 = vmul.f32 %v2462_v1, %v2462_v1  ;;  %v2715_v54 = vsel %vm1946_vm1, %v2667_v32, 0.0 }
 0x333   : > { %v2612_v47 = vadd.f32 %v2611_v49, %v2610_v35 }
 0x334   : > { %v2713_v16 = vsel %vm1946_vm1, %v2666_v48, 0.0 }
 0x335   : > { %v2714_v41 = vadd.f32 %v2713_v16, %v2712_v38  ;;  %v2614_v17 = vadd.f32 %v2613_v57, %v2612_v47 }
 0x337   : > { %v2716_v7 = vadd.f32 %v2715_v54, %v2714_v41 }
 0x343   : > { %v2975_v53 = vpop.f32.mrf.mxu1 }
 0x344   : > { %2564 = vst.msk [vmem:[%s4655_s15 + $0xa9] sm:$0xff] %vm1946_vm1, %v2975_v53  ;;  %v2669_v39 = vmul.f32 %v2975_v53, %v2975_v53  ;;  %v2617_v55 = vsel %vm1946_vm1, %v2975_v53, 0.0 }
 0x345   : > { %v2472_v60 = vpop.f32.mrf.mxu1 }
 0x346   : > { %2563 = vst.msk [vmem:[%s4655_s15 + $0xa1] sm:$0xff] %vm1946_vm1, %v2472_v60  ;;  %v2615_v29 = vsel %vm1946_vm1, %v2472_v60, 0.0  ;;  %v2668_v63 = vmul.f32 %v2472_v60, %v2472_v60  ;;  %v2719_v45 = vsel %vm1946_vm1, %v2669_v39, 0.0 }
 0x347   : > { %v2616_v4 = vadd.f32 %v2615_v29, %v2614_v17 }
 0x348   : > { %v2717_v11 = vsel %vm1946_vm1, %v2668_v63, 0.0 }
 0x349   : > { %v2718_v61 = vadd.f32 %v2717_v11, %v2716_v7  ;;  %v2618_v12 = vadd.f32 %v2617_v55, %v2616_v4 }
 0x34b   : > { %v2720_v13 = vadd.f32 %v2719_v45, %v2718_v61 }
 0x35b   : > { %v2978_v22 = vpop.f32.mrf.mxu1 }
 0x35c   : > { %2566 = vst.msk [vmem:[%s4655_s15 + $0xb9] sm:$0xff] %vm1946_vm1, %v2978_v22  ;;  %v2671_v14 = vmul.f32 %v2978_v22, %v2978_v22  ;;  %v2621_v5 = vsel %vm1946_vm1, %v2978_v22, 0.0 }
 0x35d   : > { %v2482_v21 = vpop.f32.mrf.mxu1 }
 0x35e   : > { %2565 = vst.msk [vmem:[%s4655_s15 + $0xb1] sm:$0xff] %vm1946_vm1, %v2482_v21  ;;  %v2619_v26 = vsel %vm1946_vm1, %v2482_v21, 0.0  ;;  %v2670_v44 = vmul.f32 %v2482_v21, %v2482_v21  ;;  %v2723_v8 = vsel %vm1946_vm1, %v2671_v14, 0.0 }
 0x35f   : > { %v2620_v10 = vadd.f32 %v2619_v26, %v2618_v12 }
 0x360   : > { %v2721_v24 = vsel %vm1946_vm1, %v2670_v44, 0.0 }
 0x361   : > { %v2722_v59 = vadd.f32 %v2721_v24, %v2720_v13  ;;  %v2622_v30 = vadd.f32 %v2621_v5, %v2620_v10 }
 0x363   : > { %v2724_v15 = vadd.f32 %v2723_v8, %v2722_v59 }
 0x373   : > { %v2981_v42 = vpop.f32.mrf.mxu1 }
 0x374   : > { %2568 = vst.msk [vmem:[%s4655_s15 + $0xc9] sm:$0xff] %vm1946_vm1, %v2981_v42  ;;  %v2673_v62 = vmul.f32 %v2981_v42, %v2981_v42  ;;  %v2625_v56 = vsel %vm1946_vm1, %v2981_v42, 0.0 }
 0x375   : > { %v2492_v9 = vpop.f32.mrf.mxu1 }
 0x376   : > { %2567 = vst.msk [vmem:[%s4655_s15 + $0xc1] sm:$0xff] %vm1946_vm1, %v2492_v9  ;;  %v2623_v50 = vsel %vm1946_vm1, %v2492_v9, 0.0  ;;  %v2672_v25 = vmul.f32 %v2492_v9, %v2492_v9  ;;  %v2727_v51 = vsel %vm1946_vm1, %v2673_v62, 0.0 }
 0x377   : > { %v2624_v3 = vadd.f32 %v2623_v50, %v2622_v30 }
 0x378   : > { %v2725_v58 = vsel %vm1946_vm1, %v2672_v25, 0.0 }
 0x379   : > { %v2726_v33 = vadd.f32 %v2725_v58, %v2724_v15  ;;  %v2626_v37 = vadd.f32 %v2625_v56, %v2624_v3 }
 0x37b   : > { %v2728_v23 = vadd.f32 %v2727_v51, %v2726_v33 }
 0x38b   : > { %v2984_v6 = vpop.f32.mrf.mxu1 }
 0x38c   : > { %2570 = vst.msk [vmem:[%s4655_s15 + $0xd9] sm:$0xff] %vm1946_vm1, %v2984_v6  ;;  %v2675_v20 = vmul.f32 %v2984_v6, %v2984_v6  ;;  %v2629_v43 = vsel %vm1946_vm1, %v2984_v6, 0.0 }
 0x38d   : > { %v2502_v28 = vpop.f32.mrf.mxu1 }
 0x38e   : > { %2569 = vst.msk [vmem:[%s4655_s15 + $0xd1] sm:$0xff] %vm1946_vm1, %v2502_v28  ;;  %v2674_v27 = vmul.f32 %v2502_v28, %v2502_v28  ;;  %v2627_v40 = vsel %vm1946_vm1, %v2502_v28, 0.0  ;;  %v2731_v1 = vsel %vm1946_vm1, %v2675_v20, 0.0 }
 0x38f   : > { %v2628_v31 = vadd.f32 %v2627_v40, %v2626_v37 }
 0x390   : > { %v2729_v36 = vsel %vm1946_vm1, %v2674_v27, 0.0 }
 0x391   : > { %v2730_v35 = vadd.f32 %v2729_v36, %v2728_v23  ;;  %v2630_v52 = vadd.f32 %v2629_v43, %v2628_v31 }
 0x393   : > { %v2732_v48 = vadd.f32 %v2731_v1, %v2730_v35 }
 0x3a3   : > { %v2987_v0 = vpop.f32.mrf.mxu1 }
 0x3a4   : > { %2572 = vst.msk [vmem:[%s4655_s15 + $0xe9] sm:$0xff] %vm1946_vm1, %v2987_v0  ;;  %v2677_v47 = vmul.f32 %v2987_v0, %v2987_v0  ;;  %v2633_v41 = vsel %vm1946_vm1, %v2987_v0, 0.0 }
 0x3a5   : > { %v2512_v34 = vpop.f32.mrf.mxu1 }
 0x3a6   : > { %2571 = vst.msk [vmem:[%s4655_s15 + $0xe1] sm:$0xff] %vm1946_vm1, %v2512_v34  ;;  %v2676_v46 = vmul.f32 %v2512_v34, %v2512_v34  ;;  %v2631_v2 = vsel %vm1946_vm1, %v2512_v34, 0.0  ;;  %v2735_v7 = vsel %vm1946_vm1, %v2677_v47, 0.0 }
 0x3a7   : > { %v2632_v49 = vadd.f32 %v2631_v2, %v2630_v52 }
 0x3a8   : > { %v2733_v32 = vsel %vm1946_vm1, %v2676_v46, 0.0 }
 0x3a9   : > { %v2734_v16 = vadd.f32 %v2733_v32, %v2732_v48  ;;  %v2634_v54 = vadd.f32 %v2633_v41, %v2632_v49 }
 0x3ab   : > { %v2736_v39 = vadd.f32 %v2735_v7, %v2734_v16 }
 0x3bb   : > { %v2990_v18 = vpop.f32.mrf.mxu1 }
 0x3bc   : > { %2574 = vst.msk [vmem:[%s4655_s15 + $0xf9] sm:$0xff] %vm1946_vm1, %v2990_v18  ;;  %v2679_v29 = vmul.f32 %v2990_v18, %v2990_v18  ;;  %v2637_v55 = vsel %vm1946_vm1, %v2990_v18, 0.0 }
 0x3bd   : > { %v2522_v38 = vpop.f32.mrf.mxu1 }
 0x3be   : > { %2573 = vst.msk [vmem:[%s4655_s15 + $0xf1] sm:$0xff] %vm1946_vm1, %v2522_v38  ;;  %v2678_v57 = vmul.f32 %v2522_v38, %v2522_v38  ;;  %v2635_v17 = vsel %vm1946_vm1, %v2522_v38, 0.0  ;;  %v2739_v12 = vsel %vm1946_vm1, %v2679_v29, 0.0 }
 0x3bf   : > { %v2636_v60 = vadd.f32 %v2635_v17, %v2634_v54 }
 0x3c0   : > { %v2737_v53 = vsel %vm1946_vm1, %v2678_v57, 0.0 }
 0x3c1   : > { %v2738_v63 = vadd.f32 %v2737_v53, %v2736_v39  ;;  %v2638_v61 = vadd.f32 %v2637_v55, %v2636_v60 }
 0x3c3   : > { %v2740_v21 = vadd.f32 %v2739_v12, %v2738_v63 }
 0x3c8   : > { %v2993_v4 = vpop.f32.mrf.mxu1 }
 0x3c9   : > { %2576 = vst.msk [vmem:[%s4655_s15 + $0x109] sm:$0xff] %vm1946_vm1, %v2993_v4  ;;  %v2681_v45 = vmul.f32 %v2993_v4, %v2993_v4  ;;  %v2641_v14 = vsel %vm1946_vm1, %v2993_v4, 0.0 }
 0x3ca   : > { %v2532_v11 = vpop.f32.mrf.mxu1 }
 0x3cb   : > { %2575 = vst.msk [vmem:[%s4655_s15 + $0x101] sm:$0xff] %vm1946_vm1, %v2532_v11  ;;  %v2639_v13 = vsel %vm1946_vm1, %v2532_v11, 0.0  ;;  %v2680_v19 = vmul.f32 %v2532_v11, %v2532_v11  ;;  %v2743_v5 = vsel %vm1946_vm1, %v2681_v45, 0.0 }
 0x3cc   : > { %v2640_v22 = vadd.f32 %v2639_v13, %v2638_v61 }
 0x3cd   : > { %v2741_v26 = vsel %vm1946_vm1, %v2680_v19, 0.0 }
 0x3ce   : > { %v2642_v44 = vadd.f32 %v2641_v14, %v2640_v22  ;;  %v2742_v10 = vadd.f32 %v2741_v26, %v2740_v21 }
 0x3d0   : > { %v2643_v24 = vrot.slane %v2642_v44, 4  ;;  %v2744_v59 = vadd.f32 %v2743_v5, %v2742_v10 }
 0x3d2   : > { %v2644_v30 = vadd.f32 %v2643_v24, %v2642_v44  ;;  %v2745_v8 = vrot.slane %v2744_v59, 4 }
 0x3d4   : > { %v2645_v15 = vrot.slane %v2644_v30, 2  ;;  %v2746_v42 = vadd.f32 %v2745_v8, %v2744_v59 }
 0x3d6   : > { %v2646_v9 = vadd.f32 %v2645_v15, %v2644_v30  ;;  %v2747_v62 = vrot.slane %v2746_v42, 2 }
 0x3d8   : > { %v2647_v50 = vrot.slane %v2646_v9, 1  ;;  %v2748_v25 = vadd.f32 %v2747_v62, %v2746_v42 }
 0x3da   : > { %v2648_v3 = vadd.f32 %v2647_v50, %v2646_v9  ;;  %v2749_v56 = vrot.slane %v2748_v25, 1 }
 0x3dc   : > { %2649 = vst.msk [vmem:[%s238_s17] sm:$0x1] %vm2543_vm10, %v2648_v3  ;;  %v2750_v58 = vadd.f32 %v2749_v56, %v2748_v25 }
 0x3de   : > { %2751 = vst.msk [vmem:[%s241_s22] sm:$0x1] %vm2543_vm10, %v2750_v58 }
 0x3df PF: > { %s16_s18 = sadd.s32 1, %s3049_s18  }
 0x3e0   : > { %p13_p4 = scmp.ge.s32.totalorder %s16_s18, 4  }
 0x3e2   :  { %15 = sbr.rel (!%p13_p4) target bundleno = 1 (0x1), region = 86 }

// kernel: residual_forward.4
= control target key start
LH: loop header
LB: loop body
LE: loop exit
PB: predicated region body
PF: predicated region fallthrough
CT: control target
= control target key end

     0   :  { %s3704_s27 = smov 0   ;;  %s6428_s0 = inlined_call_operand.vmem [shape: f32[2,290,4], index: 0, kind: input, shape index: {}]   ;;  %s6429_s1 = inlined_call_operand.vmem [shape: f32[36,4], index: 1, kind: input, shape index: {}]   ;;  %s6430_s2 = inlined_call_operand.vmem [shape: f32[256,2], index: 2, kind: input, shape index: {}]   ;;  %s6431_s3 = inlined_call_operand.vmem [shape: f32[290,1], index: 3, kind: input, shape index: {}]   ;;  %s6432_s4 = inlined_call_operand.vmem [shape: f32[1,4], index: 4, kind: input, shape index: {}]   ;;  %s6433_s5 = inlined_call_operand.vmem [shape: f32[1,4], index: 5, kind: input, shape index: {}]   ;;  %s6434_s6 = inlined_call_operand.vmem [shape: f32[2,256,4], index: 6, kind: output, shape index: {0}]   ;;  %s6435_s7 = inlined_call_operand.vmem [shape: f32[2,1,4], index: 7, kind: output, shape index: {1}]   ;;  %s6436_s8 = inlined_call_operand.vmem [shape: f32[2,1,4], index: 8, kind: output, shape index: {2}]  }
   0x1 LB: > { %s3467_s28 = sadd.s32 4294967295, %s3647_s27   ;;  %p3471_p0 = scmp.ge.s32.totalorder %s3647_s27, 1  ;;  %s3647_s27 = sphi %s3704_s27, %s19_s27  }
   0x2   : > { %p267_p1 = scmp.lt.s32.totalorder %s3647_s27, 3 }
   0x4   : > { %p268_p2 = pnand %p3471_p0, %p267_p1 }
   0x6   : > { %271 = sbr.rel (%p268_p2) target bundleno = 1066 (0x42a), region = 44 }
   0xb   : > { %v487_v0 = vld [vmem:[%s6431_s3 + $0x10] sm:$0xff]  ;;  %v485_v1 = vld [vmem:[%s6431_s3] sm:$0xff]  ;;  %v3649_v2 = vmov 0   ;;  %v488_v3 = vld [vmem:[%s6431_s3 + $0x18] sm:$0xff]  ;;  %p307_p3 = scmp.lt.s32.totalorder %s3467_s28, 1  ;;  %vm1357_vm0 = vcmask 1046528  }
   0xc   : > { %3638 = vset.pattern.permute.xlu1 %v3649_v2  ;;  %3637 = vset.pattern.permute.xlu0 %v3649_v2  ;;  %v486_v4 = vld [vmem:[%s6431_s3 + $0x8] sm:$0xff]  ;;  %v489_v6 = vld [vmem:[%s6431_s3 + $0x20] sm:$0xff]  ;;  %v492_v7 = vld [vmem:[%s6431_s3 + $0x38] sm:$0xff]  ;;  %s3651_s17 = smov 4   ;;  %vm1064_vm1 = vcmask 1041408   ;;  %vm1552_vm2 = vcmask 1045504  }
   0xd   : > { %534 = vperm.xlu1 %3638, %v487_v0   ;;  %524 = vperm.xlu0 %3637, %v485_v1   ;;  %v490_v5 = vld [vmem:[%s6431_s3 + $0x28] sm:$0xff]  ;;  %v491_v8 = vld [vmem:[%s6431_s3 + $0x30] sm:$0xff]  ;;  %v493_v10 = vld [vmem:[%s6431_s3 + $0x40] sm:$0xff]  ;;  %s7040_s28 = smov (!%p307_p3, %s3467_s28), 1  ;;  %s3653_s18 = smov 12   ;;  %vm2928_vm3 = vcmask 1043456  }
   0xe   : > { %v494_v9 = vld [vmem:[%s6431_s3 + $0x48] sm:$0xff]  ;;  %v496_v11 = vld [vmem:[%s6431_s3 + $0x58] sm:$0xff]  ;;  %v495_v12 = vld [vmem:[%s6431_s3 + $0x50] sm:$0xff]  ;;  %s3618_s19 = smul.u32 296, %s7040_s28  ;;  %s3655_s20 = smov 20   ;;  %vm2562_vm4 = vcmask 31744  }
   0xf   : > { %v498_v13 = vld [vmem:[%s6431_s3 + $0x68] sm:$0xff]  ;;  %v497_v14 = vld [vmem:[%s6431_s3 + $0x60] sm:$0xff]  ;;  %v500_v15 = vld [vmem:[%s6431_s3 + $0x78] sm:$0xff]  ;;  %s3656_s23 = smov 24   ;;  %s3657_s30 = smov 28   ;;  %vm2595_vm5 = vcmask 64512  }
  0x10   : > { %v499_v16 = vld [vmem:[%s6431_s3 + $0x70] sm:$0xff]  ;;  %v502_v17 = vld [vmem:[%s6431_s3 + $0x88] sm:$0xff]  ;;  %v501_v18 = vld [vmem:[%s6431_s3 + $0x80] sm:$0xff]  ;;  %s3812_s10 = scalar_lea.vmem %s6428_s0, %s3618_s19  ;;  %s3654_s19 = smov 16   ;;  %vm2628_vm6 = vcmask 97280   ;;  %vm2661_vm7 = vcmask 130048  }
  0x11   : > { %539 = vperm.xlu1 %3638, %v488_v3   ;;  %529 = vperm.xlu0 %3637, %v486_v4   ;;  %v504_v19 = vld [vmem:[%s6431_s3 + $0x98] sm:$0xff]  ;;  %v503_v20 = vld [vmem:[%s6431_s3 + $0x90] sm:$0xff]  ;;  %v506_v21 = vld [vmem:[%s6431_s3 + $0xa8] sm:$0xff]  ;;  %s3658_s14 = smov 32   ;;  %vm2694_vm8 = vcmask 162816   ;;  %vm2727_vm9 = vcmask 195584  }
  0x12   : > { %v505_v22 = vld [vmem:[%s6431_s3 + $0xa0] sm:$0xff]  ;;  %v508_v23 = vld [vmem:[%s6431_s3 + $0xb8] sm:$0xff]  ;;  %v507_v24 = vld [vmem:[%s6431_s3 + $0xb0] sm:$0xff]  ;;  %vm2760_vm10 = vcmask 228352   ;;  %vm2793_vm11 = vcmask 261120   ;;  %vm2831_vm12 = vcmask 293888  }
  0x13   : > { %v510_v25 = vld [vmem:[%s6431_s3 + $0xc8] sm:$0xff]  ;;  %v509_v26 = vld [vmem:[%s6431_s3 + $0xc0] sm:$0xff]  ;;  %v512_v27 = vld [vmem:[%s6431_s3 + $0xd8] sm:$0xff]  ;;  %s3512_s15 = sshll.u32 %s7040_s28, 8  ;;  %vm3258_vm13 = vcmask 24576  }
  0x14   : > { %v511_v28 = vld [vmem:[%s6431_s3 + $0xd0] sm:$0xff]  ;;  %v514_v29 = vld [vmem:[%s6431_s3 + $0xe8] sm:$0xff]  ;;  %v513_v30 = vld [vmem:[%s6431_s3 + $0xe0] sm:$0xff] }
  0x15   : > { %549 = vperm.xlu1 %3638, %v490_v5   ;;  %544 = vperm.xlu0 %3637, %v489_v6   ;;  %v3817_v31 = vld [vmem:[%s6432_s4] ss:$0 sm:$0xff]  ;;  %v356_v32 = vld [vmem:[%s3812_s10 + $0x108] sm:$0xff]  ;;  %v516_v37 = vld [vmem:[%s6431_s3 + $0xf8] sm:$0xff] }
  0x16   : > { %v355_v33 = vld [vmem:[%s3812_s10 + $0x100] sm:$0xff]  ;;  %v400_v34 = vmul.f32 %v3817_v31, %v356_v32  ;;  %v515_v40 = vld [vmem:[%s6431_s3 + $0xf0] sm:$0xff]  ;;  %v358_v41 = vld [vmem:[%s3812_s10 + $0x118] sm:$0xff]  ;;  %v3650_v32 = vmov 1  }
  0x17   : > { %v399_v35 = vmul.f32 %v3817_v31, %v355_v33  ;;  %v3826_v36 = vld [vmem:[%s6433_s5] ss:$0 sm:$0xff]  ;;  %v357_v42 = vld [vmem:[%s3812_s10 + $0x110] sm:$0xff]  ;;  %v402_v43 = vmul.f32 %v3817_v31, %v358_v41  ;;  %v518_v47 = vld [vmem:[%s6431_s3 + $0x108] sm:$0xff] }
  0x18   : > { %v3832_v38 = vadd.f32 %v3826_v36, %v400_v34  ;;  %v401_v44 = vmul.f32 %v3817_v31, %v357_v42  ;;  %v517_v48 = vld [vmem:[%s6431_s3 + $0x100] sm:$0xff]  ;;  %v520_v52 = vld [vmem:[%s6431_s3 + $0x118] sm:$0xff]  ;;  %v519_v53 = vld [vmem:[%s6431_s3 + $0x110] sm:$0xff] }
  0x19   : > { %559 = vperm.xlu1 %3638, %v492_v7   ;;  %554 = vperm.xlu0 %3637, %v491_v8   ;;  %v3835_v39 = vadd.f32 %v3826_v36, %v399_v35  ;;  %v3845_v45 = vadd.f32 %v3826_v36, %v402_v43  ;;  %v359_v49 = vld [vmem:[%s3812_s10 + $0x120] sm:$0x3]  ;;  %v3879_v56 = vld [vmem:[%s6430_s2 + $0x10] sm:$0xff]  ;;  %v3884_v57 = vld [vmem:[%s6430_s2 + $0x8] sm:$0xff] }
  0x1a   : > { %v3848_v46 = vadd.f32 %v3826_v36, %v401_v44  ;;  %v403_v50 = vmul.f32 %v3817_v31, %v359_v49  ;;  %v3870_v54 = vld [vmem:[%s6430_s2] sm:$0xff]  ;;  %v3896_v59 = vld [vmem:[%s6430_s2 + $0x18] sm:$0xff]  ;;  %v3903_v60 = vld [vmem:[%s6430_s2 + $0x30] sm:$0xff] }
  0x1b   : > { %v521_v55 = vld [vmem:[%s6431_s3 + $0x120] sm:$0x3]  ;;  %v3908_v61 = vld [vmem:[%s6430_s2 + $0x28] sm:$0xff]  ;;  %v3920_v63 = vld [vmem:[%s6430_s2 + $0x38] sm:$0xff] }
  0x1c   : > { %v3859_v51 = vadd.f32 %v3826_v36, %v403_v50  ;;  %v3891_v58 = vld [vmem:[%s6430_s2 + $0x20] sm:$0xff]  ;;  %v3927_v0 = vld [vmem:[%s6430_s2 + $0x50] sm:$0xff]  ;;  %v3932_v1 = vld [vmem:[%s6430_s2 + $0x48] sm:$0xff] }
  0x1d   : > { %569 = vperm.xlu1 %3638, %v494_v9   ;;  %564 = vperm.xlu0 %3637, %v493_v10   ;;  %v3915_v62 = vld [vmem:[%s6430_s2 + $0x40] sm:$0xff]  ;;  %v3944_v3 = vld [vmem:[%s6430_s2 + $0x58] sm:$0xff]  ;;  %v3951_v4 = vld [vmem:[%s6430_s2 + $0x70] sm:$0xff] }
  0x1e   : > { %v3939_v2 = vld [vmem:[%s6430_s2 + $0x60] sm:$0xff]  ;;  %v3956_v5 = vld [vmem:[%s6430_s2 + $0x68] sm:$0xff]  ;;  %v3968_v7 = vld [vmem:[%s6430_s2 + $0x78] sm:$0xff] }
  0x1f   : > { %v3963_v6 = vld [vmem:[%s6430_s2 + $0x80] sm:$0xff]  ;;  %v3975_v8 = vld [vmem:[%s6430_s2 + $0x90] sm:$0xff]  ;;  %v3980_v9 = vld [vmem:[%s6430_s2 + $0x88] sm:$0xff] }
  0x20   : > { %v3987_v10 = vld [vmem:[%s6430_s2 + $0xa0] sm:$0xff] }
  0x21   : > { %579 = vperm.xlu1 %3638, %v496_v11   ;;  %574 = vperm.xlu0 %3637, %v495_v12   ;;  %v3992_v11 = vld [vmem:[%s6430_s2 + $0x98] sm:$0xff]  ;;  %v3999_v12 = vld [vmem:[%s6430_s2 + $0xb0] sm:$0xff] }
  0x25   : > { %589 = vperm.xlu1 %3638, %v498_v13   ;;  %584 = vperm.xlu0 %3637, %v497_v14   ;;  %v4004_v13 = vld [vmem:[%s6430_s2 + $0xa8] sm:$0xff]  ;;  %v4011_v14 = vld [vmem:[%s6430_s2 + $0xc0] sm:$0xff] }
  0x29   : > { %599 = vperm.xlu1 %3638, %v500_v15   ;;  %594 = vperm.xlu0 %3637, %v499_v16   ;;  %v4016_v15 = vld [vmem:[%s6430_s2 + $0xb8] sm:$0xff]  ;;  %v4023_v16 = vld [vmem:[%s6430_s2 + $0xd0] sm:$0xff] }
  0x2d   : > { %609 = vperm.xlu1 %3638, %v502_v17   ;;  %604 = vperm.xlu0 %3637, %v501_v18   ;;  %v4028_v17 = vld [vmem:[%s6430_s2 + $0xc8] sm:$0xff] }
  0x31   : > { %619 = vperm.xlu1 %3638, %v504_v19   ;;  %614 = vperm.xlu0 %3637, %v503_v20   ;;  %v4039_v20 = vld [vmem:[%s6430_s2 + $0xe0] sm:$0xff] }
  0x35   : > { %629 = vperm.xlu1 %3638, %v506_v21   ;;  %624 = vperm.xlu0 %3637, %v505_v22   ;;  %v4044_v21 = vld [vmem:[%s6430_s2 + $0xd8] sm:$0xff] }
  0x39   : > { %639 = vperm.xlu1 %3638, %v508_v23   ;;  %634 = vperm.xlu0 %3637, %v507_v24   ;;  %v4055_v24 = vld [vmem:[%s6430_s2 + $0xf0] sm:$0xff] }
  0x3d   : > { %649 = vperm.xlu1 %3638, %v510_v25   ;;  %644 = vperm.xlu0 %3637, %v509_v26   ;;  %v4060_v25 = vld [vmem:[%s6430_s2 + $0xe8] sm:$0xff] }
  0x41   : > { %659 = vperm.xlu1 %3638, %v512_v27   ;;  %654 = vperm.xlu0 %3637, %v511_v28   ;;  %v4071_v28 = vld [vmem:[%s6430_s2 + $0xf8] sm:$0xff] }
  0x45   : > { %669 = vperm.xlu1 %3638, %v514_v29   ;;  %664 = vperm.xlu0 %3637, %v513_v30  }
  0x49   : > { %679 = vperm.xlu1 %3638, %v516_v37   ;;  %674 = vperm.xlu0 %3637, %v515_v40  }
  0x4d   : > { %689 = vperm.xlu1 %3638, %v518_v47   ;;  %684 = vperm.xlu0 %3637, %v517_v48  }
  0x51   : > { %699 = vperm.xlu1 %3638, %v520_v52   ;;  %694 = vperm.xlu0 %3637, %v519_v53  }
  0x55   : > { %778 = vperm.xlu1 %3638, %v3870_v54   ;;  %704 = vperm.xlu0 %3637, %v521_v55  }
  0x59   : > { %788 = vperm.xlu1 %3638, %v3879_v56   ;;  %783 = vperm.xlu0 %3637, %v3884_v57  }
  0x5d   : > { %798 = vperm.xlu1 %3638, %v3891_v58   ;;  %793 = vperm.xlu0 %3637, %v3896_v59  }
  0x61   : > { %808 = vperm.xlu1 %3638, %v3903_v60   ;;  %803 = vperm.xlu0 %3637, %v3908_v61  }
  0x65   : > { %818 = vperm.xlu1 %3638, %v3915_v62   ;;  %813 = vperm.xlu0 %3637, %v3920_v63  }
  0x69   : > { %828 = vperm.xlu1 %3638, %v3927_v0   ;;  %823 = vperm.xlu0 %3637, %v3932_v1  }
  0x6d   : > { %838 = vperm.xlu1 %3638, %v3939_v2   ;;  %833 = vperm.xlu0 %3637, %v3944_v3  }
  0x71   : > { %848 = vperm.xlu1 %3638, %v3951_v4   ;;  %843 = vperm.xlu0 %3637, %v3956_v5  }
  0x75   : > { %858 = vperm.xlu1 %3638, %v3963_v6   ;;  %853 = vperm.xlu0 %3637, %v3968_v7  }
  0x79   : > { %868 = vperm.xlu1 %3638, %v3975_v8   ;;  %863 = vperm.xlu0 %3637, %v3980_v9  }
  0x7d   : > { %878 = vperm.xlu1 %3638, %v3987_v10   ;;  %873 = vperm.xlu0 %3637, %v3992_v11  }
  0x81   : > { %888 = vperm.xlu1 %3638, %v3999_v12   ;;  %883 = vperm.xlu0 %3637, %v4004_v13  }
  0x85   : > { %898 = vperm.xlu1 %3638, %v4011_v14   ;;  %893 = vperm.xlu0 %3637, %v4016_v15  }
  0x88   : > { %v4030_v18 = vpop.permute.xlu1 %534  ;;  %v4032_v19 = vpop.permute.xlu0 %524 }
  0x89   : > { %908 = vperm.xlu1 %3638, %v4023_v16   ;;  %903 = vperm.xlu0 %3637, %v4028_v17  }
  0x8c   : > { %v4046_v22 = vpop.permute.xlu1 %539  ;;  %v4048_v23 = vpop.permute.xlu0 %529 }
  0x8d   : > { %918 = vperm.xlu1 %3638, %v4039_v20   ;;  %913 = vperm.xlu0 %3637, %v4044_v21  }
  0x90   : > { %v4062_v26 = vpop.permute.xlu1 %549  ;;  %v4064_v27 = vpop.permute.xlu0 %544 }
  0x91   : > { %928 = vperm.xlu1 %3638, %v4055_v24   ;;  %923 = vperm.xlu0 %3637, %v4060_v25  }
  0x94   : > { %v4073_v29 = vpop.permute.xlu1 %559  ;;  %v4075_v30 = vpop.permute.xlu0 %554 }
  0x95   : > { %3639 = vset.pattern.permute.xlu1 %v3650_v32  ;;  %933 = vperm.xlu0 %3637, %v4071_v28  }
  0x96   : > { %969 = vperm.xlu1 %3639, %v3870_v54  }
  0x98   : > { %v4079_v33 = vpop.permute.xlu1 %569  ;;  %v4081_v34 = vpop.permute.xlu0 %564 }
  0x99   : > { %3640 = vset.pattern.permute.xlu0 %v3650_v32 }
  0x9a   : > { %975 = vperm.xlu1 %3639, %v3879_v56   ;;  %972 = vperm.xlu0 %3640, %v3884_v57  }
  0x9c   : > { %v4085_v35 = vpop.permute.xlu1 %579  ;;  %v4087_v37 = vpop.permute.xlu0 %574 }
  0x9e   : > { %978 = vperm.xlu1 %3639, %v3896_v59   ;;  %981 = vperm.xlu0 %3640, %v3891_v58   ;;  %v323_v59 = vld [vmem:[%s3812_s10] sm:$0xff] }
  0xa0   : > { %v4091_v40 = vpop.permute.xlu1 %589  ;;  %v4093_v41 = vpop.permute.xlu0 %584 }
  0xa2   : > { %984 = vperm.xlu1 %3639, %v3908_v61   ;;  %987 = vperm.xlu0 %3640, %v3903_v60   ;;  %v324_v60 = vld [vmem:[%s3812_s10 + $0x8] sm:$0xff]  ;;  %v367_v61 = vmul.f32 %v3817_v31, %v323_v59  ;;  %v330_v59 = vld [vmem:[%s3812_s10 + $0x38] sm:$0xff] }
  0xa4   : > { %v4097_v42 = vpop.permute.xlu1 %599  ;;  %v4099_v43 = vpop.permute.xlu0 %594 }
  0xa6   : > { %990 = vperm.xlu1 %3639, %v3920_v63   ;;  %993 = vperm.xlu0 %3640, %v3915_v62   ;;  %v326_v62 = vld [vmem:[%s3812_s10 + $0x18] sm:$0xff]  ;;  %v368_v63 = vmul.f32 %v3817_v31, %v324_v60 }
  0xa8   : > { %v4103_v44 = vpop.permute.xlu1 %609  ;;  %v4105_v47 = vpop.permute.xlu0 %604 }
  0xaa   : > { %996 = vperm.xlu1 %3639, %v3932_v1   ;;  %999 = vperm.xlu0 %3640, %v3927_v0  }
  0xac   : > { %v4109_v48 = vpop.permute.xlu1 %619  ;;  %v4111_v49 = vpop.permute.xlu0 %614 }
  0xae   : > { %1002 = vperm.xlu1 %3639, %v3944_v3   ;;  %1005 = vperm.xlu0 %3640, %v3939_v2   ;;  %v325_v2 = vld [vmem:[%s3812_s10 + $0x10] sm:$0xff]  ;;  %v370_v3 = vmul.f32 %v3817_v31, %v326_v62 }
  0xb0   : > { %v4115_v50 = vpop.permute.xlu1 %629  ;;  %v4117_v52 = vpop.permute.xlu0 %624 }
  0xb2   : > { %1008 = vperm.xlu1 %3639, %v3956_v5   ;;  %1011 = vperm.xlu0 %3640, %v3951_v4   ;;  %v411_v4 = vadd.f32 %v3826_v36, %v367_v61  ;;  %v412_v5 = vadd.f32 %v3826_v36, %v368_v63 }
  0xb4   : > { %v4121_v53 = vpop.permute.xlu1 %639  ;;  %v4123_v54 = vpop.permute.xlu0 %634  ;;  %v448_v60 = vmax.f32 %v411_v4, 0.0  ;;  %v449_v61 = vmax.f32 %v412_v5, 0.0 }
  0xb6   : > { %1014 = vperm.xlu1 %3639, %v3968_v7   ;;  %1017 = vperm.xlu0 %3640, %v3963_v6   ;;  %v328_v6 = vld [vmem:[%s3812_s10 + $0x28] sm:$0xff] }
  0xb7   : > { %v372_v32 = vmul.f32 %v3817_v31, %v328_v6 }
  0xb8   : > { %v4127_v55 = vpop.permute.xlu1 %649  ;;  %v4129_v56 = vpop.permute.xlu0 %644 }
  0xb9   : > { %v416_v5 = vadd.f32 %v3826_v36, %v372_v32 }
  0xba   : > { %1020 = vperm.xlu1 %3639, %v3980_v9   ;;  %1023 = vperm.xlu0 %3640, %v3975_v8   ;;  %v327_v9 = vld [vmem:[%s3812_s10 + $0x20] sm:$0xff] }
  0xbb   : > { %v371_v62 = vmul.f32 %v3817_v31, %v327_v9 }
  0xbc   : > { %v4133_v57 = vpop.permute.xlu1 %659  ;;  %v4135_v58 = vpop.permute.xlu0 %654 }
  0xbe   : > { %1026 = vperm.xlu1 %3639, %v3992_v11   ;;  %1029 = vperm.xlu0 %3640, %v3987_v10   ;;  %v481_v10 = vmax.f32 %v3832_v38, 0.0  ;;  %v480_v11 = vmax.f32 %v3835_v39, 0.0  ;;  %v329_v38 = vld [vmem:[%s3812_s10 + $0x30] sm:$0xff] }
  0xbf   : > { %v373_v9 = vmul.f32 %v3817_v31, %v329_v38  ;;  %v453_v38 = vmax.f32 %v416_v5, 0.0 }
  0xc0   : > { %v4144_v0 = vpop.permute.xlu1 %669  ;;  %v4146_v1 = vpop.permute.xlu0 %664 }
  0xc2   : > { %1032 = vperm.xlu1 %3639, %v4004_v13   ;;  %1035 = vperm.xlu0 %3640, %v3999_v12   ;;  %v369_v12 = vmul.f32 %v3817_v31, %v325_v2  ;;  %v414_v13 = vadd.f32 %v3826_v36, %v370_v3  ;;  %v374_v3 = vmul.f32 %v3817_v31, %v330_v59 }
  0xc4   : > { %v4155_v7 = vpop.permute.xlu1 %679  ;;  %v4157_v8 = vpop.permute.xlu0 %674  ;;  %v413_v2 = vadd.f32 %v3826_v36, %v369_v12  ;;  %v451_v4 = vmax.f32 %v414_v13, 0.0  ;;  %v4191_v12 = vmul.f32 %v4048_v23, %v449_v61  ;;  %v331_v13 = vld [vmem:[%s3812_s10 + $0x40] sm:$0xff] }
  0xc5   : > { %6584 = vst [vmem:[#allocation2_spill] sm:$0xff] %v4155_v7  ;;  %6585 = vst [vmem:[#allocation3_spill] sm:$0xff] %v4157_v8 }
  0xc6   : > { %1038 = vperm.xlu1 %3639, %v4016_v15   ;;  %1041 = vperm.xlu0 %3640, %v4011_v14   ;;  %v483_v15 = vmax.f32 %v3845_v45, 0.0  ;;  %v482_v14 = vmax.f32 %v3848_v46, 0.0  ;;  %v4184_v45 = vmul.f32 %v4032_v19, %v448_v60  ;;  %v415_v46 = vadd.f32 %v3826_v36, %v371_v62  ;;  %6589 = vst [vmem:[#allocation7_spill] sm:$0xff] %v4191_v12 }
  0xc7   : > { %v450_v60 = vmax.f32 %v413_v2, 0.0  ;;  %v334_v2 = vld [vmem:[%s3812_s10 + $0x58] sm:$0xff] }
  0xc8   : > { %v690_v63 = vpop.permute.xlu1 %689  ;;  %v685_v8 = vpop.permute.xlu0 %684  ;;  %6588 = vst [vmem:[#allocation6_spill] sm:$0xff] %v4184_v45 }
  0xc9   : > { %v4170_v7 = vmul.f32 %v690_v63, %v481_v10  ;;  %v4172_v39 = vmul.f32 %v685_v8, %v480_v11  ;;  %v332_v10 = vld [vmem:[%s3812_s10 + $0x48] sm:$0xff]  ;;  %v4210_v63 = vmul.f32 %v4046_v22, %v451_v4  ;;  %v4223_v22 = vmul.f32 %v4030_v18, %v450_v60 }
  0xca   : > { %1044 = vperm.xlu1 %3639, %v4028_v17   ;;  %1047 = vperm.xlu0 %3640, %v4023_v16   ;;  %v484_v16 = vmax.f32 %v3859_v51, 0.0  ;;  %v418_v51 = vadd.f32 %v3826_v36, %v374_v3  ;;  %v376_v23 = vmul.f32 %v3817_v31, %v332_v10  ;;  %v1359_v3 = vrot.slane %v4191_v12, 1 }
  0xcb   : > { %6586 = vst [vmem:[#allocation4_spill] sm:$0xff] %v4170_v7  ;;  %6587 = vst [vmem:[#allocation5_spill] sm:$0xff] %v4172_v39  ;;  %v6437_v6 = vrot.slane %v4172_v39, 1  ;;  %v1844_v8 = vrot.slane %v4170_v7, 1  ;;  %v417_v10 = vadd.f32 %v3826_v36, %v373_v9  ;;  %v378_v9 = vmul.f32 %v3817_v31, %v334_v2  ;;  %v343_v7 = vld [vmem:[%s3812_s10 + $0xa0] sm:$0xff] }
  0xcc   : > { %v700_v11 = vpop.permute.xlu1 %699  ;;  %v695_v17 = vpop.permute.xlu0 %694 }
  0xcd   : > { %v4194_v32 = vmul.f32 %v700_v11, %v483_v15  ;;  %v4196_v59 = vmul.f32 %v695_v17, %v482_v14  ;;  %v4201_v19 = vsel %vm1357_vm0, %v6437_v6, %v1844_v8  ;;  %v452_v15 = vmax.f32 %v415_v46, 0.0  ;;  %v333_v17 = vld [vmem:[%s3812_s10 + $0x50] sm:$0xff] }
  0xce   : > { %6592 = vst [vmem:[#allocation10_spill] sm:$0xff] %v4201_v19  ;;  %1050 = vperm.xlu1 %3639, %v4044_v21   ;;  %1053 = vperm.xlu0 %3640, %v4039_v20   ;;  %v375_v14 = vmul.f32 %v3817_v31, %v331_v13  ;;  %v1358_v20 = vrot.slane %v4184_v45, 1  ;;  %v420_v46 = vadd.f32 %v3826_v36, %v376_v23  ;;  %v455_v13 = vmax.f32 %v418_v51, 0.0 }
  0xcf   : > { %6590 = vst [vmem:[#allocation8_spill] sm:$0xff] %v4194_v32  ;;  %6591 = vst [vmem:[#allocation9_spill] sm:$0xff] %v4196_v59  ;;  %v2268_v61 = vrot.slane %v4194_v32, 1  ;;  %v1846_v62 = vrot.slane %v4196_v59, 1  ;;  %v377_v60 = vmul.f32 %v3817_v31, %v333_v17  ;;  %v4246_v23 = vmul.f32 %v4062_v26, %v453_v38  ;;  %v344_v59 = vld [vmem:[%s3812_s10 + $0xa8] sm:$0xff] }
  0xd0   : > { %v4214_v21 = vpop.permute.xlu1 %778  ;;  %v705_v11 = vpop.permute.xlu0 %704  ;;  %v419_v18 = vadd.f32 %v3826_v36, %v375_v14  ;;  %v4249_v2 = vmul.f32 %v4064_v27, %v452_v15  ;;  %v454_v51 = vmax.f32 %v417_v10, 0.0  ;;  %v1360_v14 = vsel %vm1357_vm0, %v1358_v20, %v1359_v3 }
  0xd1   : > { %v4220_v6 = vmul.f32 %v705_v11, %v484_v16  ;;  %v4228_v4 = vsel %vm1357_vm0, %v1844_v8, %v1846_v62  ;;  %v4231_v5 = vsel %vm1357_vm0, %v1846_v62, %v2268_v61  ;;  %v335_v11 = vld [vmem:[%s3812_s10 + $0x60] sm:$0xff]  ;;  %v1363_v62 = vrot.slane %v4210_v63, 1 }
  0xd2   : > { %1056 = vperm.xlu1 %3639, %v4060_v25   ;;  %1059 = vperm.xlu0 %3640, %v4055_v24   ;;  %6594 = vst [vmem:[#allocation12_spill] sm:$0xff] %v4228_v4  ;;  %6595 = vst [vmem:[#allocation13_spill] sm:$0xff] %v4231_v5  ;;  %v336_v25 = vld [vmem:[%s3812_s10 + $0x68] sm:$0xff]  ;;  %v1361_v17 = vrot.slane %v4223_v22, 1  ;;  %v457_v4 = vmax.f32 %v420_v46, 0.0  ;;  %v422_v26 = vadd.f32 %v3826_v36, %v378_v9  ;;  %v456_v15 = vmax.f32 %v419_v18, 0.0 }
  0xd3   : > { %6593 = vst [vmem:[#allocation11_spill] sm:$0xff] %v4220_v6  ;;  %v2270_v16 = vrot.slane %v4220_v6, 1  ;;  %v380_v27 = vmul.f32 %v3817_v31, %v336_v25  ;;  %v379_v38 = vmul.f32 %v3817_v31, %v335_v11  ;;  %v421_v20 = vadd.f32 %v3826_v36, %v377_v60 }
  0xd4   : > { %v4240_v24 = vpop.permute.xlu1 %788  ;;  %v4242_v8 = vpop.permute.xlu0 %783  ;;  %v1362_v19 = vsel %vm1357_vm0, %v1359_v3, %v1361_v17  ;;  %v4272_v46 = vmul.f32 %v4073_v29, %v455_v13  ;;  %v4275_v9 = vmul.f32 %v4075_v30, %v454_v51  ;;  %v1365_v18 = vrot.slane %v4249_v2, 1 }
  0xd5   : > { %v4256_v5 = vsel %vm1357_vm0, %v2268_v61, %v2270_v16  ;;  %v4269_v61 = vsel %vm1357_vm0, %v1361_v17, %v1363_v62  ;;  %v337_v16 = vld [vmem:[%s3812_s10 + $0x70] sm:$0xff]  ;;  %v1367_v60 = vrot.slane %v4246_v23, 1  ;;  %v459_v3 = vmax.f32 %v422_v26, 0.0 }
  0xd6   : > { %1062 = vperm.xlu1 %3639, %v4071_v28   ;;  %1423 = vrot.lane.b32.xlu0 %v1360_v14, %s3651_s17  ;;  %6596 = vst [vmem:[#allocation14_spill] sm:$0xff] %v4256_v5  ;;  %v338_v28 = vld [vmem:[%s3812_s10 + $0x78] sm:$0xff]  ;;  %6597 = vst [vmem:[#allocation15_spill] sm:$0xff] %v4269_v61  ;;  %v424_v25 = vadd.f32 %v3826_v36, %v380_v27  ;;  %v423_v29 = vadd.f32 %v3826_v36, %v379_v38  ;;  %v458_v51 = vmax.f32 %v421_v20, 0.0  ;;  %v339_v5 = vld [vmem:[%s3812_s10 + $0x80] sm:$0xff] }
  0xd7   : > { %6598 = vst [vmem:[#allocation16_spill] sm:$0xff] %v4272_v46  ;;  %v382_v13 = vmul.f32 %v3817_v31, %v338_v28  ;;  %v4287_v30 = vmul.f32 %v4079_v33, %v457_v4  ;;  %v4290_v11 = vmul.f32 %v4081_v34, %v456_v15  ;;  %v381_v17 = vmul.f32 %v3817_v31, %v337_v16 }
  0xd8   : > { %v4263_v10 = vpop.permute.xlu1 %798  ;;  %v4265_v14 = vpop.permute.xlu0 %793  ;;  %v4300_v27 = vsel %vm1357_vm0, %v1363_v62, %v1365_v18  ;;  %v4303_v38 = vsel %vm1357_vm0, %v1365_v18, %v1367_v60  ;;  %v1369_v33 = vrot.slane %v4275_v9, 1  ;;  %v1371_v34 = vrot.slane %v4272_v46, 1  ;;  %v342_v18 = vld [vmem:[%s3812_s10 + $0x98] sm:$0xff] }
  0xd9   : > { %6599 = vst [vmem:[#allocation17_spill] sm:$0xff] %v4287_v30  ;;  %6600 = vst [vmem:[#allocation18_spill] sm:$0xff] %v4290_v11  ;;  %v461_v4 = vmax.f32 %v424_v25, 0.0  ;;  %v426_v15 = vadd.f32 %v3826_v36, %v382_v13  ;;  %v383_v20 = vmul.f32 %v3817_v31, %v339_v5  ;;  %v460_v28 = vmax.f32 %v423_v29, 0.0  ;;  %v341_v5 = vld [vmem:[%s3812_s10 + $0x90] sm:$0xff] }
  0xda   : > { %1425 = vrot.lane.b32.xlu1 %v1362_v19, %s3651_s17  ;;  %1427 = vrot.lane.b32.xlu0 %v4269_v61, %s3651_s17  ;;  %v340_v19 = vld [vmem:[%s3812_s10 + $0x88] sm:$0xff]  ;;  %6602 = vst [vmem:[#allocation20_spill] sm:$0xff] %v4300_v27  ;;  %6603 = vst [vmem:[#allocation21_spill] sm:$0xff] %v4303_v38  ;;  %v425_v16 = vadd.f32 %v3826_v36, %v381_v17  ;;  %v1375_v25 = vrot.slane %v4287_v30, 1  ;;  %v4323_v13 = vmul.f32 %v4085_v35, %v459_v3 }
  0xdb   : > { %v384_v62 = vmul.f32 %v3817_v31, %v340_v19  ;;  %v4326_v19 = vmul.f32 %v4087_v37, %v458_v51  ;;  %v4330_v29 = vsel %vm1357_vm0, %v1367_v60, %v1369_v33  ;;  %v4333_v17 = vsel %vm1357_vm0, %v1369_v33, %v1371_v34 }
  0xdc   : > { %v4295_v61 = vpop.permute.xlu1 %808  ;;  %v4297_v26 = vpop.permute.xlu0 %803  ;;  %6606 = vst [vmem:[#allocation24_spill] sm:$0xff] %v4323_v13  ;;  %6608 = vst [vmem:[#allocation26_spill] sm:$0xff] %v4330_v29  ;;  %v427_v3 = vadd.f32 %v3826_v36, %v383_v20  ;;  %v386_v37 = vmul.f32 %v3817_v31, %v342_v18  ;;  %v462_v51 = vmax.f32 %v425_v16, 0.0  ;;  %v385_v60 = vmul.f32 %v3817_v31, %v341_v5 }
  0xdd   : > { %6601 = vst [vmem:[#allocation19_spill] sm:$0xff] %v4295_v61  ;;  %6607 = vst [vmem:[#allocation25_spill] sm:$0xff] %v4326_v19  ;;  %v428_v35 = vadd.f32 %v3826_v36, %v384_v62  ;;  %v4356_v62 = vmul.f32 %v4091_v40, %v461_v4  ;;  %v4359_v20 = vmul.f32 %v4093_v41, %v460_v28  ;;  %v1377_v16 = vrot.slane %v4326_v19, 1 }
  0xde   : > { %1429 = vrot.lane.b32.xlu1 %v4300_v27, %s3651_s17  ;;  %1431 = vrot.lane.b32.xlu0 %v4303_v38, %s3651_s17  ;;  %v1373_v27 = vrot.slane %v4290_v11, 1  ;;  %6609 = vst [vmem:[#allocation27_spill] sm:$0xff] %v4333_v17  ;;  %v463_v38 = vmax.f32 %v426_v15, 0.0  ;;  %v1379_v18 = vrot.slane %v4323_v13, 1  ;;  %v388_v40 = vmul.f32 %v3817_v31, %v344_v59 }
  0xdf   : > { %6614 = vst [vmem:[#allocation32_spill] sm:$0xff] %v4356_v62  ;;  %6615 = vst [vmem:[#allocation33_spill] sm:$0xff] %v4359_v20  ;;  %v387_v4 = vmul.f32 %v3817_v31, %v343_v7  ;;  %v4374_v28 = vmul.f32 %v4099_v43, %v462_v51  ;;  %v464_v5 = vmax.f32 %v427_v3, 0.0  ;;  %v4384_v59 = vsel %vm1357_vm0, %v1375_v25, %v1377_v16 }
  0xe0   : > { %v4316_v6 = vpop.permute.xlu1 %818  ;;  %v4318_v32 = vpop.permute.xlu0 %813  ;;  %v4353_v15 = vsel %vm1357_vm0, %v1373_v27, %v1375_v25  ;;  %v4371_v41 = vmul.f32 %v4097_v42, %v463_v38  ;;  %6620 = vst [vmem:[#allocation38_spill] sm:$0xff] %v4384_v59  ;;  %v4387_v42 = vsel %vm1357_vm0, %v1377_v16, %v1379_v18  ;;  %v1381_v43 = vrot.slane %v4359_v20, 1 }
  0xe1   : > { %6604 = vst [vmem:[#allocation22_spill] sm:$0xff] %v4316_v6  ;;  %6605 = vst [vmem:[#allocation23_spill] sm:$0xff] %v4318_v32  ;;  %v1383_v7 = vrot.slane %v4356_v62, 1  ;;  %v432_v3 = vadd.f32 %v3826_v36, %v388_v40  ;;  %v431_v51 = vadd.f32 %v3826_v36, %v387_v4 }
  0xe2   : > { %1433 = vrot.lane.b32.xlu1 %v4330_v29, %s3651_s17  ;;  %1435 = vrot.lane.b32.xlu0 %v4333_v17, %s3651_s17  ;;  %v4350_v29 = vsel %vm1357_vm0, %v1371_v34, %v1373_v27  ;;  %6613 = vst [vmem:[#allocation31_spill] sm:$0xff] %v4353_v15  ;;  %v465_v34 = vmax.f32 %v428_v35, 0.0  ;;  %v430_v27 = vadd.f32 %v3826_v36, %v386_v37  ;;  %6616 = vst [vmem:[#allocation34_spill] sm:$0xff] %v4371_v41  ;;  %v345_v37 = vld [vmem:[%s3812_s10 + $0xb0] sm:$0xff] }
  0xe3   : > { %6612 = vst [vmem:[#allocation30_spill] sm:$0xff] %v4350_v29  ;;  %6617 = vst [vmem:[#allocation35_spill] sm:$0xff] %v4374_v28  ;;  %v429_v17 = vadd.f32 %v3826_v36, %v385_v60  ;;  %v389_v16 = vmul.f32 %v3817_v31, %v345_v37  ;;  %v4417_v4 = vsel %vm1357_vm0, %v1381_v43, %v1383_v7  ;;  %v469_v37 = vmax.f32 %v432_v3, 0.0 }
  0xe4   : > { %v4345_v33 = vpop.permute.xlu1 %828  ;;  %v4347_v6 = vpop.permute.xlu0 %823  ;;  %6621 = vst [vmem:[#allocation39_spill] sm:$0xff] %v4387_v42  ;;  %v467_v38 = vmax.f32 %v430_v27, 0.0  ;;  %v1387_v27 = vrot.slane %v4371_v41, 1  ;;  %v4408_v40 = vmul.f32 %v4103_v44, %v465_v34  ;;  %6627 = vst [vmem:[#allocation45_spill] sm:$0xff] %v4417_v4  ;;  %v468_v34 = vmax.f32 %v431_v51, 0.0 }
  0xe5   : > { %6610 = vst [vmem:[#allocation28_spill] sm:$0xff] %v4345_v33  ;;  %6611 = vst [vmem:[#allocation29_spill] sm:$0xff] %v4347_v6  ;;  %v466_v60 = vmax.f32 %v429_v17, 0.0  ;;  %v4414_v17 = vsel %vm1357_vm0, %v1379_v18, %v1381_v43  ;;  %v433_v18 = vadd.f32 %v3826_v36, %v389_v16 }
  0xe6   : > { %1437 = vrot.lane.b32.xlu1 %v4350_v29, %s3651_s17  ;;  %1439 = vrot.lane.b32.xlu0 %v4353_v15, %s3651_s17  ;;  %v346_v29 = vld [vmem:[%s3812_s10 + $0xb8] sm:$0xff]  ;;  %v348_v15 = vld [vmem:[%s3812_s10 + $0xc8] sm:$0xff]  ;;  %6624 = vst [vmem:[#allocation42_spill] sm:$0xff] %v4408_v40  ;;  %6626 = vst [vmem:[#allocation44_spill] sm:$0xff] %v4414_v17 }
  0xe7   : > { %v390_v25 = vmul.f32 %v3817_v31, %v346_v29  ;;  %v4411_v29 = vmul.f32 %v4105_v47, %v464_v5  ;;  %v392_v44 = vmul.f32 %v3817_v31, %v348_v15  ;;  %v350_v5 = vld [vmem:[%s3812_s10 + $0xd8] sm:$0xff]  ;;  %v4440_v15 = vmul.f32 %v4109_v48, %v467_v38 }
  0xe8   : > { %v4378_v33 = vpop.permute.xlu1 %838  ;;  %v4380_v35 = vpop.permute.xlu0 %833  ;;  %v394_v16 = vmul.f32 %v3817_v31, %v350_v5  ;;  %v4458_v38 = vmul.f32 %v4117_v52, %v468_v34 }
  0xe9   : > { %6618 = vst [vmem:[#allocation36_spill] sm:$0xff] %v4378_v33  ;;  %6619 = vst [vmem:[#allocation37_spill] sm:$0xff] %v4380_v35  ;;  %v347_v33 = vld [vmem:[%s3812_s10 + $0xc0] sm:$0xff]  ;;  %v1389_v51 = vrot.slane %v4411_v29, 1  ;;  %v1395_v52 = vrot.slane %v4440_v15, 1 }
  0xea   : > { %1441 = vrot.lane.b32.xlu1 %v4384_v59, %s3651_s17  ;;  %1443 = vrot.lane.b32.xlu0 %v4387_v42, %s3651_s17  ;;  %v1385_v42 = vrot.slane %v4374_v28, 1  ;;  %6625 = vst [vmem:[#allocation43_spill] sm:$0xff] %v4411_v29  ;;  %v434_v59 = vadd.f32 %v3826_v36, %v390_v25  ;;  %v391_v47 = vmul.f32 %v3817_v31, %v347_v33  ;;  %v1391_v25 = vrot.slane %v4408_v40, 1 }
  0xeb   : > { %v4443_v33 = vmul.f32 %v4111_v49, %v466_v60  ;;  %v4455_v49 = vmul.f32 %v4115_v50, %v469_v37  ;;  %v470_v60 = vmax.f32 %v433_v18, 0.0  ;;  %v438_v37 = vadd.f32 %v3826_v36, %v394_v16 }
  0xec   : > { %v4401_v35 = vpop.permute.xlu1 %848  ;;  %v4403_v6 = vpop.permute.xlu0 %843  ;;  %v4437_v3 = vsel %vm1357_vm0, %v1385_v42, %v1387_v27 }
  0xed   : > { %6622 = vst [vmem:[#allocation40_spill] sm:$0xff] %v4401_v35  ;;  %6623 = vst [vmem:[#allocation41_spill] sm:$0xff] %v4403_v6  ;;  %v349_v35 = vld [vmem:[%s3812_s10 + $0xd0] sm:$0xff]  ;;  %v1393_v50 = vrot.slane %v4443_v33, 1  ;;  %v4493_v16 = vmul.f32 %v4123_v54, %v470_v60 }
  0xee   : > { %1445 = vrot.lane.b32.xlu1 %v4414_v17, %s3651_s17  ;;  %1447 = vrot.lane.b32.xlu0 %v4417_v4, %s3651_s17  ;;  %v4434_v17 = vsel %vm1357_vm0, %v1383_v7, %v1385_v42  ;;  %6631 = vst [vmem:[#allocation49_spill] sm:$0xff] %v4437_v3  ;;  %v471_v7 = vmax.f32 %v434_v59, 0.0  ;;  %v436_v42 = vadd.f32 %v3826_v36, %v392_v44 }
  0xef   : > { %6630 = vst [vmem:[#allocation48_spill] sm:$0xff] %v4434_v17  ;;  %v393_v48 = vmul.f32 %v3817_v31, %v349_v35  ;;  %v435_v4 = vadd.f32 %v3826_v36, %v391_v47  ;;  %v4468_v44 = vsel %vm1357_vm0, %v1387_v27, %v1389_v51  ;;  %v4471_v35 = vsel %vm1357_vm0, %v1389_v51, %v1391_v25 }
  0xf0   : > { %v4429_v43 = vpop.permute.xlu1 %858  ;;  %v4431_v6 = vpop.permute.xlu0 %853  ;;  %6634 = vst [vmem:[#allocation52_spill] sm:$0xff] %v4468_v44  ;;  %6635 = vst [vmem:[#allocation53_spill] sm:$0xff] %v4471_v35  ;;  %v473_v18 = vmax.f32 %v436_v42, 0.0  ;;  %v475_v42 = vmax.f32 %v438_v37, 0.0 }
  0xf1   : > { %6628 = vst [vmem:[#allocation46_spill] sm:$0xff] %v4429_v43  ;;  %6629 = vst [vmem:[#allocation47_spill] sm:$0xff] %v4431_v6  ;;  %v351_v43 = vld [vmem:[%s3812_s10 + $0xe0] sm:$0xff]  ;;  %v437_v27 = vadd.f32 %v3826_v36, %v393_v48  ;;  %v472_v5 = vmax.f32 %v435_v4, 0.0  ;;  %v354_v48 = vld [vmem:[%s3812_s10 + $0xf8] sm:$0xff]  ;;  %v4501_v4 = vsel %vm1357_vm0, %v1393_v50, %v1395_v52 }
  0xf2   : > { %1449 = vrot.lane.b32.xlu1 %v4434_v17, %s3651_s17  ;;  %1451 = vrot.lane.b32.xlu0 %v4437_v3, %s3651_s17  ;;  %v352_v17 = vld [vmem:[%s3812_s10 + $0xe8] sm:$0xff]  ;;  %v395_v34 = vmul.f32 %v3817_v31, %v351_v43  ;;  %v4498_v43 = vsel %vm1357_vm0, %v1391_v25, %v1393_v50  ;;  %6639 = vst [vmem:[#allocation57_spill] sm:$0xff] %v4501_v4 }
  0xf3   : > { %v396_v47 = vmul.f32 %v3817_v31, %v352_v17  ;;  %v353_v17 = vld [vmem:[%s3812_s10 + $0xf0] sm:$0xff]  ;;  %6638 = vst [vmem:[#allocation56_spill] sm:$0xff] %v4498_v43  ;;  %v398_v60 = vmul.f32 %v3817_v31, %v354_v48  ;;  %v4522_v37 = vmul.f32 %v4127_v55, %v473_v18  ;;  %s3652_s10 = smov 8  }
  0xf4   : > { %v4463_v6 = vpop.permute.xlu1 %868  ;;  %v4465_v59 = vpop.permute.xlu0 %863  ;;  %v439_v54 = vadd.f32 %v3826_v36, %v395_v34  ;;  %v397_v25 = vmul.f32 %v3817_v31, %v353_v17 }
  0xf5   : > { %6632 = vst [vmem:[#allocation50_spill] sm:$0xff] %v4463_v6  ;;  %6633 = vst [vmem:[#allocation51_spill] sm:$0xff] %v4465_v59  ;;  %v1397_v6 = vrot.slane %v4458_v38, 1 }
  0xf6   : > { %1453 = vrot.lane.b32.xlu1 %v4468_v44, %s3651_s17  ;;  %1455 = vrot.lane.b32.xlu0 %v4471_v35, %s3651_s17  ;;  %v1399_v44 = vrot.slane %v4455_v49, 1  ;;  %v4490_v35 = vmul.f32 %v4121_v53, %v471_v7  ;;  %v474_v53 = vmax.f32 %v437_v27, 0.0  ;;  %v440_v7 = vadd.f32 %v3826_v36, %v396_v47  ;;  %6644 = vst [vmem:[#allocation62_spill] sm:$0xff] %v4522_v37 }
  0xf7   : > { %v4525_v27 = vmul.f32 %v4129_v56, %v472_v5  ;;  %v1401_v47 = vrot.slane %v4493_v16, 1  ;;  %v476_v34 = vmax.f32 %v439_v54, 0.0  ;;  %v442_v56 = vadd.f32 %v3826_v36, %v398_v60 }
  0xf8   : > { %v4483_v51 = vpop.permute.xlu1 %878  ;;  %v4485_v3 = vpop.permute.xlu0 %873  ;;  %v1403_v31 = vrot.slane %v4490_v35, 1  ;;  %v4537_v55 = vmul.f32 %v4135_v58, %v474_v53  ;;  %v441_v18 = vadd.f32 %v3826_v36, %v397_v25 }
  0xf9   : > { %6636 = vst [vmem:[#allocation54_spill] sm:$0xff] %v4483_v51  ;;  %6637 = vst [vmem:[#allocation55_spill] sm:$0xff] %v4485_v3  ;;  %v4516_v3 = vsel %vm1357_vm0, %v1395_v52, %v1397_v6  ;;  %v477_v52 = vmax.f32 %v440_v7, 0.0  ;;  %v4546_v17 = vsel %vm1357_vm0, %v1399_v44, %v1401_v47  ;;  %v479_v36 = vmax.f32 %v442_v56, 0.0 }
  0xfa   : > { %1457 = vrot.lane.b32.xlu1 %v4498_v43, %s3651_s17  ;;  %1459 = vrot.lane.b32.xlu0 %v4501_v4, %s3651_s17  ;;  %6642 = vst [vmem:[#allocation60_spill] sm:$0xff] %v4516_v3  ;;  %v4519_v43 = vsel %vm1357_vm0, %v1397_v6, %v1399_v44  ;;  %6645 = vst [vmem:[#allocation63_spill] sm:$0xff] %v4525_v27  ;;  %v4534_v6 = vmul.f32 %v4133_v57, %v475_v42  ;;  %v1405_v57 = vrot.slane %v4525_v27, 1 }
  0xfb   : > { %6643 = vst [vmem:[#allocation61_spill] sm:$0xff] %v4519_v43  ;;  %6647 = vst [vmem:[#allocation65_spill] sm:$0xff] %v4537_v55  ;;  %v4549_v7 = vsel %vm1357_vm0, %v1401_v47, %v1403_v31  ;;  %v1407_v42 = vrot.slane %v4522_v37, 1  ;;  %v478_v58 = vmax.f32 %v441_v18, 0.0  ;;  %v1409_v44 = vrot.slane %v4537_v55, 1 }
  0xfc   : > { %v4511_v51 = vpop.permute.xlu1 %888  ;;  %v4513_v50 = vpop.permute.xlu0 %883  ;;  %6646 = vst [vmem:[#allocation64_spill] sm:$0xff] %v4534_v6  ;;  %6650 = vst [vmem:[#allocation68_spill] sm:$0xff] %v4546_v17  ;;  %v1411_v60 = vrot.slane %v4534_v6, 1  ;;  %v4564_v25 = vmul.f32 %v4144_v0, %v477_v52  ;;  %v4567_v47 = vmul.f32 %v4146_v1, %v476_v34  ;;  %v6664_v34 = vld [vmem:[#allocation3_spill] sm:$0xff] }
  0xfd   : > { %6640 = vst [vmem:[#allocation58_spill] sm:$0xff] %v4511_v51  ;;  %6641 = vst [vmem:[#allocation59_spill] sm:$0xff] %v4513_v50  ;;  %v4573_v56 = vsel %vm1357_vm0, %v1405_v57, %v1407_v42  ;;  %v4584_v0 = vsel %vm1357_vm0, %v1407_v42, %v1409_v44 }
  0xfe   : > { %1461 = vrot.lane.b32.xlu1 %v4516_v3, %s3651_s17  ;;  %1463 = vrot.lane.b32.xlu0 %v4519_v43, %s3651_s17  ;;  %6651 = vst [vmem:[#allocation69_spill] sm:$0xff] %v4549_v7  ;;  %6654 = vst [vmem:[#allocation72_spill] sm:$0xff] %v4564_v25  ;;  %v4587_v1 = vsel %vm1357_vm0, %v1409_v44, %v1411_v60 }
  0xff   : > { %6655 = vst [vmem:[#allocation73_spill] sm:$0xff] %v4567_v47  ;;  %6657 = vst [vmem:[#allocation75_spill] sm:$0xff] %v4573_v56 }
 0x100   : > { %v4541_v5 = vpop.permute.xlu1 %898  ;;  %v4543_v48 = vpop.permute.xlu0 %893  ;;  %6660 = vst [vmem:[#allocation78_spill] sm:$0xff] %v4584_v0  ;;  %6661 = vst [vmem:[#allocation79_spill] sm:$0xff] %v4587_v1 }
 0x101   : > { %6648 = vst [vmem:[#allocation66_spill] sm:$0xff] %v4541_v5  ;;  %6649 = vst [vmem:[#allocation67_spill] sm:$0xff] %v4543_v48  ;;  %v4570_v5 = vsel %vm1357_vm0, %v1403_v31, %v1405_v57  ;;  %v6662_v31 = vld [vmem:[#allocation2_spill] sm:$0xff]  ;;  %v4593_v57 = vmul.f32 %v6664_v34, %v478_v58  ;;  %v1415_v48 = vrot.slane %v4564_v25, 1 }
 0x102   : > { %1465 = vrot.lane.b32.xlu1 %v4546_v17, %s3651_s17  ;;  %1467 = vrot.lane.b32.xlu0 %v4549_v7, %s3651_s17  ;;  %6656 = vst [vmem:[#allocation74_spill] sm:$0xff] %v4570_v5  ;;  %v4590_v52 = vmul.f32 %v6662_v31, %v479_v36 }
 0x103   : > { %6665 = vst [vmem:[#allocation3_spill] sm:$0xff] %v4593_v57  ;;  %v1417_v31 = vrot.slane %v4593_v57, 1 }
 0x104   : > { %v4557_v53 = vpop.permute.xlu1 %908  ;;  %v4559_v54 = vpop.permute.xlu0 %903  ;;  %6663 = vst [vmem:[#allocation2_spill] sm:$0xff] %v4590_v52  ;;  %v1419_v34 = vrot.slane %v4590_v52, 1 }
 0x105   : > { %6652 = vst [vmem:[#allocation70_spill] sm:$0xff] %v4557_v53  ;;  %6653 = vst [vmem:[#allocation71_spill] sm:$0xff] %v4559_v54  ;;  %v1413_v54 = vrot.slane %v4567_v47, 1 }
 0x106   : > { %1469 = vrot.lane.b32.xlu1 %v4570_v5, %s3651_s17  ;;  %1471 = vrot.lane.b32.xlu0 %v4573_v56, %s3651_s17 }
 0x107   : > { %v4606_v36 = vsel %vm1357_vm0, %v1411_v60, %v1413_v54  ;;  %v4609_v58 = vsel %vm1357_vm0, %v1413_v54, %v1415_v48  ;;  %v4623_v60 = vsel %vm1357_vm0, %v1417_v31, %v1419_v34 }
 0x108   : > { %v4579_v18 = vpop.permute.xlu1 %918  ;;  %v4581_v53 = vpop.permute.xlu0 %913  ;;  %6668 = vst [vmem:[#allocation82_spill] sm:$0xff] %v4606_v36  ;;  %6669 = vst [vmem:[#allocation83_spill] sm:$0xff] %v4609_v58 }
 0x109   : > { %6658 = vst [vmem:[#allocation76_spill] sm:$0xff] %v4579_v18  ;;  %6659 = vst [vmem:[#allocation77_spill] sm:$0xff] %v4581_v53 }
 0x10a   : > { %1473 = vrot.lane.b32.xlu1 %v4584_v0, %s3651_s17  ;;  %1475 = vrot.lane.b32.xlu0 %v4587_v1, %s3651_s17  ;;  %6672 = vst [vmem:[#allocation86_spill] sm:$0xff] %v4623_v60  ;;  %v6673_v1 = vrot.slane %v4172_v39, 1 }
 0x10c   : > { %v4601_v42 = vpop.permute.xlu1 %928  ;;  %v4603_v44 = vpop.permute.xlu0 %923 }
 0x10d   : > { %6666 = vst [vmem:[#allocation80_spill] sm:$0xff] %v4601_v42  ;;  %6667 = vst [vmem:[#allocation81_spill] sm:$0xff] %v4603_v44  ;;  %v4620_v44 = vsel %vm1357_vm0, %v1415_v48, %v1417_v31  ;;  %v4635_v31 = vsel %vm1357_vm0, %v1419_v34, %v6673_v1 }
 0x10e   : > { %1477 = vrot.lane.b32.xlu1 %v4606_v36, %s3651_s17  ;;  %1479 = vrot.lane.b32.xlu0 %v4609_v58, %s3651_s17  ;;  %6671 = vst [vmem:[#allocation85_spill] sm:$0xff] %v4620_v44  ;;  %6674 = vst [vmem:[#allocation87_spill] sm:$0xff] %v4635_v31 }
 0x110   : > { %v4617_v18 = vpop.permute.xlu0 %933 }
 0x111   : > { %6670 = vst [vmem:[#allocation84_spill] sm:$0xff] %v4617_v18  ;;  %v970_v42 = vpop.permute.xlu1 %969 }
 0x112   : > { %v1065_v54 = vrot.slane %v970_v42, 6  ;;  %1481 = vrot.lane.b32.xlu1 %v4620_v44, %s3651_s17  ;;  %1483 = vrot.lane.b32.xlu0 %v4623_v60, %s3651_s17 }
 0x114   : > { %v1161_v53 = vmul.f32 %v1065_v54, %v4184_v45  ;;  %v1226_v58 = vmul.f32 %v1065_v54, %v4223_v22  ;;  %v1291_v18 = vmul.f32 %v1065_v54, %v4249_v2 }
 0x115   : > { %v976_v36 = vpop.permute.xlu1 %975  ;;  %v973_v48 = vpop.permute.xlu0 %972 }
 0x116   : > { %v1068_v42 = vrot.slane %v976_v36, 6  ;;  %v1066_v0 = vrot.slane %v973_v48, 6  ;;  %1485 = vrot.lane.b32.xlu1 %v4635_v31, %s3651_s17  ;;  %v1553_v60 = vrot.slane %v1161_v53, 2  ;;  %v1977_v5 = vrot.slane %v1226_v58, 2 }
 0x117   : > { %v2401_v7 = vrot.slane %v1291_v18, 2 }
 0x118   : > { %v1067_v44 = vsel %vm1064_vm1, %v1065_v54, %v1066_v0  ;;  %v1069_v56 = vsel %vm1064_vm1, %v1066_v0, %v1068_v42 }
 0x119   : > { %v979_v17 = vpop.permute.xlu1 %978  ;;  %v982_v43 = vpop.permute.xlu0 %981  ;;  %v1162_v3 = vmul.f32 %v1067_v44, %v4191_v12  ;;  %v1163_v1 = vmul.f32 %v1069_v56, %v4223_v22  ;;  %v1227_v36 = vmul.f32 %v1067_v44, %v4210_v63  ;;  %v1228_v34 = vmul.f32 %v1069_v56, %v4249_v2 }
 0x11a   : > { %v1070_v48 = vrot.slane %v979_v17, 6  ;;  %v1072_v31 = vrot.slane %v982_v43, 6  ;;  %v1292_v53 = vmul.f32 %v1067_v44, %v4246_v23  ;;  %v4647_v54 = vmul.f32 %v1069_v56, %v4275_v9 }
 0x11b   : > { %v1554_v0 = vrot.slane %v1162_v3, 2  ;;  %v1556_v58 = vrot.slane %v1163_v1, 2  ;;  %v1978_v18 = vrot.slane %v1227_v36, 2  ;;  %v1980_v4 = vrot.slane %v1228_v34, 2 }
 0x11c   : > { %v1071_v45 = vsel %vm1064_vm1, %v1068_v42, %v1070_v48  ;;  %v1073_v12 = vsel %vm1064_vm1, %v1070_v48, %v1072_v31  ;;  %v2402_v51 = vrot.slane %v1292_v53, 2  ;;  %v2404_v50 = vrot.slane %v4647_v54, 2 }
 0x11d   : > { %v985_v59 = vpop.permute.xlu1 %984  ;;  %v988_v32 = vpop.permute.xlu0 %987  ;;  %v1557_v43 = vsel %vm1552_vm2, %v1554_v0, %v1556_v58  ;;  %v1555_v17 = vsel %vm1552_vm2, %v1553_v60, %v1554_v0  ;;  %v1164_v56 = vmul.f32 %v1071_v45, %v4210_v63  ;;  %v1165_v3 = vmul.f32 %v1073_v12, %v4249_v2 }
 0x11e   : > { %v1074_v44 = vrot.slane %v985_v59, 6  ;;  %v1076_v1 = vrot.slane %v988_v32, 6  ;;  %1620 = vrot.lane.b32.xlu1 %v1557_v43, %s3652_s10  ;;  %1618 = vrot.lane.b32.xlu0 %v1555_v17, %s3652_s10  ;;  %v4659_v42 = vsel %vm1552_vm2, %v1977_v5, %v1978_v18  ;;  %v4662_v36 = vsel %vm1552_vm2, %v1978_v18, %v1980_v4 }
 0x11f   : > { %6675 = vst [vmem:[#allocation88_spill] sm:$0xff] %v4659_v42  ;;  %6676 = vst [vmem:[#allocation89_spill] sm:$0xff] %v4662_v36  ;;  %v1558_v34 = vrot.slane %v1164_v56, 2  ;;  %v1560_v48 = vrot.slane %v1165_v3, 2  ;;  %v4665_v60 = vsel %vm1552_vm2, %v2401_v7, %v2402_v51  ;;  %v4668_v53 = vsel %vm1552_vm2, %v2402_v51, %v2404_v50 }
 0x120   : > { %6677 = vst [vmem:[#allocation90_spill] sm:$0xff] %v4665_v60  ;;  %6678 = vst [vmem:[#allocation91_spill] sm:$0xff] %v4668_v53  ;;  %v1075_v32 = vsel %vm1064_vm1, %v1072_v31, %v1074_v44  ;;  %v1077_v59 = vsel %vm1064_vm1, %v1074_v44, %v1076_v1  ;;  %v1229_v54 = vmul.f32 %v1071_v45, %v4246_v23 }
 0x121   : > { %v1230_v5 = vmul.f32 %v1073_v12, %v4275_v9  ;;  %v991_v0 = vpop.permute.xlu1 %990  ;;  %v994_v43 = vpop.permute.xlu0 %993  ;;  %v1561_v18 = vsel %vm1552_vm2, %v1558_v34, %v1560_v48  ;;  %v1559_v17 = vsel %vm1552_vm2, %v1556_v58, %v1558_v34  ;;  %v1166_v7 = vmul.f32 %v1075_v32, %v4246_v23 }
 0x122   : > { %v1167_v56 = vmul.f32 %v1077_v59, %v4275_v9  ;;  %v1078_v51 = vrot.slane %v991_v0, 6  ;;  %v1080_v3 = vrot.slane %v994_v43, 6  ;;  %1624 = vrot.lane.b32.xlu1 %v1561_v18, %s3652_s10  ;;  %1622 = vrot.lane.b32.xlu0 %v1559_v17, %s3652_s10  ;;  %v1982_v31 = vrot.slane %v1229_v54, 2 }
 0x123   : > { %v1984_v44 = vrot.slane %v1230_v5, 2  ;;  %v1562_v53 = vrot.slane %v1166_v7, 2  ;;  %v1294_v36 = vmul.f32 %v1071_v45, %v4272_v46  ;;  %v4682_v42 = vmul.f32 %v1073_v12, %v4290_v11 }
 0x124   : > { %v1564_v60 = vrot.slane %v1167_v56, 2  ;;  %v4685_v58 = vsel %vm1064_vm1, %v1076_v1, %v1078_v51  ;;  %v4688_v34 = vsel %vm1064_vm1, %v1078_v51, %v1080_v3  ;;  %v4691_v0 = vsel %vm1552_vm2, %v1980_v4, %v1982_v31 }
 0x125   : > { %6679 = vst [vmem:[#allocation92_spill] sm:$0xff] %v4691_v0  ;;  %v4694_v43 = vsel %vm1552_vm2, %v1982_v31, %v1984_v44  ;;  %v997_v54 = vpop.permute.xlu1 %996  ;;  %v1000_v5 = vpop.permute.xlu0 %999  ;;  %v1563_v45 = vsel %vm1552_vm2, %v1560_v48, %v1562_v53  ;;  %v1168_v12 = vmul.f32 %v4685_v58, %v4272_v46  ;;  %v1169_v1 = vmul.f32 %v4688_v34, %v4290_v11 }
 0x126   : > { %6680 = vst [vmem:[#allocation93_spill] sm:$0xff] %v4694_v43  ;;  %v1565_v18 = vsel %vm1552_vm2, %v1562_v53, %v1564_v60  ;;  %v1082_v17 = vrot.slane %v997_v54, 6  ;;  %v1084_v7 = vrot.slane %v1000_v5, 6  ;;  %1626 = vrot.lane.b32.xlu0 %v1563_v45, %s3652_s10  ;;  %v2406_v4 = vrot.slane %v1294_v36, 2 }
 0x127   : > { %1628 = vrot.lane.b32.xlu1 %v1565_v18, %s3652_s10  ;;  %v2408_v56 = vrot.slane %v4682_v42, 2  ;;  %v1566_v51 = vrot.slane %v1168_v12, 2  ;;  %v1568_v31 = vrot.slane %v1169_v1, 2  ;;  %v1231_v43 = vmul.f32 %v1075_v32, %v4272_v46 }
 0x128   : > { %v4707_v48 = vmul.f32 %v1077_v59, %v4290_v11  ;;  %v4710_v53 = vsel %vm1064_vm1, %v1080_v3, %v1082_v17  ;;  %v4713_v54 = vsel %vm1064_vm1, %v1082_v17, %v1084_v7  ;;  %v4716_v5 = vsel %vm1552_vm2, %v2404_v50, %v2406_v4 }
 0x129   : > { %6681 = vst [vmem:[#allocation94_spill] sm:$0xff] %v4716_v5  ;;  %v4719_v36 = vsel %vm1552_vm2, %v2406_v4, %v2408_v56  ;;  %v1003_v42 = vpop.permute.xlu1 %1002  ;;  %v1006_v18 = vpop.permute.xlu0 %1005  ;;  %v1569_v45 = vsel %vm1552_vm2, %v1566_v51, %v1568_v31  ;;  %v1567_v12 = vsel %vm1552_vm2, %v1564_v60, %v1566_v51  ;;  %v1170_v1 = vmul.f32 %v4710_v53, %v4287_v30 }
 0x12a   : > { %6682 = vst [vmem:[#allocation95_spill] sm:$0xff] %v4719_v36  ;;  %v1171_v3 = vmul.f32 %v4713_v54, %v4326_v19  ;;  %v1086_v17 = vrot.slane %v1003_v42, 6  ;;  %v1088_v0 = vrot.slane %v1006_v18, 6  ;;  %1630 = vrot.lane.b32.xlu0 %v1567_v12, %s3652_s10  ;;  %v1986_v50 = vrot.slane %v1231_v43, 2 }
 0x12b   : > { %1632 = vrot.lane.b32.xlu1 %v1569_v45, %s3652_s10  ;;  %v1988_v4 = vrot.slane %v4707_v48, 2  ;;  %v1570_v36 = vrot.slane %v1170_v1, 2  ;;  %v1296_v61 = vmul.f32 %v1075_v32, %v4287_v30  ;;  %v4732_v60 = vmul.f32 %v1077_v59, %v4326_v19 }
 0x12c   : > { %v1572_v5 = vrot.slane %v1171_v3, 2  ;;  %v4735_v51 = vsel %vm1064_vm1, %v1084_v7, %v1086_v17  ;;  %v4738_v42 = vsel %vm1064_vm1, %v1086_v17, %v1088_v0  ;;  %v4741_v18 = vsel %vm1552_vm2, %v1984_v44, %v1986_v50 }
 0x12d   : > { %6683 = vst [vmem:[#allocation96_spill] sm:$0xff] %v4741_v18  ;;  %v4744_v43 = vsel %vm1552_vm2, %v1986_v50, %v1988_v4  ;;  %v1009_v48 = vpop.permute.xlu1 %1008  ;;  %v1012_v45 = vpop.permute.xlu0 %1011  ;;  %v1571_v32 = vsel %vm1552_vm2, %v1568_v31, %v1570_v36  ;;  %v1172_v59 = vmul.f32 %v4735_v51, %v4323_v13  ;;  %v1173_v7 = vmul.f32 %v4738_v42, %v4359_v20 }
 0x12e   : > { %6684 = vst [vmem:[#allocation97_spill] sm:$0xff] %v4744_v43  ;;  %v1573_v12 = vsel %vm1552_vm2, %v1570_v36, %v1572_v5  ;;  %v1090_v1 = vrot.slane %v1009_v48, 6  ;;  %v1092_v3 = vrot.slane %v1012_v45, 6  ;;  %1634 = vrot.lane.b32.xlu0 %v1571_v32, %s3652_s10  ;;  %v2410_v44 = vrot.slane %v1296_v61, 2 }
 0x12f   : > { %1636 = vrot.lane.b32.xlu1 %v1573_v12, %s3652_s10  ;;  %v2412_v17 = vrot.slane %v4732_v60, 2  ;;  %v1574_v50 = vrot.slane %v1172_v59, 2  ;;  %v1576_v43 = vrot.slane %v1173_v7, 2  ;;  %v1233_v31 = vmul.f32 %v4685_v58, %v4287_v30 }
 0x130   : > { %v4759_v36 = vmul.f32 %v4688_v34, %v4326_v19  ;;  %v4762_v18 = vsel %vm1064_vm1, %v1088_v0, %v1090_v1  ;;  %v4765_v48 = vsel %vm1064_vm1, %v1090_v1, %v1092_v3  ;;  %v4768_v45 = vsel %vm1552_vm2, %v2408_v56, %v2410_v44 }
 0x131   : > { %6685 = vst [vmem:[#allocation98_spill] sm:$0xff] %v4768_v45  ;;  %v4771_v61 = vsel %vm1552_vm2, %v2410_v44, %v2412_v17  ;;  %v1015_v60 = vpop.permute.xlu1 %1014  ;;  %v1018_v12 = vpop.permute.xlu0 %1017  ;;  %v1577_v32 = vsel %vm1552_vm2, %v1574_v50, %v1576_v43  ;;  %v1575_v59 = vsel %vm1552_vm2, %v1572_v5, %v1574_v50  ;;  %v1174_v7 = vmul.f32 %v4762_v18, %v4356_v62 }
 0x132   : > { %6686 = vst [vmem:[#allocation99_spill] sm:$0xff] %v4771_v61  ;;  %v1175_v0 = vmul.f32 %v4765_v48, %v4374_v28  ;;  %v1094_v1 = vrot.slane %v1015_v60, 6  ;;  %v1096_v19 = vrot.slane %v1018_v12, 6  ;;  %1638 = vrot.lane.b32.xlu0 %v1575_v59, %s3652_s10  ;;  %v1990_v56 = vrot.slane %v1233_v31, 2 }
 0x133   : > { %1640 = vrot.lane.b32.xlu1 %v1577_v32, %s3652_s10  ;;  %v1992_v44 = vrot.slane %v4759_v36, 2  ;;  %v1578_v61 = vrot.slane %v1174_v7, 2  ;;  %v1298_v5 = vmul.f32 %v4685_v58, %v4323_v13  ;;  %v4786_v50 = vmul.f32 %v4688_v34, %v4359_v20 }
 0x134   : > { %v1580_v45 = vrot.slane %v1175_v0, 2  ;;  %v4789_v30 = vsel %vm1064_vm1, %v1092_v3, %v1094_v1  ;;  %v4792_v60 = vsel %vm1064_vm1, %v1094_v1, %v1096_v19  ;;  %v4795_v12 = vsel %vm1552_vm2, %v1988_v4, %v1990_v56 }
 0x135   : > { %6687 = vst [vmem:[#allocation100_spill] sm:$0xff] %v4795_v12  ;;  %v4798_v31 = vsel %vm1552_vm2, %v1990_v56, %v1992_v44  ;;  %v1021_v36 = vpop.permute.xlu1 %1020  ;;  %v1024_v32 = vpop.permute.xlu0 %1023  ;;  %v1579_v59 = vsel %vm1552_vm2, %v1576_v43, %v1578_v61  ;;  %v1176_v34 = vmul.f32 %v4789_v30, %v4371_v41  ;;  %v1177_v3 = vmul.f32 %v4792_v60, %v4411_v29 }
 0x136   : > { %6688 = vst [vmem:[#allocation101_spill] sm:$0xff] %v4798_v31  ;;  %v1581_v58 = vsel %vm1552_vm2, %v1578_v61, %v1580_v45  ;;  %v1098_v7 = vrot.slane %v1021_v36, 6  ;;  %v1100_v0 = vrot.slane %v1024_v32, 6  ;;  %1642 = vrot.lane.b32.xlu0 %v1579_v59, %s3652_s10  ;;  %v2414_v4 = vrot.slane %v1298_v5, 2 }
 0x137   : > { %1644 = vrot.lane.b32.xlu1 %v1581_v58, %s3652_s10  ;;  %v2416_v1 = vrot.slane %v4786_v50, 2  ;;  %v1582_v56 = vrot.slane %v1176_v34, 2  ;;  %v1584_v31 = vrot.slane %v1177_v3, 2  ;;  %v1235_v43 = vmul.f32 %v4710_v53, %v4323_v13 }
 0x138   : > { %v4813_v61 = vmul.f32 %v4713_v54, %v4359_v20  ;;  %v4816_v12 = vsel %vm1064_vm1, %v1096_v19, %v1098_v7  ;;  %v4819_v36 = vsel %vm1064_vm1, %v1098_v7, %v1100_v0  ;;  %v4822_v32 = vsel %vm1552_vm2, %v2412_v17, %v2414_v4 }
 0x139   : > { %6689 = vst [vmem:[#allocation102_spill] sm:$0xff] %v4822_v32  ;;  %v4825_v5 = vsel %vm1552_vm2, %v2414_v4, %v2416_v1  ;;  %v1027_v50 = vpop.permute.xlu1 %1026  ;;  %v1030_v58 = vpop.permute.xlu0 %1029  ;;  %v1585_v59 = vsel %vm1552_vm2, %v1582_v56, %v1584_v31  ;;  %v1583_v34 = vsel %vm1552_vm2, %v1580_v45, %v1582_v56  ;;  %v1178_v3 = vmul.f32 %v4816_v12, %v4408_v40 }
 0x13a   : > { %6690 = vst [vmem:[#allocation103_spill] sm:$0xff] %v4825_v5  ;;  %v1179_v19 = vmul.f32 %v4819_v36, %v4443_v33  ;;  %v1102_v7 = vrot.slane %v1027_v50, 6  ;;  %v1104_v20 = vrot.slane %v1030_v58, 6  ;;  %1646 = vrot.lane.b32.xlu0 %v1583_v34, %s3652_s10  ;;  %v1994_v17 = vrot.slane %v1235_v43, 2 }
 0x13b   : > { %1648 = vrot.lane.b32.xlu1 %v1585_v59, %s3652_s10  ;;  %v1996_v4 = vrot.slane %v4813_v61, 2  ;;  %v1586_v5 = vrot.slane %v1178_v3, 2  ;;  %v1300_v45 = vmul.f32 %v4710_v53, %v4356_v62  ;;  %v4840_v56 = vmul.f32 %v4713_v54, %v4374_v28 }
 0x13c   : > { %v1588_v32 = vrot.slane %v1179_v19, 2  ;;  %v4843_v13 = vsel %vm1064_vm1, %v1100_v0, %v1102_v7  ;;  %v4846_v50 = vsel %vm1064_vm1, %v1102_v7, %v1104_v20  ;;  %v4849_v58 = vsel %vm1552_vm2, %v1992_v44, %v1994_v17 }
 0x13d   : > { %6691 = vst [vmem:[#allocation104_spill] sm:$0xff] %v4849_v58  ;;  %v4852_v43 = vsel %vm1552_vm2, %v1994_v17, %v1996_v4  ;;  %v1033_v61 = vpop.permute.xlu1 %1032  ;;  %v1036_v59 = vpop.permute.xlu0 %1035  ;;  %v1587_v34 = vsel %vm1552_vm2, %v1584_v31, %v1586_v5  ;;  %v1180_v54 = vmul.f32 %v4843_v13, %v4440_v15  ;;  %v1181_v0 = vmul.f32 %v4846_v50, %v4458_v38 }
 0x13e   : > { %6692 = vst [vmem:[#allocation105_spill] sm:$0xff] %v4852_v43  ;;  %v1589_v53 = vsel %vm1552_vm2, %v1586_v5, %v1588_v32  ;;  %v1106_v3 = vrot.slane %v1033_v61, 6  ;;  %v1108_v19 = vrot.slane %v1036_v59, 6  ;;  %1650 = vrot.lane.b32.xlu0 %v1587_v34, %s3652_s10  ;;  %v2418_v44 = vrot.slane %v1300_v45, 2 }
 0x13f   : > { %1652 = vrot.lane.b32.xlu1 %v1589_v53, %s3652_s10  ;;  %v2420_v7 = vrot.slane %v4840_v56, 2  ;;  %v1590_v17 = vrot.slane %v1180_v54, 2  ;;  %v1592_v43 = vrot.slane %v1181_v0, 2  ;;  %v1237_v31 = vmul.f32 %v4735_v51, %v4356_v62 }
 0x140   : > { %v4867_v5 = vmul.f32 %v4738_v42, %v4374_v28  ;;  %v4870_v58 = vsel %vm1064_vm1, %v1104_v20, %v1106_v3  ;;  %v4873_v61 = vsel %vm1064_vm1, %v1106_v3, %v1108_v19  ;;  %v4876_v59 = vsel %vm1552_vm2, %v2416_v1, %v2418_v44 }
 0x141   : > { %6693 = vst [vmem:[#allocation106_spill] sm:$0xff] %v4876_v59  ;;  %v4879_v45 = vsel %vm1552_vm2, %v2418_v44, %v2420_v7  ;;  %v1039_v56 = vpop.permute.xlu1 %1038  ;;  %v1042_v53 = vpop.permute.xlu0 %1041  ;;  %v1593_v34 = vsel %vm1552_vm2, %v1590_v17, %v1592_v43  ;;  %v1591_v54 = vsel %vm1552_vm2, %v1588_v32, %v1590_v17  ;;  %v1182_v0 = vmul.f32 %v4870_v58, %v4455_v49 }
 0x142   : > { %6694 = vst [vmem:[#allocation107_spill] sm:$0xff] %v4879_v45  ;;  %v1183_v20 = vmul.f32 %v4873_v61, %v4493_v16  ;;  %v1110_v3 = vrot.slane %v1039_v56, 6  ;;  %v1112_v28 = vrot.slane %v1042_v53, 6  ;;  %1654 = vrot.lane.b32.xlu0 %v1591_v54, %s3652_s10  ;;  %v1998_v1 = vrot.slane %v1237_v31, 2 }
 0x143   : > { %1656 = vrot.lane.b32.xlu1 %v1593_v34, %s3652_s10  ;;  %v2000_v44 = vrot.slane %v4867_v5, 2  ;;  %v1594_v45 = vrot.slane %v1182_v0, 2  ;;  %v1302_v32 = vmul.f32 %v4735_v51, %v4371_v41  ;;  %v4894_v17 = vmul.f32 %v4738_v42, %v4411_v29 }
 0x144   : > { %v1596_v59 = vrot.slane %v1183_v20, 2  ;;  %v4897_v62 = vsel %vm1064_vm1, %v1108_v19, %v1110_v3  ;;  %v4900_v56 = vsel %vm1064_vm1, %v1110_v3, %v1112_v28  ;;  %v4903_v53 = vsel %vm1552_vm2, %v1996_v4, %v1998_v1 }
 0x145   : > { %6695 = vst [vmem:[#allocation108_spill] sm:$0xff] %v4903_v53  ;;  %v4906_v31 = vsel %vm1552_vm2, %v1998_v1, %v2000_v44  ;;  %v1045_v5 = vpop.permute.xlu1 %1044  ;;  %v1048_v34 = vpop.permute.xlu0 %1047  ;;  %v1595_v54 = vsel %vm1552_vm2, %v1592_v43, %v1594_v45  ;;  %v1184_v42 = vmul.f32 %v4897_v62, %v4490_v35  ;;  %v1185_v19 = vmul.f32 %v4900_v56, %v4525_v27 }
 0x146   : > { %6696 = vst [vmem:[#allocation109_spill] sm:$0xff] %v4906_v31  ;;  %v1597_v51 = vsel %vm1552_vm2, %v1594_v45, %v1596_v59  ;;  %v1114_v0 = vrot.slane %v1045_v5, 6  ;;  %v1116_v20 = vrot.slane %v1048_v34, 6  ;;  %1658 = vrot.lane.b32.xlu0 %v1595_v54, %s3652_s10  ;;  %v2422_v4 = vrot.slane %v1302_v32, 2 }
 0x147   : > { %1660 = vrot.lane.b32.xlu1 %v1597_v51, %s3652_s10  ;;  %v2424_v3 = vrot.slane %v4894_v17, 2  ;;  %v1598_v1 = vrot.slane %v1184_v42, 2  ;;  %v1600_v31 = vrot.slane %v1185_v19, 2  ;;  %v1239_v43 = vmul.f32 %v4762_v18, %v4371_v41 }
 0x148   : > { %v4921_v45 = vmul.f32 %v4765_v48, %v4411_v29  ;;  %v4924_v53 = vsel %vm1064_vm1, %v1112_v28, %v1114_v0  ;;  %v4927_v5 = vsel %vm1064_vm1, %v1114_v0, %v1116_v20  ;;  %v4930_v34 = vsel %vm1552_vm2, %v2420_v7, %v2422_v4 }
 0x149   : > { %6697 = vst [vmem:[#allocation110_spill] sm:$0xff] %v4930_v34  ;;  %v4933_v32 = vsel %vm1552_vm2, %v2422_v4, %v2424_v3  ;;  %v1051_v17 = vpop.permute.xlu1 %1050  ;;  %v1054_v51 = vpop.permute.xlu0 %1053  ;;  %v1601_v54 = vsel %vm1552_vm2, %v1598_v1, %v1600_v31  ;;  %v1599_v42 = vsel %vm1552_vm2, %v1596_v59, %v1598_v1  ;;  %v1186_v19 = vmul.f32 %v4924_v53, %v4522_v37 }
 0x14a   : > { %6698 = vst [vmem:[#allocation111_spill] sm:$0xff] %v4933_v32  ;;  %v1187_v28 = vmul.f32 %v4927_v5, %v4537_v55  ;;  %v1118_v0 = vrot.slane %v1051_v17, 6  ;;  %v1120_v29 = vrot.slane %v1054_v51, 6  ;;  %1662 = vrot.lane.b32.xlu0 %v1599_v42, %s3652_s10  ;;  %v2002_v7 = vrot.slane %v1239_v43, 2 }
 0x14b   : > { %1664 = vrot.lane.b32.xlu1 %v1601_v54, %s3652_s10  ;;  %v2004_v4 = vrot.slane %v4921_v45, 2  ;;  %v1602_v32 = vrot.slane %v1186_v19, 2  ;;  %v1304_v59 = vmul.f32 %v4762_v18, %v4408_v40  ;;  %v1305_v1 = vmul.f32 %v4765_v48, %v4443_v33 }
 0x14c   : > { %v1604_v34 = vrot.slane %v1187_v28, 2  ;;  %v4949_v41 = vsel %vm1064_vm1, %v1116_v20, %v1118_v0  ;;  %v4952_v17 = vsel %vm1064_vm1, %v1118_v0, %v1120_v29  ;;  %v4955_v51 = vsel %vm1552_vm2, %v2000_v44, %v2002_v7 }
 0x14d   : > { %6699 = vst [vmem:[#allocation112_spill] sm:$0xff] %v4955_v51  ;;  %v4958_v43 = vsel %vm1552_vm2, %v2002_v7, %v2004_v4  ;;  %v1057_v45 = vpop.permute.xlu1 %1056  ;;  %v1060_v54 = vpop.permute.xlu0 %1059  ;;  %v1603_v18 = vsel %vm1552_vm2, %v1600_v31, %v1602_v32  ;;  %v1188_v48 = vmul.f32 %v4949_v41, %v4534_v6  ;;  %v1189_v20 = vmul.f32 %v4952_v17, %v4567_v47 }
 0x14e   : > { %6700 = vst [vmem:[#allocation113_spill] sm:$0xff] %v4958_v43  ;;  %v1605_v42 = vsel %vm1552_vm2, %v1602_v32, %v1604_v34  ;;  %v1122_v19 = vrot.slane %v1057_v45, 6  ;;  %v1124_v28 = vrot.slane %v1060_v54, 6  ;;  %1666 = vrot.lane.b32.xlu0 %v1603_v18, %s3652_s10  ;;  %v2426_v44 = vrot.slane %v1304_v59, 2 }
 0x14f   : > { %1668 = vrot.lane.b32.xlu1 %v1605_v42, %s3652_s10  ;;  %v2428_v0 = vrot.slane %v1305_v1, 2  ;;  %v1606_v7 = vrot.slane %v1188_v48, 2  ;;  %v1608_v43 = vrot.slane %v1189_v20, 2  ;;  %v1241_v51 = vmul.f32 %v4789_v30, %v4408_v40 }
 0x150   : > { %v1242_v31 = vmul.f32 %v4792_v60, %v4443_v33  ;;  %v4973_v32 = vsel %vm1064_vm1, %v1120_v29, %v1122_v19  ;;  %v4976_v45 = vsel %vm1064_vm1, %v1122_v19, %v1124_v28  ;;  %v4979_v54 = vsel %vm1552_vm2, %v2424_v3, %v2426_v44 }
 0x151   : > { %6701 = vst [vmem:[#allocation114_spill] sm:$0xff] %v4979_v54  ;;  %v4982_v59 = vsel %vm1552_vm2, %v2426_v44, %v2428_v0  ;;  %v1063_v1 = vpop.permute.xlu1 %1062  ;;  %v4984_v42 = vpop.permute.xlu0 %1423  ;;  %v1609_v18 = vsel %vm1552_vm2, %v1606_v7, %v1608_v43  ;;  %v1607_v48 = vsel %vm1552_vm2, %v1604_v34, %v1606_v7  ;;  %v1190_v29 = vmul.f32 %v4973_v32, %v4564_v25 }
 0x152   : > { %6702 = vst [vmem:[#allocation115_spill] sm:$0xff] %v4982_v59  ;;  %6703 = vst [vmem:[#allocation116_spill] sm:$0xff] %v4984_v42  ;;  %v1191_v20 = vmul.f32 %v4976_v45, %v4593_v57  ;;  %v4992_v19 = vrot.slane %v1063_v1, 6  ;;  %1670 = vrot.lane.b32.xlu0 %v1607_v48, %s3652_s10  ;;  %v2006_v3 = vrot.slane %v1241_v51, 2  ;;  %v2008_v54 = vrot.slane %v1242_v31, 2 }
 0x153   : > { %1672 = vrot.lane.b32.xlu1 %v1609_v18, %s3652_s10  ;;  %v1610_v44 = vrot.slane %v1190_v29, 2  ;;  %v1306_v42 = vmul.f32 %v4789_v30, %v4440_v15  ;;  %v1307_v18 = vmul.f32 %v4792_v60, %v4458_v38 }
 0x154   : > { %v1612_v59 = vrot.slane %v1191_v20, 2  ;;  %v5000_v34 = vsel %vm1064_vm1, %v1124_v28, %v4992_v19  ;;  %v1193_v7 = vmul.f32 %v4992_v19, %v4172_v39  ;;  %v5005_v1 = vsel %vm1552_vm2, %v2004_v4, %v2006_v3 }
 0x155   : > { %6704 = vst [vmem:[#allocation117_spill] sm:$0xff] %v5005_v1  ;;  %v5009_v51 = vpop.permute.xlu1 %1425  ;;  %v5011_v48 = vpop.permute.xlu0 %1427  ;;  %v1611_v30 = vsel %vm1552_vm2, %v1608_v43, %v1610_v44  ;;  %v1192_v28 = vmul.f32 %v5000_v34, %v4590_v52  ;;  %v5018_v29 = vsel %vm1552_vm2, %v2006_v3, %v2008_v54  ;;  %v2430_v60 = vrot.slane %v1306_v42, 2 }
 0x156   : > { %6705 = vst [vmem:[#allocation118_spill] sm:$0xff] %v5011_v48  ;;  %v1613_v31 = vsel %vm1552_vm2, %v1610_v44, %v1612_v59  ;;  %1674 = vrot.lane.b32.xlu0 %v1611_v30, %s3652_s10  ;;  %v1616_v4 = vrot.slane %v1193_v7, 2  ;;  %v2432_v1 = vrot.slane %v1307_v18, 2  ;;  %v1243_v48 = vmul.f32 %v4816_v12, %v4440_v15 }
 0x157   : > { %1676 = vrot.lane.b32.xlu1 %v1613_v31, %s3652_s10  ;;  %v1614_v20 = vrot.slane %v1192_v28, 2  ;;  %v1244_v43 = vmul.f32 %v4819_v36, %v4458_v38  ;;  %v5027_v44 = vsel %vm1552_vm2, %v2428_v0, %v2430_v60  ;;  %v1308_v3 = vmul.f32 %v4816_v12, %v4455_v49 }
 0x158   : > { %6706 = vst [vmem:[#allocation119_spill] sm:$0xff] %v5027_v44  ;;  %v1309_v31 = vmul.f32 %v4819_v36, %v4493_v16  ;;  %v1245_v42 = vmul.f32 %v4843_v13, %v4455_v49  ;;  %v5042_v0 = vsel %vm1552_vm2, %v2430_v60, %v2432_v1  ;;  %v2010_v44 = vrot.slane %v1243_v48, 2 }
 0x159   : > { %v5035_v7 = vpop.permute.xlu1 %1429  ;;  %v5037_v18 = vpop.permute.xlu0 %1431  ;;  %v1617_v30 = vsel %vm1552_vm2, %v1614_v20, %v1616_v4  ;;  %v1615_v28 = vsel %vm1552_vm2, %v1612_v59, %v1614_v20  ;;  %6709 = vst [vmem:[#allocation122_spill] sm:$0xff] %v5042_v0  ;;  %v1194_v12 = vmul.f32 %v4214_v21, %v4223_v22  ;;  %v1195_v36 = vmul.f32 %v4242_v8, %v4210_v63 }
 0x15a   : > { %6707 = vst [vmem:[#allocation120_spill] sm:$0xff] %v5035_v7  ;;  %6708 = vst [vmem:[#allocation121_spill] sm:$0xff] %v5037_v18  ;;  %1678 = vrot.lane.b32.xlu0 %v1615_v28, %s3652_s10  ;;  %v2012_v7 = vrot.slane %v1244_v43, 2  ;;  %v2434_v18 = vrot.slane %v1308_v3, 2  ;;  %v5051_v4 = vsel %vm1552_vm2, %v2008_v54, %v2010_v44  ;;  %v2436_v59 = vrot.slane %v1309_v31, 2 }
 0x15b   : > { %1680 = vrot.lane.b32.xlu1 %v1617_v30, %s3652_s10  ;;  %v2014_v20 = vrot.slane %v1245_v42, 2  ;;  %v1246_v48 = vmul.f32 %v4846_v50, %v4493_v16  ;;  %v1310_v30 = vmul.f32 %v4843_v13, %v4490_v35  ;;  %v1311_v43 = vmul.f32 %v4846_v50, %v4525_v27  ;;  %s6115_s10 = scalar_lea.vmem %s6434_s6, %s3512_s15 }
 0x15c   : > { %v5056_v60 = vsel %vm1552_vm2, %v2010_v44, %v2012_v7  ;;  %v5059_v0 = vsel %vm1552_vm2, %v2432_v1, %v2434_v18  ;;  %v5070_v31 = vsel %vm1552_vm2, %v2434_v18, %v2436_v59  ;;  %v1247_v1 = vmul.f32 %v4870_v58, %v4490_v35 }
 0x15d   : > { %6710 = vst [vmem:[#allocation123_spill] sm:$0xff] %v5059_v0  ;;  %v5065_v3 = vpop.permute.xlu1 %1433  ;;  %v5067_v54 = vpop.permute.xlu0 %1435  ;;  %6712 = vst [vmem:[#allocation125_spill] sm:$0xff] %v5070_v31  ;;  %v5073_v42 = vsel %vm1552_vm2, %v2012_v7, %v2014_v20  ;;  %v2016_v44 = vrot.slane %v1246_v48, 2  ;;  %v1196_v13 = vmul.f32 %v4240_v24, %v4249_v2  ;;  %v1197_v50 = vmul.f32 %v4265_v14, %v4246_v23 }
 0x15e   : > { %6711 = vst [vmem:[#allocation124_spill] sm:$0xff] %v5067_v54  ;;  %6713 = vst [vmem:[#allocation126_spill] sm:$0xff] %v5073_v42  ;;  %1746 = vrot.lane.b32.xlu0 %v1194_v12, %s3653_s18  ;;  %v2438_v18 = vrot.slane %v1310_v30, 2  ;;  %v2440_v28 = vrot.slane %v1311_v43, 2  ;;  %v2018_v48 = vrot.slane %v1247_v1, 2  ;;  %v1248_v54 = vmul.f32 %v4873_v61, %v4525_v27 }
 0x15f   : > { %1748 = vrot.lane.b32.xlu1 %v1195_v36, %s3653_s18  ;;  %v5084_v7 = vsel %vm1552_vm2, %v2014_v20, %v2016_v44  ;;  %v1312_v42 = vmul.f32 %v4870_v58, %v4522_v37  ;;  %v1249_v12 = vmul.f32 %v4897_v62, %v4522_v37  ;;  %v1250_v36 = vmul.f32 %v4900_v56, %v4537_v55 }
 0x160   : > { %v5091_v31 = vsel %vm1552_vm2, %v2436_v59, %v2438_v18  ;;  %v5094_v0 = vsel %vm1552_vm2, %v2438_v18, %v2440_v28  ;;  %v5105_v43 = vsel %vm1552_vm2, %v2016_v44, %v2018_v48  ;;  %v2020_v58 = vrot.slane %v1248_v54, 2 }
 0x161   : > { %6714 = vst [vmem:[#allocation127_spill] sm:$0xff] %v5091_v31  ;;  %6715 = vst [vmem:[#allocation128_spill] sm:$0xff] %v5094_v0  ;;  %v5100_v20 = vpop.permute.xlu1 %1437  ;;  %v5102_v30 = vpop.permute.xlu0 %1439  ;;  %v2442_v1 = vrot.slane %v1312_v42, 2  ;;  %v1313_v59 = vmul.f32 %v4873_v61, %v4537_v55  ;;  %v1198_v18 = vmul.f32 %v4263_v10, %v4275_v9  ;;  %v1199_v37 = vmul.f32 %v4297_v26, %v4272_v46 }
 0x162   : > { %6716 = vst [vmem:[#allocation129_spill] sm:$0xff] %v5100_v20  ;;  %6717 = vst [vmem:[#allocation130_spill] sm:$0xff] %v5102_v30  ;;  %1750 = vrot.lane.b32.xlu0 %v1196_v13, %s3653_s18  ;;  %v2022_v0 = vrot.slane %v1249_v12, 2  ;;  %v2024_v30 = vrot.slane %v1250_v36, 2  ;;  %v5116_v44 = vsel %vm1552_vm2, %v2018_v48, %v2020_v58  ;;  %v1314_v61 = vmul.f32 %v4897_v62, %v4534_v6  ;;  %v6820_v20 = vld [vmem:[#allocation96_spill] sm:$0xff] }
 0x163   : > { %6718 = vst [vmem:[#allocation131_spill] sm:$0xff] %v5105_v43  ;;  %1752 = vrot.lane.b32.xlu1 %v1197_v50, %s3653_s18  ;;  %6719 = vst [vmem:[#allocation132_spill] sm:$0xff] %v5116_v44  ;;  %v5119_v54 = vsel %vm1552_vm2, %v2440_v28, %v2442_v1  ;;  %v2444_v42 = vrot.slane %v1313_v59, 2  ;;  %v1251_v13 = vmul.f32 %v4924_v53, %v4534_v6  ;;  %v6727_v6 = vld [vmem:[#allocation17_spill] sm:$0xff] }
 0x164   : > { %6720 = vst [vmem:[#allocation133_spill] sm:$0xff] %v5119_v54  ;;  %v5124_v55 = vsel %vm1552_vm2, %v2020_v58, %v2022_v0  ;;  %v5127_v43 = vsel %vm1552_vm2, %v2022_v0, %v2024_v30  ;;  %v1252_v50 = vmul.f32 %v4927_v5, %v4567_v47  ;;  %v2446_v62 = vrot.slane %v1314_v61, 2  ;;  %v6726_v58 = vld [vmem:[#allocation19_spill] sm:$0xff] }
 0x165   : > { %6721 = vst [vmem:[#allocation134_spill] sm:$0xff] %v5124_v55  ;;  %6722 = vst [vmem:[#allocation135_spill] sm:$0xff] %v5127_v43  ;;  %v5133_v48 = vpop.permute.xlu1 %1441  ;;  %v5135_v28 = vpop.permute.xlu0 %1443  ;;  %v5138_v12 = vsel %vm1552_vm2, %v2442_v1, %v2444_v42  ;;  %v1315_v36 = vmul.f32 %v4900_v56, %v4567_v47  ;;  %v1316_v0 = vmul.f32 %v4924_v53, %v4564_v25  ;;  %v6728_v43 = vld [vmem:[#allocation23_spill] sm:$0xff] }
 0x166   : > { %6723 = vst [vmem:[#allocation136_spill] sm:$0xff] %v5133_v48  ;;  %6724 = vst [vmem:[#allocation137_spill] sm:$0xff] %v5135_v28  ;;  %v1200_v59 = vmul.f32 %v6726_v58, %v4290_v11  ;;  %v1201_v55 = vmul.f32 %v6728_v43, %v6727_v6  ;;  %1754 = vrot.lane.b32.xlu0 %v1198_v18, %s3653_s18  ;;  %v2026_v28 = vrot.slane %v1251_v13, 2  ;;  %v2028_v1 = vrot.slane %v1252_v50, 2 }
 0x167   : > { %6725 = vst [vmem:[#allocation138_spill] sm:$0xff] %v5138_v12  ;;  %1756 = vrot.lane.b32.xlu1 %v1199_v37, %s3653_s18  ;;  %v5151_v61 = vsel %vm1552_vm2, %v2444_v42, %v2446_v62  ;;  %v2448_v12 = vrot.slane %v1315_v36, 2  ;;  %v2450_v56 = vrot.slane %v1316_v0, 2  ;;  %v1253_v53 = vmul.f32 %v4949_v41, %v4564_v25  ;;  %v6736_v0 = vld [vmem:[#allocation25_spill] sm:$0xff]  ;;  %v6737_v25 = vld [vmem:[#allocation22_spill] sm:$0xff] }
 0x168   : > { %6729 = vst [vmem:[#allocation19_spill] sm:$0xff] %v5151_v61  ;;  %v5156_v47 = vsel %vm1552_vm2, %v2024_v30, %v2026_v28  ;;  %v5159_v54 = vsel %vm1552_vm2, %v2026_v28, %v2028_v1  ;;  %v1254_v37 = vmul.f32 %v4952_v17, %v4593_v57  ;;  %v1317_v18 = vmul.f32 %v4927_v5, %v4593_v57  ;;  %v6739_v61 = vld [vmem:[#allocation29_spill] sm:$0xff] }
 0x169   : > { %6730 = vst [vmem:[#allocation139_spill] sm:$0xff] %v5156_v47  ;;  %6731 = vst [vmem:[#allocation140_spill] sm:$0xff] %v5159_v54  ;;  %v5165_v13 = vpop.permute.xlu1 %1445  ;;  %v5167_v42 = vpop.permute.xlu0 %1447  ;;  %v5170_v50 = vsel %vm1552_vm2, %v2446_v62, %v2448_v12  ;;  %v5173_v36 = vsel %vm1552_vm2, %v2448_v12, %v2450_v56  ;;  %v2030_v30 = vrot.slane %v1253_v53, 2  ;;  %v1318_v28 = vmul.f32 %v4949_v41, %v4590_v52  ;;  %v6738_v47 = vld [vmem:[#allocation24_spill] sm:$0xff] }
 0x16a   : > { %6732 = vst [vmem:[#allocation141_spill] sm:$0xff] %v5165_v13  ;;  %6733 = vst [vmem:[#allocation142_spill] sm:$0xff] %v5167_v42  ;;  %v1202_v54 = vmul.f32 %v6737_v25, %v6736_v0  ;;  %v1203_v5 = vmul.f32 %v6739_v61, %v6738_v47  ;;  %1758 = vrot.lane.b32.xlu0 %v1200_v59, %s3653_s18  ;;  %v2032_v57 = vrot.slane %v1254_v37, 2  ;;  %v2452_v62 = vrot.slane %v1317_v18, 2  ;;  %v6743_v59 = vld [vmem:[#allocation4_spill] sm:$0xff] }
 0x16b   : > { %6734 = vst [vmem:[#allocation143_spill] sm:$0xff] %v5170_v50  ;;  %6735 = vst [vmem:[#allocation144_spill] sm:$0xff] %v5173_v36  ;;  %1760 = vrot.lane.b32.xlu1 %v1201_v55, %s3653_s18  ;;  %v5184_v50 = vsel %vm1552_vm2, %v2028_v1, %v2030_v30  ;;  %v2454_v12 = vrot.slane %v1318_v28, 2  ;;  %v1255_v53 = vmul.f32 %v4973_v32, %v4590_v52  ;;  %v6749_v13 = vld [vmem:[#allocation32_spill] sm:$0xff] }
 0x16c   : > { %6740 = vst [vmem:[#allocation22_spill] sm:$0xff] %v5184_v50  ;;  %v1256_v41 = vmul.f32 %v4976_v45, %v4172_v39  ;;  %v5191_v36 = vsel %vm1552_vm2, %v2030_v30, %v2032_v57  ;;  %v5194_v42 = vsel %vm1552_vm2, %v2450_v56, %v2452_v62  ;;  %v1319_v55 = vmul.f32 %v4952_v17, %v4172_v39  ;;  %v6747_v56 = vld [vmem:[#allocation33_spill] sm:$0xff] }
 0x16d   : > { %6741 = vst [vmem:[#allocation29_spill] sm:$0xff] %v5191_v36  ;;  %6742 = vst [vmem:[#allocation145_spill] sm:$0xff] %v5194_v42  ;;  %v1320_v1 = vmul.f32 %v4973_v32, %v6743_v59  ;;  %v5200_v37 = vpop.permute.xlu1 %1449  ;;  %v5202_v18 = vpop.permute.xlu0 %1451  ;;  %v5205_v28 = vsel %vm1552_vm2, %v2452_v62, %v2454_v12  ;;  %v2034_v52 = vrot.slane %v1255_v53, 2  ;;  %v1257_v30 = vmul.f32 %v5000_v34, %v6743_v59  ;;  %v6748_v42 = vld [vmem:[#allocation28_spill] sm:$0xff]  ;;  %v6750_v17 = vld [vmem:[#allocation37_spill] sm:$0xff] }
 0x16e   : > { %6744 = vst [vmem:[#allocation146_spill] sm:$0xff] %v5200_v37  ;;  %6745 = vst [vmem:[#allocation147_spill] sm:$0xff] %v5202_v18  ;;  %v2036_v50 = vrot.slane %v1256_v41, 2  ;;  %v1204_v36 = vmul.f32 %v6748_v42, %v6747_v56  ;;  %v1205_v39 = vmul.f32 %v6750_v17, %v6749_v13  ;;  %1762 = vrot.lane.b32.xlu0 %v1202_v54, %s3653_s18  ;;  %v2456_v32 = vrot.slane %v1319_v55, 2  ;;  %v6753_v59 = vld [vmem:[#allocation9_spill] sm:$0xff] }
 0x16f   : > { %6746 = vst [vmem:[#allocation148_spill] sm:$0xff] %v5205_v28  ;;  %1764 = vrot.lane.b32.xlu1 %v1203_v5, %s3653_s18  ;;  %v2458_v18 = vrot.slane %v1320_v1, 2  ;;  %v5216_v62 = vsel %vm1552_vm2, %v2032_v57, %v2034_v52  ;;  %v2038_v41 = vrot.slane %v1257_v30, 2  ;;  %v1258_v28 = vmul.f32 %v4992_v19, %v6753_v59  ;;  %v6756_v5 = vld [vmem:[#allocation8_spill] sm:$0xff] }
 0x170   : > { %6751 = vst [vmem:[#allocation149_spill] sm:$0xff] %v5216_v62  ;;  %v5219_v53 = vsel %vm1552_vm2, %v2034_v52, %v2036_v50  ;;  %v5224_v37 = vsel %vm1552_vm2, %v2454_v12, %v2456_v32  ;;  %v1321_v54 = vmul.f32 %v4976_v45, %v6753_v59  ;;  %v1322_v57 = vmul.f32 %v5000_v34, %v6756_v5  ;;  %v6762_v5 = vld [vmem:[#allocation35_spill] sm:$0xff]  ;;  %v6764_v62 = vld [vmem:[#allocation34_spill] sm:$0xff] }
 0x171   : > { %6752 = vst [vmem:[#allocation150_spill] sm:$0xff] %v5219_v53  ;;  %6754 = vst [vmem:[#allocation151_spill] sm:$0xff] %v5224_v37  ;;  %v5227_v48 = vsel %vm1552_vm2, %v2456_v32, %v2458_v18  ;;  %v5233_v55 = vpop.permute.xlu1 %1453  ;;  %v5235_v52 = vpop.permute.xlu0 %1455  ;;  %v5238_v1 = vsel %vm1552_vm2, %v2036_v50, %v2038_v41  ;;  %v2040_v30 = vrot.slane %v1258_v28, 2  ;;  %v6760_v53 = vld [vmem:[#allocation11_spill] sm:$0xff]  ;;  %v6765_v50 = vld [vmem:[#allocation41_spill] sm:$0xff] }
 0x172   : > { %6755 = vst [vmem:[#allocation152_spill] sm:$0xff] %v5227_v48  ;;  %6757 = vst [vmem:[#allocation153_spill] sm:$0xff] %v5233_v55  ;;  %v1323_v12 = vmul.f32 %v4992_v19, %v6760_v53  ;;  %1766 = vrot.lane.b32.xlu0 %v1204_v36, %s3653_s18  ;;  %v2460_v32 = vrot.slane %v1321_v54, 2  ;;  %v2462_v45 = vrot.slane %v1322_v57, 2  ;;  %v6763_v48 = vld [vmem:[#allocation36_spill] sm:$0xff] }
 0x173   : > { %6758 = vst [vmem:[#allocation154_spill] sm:$0xff] %v5235_v52  ;;  %6759 = vst [vmem:[#allocation155_spill] sm:$0xff] %v5238_v1  ;;  %1768 = vrot.lane.b32.xlu1 %v1205_v39, %s3653_s18  ;;  %v5245_v59 = vsel %vm1552_vm2, %v2038_v41, %v2040_v30  ;;  %v1206_v37 = vmul.f32 %v6763_v48, %v6762_v5  ;;  %v1207_v1 = vmul.f32 %v6765_v50, %v6764_v62  ;;  %v6771_v41 = vld [vmem:[#allocation43_spill] sm:$0xff]  ;;  %v6772_v54 = vld [vmem:[#allocation40_spill] sm:$0xff] }
 0x174   : > { %6761 = vst [vmem:[#allocation11_spill] sm:$0xff] %v5245_v59  ;;  %v2464_v34 = vrot.slane %v1323_v12, 2  ;;  %v5252_v28 = vsel %vm1552_vm2, %v2458_v18, %v2460_v32  ;;  %v5255_v19 = vsel %vm1552_vm2, %v2460_v32, %v2462_v45  ;;  %v1208_v57 = vmul.f32 %v6772_v54, %v6771_v41  ;;  %v6773_v18 = vld [vmem:[#allocation47_spill] sm:$0xff] }
 0x175   : > { %6766 = vst [vmem:[#allocation41_spill] sm:$0xff] %v5252_v28  ;;  %6767 = vst [vmem:[#allocation156_spill] sm:$0xff] %v5255_v19  ;;  %v5257_v39 = vpop.permute.xlu1 %1457  ;;  %v5259_v36 = vpop.permute.xlu0 %1459  ;;  %v1209_v30 = vmul.f32 %v6773_v18, %v4408_v40  ;;  %v6791_v52 = vld [vmem:[#allocation15_spill] sm:$0xff] }
 0x176   : > { %6768 = vst [vmem:[#allocation157_spill] sm:$0xff] %v5257_v39  ;;  %6769 = vst [vmem:[#allocation158_spill] sm:$0xff] %v5259_v36  ;;  %v5262_v53 = vsel %vm1552_vm2, %v2462_v45, %v2464_v34  ;;  %1770 = vrot.lane.b32.xlu0 %v1206_v37, %s3653_s18  ;;  %v6776_v45 = vld [vmem:[#allocation46_spill] sm:$0xff] }
 0x177   : > { %6770 = vst [vmem:[#allocation159_spill] sm:$0xff] %v5262_v53  ;;  %1772 = vrot.lane.b32.xlu1 %v1207_v1, %s3653_s18  ;;  %v1210_v34 = vmul.f32 %v6776_v45, %v4443_v33  ;;  %v6777_v1 = vld [vmem:[#allocation51_spill] sm:$0xff] }
 0x178   : > { %v1211_v37 = vmul.f32 %v6777_v1, %v4440_v15 }
 0x179   : > { %v5270_v12 = vpop.permute.xlu1 %1461  ;;  %v5272_v32 = vpop.permute.xlu0 %1463 }
 0x17a   : > { %6774 = vst [vmem:[#allocation40_spill] sm:$0xff] %v5270_v12  ;;  %6775 = vst [vmem:[#allocation47_spill] sm:$0xff] %v5272_v32  ;;  %1774 = vrot.lane.b32.xlu0 %v1208_v57, %s3653_s18  ;;  %v6780_v32 = vld [vmem:[#allocation50_spill] sm:$0xff] }
 0x17b   : > { %1776 = vrot.lane.b32.xlu1 %v1209_v30, %s3653_s18  ;;  %v1212_v28 = vmul.f32 %v6780_v32, %v4458_v38  ;;  %v6781_v30 = vld [vmem:[#allocation55_spill] sm:$0xff] }
 0x17c   : > { %v1213_v57 = vmul.f32 %v6781_v30, %v4455_v49 }
 0x17d   : > { %v5280_v19 = vpop.permute.xlu1 %1465  ;;  %v5282_v53 = vpop.permute.xlu0 %1467 }
 0x17e   : > { %6778 = vst [vmem:[#allocation46_spill] sm:$0xff] %v5280_v19  ;;  %6779 = vst [vmem:[#allocation51_spill] sm:$0xff] %v5282_v53  ;;  %1778 = vrot.lane.b32.xlu0 %v1210_v34, %s3653_s18  ;;  %v6784_v53 = vld [vmem:[#allocation54_spill] sm:$0xff] }
 0x17f   : > { %1780 = vrot.lane.b32.xlu1 %v1211_v37, %s3653_s18  ;;  %v1214_v19 = vmul.f32 %v6784_v53, %v4493_v16  ;;  %v6785_v37 = vld [vmem:[#allocation59_spill] sm:$0xff] }
 0x180   : > { %v1215_v34 = vmul.f32 %v6785_v37, %v4490_v35 }
 0x181   : > { %v5290_v59 = vpop.permute.xlu1 %1469  ;;  %v5292_v12 = vpop.permute.xlu0 %1471 }
 0x182   : > { %6782 = vst [vmem:[#allocation50_spill] sm:$0xff] %v5290_v59  ;;  %6783 = vst [vmem:[#allocation55_spill] sm:$0xff] %v5292_v12  ;;  %1782 = vrot.lane.b32.xlu0 %v1212_v28, %s3653_s18  ;;  %v6788_v12 = vld [vmem:[#allocation58_spill] sm:$0xff] }
 0x183   : > { %1784 = vrot.lane.b32.xlu1 %v1213_v57, %s3653_s18  ;;  %v1216_v59 = vmul.f32 %v6788_v12, %v4525_v27  ;;  %v1261_v27 = vmul.f32 %v4240_v24, %v4275_v9 }
 0x185   : > { %v5300_v36 = vpop.permute.xlu1 %1473  ;;  %v5302_v39 = vpop.permute.xlu0 %1475 }
 0x186   : > { %6786 = vst [vmem:[#allocation160_spill] sm:$0xff] %v5300_v36  ;;  %6787 = vst [vmem:[#allocation161_spill] sm:$0xff] %v5302_v39  ;;  %1786 = vrot.lane.b32.xlu0 %v1214_v19, %s3653_s18  ;;  %v6794_v19 = vld [vmem:[#allocation88_spill] sm:$0xff] }
 0x187   : > { %1788 = vrot.lane.b32.xlu1 %v1215_v34, %s3653_s18  ;;  %v6795_v34 = vld [vmem:[#allocation20_spill] sm:$0xff] }
 0x189   : > { %v5308_v57 = vpop.permute.xlu1 %1477  ;;  %v5310_v28 = vpop.permute.xlu0 %1479 }
 0x18a   : > { %6789 = vst [vmem:[#allocation162_spill] sm:$0xff] %v5308_v57  ;;  %6790 = vst [vmem:[#allocation163_spill] sm:$0xff] %v5310_v28  ;;  %1790 = vrot.lane.b32.xlu0 %v1216_v59, %s3653_s18  ;;  %v2830_v28 = vld [vmem:[%s6429_s1 + $0x20] sm:$0xf]  ;;  %v1259_v59 = vmul.f32 %v4214_v21, %v4249_v2  ;;  %v2827_v57 = vld [vmem:[%s6429_s1 + $0x8] sm:$0xff] }
 0x18b   : > { %1848 = vrot.lane.b32.xlu1 %v6791_v52, %s3654_s19  ;;  %3550 = vmatprep.subr.msk.mxu0 %vm2928_vm3, %v2830_v28 }
 0x18c   : > { %3608 = vmatprep.subr.msk.mxu1 %vm2928_vm3, %v2830_v28  ;;  %3551 = vmatpush3.msk.msra.mxu0 %vm2928_vm3, %v2830_v28 }
 0x18d   : > { %v5315_v36 = vpop.permute.xlu1 %1481  ;;  %v5317_v39 = vpop.permute.xlu0 %1483  ;;  %3613 = vmatpush3.msk.msra.mxu1 %vm2928_vm3, %v2830_v28  ;;  %v1260_v28 = vmul.f32 %v4242_v8, %v4246_v23 }
 0x18e   : > { %6792 = vst [vmem:[#allocation15_spill] sm:$0xff] %v5315_v36  ;;  %6793 = vst [vmem:[#allocation164_spill] sm:$0xff] %v5317_v39  ;;  %1850 = vrot.lane.b32.xlu0 %v6795_v34, %s3654_s19  ;;  %v2829_v34 = vld [vmem:[%s6429_s1 + $0x18] sm:$0xff]  ;;  %v2828_v36 = vld [vmem:[%s6429_s1 + $0x10] sm:$0xff] }
 0x18f   : > { %2042 = vrot.lane.b32.xlu1 %v6794_v19, %s3655_s20  ;;  %v6797_v19 = vld [vmem:[#allocation89_spill] sm:$0xff]  ;;  %3552 = vmatprep.subr.mxu0 %v2829_v34 }
 0x190   : > { %3609 = vmatprep.subr.mxu1 %v2829_v34  ;;  %3553 = vmatpush3.msra.mxu0 %v2829_v34 }
 0x191   : > { %v5328_v52 = vpop.permute.xlu1 %1485  ;;  %v5330_v39 = vpop.permute.xlu0 %1618  ;;  %3614 = vmatpush3.msra.mxu1 %v2829_v34  ;;  %3554 = vmatprep.subr.mxu0 %v2828_v36  ;;  %v2826_v34 = vld [vmem:[%s6429_s1] sm:$0xff] }
 0x192   : > { %6796 = vst [vmem:[#allocation88_spill] sm:$0xff] %v5328_v52  ;;  %2044 = vrot.lane.b32.xlu0 %v6797_v19, %s3655_s20  ;;  %3610 = vmatprep.subr.mxu1 %v2828_v36  ;;  %v6798_v19 = vld [vmem:[#allocation21_spill] sm:$0xff] }
 0x193   : > { %2170 = vrot.lane.b32.xlu1 %v1259_v59, %s3656_s23  ;;  %3555 = vmatpush3.msra.mxu0 %v2828_v36 }
 0x194   : > { %3615 = vmatpush3.msra.mxu1 %v2828_v36  ;;  %3556 = vmatprep.subr.mxu0 %v2827_v57 }
 0x195   : > { %v5343_v52 = vpop.permute.xlu1 %1620  ;;  %v5345_v59 = vpop.permute.xlu0 %1622  ;;  %3611 = vmatprep.subr.mxu1 %v2827_v57  ;;  %3557 = vmatpush3.msra.mxu0 %v2827_v57 }
 0x196   : > { %2172 = vrot.lane.b32.xlu0 %v1260_v28, %s3656_s23  ;;  %3616 = vmatpush3.msra.mxu1 %v2827_v57  ;;  %v6799_v28 = vld [vmem:[#allocation26_spill] sm:$0xff] }
 0x197   : > { %2272 = vrot.lane.b32.xlu1 %v6798_v19, %s3657_s30  ;;  %3558 = vmatprep.subr.mxu0 %v2826_v34  ;;  %v6800_v57 = vld [vmem:[#allocation90_spill] sm:$0xff] }
 0x198   : > { %3612 = vmatprep.subr.mxu1 %v2826_v34  ;;  %3559 = vmatpush3.msra.mxu0 %v2826_v34 }
 0x199   : > { %v5356_v55 = vpop.permute.xlu1 %1624  ;;  %v5358_v12 = vpop.permute.xlu0 %1626  ;;  %3617 = vmatpush3.msra.mxu1 %v2826_v34  ;;  %v6804_v34 = vld [vmem:[#allocation92_spill] sm:$0xff] }
 0x19a   : > { %1852 = vrot.lane.b32.xlu0 %v6798_v19, %s3654_s19  ;;  %v6803_v19 = vld [vmem:[#allocation91_spill] sm:$0xff] }
 0x19b   : > { %2274 = vrot.lane.b32.xlu1 %v6799_v28, %s3657_s30 }
 0x19d   : > { %v5364_v36 = vpop.permute.xlu1 %1628  ;;  %v5366_v37 = vpop.permute.xlu0 %1630 }
 0x19e   : > { %2466 = vrot.lane.b32.xlu0 %v6800_v57, %s3658_s14  ;;  %v6807_v57 = vld [vmem:[#allocation93_spill] sm:$0xff] }
 0x19f   : > { %1854 = vrot.lane.b32.xlu1 %v6799_v28, %s3654_s19 }
 0x1a1   : > { %v5372_v44 = vpop.permute.xlu1 %1632  ;;  %v5374_v53 = vpop.permute.xlu0 %1634 }
 0x1a2   : > { %6801 = vst [vmem:[#allocation20_spill] sm:$0xff] %v5372_v44  ;;  %6802 = vst [vmem:[#allocation89_spill] sm:$0xff] %v5374_v53  ;;  %2046 = vrot.lane.b32.xlu0 %v6804_v34, %s3655_s20  ;;  %v1262_v53 = vmul.f32 %v4265_v14, %v4272_v46  ;;  %v6810_v34 = vld [vmem:[#allocation27_spill] sm:$0xff] }
 0x1a3   : > { %2468 = vrot.lane.b32.xlu1 %v6803_v19, %s3658_s14 }
 0x1a5   : > { %v5382_v31 = vpop.permute.xlu1 %1636  ;;  %v5384_v28 = vpop.permute.xlu0 %1638 }
 0x1a6   : > { %6805 = vst [vmem:[#allocation21_spill] sm:$0xff] %v5382_v31  ;;  %6806 = vst [vmem:[#allocation26_spill] sm:$0xff] %v5384_v28  ;;  %2048 = vrot.lane.b32.xlu0 %v6807_v57, %s3655_s20 }
 0x1a7   : > { %2174 = vrot.lane.b32.xlu1 %v1261_v27, %s3656_s23  ;;  %v6813_v27 = vld [vmem:[#allocation30_spill] sm:$0xff] }
 0x1a9   : > { %v5391_v44 = vpop.permute.xlu1 %1640  ;;  %v5393_v19 = vpop.permute.xlu0 %1642 }
 0x1aa   : > { %6808 = vst [vmem:[#allocation90_spill] sm:$0xff] %v5391_v44  ;;  %6809 = vst [vmem:[#allocation91_spill] sm:$0xff] %v5393_v19  ;;  %2176 = vrot.lane.b32.xlu0 %v1262_v53, %s3656_s23  ;;  %v6816_v19 = vld [vmem:[#allocation94_spill] sm:$0xff] }
 0x1ab   : > { %2276 = vrot.lane.b32.xlu1 %v6810_v34, %s3657_s30 }
 0x1ad   : > { %v5398_v31 = vpop.permute.xlu1 %1644  ;;  %v5400_v28 = vpop.permute.xlu0 %1646 }
 0x1ae   : > { %6811 = vst [vmem:[#allocation92_spill] sm:$0xff] %v5398_v31  ;;  %6812 = vst [vmem:[#allocation93_spill] sm:$0xff] %v5400_v28  ;;  %1856 = vrot.lane.b32.xlu0 %v6810_v34, %s3654_s19  ;;  %v6819_v28 = vld [vmem:[#allocation95_spill] sm:$0xff]  ;;  %v1263_v34 = vmul.f32 %v4263_v10, %v4290_v11 }
 0x1af   : > { %2278 = vrot.lane.b32.xlu1 %v6813_v27, %s3657_s30 }
 0x1b1   : > { %v5406_v57 = vpop.permute.xlu1 %1648  ;;  %v5408_v44 = vpop.permute.xlu0 %1650 }
 0x1b2   : > { %6814 = vst [vmem:[#allocation27_spill] sm:$0xff] %v5406_v57  ;;  %6815 = vst [vmem:[#allocation30_spill] sm:$0xff] %v5408_v44  ;;  %2470 = vrot.lane.b32.xlu0 %v6816_v19, %s3658_s14  ;;  %v6823_v19 = vld [vmem:[#allocation97_spill] sm:$0xff] }
 0x1b3   : > { %1858 = vrot.lane.b32.xlu1 %v6813_v27, %s3654_s19  ;;  %v1264_v27 = vmul.f32 %v4297_v26, %v6727_v6  ;;  %v6845_v6 = vld [vmem:[#allocation104_spill] sm:$0xff] }
 0x1b5   : > { %v5414_v53 = vpop.permute.xlu1 %1652  ;;  %v5416_v31 = vpop.permute.xlu0 %1654 }
 0x1b6   : > { %6817 = vst [vmem:[#allocation94_spill] sm:$0xff] %v5414_v53  ;;  %6818 = vst [vmem:[#allocation165_spill] sm:$0xff] %v5416_v31  ;;  %2050 = vrot.lane.b32.xlu0 %v6820_v20, %s3655_s20  ;;  %v6826_v20 = vld [vmem:[#allocation31_spill] sm:$0xff]  ;;  %v6836_v53 = vld [vmem:[#allocation100_spill] sm:$0xff] }
 0x1b7   : > { %2472 = vrot.lane.b32.xlu1 %v6819_v28, %s3658_s14 }
 0x1b9   : > { %v5424_v44 = vpop.permute.xlu1 %1656  ;;  %v5426_v57 = vpop.permute.xlu0 %1658 }
 0x1ba   : > { %6821 = vst [vmem:[#allocation95_spill] sm:$0xff] %v5424_v44  ;;  %6822 = vst [vmem:[#allocation96_spill] sm:$0xff] %v5426_v57  ;;  %2052 = vrot.lane.b32.xlu0 %v6823_v19, %s3655_s20 }
 0x1bb   : > { %2178 = vrot.lane.b32.xlu1 %v1263_v34, %s3656_s23  ;;  %v6829_v34 = vld [vmem:[#allocation38_spill] sm:$0xff] }
 0x1bd   : > { %v5433_v31 = vpop.permute.xlu1 %1660  ;;  %v5435_v28 = vpop.permute.xlu0 %1662 }
 0x1be   : > { %6824 = vst [vmem:[#allocation97_spill] sm:$0xff] %v5433_v31  ;;  %6825 = vst [vmem:[#allocation166_spill] sm:$0xff] %v5435_v28  ;;  %2180 = vrot.lane.b32.xlu0 %v1264_v27, %s3656_s23  ;;  %v6832_v28 = vld [vmem:[#allocation98_spill] sm:$0xff] }
 0x1bf   : > { %2280 = vrot.lane.b32.xlu1 %v6826_v20, %s3657_s30 }
 0x1c1   : > { %v5440_v44 = vpop.permute.xlu1 %1664  ;;  %v5442_v57 = vpop.permute.xlu0 %1666 }
 0x1c2   : > { %6827 = vst [vmem:[#allocation31_spill] sm:$0xff] %v5440_v44  ;;  %6828 = vst [vmem:[#allocation167_spill] sm:$0xff] %v5442_v57  ;;  %1860 = vrot.lane.b32.xlu0 %v6826_v20, %s3654_s19  ;;  %v6835_v57 = vld [vmem:[#allocation99_spill] sm:$0xff]  ;;  %v1265_v20 = vmul.f32 %v6726_v58, %v6736_v0 }
 0x1c3   : > { %2282 = vrot.lane.b32.xlu1 %v6829_v34, %s3657_s30  ;;  %v6844_v0 = vld [vmem:[#allocation103_spill] sm:$0xff] }
 0x1c5   : > { %v5448_v19 = vpop.permute.xlu1 %1668  ;;  %v5450_v31 = vpop.permute.xlu0 %1670 }
 0x1c6   : > { %6830 = vst [vmem:[#allocation38_spill] sm:$0xff] %v5448_v19  ;;  %6831 = vst [vmem:[#allocation168_spill] sm:$0xff] %v5450_v31  ;;  %2474 = vrot.lane.b32.xlu0 %v6832_v28, %s3658_s14  ;;  %v6839_v28 = vld [vmem:[#allocation101_spill] sm:$0xff] }
 0x1c7   : > { %1862 = vrot.lane.b32.xlu1 %v6829_v34, %s3654_s19  ;;  %v1266_v34 = vmul.f32 %v6728_v43, %v6738_v47 }
 0x1c9   : > { %v5456_v27 = vpop.permute.xlu1 %1672  ;;  %v5458_v44 = vpop.permute.xlu0 %1674 }
 0x1ca   : > { %6833 = vst [vmem:[#allocation98_spill] sm:$0xff] %v5456_v27  ;;  %6834 = vst [vmem:[#allocation169_spill] sm:$0xff] %v5458_v44  ;;  %2054 = vrot.lane.b32.xlu0 %v6836_v53, %s3655_s20  ;;  %v6841_v53 = vld [vmem:[#allocation39_spill] sm:$0xff]  ;;  %v6843_v27 = vld [vmem:[#allocation102_spill] sm:$0xff] }
 0x1cb   : > { %2476 = vrot.lane.b32.xlu1 %v6835_v57, %s3658_s14 }
 0x1cd   : > { %v5466_v31 = vpop.permute.xlu1 %1676  ;;  %v5468_v19 = vpop.permute.xlu0 %1678 }
 0x1ce   : > { %6837 = vst [vmem:[#allocation99_spill] sm:$0xff] %v5466_v31  ;;  %6838 = vst [vmem:[#allocation100_spill] sm:$0xff] %v5468_v19  ;;  %2056 = vrot.lane.b32.xlu0 %v6839_v28, %s3655_s20 }
 0x1cf   : > { %2182 = vrot.lane.b32.xlu1 %v1265_v20, %s3656_s23  ;;  %v6842_v20 = vld [vmem:[#allocation44_spill] sm:$0xff] }
 0x1d1   : > { %v5475_v44 = vpop.permute.xlu1 %1680  ;;  %v5477_v57 = vpop.permute.xlu0 %1746 }
 0x1d2   : > { %6840 = vst [vmem:[#allocation101_spill] sm:$0xff] %v5475_v44  ;;  %2184 = vrot.lane.b32.xlu0 %v1266_v34, %s3656_s23 }
 0x1d3   : > { %2284 = vrot.lane.b32.xlu1 %v6841_v53, %s3657_s30 }
 0x1d5   : > { %v5482_v31 = vpop.permute.xlu1 %1748  ;;  %v5484_v19 = vpop.permute.xlu0 %1750 }
 0x1d6   : > { %1864 = vrot.lane.b32.xlu0 %v6841_v53, %s3654_s19  ;;  %v1267_v53 = vmul.f32 %v6737_v25, %v6747_v56 }
 0x1d7   : > { %2286 = vrot.lane.b32.xlu1 %v6842_v20, %s3657_s30 }
 0x1d9   : > { %v5490_v28 = vpop.permute.xlu1 %1752  ;;  %v5492_v44 = vpop.permute.xlu0 %1754 }
 0x1da   : > { %2478 = vrot.lane.b32.xlu0 %v6843_v27, %s3658_s14  ;;  %v6847_v27 = vld [vmem:[#allocation105_spill] sm:$0xff] }
 0x1db   : > { %1866 = vrot.lane.b32.xlu1 %v6842_v20, %s3654_s19  ;;  %v1268_v20 = vmul.f32 %v6739_v61, %v6749_v13 }
 0x1dd   : > { %v5498_v34 = vpop.permute.xlu1 %1756  ;;  %v5500_v47 = vpop.permute.xlu0 %1758 }
 0x1de   : > { %2058 = vrot.lane.b32.xlu0 %v6845_v6, %s3655_s20  ;;  %v6850_v6 = vld [vmem:[#allocation45_spill] sm:$0xff] }
 0x1df   : > { %2480 = vrot.lane.b32.xlu1 %v6844_v0, %s3658_s14 }
 0x1e1   : > { %v5508_v11 = vpop.permute.xlu1 %1760  ;;  %v5510_v43 = vpop.permute.xlu0 %1762 }
 0x1e2   : > { %6846 = vst [vmem:[#allocation39_spill] sm:$0xff] %v5510_v43  ;;  %2060 = vrot.lane.b32.xlu0 %v6847_v27, %s3655_s20 }
 0x1e3   : > { %2186 = vrot.lane.b32.xlu1 %v1267_v53, %s3656_s23  ;;  %v6853_v53 = vld [vmem:[#allocation48_spill] sm:$0xff] }
 0x1e5   : > { %v5517_v46 = vpop.permute.xlu1 %1764  ;;  %v5519_v0 = vpop.permute.xlu0 %1766 }
 0x1e6   : > { %6848 = vst [vmem:[#allocation44_spill] sm:$0xff] %v5517_v46  ;;  %6849 = vst [vmem:[#allocation102_spill] sm:$0xff] %v5519_v0  ;;  %2188 = vrot.lane.b32.xlu0 %v1268_v20, %s3656_s23  ;;  %v6856_v0 = vld [vmem:[#allocation106_spill] sm:$0xff]  ;;  %v6860_v46 = vld [vmem:[#allocation108_spill] sm:$0xff] }
 0x1e7   : > { %2288 = vrot.lane.b32.xlu1 %v6850_v6, %s3657_s30 }
 0x1e9   : > { %v5524_v56 = vpop.permute.xlu1 %1768  ;;  %v5526_v43 = vpop.permute.xlu0 %1770 }
 0x1ea   : > { %6851 = vst [vmem:[#allocation103_spill] sm:$0xff] %v5524_v56  ;;  %6852 = vst [vmem:[#allocation104_spill] sm:$0xff] %v5526_v43  ;;  %1868 = vrot.lane.b32.xlu0 %v6850_v6, %s3654_s19  ;;  %v6859_v43 = vld [vmem:[#allocation107_spill] sm:$0xff]  ;;  %v1269_v6 = vmul.f32 %v6748_v42, %v6762_v5 }
 0x1eb   : > { %2290 = vrot.lane.b32.xlu1 %v6853_v53, %s3657_s30 }
 0x1ed   : > { %v5532_v27 = vpop.permute.xlu1 %1772  ;;  %v5534_v13 = vpop.permute.xlu0 %1774 }
 0x1ee   : > { %6854 = vst [vmem:[#allocation105_spill] sm:$0xff] %v5532_v27  ;;  %6855 = vst [vmem:[#allocation45_spill] sm:$0xff] %v5534_v13  ;;  %2482 = vrot.lane.b32.xlu0 %v6856_v0, %s3658_s14  ;;  %v6863_v0 = vld [vmem:[#allocation109_spill] sm:$0xff] }
 0x1ef   : > { %1870 = vrot.lane.b32.xlu1 %v6853_v53, %s3654_s19  ;;  %v1270_v53 = vmul.f32 %v6750_v17, %v6764_v62  ;;  %v1271_v62 = vmul.f32 %v6763_v48, %v6771_v41 }
 0x1f1   : > { %v5540_v20 = vpop.permute.xlu1 %1776  ;;  %v5542_v56 = vpop.permute.xlu0 %1778 }
 0x1f2   : > { %6857 = vst [vmem:[#allocation48_spill] sm:$0xff] %v5540_v20  ;;  %6858 = vst [vmem:[#allocation106_spill] sm:$0xff] %v5542_v56  ;;  %2062 = vrot.lane.b32.xlu0 %v6860_v46, %s3655_s20  ;;  %v6866_v46 = vld [vmem:[#allocation49_spill] sm:$0xff] }
 0x1f3   : > { %2484 = vrot.lane.b32.xlu1 %v6859_v43, %s3658_s14 }
 0x1f5   : > { %v5550_v13 = vpop.permute.xlu1 %1780  ;;  %v5552_v27 = vpop.permute.xlu0 %1782 }
 0x1f6   : > { %6861 = vst [vmem:[#allocation107_spill] sm:$0xff] %v5550_v13  ;;  %6862 = vst [vmem:[#allocation108_spill] sm:$0xff] %v5552_v27  ;;  %2064 = vrot.lane.b32.xlu0 %v6863_v0, %s3655_s20 }
 0x1f7   : > { %2190 = vrot.lane.b32.xlu1 %v1269_v6, %s3656_s23  ;;  %v6869_v6 = vld [vmem:[#allocation52_spill] sm:$0xff] }
 0x1f9   : > { %v5559_v56 = vpop.permute.xlu1 %1784  ;;  %v5561_v43 = vpop.permute.xlu0 %1786 }
 0x1fa   : > { %6864 = vst [vmem:[#allocation109_spill] sm:$0xff] %v5559_v56  ;;  %6865 = vst [vmem:[#allocation170_spill] sm:$0xff] %v5561_v43  ;;  %2192 = vrot.lane.b32.xlu0 %v1270_v53, %s3656_s23  ;;  %v6870_v43 = vld [vmem:[#allocation110_spill] sm:$0xff] }
 0x1fb   : > { %2292 = vrot.lane.b32.xlu1 %v6866_v46, %s3657_s30 }
 0x1fd   : > { %v5566_v13 = vpop.permute.xlu1 %1788  ;;  %v5568_v27 = vpop.permute.xlu0 %1790 }
 0x1fe   : > { %6867 = vst [vmem:[#allocation49_spill] sm:$0xff] %v5566_v13  ;;  %6868 = vst [vmem:[#allocation171_spill] sm:$0xff] %v5568_v27  ;;  %1872 = vrot.lane.b32.xlu0 %v6866_v46, %s3654_s19  ;;  %v6871_v13 = vld [vmem:[#allocation111_spill] sm:$0xff]  ;;  %v6872_v27 = vld [vmem:[#allocation112_spill] sm:$0xff] }
 0x1ff   : > { %2294 = vrot.lane.b32.xlu1 %v6869_v6, %s3657_s30  ;;  %v6873_v46 = vld [vmem:[#allocation6_spill] sm:$0xff] }
 0x200   : > { %v936_v5 = vmul.f32 %v4214_v21, %v6873_v46 }
 0x201   : > { %v1849_v0 = vpop.permute.xlu1 %1848  ;;  %v1851_v20 = vpop.permute.xlu0 %1850 }
 0x202   : > { %2486 = vrot.lane.b32.xlu0 %v6870_v43, %s3658_s14  ;;  %v6874_v43 = vld [vmem:[#allocation113_spill] sm:$0xff] }
 0x203   : > { %1874 = vrot.lane.b32.xlu1 %v6869_v6, %s3654_s19 }
 0x205   : > { %v2043_v56 = vpop.permute.xlu1 %2042  ;;  %v2045_v53 = vpop.permute.xlu0 %2044 }
 0x206   : > { %2066 = vrot.lane.b32.xlu0 %v6872_v27, %s3655_s20  ;;  %v1272_v27 = vmul.f32 %v6765_v50, %v4408_v40 }
 0x207   : > { %2488 = vrot.lane.b32.xlu1 %v6871_v13, %s3658_s14  ;;  %v6875_v13 = vld [vmem:[#allocation116_spill] sm:$0xff] }
 0x208   : > { %v2563_v42 = vsel %vm2562_vm4, %v936_v5, %v6875_v13 }
 0x209   : > { %v2171_v6 = vpop.permute.xlu1 %2170  ;;  %v2173_v17 = vpop.permute.xlu0 %2172  ;;  %v2596_v41 = vsel %vm2595_vm5, %v2563_v42, %v5330_v39  ;;  %v6877_v39 = vld [vmem:[#allocation7_spill] sm:$0xff] }
 0x20a   : > { %2068 = vrot.lane.b32.xlu0 %v6874_v43, %s3655_s20  ;;  %v2629_v21 = vsel %vm2628_vm6, %v2596_v41, %v5477_v57  ;;  %v6876_v43 = vld [vmem:[#allocation53_spill] sm:$0xff]  ;;  %v937_v41 = vmul.f32 %v4242_v8, %v6877_v39  ;;  %v6880_v39 = vld [vmem:[#allocation115_spill] sm:$0xff] }
 0x20b   : > { %2194 = vrot.lane.b32.xlu1 %v1271_v62, %s3656_s23  ;;  %v2662_v48 = vsel %vm2661_vm7, %v2629_v21, %v1849_v0  ;;  %v6878_v0 = vld [vmem:[#allocation56_spill] sm:$0xff] }
 0x20c   : > { %v2695_v5 = vsel %vm2694_vm8, %v2662_v48, %v2043_v56  ;;  %v2564_v48 = vsel %vm2562_vm4, %v937_v41, %v5009_v51  ;;  %v1273_v41 = vmul.f32 %v6772_v54, %v4443_v33 }
 0x20d   : > { %v2273_v46 = vpop.permute.xlu1 %2272  ;;  %v1853_v62 = vpop.permute.xlu0 %1852  ;;  %v2728_v42 = vsel %vm2727_vm9, %v2695_v5, %v2171_v6  ;;  %v2597_v8 = vsel %vm2595_vm5, %v2564_v48, %v5343_v52 }
 0x20e   : > { %2196 = vrot.lane.b32.xlu0 %v1272_v27, %s3656_s23  ;;  %v2761_v57 = vsel %vm2760_vm10, %v2728_v42, %v2273_v46  ;;  %v2630_v56 = vsel %vm2628_vm6, %v2597_v8, %v5482_v31 }
 0x20f   : > { %2296 = vrot.lane.b32.xlu1 %v6876_v43, %s3657_s30  ;;  %v2663_v46 = vsel %vm2661_vm7, %v2630_v56, %v1851_v20  ;;  %v6881_v20 = vld [vmem:[#allocation117_spill] sm:$0xff] }
 0x210   : > { %v2696_v51 = vsel %vm2694_vm8, %v2663_v46, %v2045_v53  ;;  %v6883_v46 = vld [vmem:[#allocation57_spill] sm:$0xff] }
 0x211   : > { %v2275_v13 = vpop.permute.xlu1 %2274  ;;  %v2467_v40 = vpop.permute.xlu0 %2466 }
 0x212   : > { %1876 = vrot.lane.b32.xlu0 %v6876_v43, %s3654_s19  ;;  %v2794_v27 = vsel %vm2793_vm11, %v2761_v57, %v2467_v40  ;;  %v6879_v40 = vld [vmem:[#allocation114_spill] sm:$0xff]  ;;  %v2729_v43 = vsel %vm2727_vm9, %v2696_v51, %v2173_v17  ;;  %v938_v17 = vmul.f32 %v4240_v24, %v4223_v22  ;;  %v939_v51 = vmul.f32 %v4265_v14, %v4210_v63 }
 0x213   : > { %2298 = vrot.lane.b32.xlu1 %v6878_v0, %s3657_s30  ;;  %3560 = vmatprep.mubr.msk.f32.mxu0 %vm2831_vm12, %v2794_v27  ;;  %v2762_v5 = vsel %vm2760_vm10, %v2729_v43, %v2275_v13  ;;  %v6882_v13 = vld [vmem:[#allocation118_spill] sm:$0xff]  ;;  %v1274_v27 = vmul.f32 %v6773_v18, %v4440_v15 }
 0x215   : > { %v1855_v6 = vpop.permute.xlu1 %1854  ;;  %v2047_v21 = vpop.permute.xlu0 %2046 }
 0x216   : > { %2490 = vrot.lane.b32.xlu0 %v6879_v40, %s3658_s14 }
 0x217   : > { %1878 = vrot.lane.b32.xlu1 %v6878_v0, %s3654_s19  ;;  %v2565_v0 = vsel %vm2562_vm4, %v938_v17, %v6882_v13 }
 0x218   : > { %v2598_v48 = vsel %vm2595_vm5, %v2565_v0, %v5345_v59 }
 0x219   : > { %v2469_v52 = vpop.permute.xlu1 %2468  ;;  %v2049_v42 = vpop.permute.xlu0 %2048  ;;  %v2631_v8 = vsel %vm2628_vm6, %v2598_v48, %v5484_v19 }
 0x21a   : > { %v2795_v31 = vsel %vm2793_vm11, %v2762_v5, %v2469_v52  ;;  %2070 = vrot.lane.b32.xlu0 %v6881_v20, %s3655_s20  ;;  %v2664_v56 = vsel %vm2661_vm7, %v2631_v8, %v1853_v62  ;;  %v6884_v62 = vld [vmem:[#allocation60_spill] sm:$0xff]  ;;  %v6888_v8 = vld [vmem:[#allocation121_spill] sm:$0xff] }
 0x21b   : > { %2492 = vrot.lane.b32.xlu1 %v6880_v39, %s3658_s14  ;;  %3561 = vmatmul.mubr.msk.f32.vlgmr.msra.gmra.mxu0 %vm2831_vm12, %v2795_v31  ;;  %v6885_v52 = vld [vmem:[#allocation120_spill] sm:$0xff] }
 0x21d   : > { %v2175_v53 = vpop.permute.xlu1 %2174  ;;  %v2177_v57 = vpop.permute.xlu0 %2176 }
 0x21e   : > { %2072 = vrot.lane.b32.xlu0 %v5018_v29, %s3655_s20  ;;  %v2697_v29 = vsel %vm2694_vm8, %v2664_v56, %v2047_v21  ;;  %v2566_v21 = vsel %vm2562_vm4, %v939_v51, %v6885_v52 }
 0x21f   : > { %2198 = vrot.lane.b32.xlu1 %v1273_v41, %s3656_s23  ;;  %v2730_v40 = vsel %vm2727_vm9, %v2697_v29, %v2175_v53  ;;  %v2599_v63 = vsel %vm2595_vm5, %v2566_v21, %v5356_v55  ;;  %v6886_v41 = vld [vmem:[#allocation119_spill] sm:$0xff] }
 0x220   : > { %v2632_v14 = vsel %vm2628_vm6, %v2599_v63, %v5490_v28  ;;  %v6891_v63 = vld [vmem:[#allocation123_spill] sm:$0xff] }
 0x221   : > { %v2277_v22 = vpop.permute.xlu1 %2276  ;;  %v1857_v24 = vpop.permute.xlu0 %1856  ;;  %v2665_v20 = vsel %vm2661_vm7, %v2632_v14, %v1855_v6  ;;  %v1275_v6 = vmul.f32 %v6776_v45, %v4458_v38 }
 0x222   : > { %2200 = vrot.lane.b32.xlu0 %v1274_v27, %s3656_s23  ;;  %v2763_v59 = vsel %vm2760_vm10, %v2730_v40, %v2277_v22  ;;  %v2698_v17 = vsel %vm2694_vm8, %v2665_v20, %v2049_v42  ;;  %v6887_v27 = vld [vmem:[#allocation122_spill] sm:$0xff]  ;;  %v940_v42 = vmul.f32 %v4263_v10, %v4249_v2  ;;  %v6889_v40 = vld [vmem:[#allocation61_spill] sm:$0xff] }
 0x223   : > { %2300 = vrot.lane.b32.xlu1 %v6883_v46, %s3657_s30  ;;  %v2731_v53 = vsel %vm2727_vm9, %v2698_v17, %v2177_v57  ;;  %v1277_v17 = vmul.f32 %v6780_v32, %v4493_v16 }
 0x224   : > { %v2567_v22 = vsel %vm2562_vm4, %v940_v42, %v6888_v8 }
 0x225   : > { %v2279_v43 = vpop.permute.xlu1 %2278  ;;  %v2471_v19 = vpop.permute.xlu0 %2470  ;;  %v2600_v56 = vsel %vm2595_vm5, %v2567_v22, %v5358_v12  ;;  %v6896_v22 = vld [vmem:[#allocation16_spill] sm:$0xff] }
 0x226   : > { %v2796_v5 = vsel %vm2793_vm11, %v2763_v59, %v2471_v19  ;;  %1880 = vrot.lane.b32.xlu0 %v6883_v46, %s3654_s19  ;;  %v2764_v13 = vsel %vm2760_vm10, %v2731_v53, %v2279_v43  ;;  %v2633_v46 = vsel %vm2628_vm6, %v2600_v56, %v5492_v44  ;;  %v941_v59 = vmul.f32 %v4297_v26, %v4246_v23 }
 0x227   : > { %2302 = vrot.lane.b32.xlu1 %v6884_v62, %s3657_s30  ;;  %3563 = vmatprep.mubr.msk.f32.mxu0 %vm2831_vm12, %v2796_v5  ;;  %v2666_v29 = vsel %vm2661_vm7, %v2633_v46, %v1857_v24  ;;  %v6890_v24 = vld [vmem:[#allocation68_spill] sm:$0xff]  ;;  %v942_v53 = vmul.f32 %v6726_v58, %v4275_v9 }
 0x228   : > { %v2568_v5 = vsel %vm2562_vm4, %v941_v59, %v5065_v3 }
 0x229   : > { %v1859_v31 = vpop.permute.xlu1 %1858  ;;  %v2051_v39 = vpop.permute.xlu0 %2050  ;;  %v2601_v23 = vsel %vm2595_vm5, %v2568_v5, %v5364_v36 }
 0x22a   : > { %2494 = vrot.lane.b32.xlu0 %v6886_v41, %s3658_s14  ;;  %v2634_v26 = vsel %vm2628_vm6, %v2601_v23, %v5498_v34  ;;  %v6892_v41 = vld [vmem:[#allocation125_spill] sm:$0xff] }
 0x22b   : > { %1882 = vrot.lane.b32.xlu1 %v6884_v62, %s3654_s19  ;;  %v2667_v21 = vsel %vm2661_vm7, %v2634_v26, %v1859_v31  ;;  %v6893_v31 = vld [vmem:[#allocation126_spill] sm:$0xff] }
 0x22d   : > { %v2473_v55 = vpop.permute.xlu1 %2472  ;;  %v2053_v0 = vpop.permute.xlu0 %2052 }
 0x22e   : > { %v2797_v28 = vsel %vm2793_vm11, %v2764_v13, %v2473_v55  ;;  %2074 = vrot.lane.b32.xlu0 %v5051_v4, %s3655_s20  ;;  %v1276_v4 = vmul.f32 %v6777_v1, %v4455_v49  ;;  %v2700_v3 = vsel %vm2694_vm8, %v2667_v21, %v2053_v0  ;;  %v6894_v0 = vld [vmem:[#allocation124_spill] sm:$0xff] }
 0x22f   : > { %2496 = vrot.lane.b32.xlu1 %v6887_v27, %s3658_s14  ;;  %3564 = vmatmul.mubr.msk.f32.gmra.mxu0 %vm2831_vm12, %v2797_v28  ;;  %v2569_v28 = vsel %vm2562_vm4, %v942_v53, %v6894_v0  ;;  %v1278_v27 = vmul.f32 %v6781_v30, %v4490_v35  ;;  %v6902_v21 = vld [vmem:[#allocation128_spill] sm:$0xff]  ;;  %v6909_v53 = vld [vmem:[#allocation62_spill] sm:$0xff]  ;;  %v6911_v0 = vld [vmem:[#allocation89_spill] sm:$0xff] }
 0x231   : > { %v2179_v57 = vpop.permute.xlu1 %2178  ;;  %v2181_v48 = vpop.permute.xlu0 %2180 }
 0x232   : > { %2076 = vrot.lane.b32.xlu0 %v5056_v60, %s3655_s20  ;;  %v2699_v60 = vsel %vm2694_vm8, %v2666_v29, %v2051_v39  ;;  %v2733_v14 = vsel %vm2727_vm9, %v2700_v3, %v2181_v48  ;;  %v6895_v48 = vld [vmem:[#allocation69_spill] sm:$0xff]  ;;  %v6905_v3 = vld [vmem:[#allocation54_spill] sm:$0xff] }
 0x233   : > { %2202 = vrot.lane.b32.xlu1 %v1275_v6, %s3656_s23  ;;  %v2732_v51 = vsel %vm2727_vm9, %v2699_v60, %v2179_v57  ;;  %v2602_v6 = vsel %vm2595_vm5, %v2569_v28, %v5366_v37  ;;  %v6899_v29 = vld [vmem:[#allocation129_spill] sm:$0xff]  ;;  %v6900_v60 = vld [vmem:[#allocation20_spill] sm:$0xff] }
 0x234   : > { %v2635_v42 = vsel %vm2628_vm6, %v2602_v6, %v5500_v47 }
 0x235   : > { %v2281_v2 = vpop.permute.xlu1 %2280  ;;  %v1861_v10 = vpop.permute.xlu0 %1860 }
 0x236   : > { %2204 = vrot.lane.b32.xlu0 %v1276_v4, %s3656_s23  ;;  %v2765_v12 = vsel %vm2760_vm10, %v2732_v51, %v2281_v2  ;;  %v2668_v57 = vsel %vm2661_vm7, %v2635_v42, %v1861_v10  ;;  %v6897_v4 = vld [vmem:[#allocation23_spill] sm:$0xff]  ;;  %v6898_v10 = vld [vmem:[#allocation74_spill] sm:$0xff] }
 0x237   : > { %2304 = vrot.lane.b32.xlu1 %v6889_v40, %s3657_s30  ;;  %v943_v56 = vmul.f32 %v6897_v4, %v6896_v22  ;;  %v6915_v4 = vld [vmem:[#allocation17_spill] sm:$0xff] }
 0x239   : > { %v2283_v43 = vpop.permute.xlu1 %2282  ;;  %v2475_v44 = vpop.permute.xlu0 %2474 }
 0x23a   : > { %v2798_v19 = vsel %vm2793_vm11, %v2765_v12, %v2475_v44  ;;  %1884 = vrot.lane.b32.xlu0 %v6889_v40, %s3654_s19  ;;  %v2766_v39 = vsel %vm2760_vm10, %v2733_v14, %v2283_v43  ;;  %v2570_v40 = vsel %vm2562_vm4, %v943_v56, %v6899_v29  ;;  %v945_v56 = vmul.f32 %v6739_v61, %v6915_v4  ;;  %v6917_v29 = vld [vmem:[#allocation21_spill] sm:$0xff]  ;;  %v6918_v61 = vld [vmem:[#allocation44_spill] sm:$0xff] }
 0x23b   : > { %2306 = vrot.lane.b32.xlu1 %v6890_v24, %s3657_s30  ;;  %3566 = vmatprep.mubr.msk.f32.mxu0 %vm2831_vm12, %v2798_v19  ;;  %v2603_v51 = vsel %vm2595_vm5, %v2570_v40, %v6900_v60  ;;  %v6901_v19 = vld [vmem:[#allocation127_spill] sm:$0xff] }
 0x23c   : > { %v2636_v59 = vsel %vm2628_vm6, %v2603_v51, %v5508_v11 }
 0x23d   : > { %v1863_v62 = vpop.permute.xlu1 %1862  ;;  %v2055_v52 = vpop.permute.xlu0 %2054 }
 0x23e   : > { %2498 = vrot.lane.b32.xlu0 %v6891_v63, %s3658_s14  ;;  %v2669_v44 = vsel %vm2661_vm7, %v2636_v59, %v1863_v62  ;;  %v6903_v62 = vld [vmem:[#allocation131_spill] sm:$0xff] }
 0x23f   : > { %1886 = vrot.lane.b32.xlu1 %v6890_v24, %s3654_s19  ;;  %v6904_v63 = vld [vmem:[#allocation63_spill] sm:$0xff] }
 0x240   : > { %v1279_v14 = vmul.f32 %v6905_v3, %v6904_v63 }
 0x241   : > { %v2477_v36 = vpop.permute.xlu1 %2476  ;;  %v2057_v20 = vpop.permute.xlu0 %2056 }
 0x242   : > { %v2799_v34 = vsel %vm2793_vm11, %v2766_v39, %v2477_v36  ;;  %2078 = vrot.lane.b32.xlu0 %v6893_v31, %s3655_s20  ;;  %v2702_v24 = vsel %vm2694_vm8, %v2669_v44, %v2057_v20  ;;  %v6906_v39 = vld [vmem:[#allocation18_spill] sm:$0xff]  ;;  %v6919_v44 = vld [vmem:[#allocation133_spill] sm:$0xff] }
 0x243   : > { %2500 = vrot.lane.b32.xlu1 %v6892_v41, %s3658_s14  ;;  %3567 = vmatmul.mubr.msk.f32.gmra.mxu0 %vm2831_vm12, %v2799_v34  ;;  %v944_v36 = vmul.f32 %v6737_v25, %v6906_v39  ;;  %v6907_v41 = vld [vmem:[#allocation132_spill] sm:$0xff]  ;;  %v6908_v31 = vld [vmem:[#allocation130_spill] sm:$0xff] }
 0x245   : > { %v2183_v13 = vpop.permute.xlu1 %2182  ;;  %v2185_v55 = vpop.permute.xlu0 %2184 }
 0x246   : > { %2080 = vrot.lane.b32.xlu0 %v5084_v7, %s3655_s20  ;;  %v2701_v7 = vsel %vm2694_vm8, %v2668_v57, %v2055_v52  ;;  %v2735_v5 = vsel %vm2727_vm9, %v2702_v24, %v2185_v55  ;;  %v6913_v57 = vld [vmem:[#allocation75_spill] sm:$0xff] }
 0x247   : > { %2206 = vrot.lane.b32.xlu1 %v1277_v17, %s3656_s23  ;;  %v2734_v8 = vsel %vm2727_vm9, %v2701_v7, %v2183_v13  ;;  %v2571_v17 = vsel %vm2562_vm4, %v944_v36, %v6908_v31  ;;  %v6910_v13 = vld [vmem:[#allocation59_spill] sm:$0xff] }
 0x248   : > { %v1280_v55 = vmul.f32 %v6910_v13, %v6909_v53  ;;  %v2604_v28 = vsel %vm2595_vm5, %v2571_v17, %v6911_v0  ;;  %v6914_v7 = vld [vmem:[#allocation67_spill] sm:$0xff]  ;;  %v6927_v17 = vld [vmem:[#allocation65_spill] sm:$0xff] }
 0x249   : > { %v2285_v9 = vpop.permute.xlu1 %2284  ;;  %v1865_v58 = vpop.permute.xlu0 %1864 }
 0x24a   : > { %2208 = vrot.lane.b32.xlu0 %v1278_v27, %s3656_s23  ;;  %v2767_v37 = vsel %vm2760_vm10, %v2734_v8, %v2285_v9  ;;  %v6912_v27 = vld [vmem:[#allocation39_spill] sm:$0xff]  ;;  %v1217_v8 = vmul.f32 %v6914_v7, %v6909_v53 }
 0x24b   : > { %2308 = vrot.lane.b32.xlu1 %v6895_v48, %s3657_s30  ;;  %v2637_v6 = vsel %vm2628_vm6, %v2604_v28, %v6912_v27  ;;  %v6929_v28 = vld [vmem:[#allocation66_spill] sm:$0xff] }
 0x24c   : > { %v2670_v9 = vsel %vm2661_vm7, %v2637_v6, %v1865_v58  ;;  %v1218_v27 = vmul.f32 %v6929_v28, %v6927_v17  ;;  %v6930_v6 = vld [vmem:[#allocation26_spill] sm:$0xff] }
 0x24d   : > { %v2287_v46 = vpop.permute.xlu1 %2286  ;;  %v2479_v47 = vpop.permute.xlu0 %2478 }
 0x24e   : > { %v2800_v2 = vsel %vm2793_vm11, %v2767_v37, %v2479_v47  ;;  %1888 = vrot.lane.b32.xlu0 %v6895_v48, %s3654_s19  ;;  %v2768_v23 = vsel %vm2760_vm10, %v2735_v5, %v2287_v46 }
 0x24f   : > { %2310 = vrot.lane.b32.xlu1 %v6898_v10, %s3657_s30  ;;  %3569 = vmatprep.mubr.msk.f32.mxu0 %vm2831_vm12, %v2800_v2  ;;  %v6916_v2 = vld [vmem:[#allocation136_spill] sm:$0xff] }
 0x251   : > { %v1867_v12 = vpop.permute.xlu1 %1866  ;;  %v2059_v43 = vpop.permute.xlu0 %2058 }
 0x252   : > { %2502 = vrot.lane.b32.xlu0 %v6901_v19, %s3658_s14  ;;  %v2703_v48 = vsel %vm2694_vm8, %v2670_v9, %v2059_v43  ;;  %v6920_v19 = vld [vmem:[#allocation78_spill] sm:$0xff] }
 0x253   : > { %1890 = vrot.lane.b32.xlu1 %v6898_v10, %s3654_s19  ;;  %v2572_v10 = vsel %vm2562_vm4, %v945_v56, %v6916_v2  ;;  %v6931_v9 = vld [vmem:[#allocation102_spill] sm:$0xff]  ;;  %v6932_v56 = vld [vmem:[#allocation64_spill] sm:$0xff] }
 0x254   : > { %v2605_v40 = vsel %vm2595_vm5, %v2572_v10, %v6917_v29 }
 0x255   : > { %v2481_v26 = vpop.permute.xlu1 %2480  ;;  %v2061_v52 = vpop.permute.xlu0 %2060  ;;  %v2638_v60 = vsel %vm2628_vm6, %v2605_v40, %v6918_v61  ;;  %v6935_v61 = vld [vmem:[#allocation79_spill] sm:$0xff] }
 0x256   : > { %v2801_v11 = vsel %vm2793_vm11, %v2768_v23, %v2481_v26  ;;  %2082 = vrot.lane.b32.xlu0 %v6903_v62, %s3655_s20  ;;  %v2671_v43 = vsel %vm2661_vm7, %v2638_v60, %v1867_v12  ;;  %v6921_v62 = vld [vmem:[#allocation134_spill] sm:$0xff]  ;;  %v6922_v12 = vld [vmem:[#allocation25_spill] sm:$0xff] }
 0x257   : > { %2504 = vrot.lane.b32.xlu1 %v6902_v21, %s3658_s14  ;;  %3570 = vmatmul.mubr.msk.f32.gmra.mxu0 %vm2831_vm12, %v2801_v11  ;;  %v2704_v24 = vsel %vm2694_vm8, %v2671_v43, %v2061_v52  ;;  %v6936_v60 = vld [vmem:[#allocation141_spill] sm:$0xff]  ;;  %v6937_v43 = vld [vmem:[#allocation71_spill] sm:$0xff] }
 0x259   : > { %v2187_v20 = vpop.permute.xlu1 %2186  ;;  %v2189_v34 = vpop.permute.xlu0 %2188 }
 0x25a   : > { %2084 = vrot.lane.b32.xlu0 %v6907_v41, %s3655_s20  ;;  %v2736_v22 = vsel %vm2727_vm9, %v2703_v48, %v2187_v20  ;;  %v2737_v5 = vsel %vm2727_vm9, %v2704_v24, %v2189_v34  ;;  %v6924_v20 = vld [vmem:[#allocation135_spill] sm:$0xff]  ;;  %v6925_v34 = vld [vmem:[#allocation138_spill] sm:$0xff]  ;;  %v6926_v41 = vld [vmem:[#allocation137_spill] sm:$0xff] }
 0x25b   : > { %2210 = vrot.lane.b32.xlu1 %v1279_v14, %s3656_s23  ;;  %v6923_v14 = vld [vmem:[#allocation28_spill] sm:$0xff] }
 0x25c   : > { %v946_v39 = vmul.f32 %v6923_v14, %v6922_v12 }
 0x25d   : > { %v2289_v25 = vpop.permute.xlu1 %2288  ;;  %v1869_v42 = vpop.permute.xlu0 %1868 }
 0x25e   : > { %2212 = vrot.lane.b32.xlu0 %v1280_v55, %s3656_s23  ;;  %v2769_v37 = vsel %vm2760_vm10, %v2736_v22, %v2289_v25  ;;  %v2573_v31 = vsel %vm2562_vm4, %v946_v39, %v6926_v41  ;;  %v6928_v55 = vld [vmem:[#allocation58_spill] sm:$0xff]  ;;  %v6940_v41 = vld [vmem:[#allocation19_spill] sm:$0xff] }
 0x25f   : > { %2312 = vrot.lane.b32.xlu1 %v6913_v57, %s3657_s30  ;;  %v1281_v0 = vmul.f32 %v6928_v55, %v6927_v17  ;;  %v2606_v25 = vsel %vm2595_vm5, %v2573_v31, %v6930_v6  ;;  %v6942_v31 = vld [vmem:[#allocation33_spill] sm:$0xff] }
 0x261   : > { %v2291_v46 = vpop.permute.xlu1 %2290  ;;  %v2483_v47 = vpop.permute.xlu0 %2482 }
 0x262   : > { %v2802_v58 = vsel %vm2793_vm11, %v2769_v37, %v2483_v47  ;;  %1792 = vrot.lane.b32.xlu0 %v1217_v8, %s3653_s18  ;;  %v2770_v23 = vsel %vm2760_vm10, %v2737_v5, %v2291_v46  ;;  %v1282_v37 = vmul.f32 %v6914_v7, %v6932_v56  ;;  %v6933_v47 = vld [vmem:[#allocation24_spill] sm:$0xff]  ;;  %v6939_v5 = vld [vmem:[#allocation103_spill] sm:$0xff] }
 0x263   : > { %1892 = vrot.lane.b32.xlu1 %v6913_v57, %s3654_s19  ;;  %3572 = vmatprep.mubr.msk.f32.mxu0 %vm2831_vm12, %v2802_v58  ;;  %v2639_v57 = vsel %vm2628_vm6, %v2606_v25, %v6931_v9  ;;  %v6934_v58 = vld [vmem:[#allocation37_spill] sm:$0xff]  ;;  %v6945_v25 = vld [vmem:[#allocation142_spill] sm:$0xff] }
 0x264   : > { %v2672_v22 = vsel %vm2661_vm7, %v2639_v57, %v1869_v42  ;;  %v947_v2 = vmul.f32 %v6934_v58, %v6933_v47  ;;  %v6946_v57 = vld [vmem:[#allocation91_spill] sm:$0xff]  ;;  %v6948_v58 = vld [vmem:[#allocation140_spill] sm:$0xff] }
 0x265   : > { %v1871_v51 = vpop.permute.xlu1 %1870  ;;  %v2063_v59 = vpop.permute.xlu0 %2062 }
 0x266   : > { %2314 = vrot.lane.b32.xlu0 %v6920_v19, %s3657_s30  ;;  %v2705_v4 = vsel %vm2694_vm8, %v2672_v22, %v2063_v59  ;;  %v2574_v59 = vsel %vm2562_vm4, %v947_v2, %v6936_v60  ;;  %v6947_v22 = vld [vmem:[#allocation104_spill] sm:$0xff]  ;;  %v6949_v2 = vld [vmem:[#allocation143_spill] sm:$0xff] }
 0x267   : > { %2506 = vrot.lane.b32.xlu1 %v6919_v44, %s3658_s14  ;;  %v1219_v44 = vmul.f32 %v6937_v43, %v6932_v56 }
 0x269   : > { %v2485_v26 = vpop.permute.xlu1 %2484  ;;  %v2065_v11 = vpop.permute.xlu0 %2064 }
 0x26a   : > { %v2803_v21 = vsel %vm2793_vm11, %v2770_v23, %v2485_v26  ;;  %1894 = vrot.lane.b32.xlu0 %v6920_v19, %s3654_s19  ;;  %v6938_v19 = vld [vmem:[#allocation90_spill] sm:$0xff] }
 0x26b   : > { %2086 = vrot.lane.b32.xlu1 %v6921_v62, %s3655_s20  ;;  %3573 = vmatmul.mubr.msk.f32.gmra.mxu0 %vm2831_vm12, %v2803_v21  ;;  %v2607_v24 = vsel %vm2595_vm5, %v2574_v59, %v6938_v19  ;;  %v6952_v59 = vld [vmem:[#allocation32_spill] sm:$0xff] }
 0x26c   : > { %v2640_v23 = vsel %vm2628_vm6, %v2607_v24, %v6939_v5 }
 0x26d   : > { %v2191_v52 = vpop.permute.xlu1 %2190  ;;  %v2193_v36 = vpop.permute.xlu0 %2192  ;;  %v2673_v62 = vsel %vm2661_vm7, %v2640_v23, %v1871_v51  ;;  %v6941_v51 = vld [vmem:[#allocation82_spill] sm:$0xff] }
 0x26e   : > { %2508 = vrot.lane.b32.xlu0 %v6925_v34, %s3658_s14  ;;  %v2738_v46 = vsel %vm2727_vm9, %v2705_v4, %v2191_v52  ;;  %v2706_v12 = vsel %vm2694_vm8, %v2673_v62, %v2065_v11  ;;  %v6953_v23 = vld [vmem:[#allocation146_spill] sm:$0xff]  ;;  %v6954_v62 = vld [vmem:[#allocation72_spill] sm:$0xff] }
 0x26f   : > { %2088 = vrot.lane.b32.xlu1 %v6924_v20, %s3655_s20  ;;  %v2739_v14 = vsel %vm2727_vm9, %v2706_v12, %v2193_v36  ;;  %v6944_v36 = vld [vmem:[#allocation139_spill] sm:$0xff]  ;;  %v1284_v12 = vmul.f32 %v6937_v43, %v6954_v62 }
 0x271   : > { %v2293_v48 = vpop.permute.xlu1 %2292  ;;  %v1873_v8 = vpop.permute.xlu0 %1872 }
 0x272   : > { %2214 = vrot.lane.b32.xlu0 %v1281_v0, %s3656_s23  ;;  %v2771_v10 = vsel %vm2760_vm10, %v2738_v46, %v2293_v48  ;;  %v6943_v0 = vld [vmem:[#allocation36_spill] sm:$0xff] }
 0x273   : > { %1794 = vrot.lane.b32.xlu1 %v1218_v27, %s3653_s18  ;;  %v948_v27 = vmul.f32 %v6943_v0, %v6942_v31  ;;  %v6957_v31 = vld [vmem:[#allocation83_spill] sm:$0xff] }
 0x275   : > { %v2295_v29 = vpop.permute.xlu1 %2294  ;;  %v2487_v40 = vpop.permute.xlu0 %2486  ;;  %v2575_v9 = vsel %vm2562_vm4, %v948_v27, %v6945_v25  ;;  %v6958_v27 = vld [vmem:[#allocation77_spill] sm:$0xff] }
 0x276   : > { %v2804_v42 = vsel %vm2793_vm11, %v2771_v10, %v2487_v40  ;;  %2216 = vrot.lane.b32.xlu0 %v1282_v37, %s3656_s23  ;;  %v2772_v39 = vsel %vm2760_vm10, %v2739_v14, %v2295_v29  ;;  %v2608_v48 = vsel %vm2595_vm5, %v2575_v9, %v6946_v57  ;;  %v6950_v29 = vld [vmem:[#allocation73_spill] sm:$0xff]  ;;  %v6955_v14 = vld [vmem:[#allocation92_spill] sm:$0xff] }
 0x277   : > { %2316 = vrot.lane.b32.xlu1 %v6935_v61, %s3657_s30  ;;  %3575 = vmatprep.mubr.msk.f32.mxu0 %vm2831_vm12, %v2804_v42  ;;  %v2641_v4 = vsel %vm2628_vm6, %v2608_v48, %v6947_v22  ;;  %v1283_v40 = vmul.f32 %v6929_v28, %v6950_v29  ;;  %v6951_v42 = vld [vmem:[#allocation70_spill] sm:$0xff] }
 0x278   : > { %v2674_v47 = vsel %vm2661_vm7, %v2641_v4, %v1873_v8 }
 0x279   : > { %v1875_v26 = vpop.permute.xlu1 %1874  ;;  %v2067_v21 = vpop.permute.xlu0 %2066 }
 0x27a   : > { %1796 = vrot.lane.b32.xlu0 %v1219_v44, %s3653_s18  ;;  %v2707_v10 = vsel %vm2694_vm8, %v2674_v47, %v2067_v21  ;;  %v949_v44 = vmul.f32 %v6765_v50, %v6952_v59  ;;  %v6962_v47 = vld [vmem:[#allocation147_spill] sm:$0xff] }
 0x27b   : > { %1896 = vrot.lane.b32.xlu1 %v6935_v61, %s3654_s19  ;;  %v1220_v61 = vmul.f32 %v6951_v42, %v6950_v29 }
 0x27c   : > { %v2576_v21 = vsel %vm2562_vm4, %v949_v44, %v6953_v23  ;;  %v6965_v44 = vld [vmem:[#allocation22_spill] sm:$0xff] }
 0x27d   : > { %v2489_v52 = vpop.permute.xlu1 %2488  ;;  %v2069_v20 = vpop.permute.xlu0 %2068  ;;  %v2609_v50 = vsel %vm2595_vm5, %v2576_v21, %v6955_v14 }
 0x27e   : > { %v2805_v34 = vsel %vm2793_vm11, %v2772_v39, %v2489_v52  ;;  %2318 = vrot.lane.b32.xlu0 %v6941_v51, %s3657_s30  ;;  %v6956_v39 = vld [vmem:[#allocation105_spill] sm:$0xff] }
 0x27f   : > { %2510 = vrot.lane.b32.xlu1 %v6940_v41, %s3658_s14  ;;  %3576 = vmatmul.mubr.msk.f32.gmra.mxu0 %vm2831_vm12, %v2805_v34  ;;  %v2642_v52 = vsel %vm2628_vm6, %v2609_v50, %v6956_v39  ;;  %v6968_v50 = vld [vmem:[#allocation145_spill] sm:$0xff] }
 0x280   : > { %v6969_v39 = vld [vmem:[#allocation153_spill] sm:$0xff] }
 0x281   : > { %v2195_v11 = vpop.permute.xlu1 %2194  ;;  %v2197_v6 = vpop.permute.xlu0 %2196 }
 0x282   : > { %1898 = vrot.lane.b32.xlu0 %v6941_v51, %s3654_s19  ;;  %v2740_v60 = vsel %vm2727_vm9, %v2707_v10, %v2195_v11  ;;  %v2675_v51 = vsel %vm2661_vm7, %v2642_v52, %v1875_v26  ;;  %v1221_v11 = vmul.f32 %v6958_v27, %v6954_v62  ;;  %v6959_v26 = vld [vmem:[#allocation35_spill] sm:$0xff] }
 0x283   : > { %2090 = vrot.lane.b32.xlu1 %v6944_v36, %s3655_s20  ;;  %v2708_v0 = vsel %vm2694_vm8, %v2675_v51, %v2069_v20  ;;  %v950_v20 = vmul.f32 %v6772_v54, %v6959_v26  ;;  %v6971_v51 = vld [vmem:[#allocation76_spill] sm:$0xff] }
 0x284   : > { %v2741_v36 = vsel %vm2727_vm9, %v2708_v0, %v2197_v6  ;;  %v6960_v6 = vld [vmem:[#allocation144_spill] sm:$0xff]  ;;  %v6972_v0 = vld [vmem:[#allocation27_spill] sm:$0xff] }
 0x285   : > { %v2297_v37 = vpop.permute.xlu1 %2296  ;;  %v1877_v46 = vpop.permute.xlu0 %1876 }
 0x286   : > { %2512 = vrot.lane.b32.xlu0 %v6949_v2, %s3658_s14  ;;  %v2773_v8 = vsel %vm2760_vm10, %v2740_v60, %v2297_v37  ;;  %v6961_v37 = vld [vmem:[#allocation85_spill] sm:$0xff] }
 0x287   : > { %2092 = vrot.lane.b32.xlu1 %v6948_v58, %s3655_s20  ;;  %v2577_v58 = vsel %vm2562_vm4, %v950_v20, %v6962_v47  ;;  %v6963_v2 = vld [vmem:[#allocation93_spill] sm:$0xff] }
 0x288   : > { %v2610_v10 = vsel %vm2595_vm5, %v2577_v58, %v6963_v2 }
 0x289   : > { %v2299_v19 = vpop.permute.xlu1 %2298  ;;  %v2491_v24 = vpop.permute.xlu0 %2490 }
 0x28a   : > { %v2806_v5 = vsel %vm2793_vm11, %v2773_v8, %v2491_v24  ;;  %2218 = vrot.lane.b32.xlu0 %v1283_v40, %s3656_s23  ;;  %v2774_v25 = vsel %vm2760_vm10, %v2741_v36, %v2299_v19  ;;  %v6964_v40 = vld [vmem:[#allocation45_spill] sm:$0xff]  ;;  %v6966_v24 = vld [vmem:[#allocation34_spill] sm:$0xff]  ;;  %v6973_v36 = vld [vmem:[#allocation48_spill] sm:$0xff] }
 0x28b   : > { %1798 = vrot.lane.b32.xlu1 %v1220_v61, %s3653_s18  ;;  %3578 = vmatprep.mubr.msk.f32.mxu0 %vm2831_vm12, %v2806_v5  ;;  %v2643_v61 = vsel %vm2628_vm6, %v2610_v10, %v6964_v40  ;;  %v951_v5 = vmul.f32 %v6773_v18, %v6966_v24  ;;  %v6975_v40 = vld [vmem:[#allocation86_spill] sm:$0xff] }
 0x28c   : > { %v2676_v54 = vsel %vm2661_vm7, %v2643_v61, %v1877_v46  ;;  %v6967_v46 = vld [vmem:[#allocation29_spill] sm:$0xff]  ;;  %v6977_v61 = vld [vmem:[#allocation43_spill] sm:$0xff] }
 0x28d   : > { %v1879_v34 = vpop.permute.xlu1 %1878  ;;  %v2071_v41 = vpop.permute.xlu0 %2070  ;;  %v2578_v52 = vsel %vm2562_vm4, %v951_v5, %v6969_v39  ;;  %v6980_v5 = vld [vmem:[#allocation106_spill] sm:$0xff] }
 0x28e   : > { %2220 = vrot.lane.b32.xlu0 %v1284_v12, %s3656_s23  ;;  %v2709_v8 = vsel %vm2694_vm8, %v2676_v54, %v2071_v41  ;;  %v6970_v41 = vld [vmem:[#allocation3_spill] sm:$0xff] }
 0x28f   : > { %2320 = vrot.lane.b32.xlu1 %v6957_v31, %s3657_s30  ;;  %v1285_v18 = vmul.f32 %v6951_v42, %v6970_v41 }
 0x291   : > { %v2493_v9 = vpop.permute.xlu1 %2492  ;;  %v2073_v57 = vpop.permute.xlu0 %2072 }
 0x292   : > { %v2807_v48 = vsel %vm2793_vm11, %v2774_v25, %v2493_v9  ;;  %1800 = vrot.lane.b32.xlu0 %v1221_v11, %s3653_s18  ;;  %v2611_v11 = vsel %vm2595_vm5, %v2578_v52, %v6972_v0  ;;  %v6983_v52 = vld [vmem:[#allocation42_spill] sm:$0xff] }
 0x293   : > { %1900 = vrot.lane.b32.xlu1 %v6957_v31, %s3654_s19  ;;  %3579 = vmatmul.mubr.msk.f32.gmra.mxu0 %vm2831_vm12, %v2807_v48  ;;  %v1222_v31 = vmul.f32 %v6971_v51, %v6970_v41  ;;  %v2644_v25 = vsel %vm2628_vm6, %v2611_v11, %v6973_v36  ;;  %v6984_v36 = vld [vmem:[#allocation149_spill] sm:$0xff] }
 0x294   : > { %v2677_v26 = vsel %vm2661_vm7, %v2644_v25, %v1879_v34  ;;  %v6976_v34 = vld [vmem:[#allocation81_spill] sm:$0xff] }
 0x295   : > { %v2199_v22 = vpop.permute.xlu1 %2198  ;;  %v2201_v4 = vpop.permute.xlu0 %2200  ;;  %v2710_v20 = vsel %vm2694_vm8, %v2677_v26, %v2073_v57  ;;  %v6985_v25 = vld [vmem:[#allocation157_spill] sm:$0xff]  ;;  %v6986_v26 = vld [vmem:[#allocation94_spill] sm:$0xff] }
 0x296   : > { %2322 = vrot.lane.b32.xlu0 %v6961_v37, %s3657_s30  ;;  %v2742_v19 = vsel %vm2727_vm9, %v2709_v8, %v2199_v22  ;;  %v6974_v22 = vld [vmem:[#allocation2_spill] sm:$0xff] }
 0x297   : > { %2514 = vrot.lane.b32.xlu1 %v6960_v6, %s3658_s14  ;;  %v1286_v6 = vmul.f32 %v6958_v27, %v6974_v22  ;;  %v1223_v57 = vmul.f32 %v6976_v34, %v6974_v22 }
 0x299   : > { %v2301_v60 = vpop.permute.xlu1 %2300  ;;  %v1881_v59 = vpop.permute.xlu0 %1880 }
 0x29a   : > { %1902 = vrot.lane.b32.xlu0 %v6961_v37, %s3654_s19  ;;  %v2775_v23 = vsel %vm2760_vm10, %v2742_v19, %v2301_v60  ;;  %v2743_v37 = vsel %vm2727_vm9, %v2710_v20, %v2201_v4  ;;  %v952_v60 = vmul.f32 %v6776_v45, %v6977_v61  ;;  %v6979_v19 = vld [vmem:[#allocation30_spill] sm:$0xff]  ;;  %v6987_v20 = vld [vmem:[#allocation107_spill] sm:$0xff]  ;;  %v6990_v61 = vld [vmem:[#allocation5_spill] sm:$0xff] }
 0x29b   : > { %2094 = vrot.lane.b32.xlu1 %v6965_v44, %s3655_s20  ;;  %v6978_v44 = vld [vmem:[#allocation154_spill] sm:$0xff] }
 0x29c   : > { %v2579_v8 = vsel %vm2562_vm4, %v952_v60, %v6978_v44  ;;  %v1287_v60 = vmul.f32 %v6971_v51, %v6990_v61 }
 0x29d   : > { %v2303_v21 = vpop.permute.xlu1 %2302  ;;  %v2495_v12 = vpop.permute.xlu0 %2494  ;;  %v2612_v24 = vsel %vm2595_vm5, %v2579_v8, %v6979_v19 }
 0x29e   : > { %v2808_v14 = vsel %vm2793_vm11, %v2775_v23, %v2495_v12  ;;  %2516 = vrot.lane.b32.xlu0 %v6968_v50, %s3658_s14  ;;  %v2776_v47 = vsel %vm2760_vm10, %v2743_v37, %v2303_v21  ;;  %v2645_v23 = vsel %vm2628_vm6, %v2612_v24, %v6980_v5 }
 0x29f   : > { %2096 = vrot.lane.b32.xlu1 %v6967_v46, %s3655_s20  ;;  %3581 = vmatprep.mubr.msk.f32.mxu0 %vm2831_vm12, %v2808_v14  ;;  %v2678_v45 = vsel %vm2661_vm7, %v2645_v23, %v1881_v59  ;;  %v6981_v14 = vld [vmem:[#allocation148_spill] sm:$0xff]  ;;  %v6982_v46 = vld [vmem:[#allocation87_spill] sm:$0xff] }
 0x2a1   : > { %v1883_v9 = vpop.permute.xlu1 %1882  ;;  %v2075_v48 = vpop.permute.xlu0 %2074 }
 0x2a2   : > { %2222 = vrot.lane.b32.xlu0 %v1285_v18, %s3656_s23  ;;  %v2711_v50 = vsel %vm2694_vm8, %v2678_v45, %v2075_v48  ;;  %v953_v18 = vmul.f32 %v6777_v1, %v6983_v52 }
 0x2a3   : > { %1802 = vrot.lane.b32.xlu1 %v1222_v31, %s3653_s18 }
 0x2a4   : > { %v2580_v48 = vsel %vm2562_vm4, %v953_v18, %v6985_v25  ;;  %v6996_v18 = vld [vmem:[#allocation165_spill] sm:$0xff] }
 0x2a5   : > { %v2497_v58 = vpop.permute.xlu1 %2496  ;;  %v2077_v2 = vpop.permute.xlu0 %2076  ;;  %v2613_v1 = vsel %vm2595_vm5, %v2580_v48, %v6986_v26  ;;  %v955_v48 = vmul.f32 %v6781_v30, %v4440_v15  ;;  %v7002_v30 = vld [vmem:[#allocation109_spill] sm:$0xff] }
 0x2a6   : > { %v2809_v10 = vsel %vm2793_vm11, %v2776_v47, %v2497_v58  ;;  %2224 = vrot.lane.b32.xlu0 %v1286_v6, %s3656_s23  ;;  %v2646_v6 = vsel %vm2628_vm6, %v2613_v1, %v6987_v20 }
 0x2a7   : > { %2324 = vrot.lane.b32.xlu1 %v6975_v40, %s3657_s30  ;;  %3582 = vmatmul.mubr.msk.f32.gmra.mxu0 %vm2831_vm12, %v2809_v10  ;;  %v2679_v58 = vsel %vm2661_vm7, %v2646_v6, %v1883_v9  ;;  %v6988_v10 = vld [vmem:[#allocation150_spill] sm:$0xff] }
 0x2a9   : > { %v2203_v4 = vpop.permute.xlu1 %2202  ;;  %v2205_v54 = vpop.permute.xlu0 %2204 }
 0x2aa   : > { %1804 = vrot.lane.b32.xlu0 %v1223_v57, %s3653_s18  ;;  %v2744_v39 = vsel %vm2727_vm9, %v2711_v50, %v2203_v4  ;;  %v2712_v57 = vsel %vm2694_vm8, %v2679_v58, %v2077_v2  ;;  %v6991_v4 = vld [vmem:[#allocation80_spill] sm:$0xff] }
 0x2ab   : > { %1904 = vrot.lane.b32.xlu1 %v6975_v40, %s3654_s19  ;;  %v6989_v40 = vld [vmem:[#allocation151_spill] sm:$0xff]  ;;  %v1224_v44 = vmul.f32 %v6991_v4, %v6990_v61  ;;  %v2745_v8 = vsel %vm2727_vm9, %v2712_v57, %v2205_v54  ;;  %v6992_v2 = vld [vmem:[#allocation4_spill] sm:$0xff] }
 0x2ac   : > { %v1288_v23 = vmul.f32 %v6976_v34, %v6992_v2  ;;  %v6999_v58 = vld [vmem:[#allocation12_spill] sm:$0xff] }
 0x2ad   : > { %v2305_v21 = vpop.permute.xlu1 %2304  ;;  %v1885_v12 = vpop.permute.xlu0 %1884 }
 0x2ae   : > { %2326 = vrot.lane.b32.xlu0 %v6982_v46, %s3657_s30  ;;  %v2777_v31 = vsel %vm2760_vm10, %v2744_v39, %v2305_v21  ;;  %v954_v21 = vmul.f32 %v6780_v32, %v4443_v33  ;;  %v6995_v39 = vld [vmem:[#allocation84_spill] sm:$0xff] }
 0x2af   : > { %2518 = vrot.lane.b32.xlu1 %v6981_v14, %s3658_s14  ;;  %v6993_v14 = vld [vmem:[#allocation10_spill] sm:$0xff]  ;;  %v1225_v52 = vmul.f32 %v6995_v39, %v6992_v2 }
 0x2b1   : > { %v2307_v0 = vpop.permute.xlu1 %2306  ;;  %v2499_v11 = vpop.permute.xlu0 %2498 }
 0x2b2   : > { %1906 = vrot.lane.b32.xlu0 %v6982_v46, %s3654_s19  ;;  %v2810_v59 = vsel %vm2793_vm11, %v2777_v31, %v2499_v11  ;;  %v2778_v19 = vsel %vm2760_vm10, %v2745_v8, %v2307_v0  ;;  %v6994_v46 = vld [vmem:[#allocation158_spill] sm:$0xff]  ;;  %v6997_v0 = vld [vmem:[#allocation108_spill] sm:$0xff]  ;;  %v7003_v8 = vld [vmem:[#allocation155_spill] sm:$0xff] }
 0x2b3   : > { %2098 = vrot.lane.b32.xlu1 %v6984_v36, %s3655_s20  ;;  %3584 = vmatprep.mubr.msk.f32.mxu1 %vm2831_vm12, %v2810_v59  ;;  %v2581_v50 = vsel %vm2562_vm4, %v954_v21, %v6994_v46  ;;  %v7007_v46 = vld [vmem:[#allocation8_spill] sm:$0xff] }
 0x2b4   : > { %v2614_v31 = vsel %vm2595_vm5, %v2581_v50, %v6996_v18  ;;  %v956_v18 = vmul.f32 %v6905_v3, %v4458_v38  ;;  %v7012_v38 = vld [vmem:[#allocation170_spill] sm:$0xff] }
 0x2b5   : > { %v1887_v37 = vpop.permute.xlu1 %1886  ;;  %v2079_v47 = vpop.permute.xlu0 %2078  ;;  %v2647_v11 = vsel %vm2628_vm6, %v2614_v31, %v6997_v0 }
 0x2b6   : > { %2520 = vrot.lane.b32.xlu0 %v6989_v40, %s3658_s14  ;;  %v2680_v36 = vsel %vm2661_vm7, %v2647_v11, %v1885_v12  ;;  %v6998_v12 = vld [vmem:[#allocation152_spill] sm:$0xff]  ;;  %v7001_v40 = vld [vmem:[#allocation95_spill] sm:$0xff]  ;;  %v7008_v11 = vld [vmem:[#allocation14_spill] sm:$0xff] }
 0x2b7   : > { %2100 = vrot.lane.b32.xlu1 %v6988_v10, %s3655_s20  ;;  %v2713_v59 = vsel %vm2694_vm8, %v2680_v36, %v2079_v47  ;;  %v7000_v10 = vld [vmem:[#allocation40_spill] sm:$0xff]  ;;  %v7010_v36 = vld [vmem:[#allocation47_spill] sm:$0xff] }
 0x2b8   : > { %v2582_v47 = vsel %vm2562_vm4, %v955_v48, %v7000_v10 }
 0x2b9   : > { %v2501_v24 = vpop.permute.xlu1 %2500  ;;  %v2081_v9 = vpop.permute.xlu0 %2080  ;;  %v2615_v15 = vsel %vm2595_vm5, %v2582_v47, %v7001_v40  ;;  %v7016_v40 = vld [vmem:[#allocation97_spill] sm:$0xff] }
 0x2ba   : > { %v2811_v5 = vsel %vm2793_vm11, %v2778_v19, %v2501_v24  ;;  %2226 = vrot.lane.b32.xlu0 %v1287_v60, %s3656_s23  ;;  %v2648_v57 = vsel %vm2628_vm6, %v2615_v15, %v7002_v30 }
 0x2bb   : > { %1806 = vrot.lane.b32.xlu1 %v1224_v44, %s3653_s18  ;;  %3585 = vmatmul.mubr.msk.f32.vlgmr.msra.gmra.mxu1 %vm2831_vm12, %v2811_v5  ;;  %v2681_v44 = vsel %vm2661_vm7, %v2648_v57, %v1887_v37  ;;  %v7005_v37 = vld [vmem:[#allocation41_spill] sm:$0xff] }
 0x2bc   : > { %v2714_v19 = vsel %vm2694_vm8, %v2681_v44, %v2081_v9 }
 0x2bd   : > { %v2207_v45 = vpop.permute.xlu1 %2206  ;;  %v2209_v54 = vpop.permute.xlu0 %2208 }
 0x2be   : > { %2228 = vrot.lane.b32.xlu0 %v1288_v23, %s3656_s23  ;;  %v2746_v25 = vsel %vm2727_vm9, %v2713_v59, %v2207_v45  ;;  %v2747_v24 = vsel %vm2727_vm9, %v2714_v19, %v2209_v54  ;;  %v7004_v45 = vld [vmem:[#allocation11_spill] sm:$0xff]  ;;  %v1290_v54 = vmul.f32 %v6995_v39, %v7007_v46  ;;  %v2583_v59 = vsel %vm2562_vm4, %v956_v18, %v7010_v36 }
 0x2bf   : > { %2328 = vrot.lane.b32.xlu1 %v6993_v14, %s3657_s30 }
 0x2c1   : > { %v2309_v33 = vpop.permute.xlu1 %2308  ;;  %v1889_v32 = vpop.permute.xlu0 %1888 }
 0x2c2   : > { %1808 = vrot.lane.b32.xlu0 %v1225_v52, %s3653_s18  ;;  %v2779_v26 = vsel %vm2760_vm10, %v2746_v25, %v2309_v33  ;;  %v7009_v33 = vld [vmem:[#allocation13_spill] sm:$0xff]  ;;  %v7011_v25 = vld [vmem:[#allocation96_spill] sm:$0xff] }
 0x2c3   : > { %1908 = vrot.lane.b32.xlu1 %v6993_v14, %s3654_s19  ;;  %v7006_v14 = vld [vmem:[#allocation9_spill] sm:$0xff]  ;;  %v2616_v48 = vsel %vm2595_vm5, %v2583_v59, %v7011_v25  ;;  %v958_v25 = vmul.f32 %v6928_v55, %v4493_v16 }
 0x2c4   : > { %v1289_v9 = vmul.f32 %v6991_v4, %v7006_v14  ;;  %v2649_v3 = vsel %vm2628_vm6, %v2616_v48, %v7012_v38  ;;  %v7018_v38 = vld [vmem:[#allocation51_spill] sm:$0xff] }
 0x2c5   : > { %v2311_v1 = vpop.permute.xlu1 %2310  ;;  %v2503_v20 = vpop.permute.xlu0 %2502 }
 0x2c6   : > { %v2812_v6 = vsel %vm2793_vm11, %v2779_v26, %v2503_v20  ;;  %2330 = vrot.lane.b32.xlu0 %v6999_v58, %s3657_s30  ;;  %v2780_v5 = vsel %vm2760_vm10, %v2747_v24, %v2311_v1  ;;  %v957_v26 = vmul.f32 %v6910_v13, %v4455_v49  ;;  %v7015_v49 = vld [vmem:[#allocation46_spill] sm:$0xff] }
 0x2c7   : > { %2522 = vrot.lane.b32.xlu1 %v6998_v12, %s3658_s14  ;;  %3587 = vmatprep.mubr.msk.f32.mxu1 %vm2831_vm12, %v2812_v6  ;;  %v2682_v6 = vsel %vm2661_vm7, %v2649_v3, %v1889_v32  ;;  %v7013_v12 = vld [vmem:[#allocation159_spill] sm:$0xff]  ;;  %v7017_v32 = vld [vmem:[#allocation49_spill] sm:$0xff]  ;;  %v2585_v3 = vsel %vm2562_vm4, %v958_v25, %v7018_v38 }
 0x2c8   : > { %v2584_v13 = vsel %vm2562_vm4, %v957_v26, %v7015_v49  ;;  %v7020_v49 = vld [vmem:[#allocation171_spill] sm:$0xff] }
 0x2c9   : > { %v1891_v61 = vpop.permute.xlu1 %1890  ;;  %v2083_v60 = vpop.permute.xlu0 %2082  ;;  %v2617_v15 = vsel %vm2595_vm5, %v2584_v13, %v7016_v40 }
 0x2ca   : > { %1910 = vrot.lane.b32.xlu0 %v6999_v58, %s3654_s19  ;;  %v7014_v58 = vld [vmem:[#allocation156_spill] sm:$0xff]  ;;  %v2715_v10 = vsel %vm2694_vm8, %v2682_v6, %v2083_v60  ;;  %v2650_v57 = vsel %vm2628_vm6, %v2617_v15, %v7017_v32  ;;  %v959_v6 = vmul.f32 %v6914_v7, %v4490_v35 }
 0x2cb   : > { %2102 = vrot.lane.b32.xlu1 %v7003_v8, %s3655_s20 }
 0x2cd   : > { %v2505_v2 = vpop.permute.xlu1 %2504  ;;  %v2085_v23 = vpop.permute.xlu0 %2084 }
 0x2ce   : > { %v2813_v21 = vsel %vm2793_vm11, %v2780_v5, %v2505_v2  ;;  %2524 = vrot.lane.b32.xlu0 %v7005_v37, %s3658_s14  ;;  %v2683_v5 = vsel %vm2661_vm7, %v2650_v57, %v1891_v61  ;;  %v7022_v57 = vld [vmem:[#allocation31_spill] sm:$0xff] }
 0x2cf   : > { %2104 = vrot.lane.b32.xlu1 %v7004_v45, %s3655_s20  ;;  %3588 = vmatmul.mubr.msk.f32.gmra.mxu1 %vm2831_vm12, %v2813_v21  ;;  %v2716_v21 = vsel %vm2694_vm8, %v2683_v5, %v2085_v23  ;;  %s319_s20 = scalar_lea.vmem %s6435_s7, %s7040_s28 }
 0x2d1   : > { %v2211_v50 = vpop.permute.xlu1 %2210  ;;  %v2213_v52 = vpop.permute.xlu0 %2212 }
 0x2d2   : > { %2230 = vrot.lane.b32.xlu0 %v1289_v9, %s3656_s23  ;;  %v2748_v30 = vsel %vm2727_vm9, %v2715_v10, %v2211_v50  ;;  %v2749_v9 = vsel %vm2727_vm9, %v2716_v21, %v2213_v52  ;;  %v7021_v10 = vld [vmem:[#allocation50_spill] sm:$0xff] }
 0x2d3   : > { %2232 = vrot.lane.b32.xlu1 %v1290_v54, %s3656_s23  ;;  %s322_s23 = scalar_lea.vmem %s6436_s8, %s7040_s28 }
 0x2d5   : > { %v2313_v31 = vpop.permute.xlu1 %2312  ;;  %v6097_v0 = vpop.permute.xlu0 %1792 }
 0x2d6   : > { %2332 = vrot.lane.b32.xlu0 %v7009_v33, %s3657_s30  ;;  %v2781_v44 = vsel %vm2760_vm10, %v2748_v30, %v2313_v31 }
 0x2d7   : > { %2334 = vrot.lane.b32.xlu1 %v7008_v11, %s3657_s30 }
 0x2d9   : > { %v1893_v1 = vpop.permute.xlu1 %1892  ;;  %v2315_v20 = vpop.permute.xlu0 %2314 }
 0x2da   : > { %2526 = vrot.lane.b32.xlu0 %v7014_v58, %s3658_s14  ;;  %v2782_v54 = vsel %vm2760_vm10, %v2749_v9, %v2315_v20 }
 0x2db   : > { %2528 = vrot.lane.b32.xlu1 %v7013_v12, %s3658_s14  ;;  %v3562_v47 = vpop.f32.mrf.mxu0  ;;  %v7019_v12 = vld [vmem:[#allocation166_spill] sm:$0xff] }
 0x2dc   : > { %3158 = vst.msk [vmem:[%s6115_s10 + $0x8] sm:$0xff] %vm2562_vm4, %v3562_v47  ;;  %v3261_v8 = vmul.f32 %v3562_v47, %v3562_v47  ;;  %v3190_v45 = vsel %vm2562_vm4, %v3562_v47, 0.0  ;;  %v2618_v58 = vsel %vm2595_vm5, %v2585_v3, %v7019_v12  ;;  %v2586_v47 = vsel %vm2562_vm4, %v959_v6, %v7021_v10  ;;  %v7023_v6 = vld [vmem:[#allocation55_spill] sm:$0xff] }
 0x2dd   : > { %v2507_v19 = vpop.permute.xlu1 %2506  ;;  %v1895_v24 = vpop.permute.xlu0 %1894  ;;  %v2651_v13 = vsel %vm2628_vm6, %v2618_v58, %v7020_v49 }
 0x2de   : > { %v2814_v60 = vsel %vm2793_vm11, %v2781_v44, %v2507_v19  ;;  %v2998_v2 = vpop.f32.mrf.mxu0  ;;  %v3293_v61 = vsel %vm2562_vm4, %v3261_v8, 0.0  ;;  %v2684_v40 = vsel %vm2661_vm7, %v2651_v13, %v1893_v1  ;;  %v2619_v44 = vsel %vm2595_vm5, %v2586_v47, %v7022_v57 }
 0x2df   : > { %3157 = vst.msk [vmem:[%s6115_s10] sm:$0xff] %vm2562_vm4, %v2998_v2  ;;  %v3189_v37 = vsel %vm2562_vm4, %v2998_v2, 0.0  ;;  %v3260_v14 = vmul.f32 %v2998_v2, %v2998_v2  ;;  %3590 = vmatprep.mubr.msk.f32.mxu1 %vm2831_vm12, %v2814_v60  ;;  %v2652_v5 = vsel %vm2628_vm6, %v2619_v44, %v6097_v0  ;;  %v7025_v44 = vld [vmem:[#allocation160_spill] sm:$0xff] }
 0x2e0   : > { %v3191_v46 = vadd.f32 %v3190_v45, %v3189_v37  ;;  %v2685_v37 = vsel %vm2661_vm7, %v2652_v5, %v1895_v24 }
 0x2e1   : > { %v3292_v50 = vsel %vm2562_vm4, %v3260_v14, 0.0  ;;  %v2087_v18 = vpop.permute.xlu1 %2086  ;;  %v2509_v23 = vpop.permute.xlu0 %2508 }
 0x2e2   : > { %v3294_v31 = vadd.f32 %v3293_v61, %v3292_v50  ;;  %v2815_v11 = vsel %vm2793_vm11, %v2782_v54, %v2509_v23  ;;  %v2717_v30 = vsel %vm2694_vm8, %v2684_v40, %v2087_v18 }
 0x2e3   : > { %3591 = vmatmul.mubr.msk.f32.gmra.mxu1 %vm2831_vm12, %v2815_v11 }
 0x2e5   : > { %v2089_v33 = vpop.permute.xlu1 %2088  ;;  %v2215_v36 = vpop.permute.xlu0 %2214 }
 0x2e6   : > { %v2750_v8 = vsel %vm2727_vm9, %v2717_v30, %v2215_v36 }
 0x2e9   : > { %v6147_v59 = vpop.permute.xlu1 %1794  ;;  %v2217_v52 = vpop.permute.xlu0 %2216 }
 0x2ed   : > { %v2317_v48 = vpop.permute.xlu1 %2316  ;;  %v6151_v26 = vpop.permute.xlu0 %1796 }
 0x2ee   : > { %v2783_v1 = vsel %vm2760_vm10, %v2750_v8, %v2317_v48 }
 0x2ef   : > { %v3565_v20 = vpop.f32.mrf.mxu0 }
 0x2f0   : > { %3160 = vst.msk [vmem:[%s6115_s10 + $0x18] sm:$0xff] %vm2562_vm4, %v3565_v20  ;;  %v3263_v32 = vmul.f32 %v3565_v20, %v3565_v20  ;;  %v3194_v60 = vsel %vm2562_vm4, %v3565_v20, 0.0 }
 0x2f1   : > { %v1897_v16 = vpop.permute.xlu1 %1896  ;;  %v2319_v55 = vpop.permute.xlu0 %2318 }
 0x2f2   : > { %v3008_v15 = vpop.f32.mrf.mxu0  ;;  %v3297_v61 = vsel %vm2562_vm4, %v3263_v32, 0.0 }
 0x2f3   : > { %3159 = vst.msk [vmem:[%s6115_s10 + $0x10] sm:$0xff] %vm2562_vm4, %v3008_v15  ;;  %v3192_v35 = vsel %vm2562_vm4, %v3008_v15, 0.0  ;;  %v3262_v7 = vmul.f32 %v3008_v15, %v3008_v15 }
 0x2f4   : > { %v3193_v19 = vadd.f32 %v3192_v35, %v3191_v46  ;;  %v2718_v46 = vsel %vm2694_vm8, %v2685_v37, %v2089_v33 }
 0x2f5   : > { %v3295_v2 = vsel %vm2562_vm4, %v3262_v7, 0.0  ;;  %v2511_v21 = vpop.permute.xlu1 %2510  ;;  %v1899_v45 = vpop.permute.xlu0 %1898  ;;  %v2751_v0 = vsel %vm2727_vm9, %v2718_v46, %v2217_v52  ;;  %v960_v52 = vmul.f32 %v6929_v28, %v6904_v63  ;;  %v961_v63 = vmul.f32 %v6937_v43, %v6909_v53  ;;  %v7026_v43 = vld [vmem:[#allocation38_spill] sm:$0xff] }
 0x2f6   : > { %v3296_v14 = vadd.f32 %v3295_v2, %v3294_v31  ;;  %v2816_v9 = vsel %vm2793_vm11, %v2783_v1, %v2511_v21  ;;  %v3195_v54 = vadd.f32 %v3194_v60, %v3193_v19  ;;  %v2784_v18 = vsel %vm2760_vm10, %v2751_v0, %v2319_v55  ;;  %v7024_v55 = vld [vmem:[#allocation167_spill] sm:$0xff] }
 0x2f7   : > { %3593 = vmatprep.mubr.msk.f32.mxu1 %vm2831_vm12, %v2816_v9  ;;  %v2587_v12 = vsel %vm2562_vm4, %v960_v52, %v7023_v6  ;;  %v2588_v8 = vsel %vm2562_vm4, %v961_v63, %v7025_v44  ;;  %v962_v52 = vmul.f32 %v6951_v42, %v6927_v17  ;;  %v963_v17 = vmul.f32 %v6958_v27, %v6932_v56  ;;  %v7030_v44 = vld [vmem:[#allocation98_spill] sm:$0xff] }
 0x2f8   : > { %v3298_v50 = vadd.f32 %v3297_v61, %v3296_v14  ;;  %v2620_v10 = vsel %vm2595_vm5, %v2587_v12, %v7024_v55 }
 0x2f9   : > { %v2091_v23 = vpop.permute.xlu1 %2090  ;;  %v2513_v11 = vpop.permute.xlu0 %2512  ;;  %v2653_v28 = vsel %vm2628_vm6, %v2620_v10, %v6147_v59  ;;  %v2621_v59 = vsel %vm2595_vm5, %v2588_v8, %v7026_v43 }
 0x2fa   : > { %v2817_v24 = vsel %vm2793_vm11, %v2784_v18, %v2513_v11  ;;  %v2686_v35 = vsel %vm2661_vm7, %v2653_v28, %v1897_v16  ;;  %v2654_v60 = vsel %vm2628_vm6, %v2621_v59, %v6151_v26 }
 0x2fb   : > { %3594 = vmatmul.mubr.msk.f32.gmra.mxu1 %vm2831_vm12, %v2817_v24  ;;  %v2719_v19 = vsel %vm2694_vm8, %v2686_v35, %v2091_v23  ;;  %v2687_v37 = vsel %vm2661_vm7, %v2654_v60, %v1899_v45  ;;  %v7029_v35 = vld [vmem:[#allocation162_spill] sm:$0xff] }
 0x2fd   : > { %v2093_v31 = vpop.permute.xlu1 %2092  ;;  %v2219_v36 = vpop.permute.xlu0 %2218 }
 0x2fe   : > { %v2752_v5 = vsel %vm2727_vm9, %v2719_v19, %v2219_v36  ;;  %v2720_v9 = vsel %vm2694_vm8, %v2687_v37, %v2093_v31 }
 0x301   : > { %v6187_v25 = vpop.permute.xlu1 %1798  ;;  %v2221_v33 = vpop.permute.xlu0 %2220 }
 0x303   : > { %v3568_v48 = vpop.f32.mrf.mxu0 }
 0x304   : > { %3162 = vst.msk [vmem:[%s6115_s10 + $0x28] sm:$0xff] %vm2562_vm4, %v3568_v48  ;;  %v3265_v58 = vmul.f32 %v3568_v48, %v3568_v48  ;;  %v3198_v40 = vsel %vm2562_vm4, %v3568_v48, 0.0 }
 0x305   : > { %v2321_v38 = vpop.permute.xlu1 %2320  ;;  %v6193_v3 = vpop.permute.xlu0 %1800 }
 0x306   : > { %v3018_v20 = vpop.f32.mrf.mxu0  ;;  %v3301_v53 = vsel %vm2562_vm4, %v3265_v58, 0.0  ;;  %v2785_v16 = vsel %vm2760_vm10, %v2752_v5, %v2321_v38 }
 0x307   : > { %3161 = vst.msk [vmem:[%s6115_s10 + $0x20] sm:$0xff] %vm2562_vm4, %v3018_v20  ;;  %v3196_v49 = vsel %vm2562_vm4, %v3018_v20, 0.0  ;;  %v3264_v13 = vmul.f32 %v3018_v20, %v3018_v20 }
 0x308   : > { %v3197_v47 = vadd.f32 %v3196_v49, %v3195_v54  ;;  %v2753_v54 = vsel %vm2727_vm9, %v2720_v9, %v2221_v33 }
 0x309   : > { %v3299_v15 = vsel %vm2562_vm4, %v3264_v13, 0.0  ;;  %v1901_v30 = vpop.permute.xlu1 %1900  ;;  %v2323_v32 = vpop.permute.xlu0 %2322  ;;  %v7027_v13 = vld [vmem:[#allocation161_spill] sm:$0xff] }
 0x30a   : > { %v3300_v7 = vadd.f32 %v3299_v15, %v3298_v50  ;;  %v3199_v57 = vadd.f32 %v3198_v40, %v3197_v47  ;;  %v2786_v46 = vsel %vm2760_vm10, %v2753_v54, %v2323_v32  ;;  %v2589_v55 = vsel %vm2562_vm4, %v962_v52, %v7027_v13  ;;  %v7028_v47 = vld [vmem:[#allocation168_spill] sm:$0xff]  ;;  %v7031_v52 = vld [vmem:[#allocation163_spill] sm:$0xff] }
 0x30b   : > { %v2622_v63 = vsel %vm2595_vm5, %v2589_v55, %v7028_v47 }
 0x30c   : > { %v3302_v1 = vadd.f32 %v3301_v53, %v3300_v7  ;;  %v2655_v42 = vsel %vm2628_vm6, %v2622_v63, %v6187_v25  ;;  %v2590_v7 = vsel %vm2562_vm4, %v963_v17, %v7029_v35  ;;  %v7034_v63 = vld [vmem:[#allocation99_spill] sm:$0xff] }
 0x30d   : > { %v2515_v2 = vpop.permute.xlu1 %2514  ;;  %v1903_v21 = vpop.permute.xlu0 %1902  ;;  %v2688_v32 = vsel %vm2661_vm7, %v2655_v42, %v1901_v30  ;;  %v2623_v8 = vsel %vm2595_vm5, %v2590_v7, %v7030_v44 }
 0x30e   : > { %v2818_v14 = vsel %vm2793_vm11, %v2785_v16, %v2515_v2  ;;  %v2656_v56 = vsel %vm2628_vm6, %v2623_v8, %v6193_v3 }
 0x30f   : > { %3596 = vmatprep.mubr.msk.f32.mxu1 %vm2831_vm12, %v2818_v14  ;;  %v2689_v30 = vsel %vm2661_vm7, %v2656_v56, %v1903_v21 }
 0x311   : > { %v2095_v61 = vpop.permute.xlu1 %2094  ;;  %v2517_v26 = vpop.permute.xlu0 %2516 }
 0x312   : > { %v2819_v0 = vsel %vm2793_vm11, %v2786_v46, %v2517_v26 }
 0x313   : > { %3597 = vmatmul.mubr.msk.f32.gmra.mxu1 %vm2831_vm12, %v2819_v0 }
 0x315   : > { %v2097_v50 = vpop.permute.xlu1 %2096  ;;  %v2223_v18 = vpop.permute.xlu0 %2222 }
 0x316   : > { %v2722_v59 = vsel %vm2694_vm8, %v2689_v30, %v2097_v50  ;;  %v966_v30 = vmul.f32 %v6991_v4, %v6970_v41  ;;  %v967_v41 = vmul.f32 %v6995_v39, %v6974_v22 }
 0x317   : > { %v3571_v45 = vpop.f32.mrf.mxu0 }
 0x318   : > { %3164 = vst.msk [vmem:[%s6115_s10 + $0x38] sm:$0xff] %vm2562_vm4, %v3571_v45  ;;  %v3267_v31 = vmul.f32 %v3571_v45, %v3571_v45  ;;  %v3202_v38 = vsel %vm2562_vm4, %v3571_v45, 0.0 }
 0x319   : > { %v6229_v23 = vpop.permute.xlu1 %1802  ;;  %v2225_v11 = vpop.permute.xlu0 %2224 }
 0x31a   : > { %v3028_v24 = vpop.f32.mrf.mxu0  ;;  %v3305_v10 = vsel %vm2562_vm4, %v3267_v31, 0.0  ;;  %v2755_v5 = vsel %vm2727_vm9, %v2722_v59, %v2225_v11 }
 0x31b   : > { %3163 = vst.msk [vmem:[%s6115_s10 + $0x30] sm:$0xff] %vm2562_vm4, %v3028_v24  ;;  %v3200_v36 = vsel %vm2562_vm4, %v3028_v24, 0.0  ;;  %v3266_v33 = vmul.f32 %v3028_v24, %v3028_v24 }
 0x31c   : > { %v3201_v48 = vadd.f32 %v3200_v36, %v3199_v57  ;;  %v2721_v57 = vsel %vm2694_vm8, %v2688_v32, %v2095_v61  ;;  %v964_v36 = vmul.f32 %v6971_v51, %v6950_v29  ;;  %v7033_v29 = vld [vmem:[#allocation15_spill] sm:$0xff] }
 0x31d   : > { %v3303_v20 = vsel %vm2562_vm4, %v3266_v33, 0.0  ;;  %v2325_v6 = vpop.permute.xlu1 %2324  ;;  %v6238_v12 = vpop.permute.xlu0 %1804  ;;  %v2754_v19 = vsel %vm2727_vm9, %v2721_v57, %v2223_v18 }
 0x31e   : > { %v3304_v58 = vadd.f32 %v3303_v20, %v3302_v1  ;;  %v3203_v49 = vadd.f32 %v3202_v38, %v3201_v48  ;;  %v2787_v27 = vsel %vm2760_vm10, %v2754_v19, %v2325_v6  ;;  %v2591_v38 = vsel %vm2562_vm4, %v964_v36, %v7031_v52  ;;  %v7032_v20 = vld [vmem:[#allocation169_spill] sm:$0xff] }
 0x31f   : > { %v2624_v6 = vsel %vm2595_vm5, %v2591_v38, %v7032_v20 }
 0x320   : > { %v3306_v28 = vadd.f32 %v3305_v10, %v3304_v58  ;;  %v965_v58 = vmul.f32 %v6976_v34, %v6954_v62 }
 0x321   : > { %v1905_v40 = vpop.permute.xlu1 %1904  ;;  %v2327_v15 = vpop.permute.xlu0 %2326 }
 0x322   : > { %v2788_v1 = vsel %vm2760_vm10, %v2755_v5, %v2327_v15  ;;  %v2592_v51 = vsel %vm2562_vm4, %v965_v58, %v7033_v29 }
 0x325   : > { %v2519_v25 = vpop.permute.xlu1 %2518  ;;  %v1907_v53 = vpop.permute.xlu0 %1906 }
 0x326   : > { %v2820_v43 = vsel %vm2793_vm11, %v2787_v27, %v2519_v25 }
 0x327   : > { %3599 = vmatprep.mubr.msk.f32.mxu1 %vm2831_vm12, %v2820_v43 }
 0x329   : > { %v2099_v60 = vpop.permute.xlu1 %2098  ;;  %v2521_v16 = vpop.permute.xlu0 %2520 }
 0x32a   : > { %v2821_v3 = vsel %vm2793_vm11, %v2788_v1, %v2521_v16 }
 0x32b   : > { %v3574_v2 = vpop.f32.mrf.mxu0  ;;  %3600 = vmatmul.mubr.msk.f32.gmra.mxu1 %vm2831_vm12, %v2821_v3  ;;  %v7035_v3 = vld [vmem:[#allocation164_spill] sm:$0xff] }
 0x32c   : > { %3166 = vst.msk [vmem:[%s6115_s10 + $0x48] sm:$0xff] %vm2562_vm4, %v3574_v2  ;;  %v3269_v9 = vmul.f32 %v3574_v2, %v3574_v2  ;;  %v3206_v26 = vsel %vm2562_vm4, %v3574_v2, 0.0  ;;  %v2593_v2 = vsel %vm2562_vm4, %v966_v30, %v7035_v3 }
 0x32d   : > { %v2101_v21 = vpop.permute.xlu1 %2100  ;;  %v2227_v37 = vpop.permute.xlu0 %2226 }
 0x32e   : > { %v3038_v14 = vpop.f32.mrf.mxu0  ;;  %v3309_v24 = vsel %vm2562_vm4, %v3269_v9, 0.0 }
 0x32f   : > { %3165 = vst.msk [vmem:[%s6115_s10 + $0x40] sm:$0xff] %vm2562_vm4, %v3038_v14  ;;  %v3204_v54 = vsel %vm2562_vm4, %v3038_v14, 0.0  ;;  %v3268_v46 = vmul.f32 %v3038_v14, %v3038_v14 }
 0x330   : > { %v3205_v61 = vadd.f32 %v3204_v54, %v3203_v49  ;;  %v2657_v49 = vsel %vm2628_vm6, %v2624_v6, %v6229_v23 }
 0x331   : > { %v3307_v0 = vsel %vm2562_vm4, %v3268_v46, 0.0  ;;  %v1807_v50 = vpop.permute.xlu1 %1806  ;;  %v2229_v18 = vpop.permute.xlu0 %2228  ;;  %v2690_v10 = vsel %vm2661_vm7, %v2657_v49, %v1905_v40 }
 0x332   : > { %v3308_v45 = vadd.f32 %v3307_v0, %v3306_v28  ;;  %v3207_v11 = vadd.f32 %v3206_v26, %v3205_v61  ;;  %v2723_v47 = vsel %vm2694_vm8, %v2690_v10, %v2099_v60  ;;  %v2625_v28 = vsel %vm2595_vm5, %v2592_v51, %v7034_v63  ;;  %v7037_v26 = vld [vmem:[#allocation88_spill] sm:$0xff] }
 0x333   : > { %v2756_v17 = vsel %vm2727_vm9, %v2723_v47, %v2227_v37  ;;  %v2658_v62 = vsel %vm2628_vm6, %v2625_v28, %v6238_v12  ;;  %v7036_v37 = vld [vmem:[#allocation100_spill] sm:$0xff]  ;;  %v2594_v0 = vsel %vm2562_vm4, %v967_v41, %v7037_v26 }
 0x334   : > { %v3310_v31 = vadd.f32 %v3309_v24, %v3308_v45  ;;  %v2691_v40 = vsel %vm2661_vm7, %v2658_v62, %v1907_v53  ;;  %v2626_v14 = vsel %vm2595_vm5, %v2593_v2, %v7036_v37  ;;  %v7038_v45 = vld [vmem:[#allocation101_spill] sm:$0xff] }
 0x335   : > { %v2329_v33 = vpop.permute.xlu1 %2328  ;;  %v1809_v48 = vpop.permute.xlu0 %1808  ;;  %v2724_v32 = vsel %vm2694_vm8, %v2691_v40, %v2101_v21  ;;  %v2659_v4 = vsel %vm2628_vm6, %v2626_v14, %v1807_v50 }
 0x336   : > { %v2789_v34 = vsel %vm2760_vm10, %v2756_v17, %v2329_v33  ;;  %v2757_v7 = vsel %vm2727_vm9, %v2724_v32, %v2229_v18 }
 0x339   : > { %v1909_v13 = vpop.permute.xlu1 %1908  ;;  %v2331_v55 = vpop.permute.xlu0 %2330 }
 0x33a   : > { %v2790_v12 = vsel %vm2760_vm10, %v2757_v7, %v2331_v55  ;;  %v2692_v61 = vsel %vm2661_vm7, %v2659_v4, %v1909_v13 }
 0x33d   : > { %v2523_v23 = vpop.permute.xlu1 %2522  ;;  %v1911_v42 = vpop.permute.xlu0 %1910 }
 0x33e   : > { %v2822_v15 = vsel %vm2793_vm11, %v2789_v34, %v2523_v23 }
 0x33f   : > { %v3577_v35 = vpop.f32.mrf.mxu0  ;;  %3602 = vmatprep.mubr.msk.f32.mxu1 %vm2831_vm12, %v2822_v15 }
 0x340   : > { %3168 = vst.msk [vmem:[%s6115_s10 + $0x58] sm:$0xff] %vm2562_vm4, %v3577_v35  ;;  %v3271_v56 = vmul.f32 %v3577_v35, %v3577_v35  ;;  %v3210_v43 = vsel %vm2562_vm4, %v3577_v35, 0.0 }
 0x341   : > { %v2103_v57 = vpop.permute.xlu1 %2102  ;;  %v2525_v44 = vpop.permute.xlu0 %2524 }
 0x342   : > { %v2823_v8 = vsel %vm2793_vm11, %v2790_v12, %v2525_v44  ;;  %v3048_v19 = vpop.f32.mrf.mxu0  ;;  %v3313_v21 = vsel %vm2562_vm4, %v3271_v56, 0.0  ;;  %v2725_v18 = vsel %vm2694_vm8, %v2692_v61, %v2103_v57 }
 0x343   : > { %3167 = vst.msk [vmem:[%s6115_s10 + $0x50] sm:$0xff] %vm2562_vm4, %v3048_v19  ;;  %v3208_v27 = vsel %vm2562_vm4, %v3048_v19, 0.0  ;;  %v3270_v25 = vmul.f32 %v3048_v19, %v3048_v19  ;;  %3603 = vmatmul.mubr.msk.f32.gmra.mxu1 %vm2831_vm12, %v2823_v8 }
 0x344   : > { %v3209_v53 = vadd.f32 %v3208_v27, %v3207_v11  ;;  %v2627_v11 = vsel %vm2595_vm5, %v2594_v0, %v7038_v45 }
 0x345   : > { %v3311_v59 = vsel %vm2562_vm4, %v3270_v25, 0.0  ;;  %v2105_v5 = vpop.permute.xlu1 %2104  ;;  %v2231_v1 = vpop.permute.xlu0 %2230 }
 0x346   : > { %v3312_v60 = vadd.f32 %v3311_v59, %v3310_v31  ;;  %v3211_v16 = vadd.f32 %v3210_v43, %v3209_v53  ;;  %v2758_v24 = vsel %vm2727_vm9, %v2725_v18, %v2231_v1  ;;  %v2660_v31 = vsel %vm2628_vm6, %v2627_v11, %v1809_v48 }
 0x347   : > { %v2693_v36 = vsel %vm2661_vm7, %v2660_v31, %v1911_v42 }
 0x348   : > { %v3314_v9 = vadd.f32 %v3313_v21, %v3312_v60  ;;  %v2726_v52 = vsel %vm2694_vm8, %v2693_v36, %v2105_v5 }
 0x349   : > { %v2233_v54 = vpop.permute.xlu1 %2232  ;;  %v2333_v46 = vpop.permute.xlu0 %2332 }
 0x34a   : > { %v2791_v22 = vsel %vm2760_vm10, %v2758_v24, %v2333_v46  ;;  %v2759_v38 = vsel %vm2727_vm9, %v2726_v52, %v2233_v54 }
 0x34d   : > { %v2335_v39 = vpop.permute.xlu1 %2334  ;;  %v2527_v50 = vpop.permute.xlu0 %2526 }
 0x34e   : > { %v2824_v33 = vsel %vm2793_vm11, %v2791_v22, %v2527_v50  ;;  %v2792_v20 = vsel %vm2760_vm10, %v2759_v38, %v2335_v39 }
 0x34f   : > { %3605 = vmatprep.mubr.msk.f32.mxu1 %vm2831_vm12, %v2824_v33 }
 0x351   : > { %v2529_v6 = vpop.permute.xlu1 %2528 }
 0x352   : > { %v2825_v48 = vsel %vm2793_vm11, %v2792_v20, %v2529_v6 }
 0x353   : > { %v3580_v58 = vpop.f32.mrf.mxu0  ;;  %3606 = vmatmul.mubr.msk.f32.gmra.mxu1 %vm2831_vm12, %v2825_v48 }
 0x354   : > { %3170 = vst.msk [vmem:[%s6115_s10 + $0x68] sm:$0xff] %vm2562_vm4, %v3580_v58  ;;  %v3273_v13 = vmul.f32 %v3580_v58, %v3580_v58  ;;  %v3214_v51 = vsel %vm2562_vm4, %v3580_v58, 0.0 }
 0x355   : > { %v3058_v49 = vpop.f32.mrf.mxu0 }
 0x356   : > { %3169 = vst.msk [vmem:[%s6115_s10 + $0x60] sm:$0xff] %vm2562_vm4, %v3058_v49  ;;  %v3212_v55 = vsel %vm2562_vm4, %v3058_v49, 0.0  ;;  %v3272_v10 = vmul.f32 %v3058_v49, %v3058_v49  ;;  %v3317_v17 = vsel %vm2562_vm4, %v3273_v13, 0.0 }
 0x357   : > { %v3213_v29 = vadd.f32 %v3212_v55, %v3211_v16 }
 0x358   : > { %v3315_v47 = vsel %vm2562_vm4, %v3272_v10, 0.0 }
 0x359   : > { %v3316_v63 = vadd.f32 %v3315_v47, %v3314_v9  ;;  %v3215_v28 = vadd.f32 %v3214_v51, %v3213_v29 }
 0x35b   : > { %v3318_v62 = vadd.f32 %v3317_v17, %v3316_v63 }
 0x367   : > { %v3583_v34 = vpop.f32.mrf.mxu0 }
 0x368   : > { %3172 = vst.msk [vmem:[%s6115_s10 + $0x78] sm:$0xff] %vm2562_vm4, %v3583_v34  ;;  %v3275_v42 = vmul.f32 %v3583_v34, %v3583_v34  ;;  %v3218_v35 = vsel %vm2562_vm4, %v3583_v34, 0.0 }
 0x369   : > { %v3068_v23 = vpop.f32.mrf.mxu0 }
 0x36a   : > { %3171 = vst.msk [vmem:[%s6115_s10 + $0x70] sm:$0xff] %vm2562_vm4, %v3068_v23  ;;  %v3216_v40 = vsel %vm2562_vm4, %v3068_v23, 0.0  ;;  %v3274_v15 = vmul.f32 %v3068_v23, %v3068_v23  ;;  %v3321_v44 = vsel %vm2562_vm4, %v3275_v42, 0.0 }
 0x36b   : > { %v3217_v32 = vadd.f32 %v3216_v40, %v3215_v28 }
 0x36c   : > { %v3319_v7 = vsel %vm2562_vm4, %v3274_v15, 0.0 }
 0x36d   : > { %v3219_v12 = vadd.f32 %v3218_v35, %v3217_v32  ;;  %v3320_v57 = vadd.f32 %v3319_v7, %v3318_v62 }
 0x36f   : > { %v3322_v8 = vadd.f32 %v3321_v44, %v3320_v57 }
 0x37b   : > { %v3586_v19 = vpop.f32.mrf.mxu1 }
 0x37c   : > { %3174 = vst.msk [vmem:[%s6115_s10 + $0x88] sm:$0xff] %vm2562_vm4, %v3586_v19  ;;  %v3277_v27 = vmul.f32 %v3586_v19, %v3586_v19  ;;  %v3222_v43 = vsel %vm2562_vm4, %v3586_v19, 0.0 }
 0x37d   : > { %v3078_v56 = vpop.f32.mrf.mxu1 }
 0x37e   : > { %3173 = vst.msk [vmem:[%s6115_s10 + $0x80] sm:$0xff] %vm2562_vm4, %v3078_v56  ;;  %v3220_v25 = vsel %vm2562_vm4, %v3078_v56, 0.0  ;;  %v3276_v53 = vmul.f32 %v3078_v56, %v3078_v56  ;;  %v3325_v60 = vsel %vm2562_vm4, %v3277_v27, 0.0 }
 0x37f   : > { %v3221_v30 = vadd.f32 %v3220_v25, %v3219_v12 }
 0x380   : > { %v3323_v59 = vsel %vm2562_vm4, %v3276_v53, 0.0 }
 0x381   : > { %v3324_v5 = vadd.f32 %v3323_v59, %v3322_v8  ;;  %v3223_v1 = vadd.f32 %v3222_v43, %v3221_v30 }
 0x383   : > { %v3326_v16 = vadd.f32 %v3325_v60, %v3324_v5 }
 0x38f   : > { %v3589_v3 = vpop.f32.mrf.mxu1 }
 0x390   : > { %3176 = vst.msk [vmem:[%s6115_s10 + $0x98] sm:$0xff] %vm2562_vm4, %v3589_v3  ;;  %v3279_v21 = vmul.f32 %v3589_v3, %v3589_v3  ;;  %v3226_v41 = vsel %vm2562_vm4, %v3589_v3, 0.0 }
 0x391   : > { %v3088_v2 = vpop.f32.mrf.mxu1 }
 0x392   : > { %3175 = vst.msk [vmem:[%s6115_s10 + $0x90] sm:$0xff] %vm2562_vm4, %v3088_v2  ;;  %v3224_v37 = vsel %vm2562_vm4, %v3088_v2, 0.0  ;;  %v3278_v14 = vmul.f32 %v3088_v2, %v3088_v2  ;;  %v3329_v61 = vsel %vm2562_vm4, %v3279_v21, 0.0 }
 0x393   : > { %v3225_v9 = vadd.f32 %v3224_v37, %v3223_v1 }
 0x394   : > { %v3327_v4 = vsel %vm2562_vm4, %v3278_v14, 0.0 }
 0x395   : > { %v3328_v54 = vadd.f32 %v3327_v4, %v3326_v16  ;;  %v3227_v46 = vadd.f32 %v3226_v41, %v3225_v9 }
 0x397   : > { %v3330_v26 = vadd.f32 %v3329_v61, %v3328_v54 }
 0x3a3   : > { %v3592_v0 = vpop.f32.mrf.mxu1 }
 0x3a4   : > { %3178 = vst.msk [vmem:[%s6115_s10 + $0xa8] sm:$0xff] %vm2562_vm4, %v3592_v0  ;;  %v3281_v45 = vmul.f32 %v3592_v0, %v3592_v0  ;;  %v3230_v22 = vsel %vm2562_vm4, %v3592_v0, 0.0 }
 0x3a5   : > { %v3098_v18 = vpop.f32.mrf.mxu1 }
 0x3a6   : > { %3177 = vst.msk [vmem:[%s6115_s10 + $0xa0] sm:$0xff] %vm2562_vm4, %v3098_v18  ;;  %v3228_v11 = vsel %vm2562_vm4, %v3098_v18, 0.0  ;;  %v3280_v24 = vmul.f32 %v3098_v18, %v3098_v18  ;;  %v3333_v33 = vsel %vm2562_vm4, %v3281_v45, 0.0 }
 0x3a7   : > { %v3229_v31 = vadd.f32 %v3228_v11, %v3227_v46 }
 0x3a8   : > { %v3331_v39 = vsel %vm2562_vm4, %v3280_v24, 0.0 }
 0x3a9   : > { %v3332_v50 = vadd.f32 %v3331_v39, %v3330_v26  ;;  %v3231_v36 = vadd.f32 %v3230_v22, %v3229_v31 }
 0x3ab   : > { %v3334_v52 = vadd.f32 %v3333_v33, %v3332_v50 }
 0x3bb   : > { %v3595_v38 = vpop.f32.mrf.mxu1 }
 0x3bc   : > { %3180 = vst.msk [vmem:[%s6115_s10 + $0xb8] sm:$0xff] %vm2562_vm4, %v3595_v38  ;;  %v3283_v6 = vmul.f32 %v3595_v38, %v3595_v38  ;;  %v3234_v13 = vsel %vm2562_vm4, %v3595_v38, 0.0 }
 0x3bd   : > { %v3108_v20 = vpop.f32.mrf.mxu1 }
 0x3be   : > { %3179 = vst.msk [vmem:[%s6115_s10 + $0xb0] sm:$0xff] %vm2562_vm4, %v3108_v20  ;;  %v3232_v48 = vsel %vm2562_vm4, %v3108_v20, 0.0  ;;  %v3282_v58 = vmul.f32 %v3108_v20, %v3108_v20  ;;  %v3337_v51 = vsel %vm2562_vm4, %v3283_v6, 0.0 }
 0x3bf   : > { %v3233_v49 = vadd.f32 %v3232_v48, %v3231_v36 }
 0x3c0   : > { %v3335_v55 = vsel %vm2562_vm4, %v3282_v58, 0.0 }
 0x3c1   : > { %v3336_v10 = vadd.f32 %v3335_v55, %v3334_v52  ;;  %v3235_v29 = vadd.f32 %v3234_v13, %v3233_v49 }
 0x3c3   : > { %v3338_v47 = vadd.f32 %v3337_v51, %v3336_v10 }
 0x3d3   : > { %v3598_v63 = vpop.f32.mrf.mxu1 }
 0x3d4   : > { %3182 = vst.msk [vmem:[%s6115_s10 + $0xc8] sm:$0xff] %vm2562_vm4, %v3598_v63  ;;  %v3285_v35 = vmul.f32 %v3598_v63, %v3598_v63  ;;  %v3238_v57 = vsel %vm2562_vm4, %v3598_v63, 0.0 }
 0x3d5   : > { %v3118_v28 = vpop.f32.mrf.mxu1 }
 0x3d6   : > { %3181 = vst.msk [vmem:[%s6115_s10 + $0xc0] sm:$0xff] %vm2562_vm4, %v3118_v28  ;;  %v3284_v34 = vmul.f32 %v3118_v28, %v3118_v28  ;;  %v3236_v23 = vsel %vm2562_vm4, %v3118_v28, 0.0  ;;  %v3341_v19 = vsel %vm2562_vm4, %v3285_v35, 0.0 }
 0x3d7   : > { %v3237_v15 = vadd.f32 %v3236_v23, %v3235_v29 }
 0x3d8   : > { %v3339_v40 = vsel %vm2562_vm4, %v3284_v34, 0.0 }
 0x3d9   : > { %v3340_v12 = vadd.f32 %v3339_v40, %v3338_v47  ;;  %v3239_v8 = vadd.f32 %v3238_v57, %v3237_v15 }
 0x3db   : > { %v3342_v25 = vadd.f32 %v3341_v19, %v3340_v12 }
 0x3eb   : > { %v3601_v17 = vpop.f32.mrf.mxu1 }
 0x3ec   : > { %3184 = vst.msk [vmem:[%s6115_s10 + $0xd8] sm:$0xff] %vm2562_vm4, %v3601_v17  ;;  %v3287_v53 = vmul.f32 %v3601_v17, %v3601_v17  ;;  %v3242_v59 = vsel %vm2562_vm4, %v3601_v17, 0.0 }
 0x3ed   : > { %v3128_v62 = vpop.f32.mrf.mxu1 }
 0x3ee   : > { %3183 = vst.msk [vmem:[%s6115_s10 + $0xd0] sm:$0xff] %vm2562_vm4, %v3128_v62  ;;  %v3286_v7 = vmul.f32 %v3128_v62, %v3128_v62  ;;  %v3240_v44 = vsel %vm2562_vm4, %v3128_v62, 0.0  ;;  %v3345_v60 = vsel %vm2562_vm4, %v3287_v53, 0.0 }
 0x3ef   : > { %v3241_v27 = vadd.f32 %v3240_v44, %v3239_v8 }
 0x3f0   : > { %v3343_v56 = vsel %vm2562_vm4, %v3286_v7, 0.0 }
 0x3f1   : > { %v3344_v43 = vadd.f32 %v3343_v56, %v3342_v25  ;;  %v3243_v1 = vadd.f32 %v3242_v59, %v3241_v27 }
 0x3f3   : > { %v3346_v2 = vadd.f32 %v3345_v60, %v3344_v43 }
 0x403   : > { %v3604_v42 = vpop.f32.mrf.mxu1 }
 0x404   : > { %3186 = vst.msk [vmem:[%s6115_s10 + $0xe8] sm:$0xff] %vm2562_vm4, %v3604_v42  ;;  %v3289_v21 = vmul.f32 %v3604_v42, %v3604_v42  ;;  %v3246_v9 = vsel %vm2562_vm4, %v3604_v42, 0.0 }
 0x405   : > { %v3138_v32 = vpop.f32.mrf.mxu1 }
 0x406   : > { %3185 = vst.msk [vmem:[%s6115_s10 + $0xe0] sm:$0xff] %vm2562_vm4, %v3138_v32  ;;  %v3288_v30 = vmul.f32 %v3138_v32, %v3138_v32  ;;  %v3244_v5 = vsel %vm2562_vm4, %v3138_v32, 0.0  ;;  %v3349_v54 = vsel %vm2562_vm4, %v3289_v21, 0.0 }
 0x407   : > { %v3245_v3 = vadd.f32 %v3244_v5, %v3243_v1 }
 0x408   : > { %v3347_v16 = vsel %vm2562_vm4, %v3288_v30, 0.0 }
 0x409   : > { %v3348_v37 = vadd.f32 %v3347_v16, %v3346_v2  ;;  %v3247_v4 = vadd.f32 %v3246_v9, %v3245_v3 }
 0x40b   : > { %v3350_v18 = vadd.f32 %v3349_v54, %v3348_v37 }
 0x413   : > { %v3607_v14 = vpop.f32.mrf.mxu1 }
 0x414   : > { %3188 = vst.msk [vmem:[%s6115_s10 + $0xf8] sm:$0xff] %vm2562_vm4, %v3607_v14  ;;  %v3291_v46 = vmul.f32 %v3607_v14, %v3607_v14  ;;  %v3250_v45 = vsel %vm2562_vm4, %v3607_v14, 0.0 }
 0x415   : > { %v3148_v41 = vpop.f32.mrf.mxu1 }
 0x416   : > { %3187 = vst.msk [vmem:[%s6115_s10 + $0xf0] sm:$0xff] %vm2562_vm4, %v3148_v41  ;;  %v3248_v61 = vsel %vm2562_vm4, %v3148_v41, 0.0  ;;  %v3290_v26 = vmul.f32 %v3148_v41, %v3148_v41  ;;  %v3353_v22 = vsel %vm2562_vm4, %v3291_v46, 0.0 }
 0x417   : > { %v3249_v0 = vadd.f32 %v3248_v61, %v3247_v4 }
 0x418   : > { %v3351_v11 = vsel %vm2562_vm4, %v3290_v26, 0.0 }
 0x419   : > { %v3251_v24 = vadd.f32 %v3250_v45, %v3249_v0  ;;  %v3352_v31 = vadd.f32 %v3351_v11, %v3350_v18 }
 0x41b   : > { %v3252_v39 = vrot.slane %v3251_v24, 4  ;;  %v3354_v50 = vadd.f32 %v3353_v22, %v3352_v31 }
 0x41d   : > { %v3253_v36 = vadd.f32 %v3252_v39, %v3251_v24  ;;  %v3355_v33 = vrot.slane %v3354_v50, 4 }
 0x41f   : > { %v3254_v52 = vrot.slane %v3253_v36, 2  ;;  %v3356_v38 = vadd.f32 %v3355_v33, %v3354_v50 }
 0x421   : > { %v3255_v20 = vadd.f32 %v3254_v52, %v3253_v36  ;;  %v3357_v6 = vrot.slane %v3356_v38, 2 }
 0x423   : > { %v3256_v48 = vrot.slane %v3255_v20, 1  ;;  %v3358_v58 = vadd.f32 %v3357_v6, %v3356_v38 }
 0x425   : > { %v3257_v49 = vadd.f32 %v3256_v48, %v3255_v20  ;;  %v3359_v13 = vrot.slane %v3358_v58, 1 }
 0x427   : > { %3259 = vst.msk [vmem:[%s319_s20] sm:$0x1] %vm3258_vm13, %v3257_v49  ;;  %v3360_v55 = vadd.f32 %v3359_v13, %v3358_v58 }
 0x429   : > { %3361 = vst.msk [vmem:[%s322_s23] sm:$0x1] %vm3258_vm13, %v3360_v55 }
 0x42a PF: > { %s19_s27 = sadd.s32 1, %s3647_s27  }
 0x42b   : > { %p16_p4 = scmp.ge.s32.totalorder %s19_s27, 4  }
 0x42d   :  { %18 = sbr.rel (!%p16_p4) target bundleno = 1 (0x1), region = 98 }

</bundles_post_ra>
